<compile_context>
chip_gen: v5e
topology: v5e:2x2
jax: 0.10.0
libtpu: 0.0.40
codegen_flags: <defaults>
</compile_context>

<pallas_src>
import functools

import jax
import jax.numpy as jnp
import numpy as np
from jax.experimental import pallas as pl
from jax.experimental.pallas import tpu as pltpu


# ----------------------------------------------------------------------------
# Fused kernel: multi-scale conv+BN -> SPR attention -> softmax -> scaling
# (one image per grid step; everything stays in VMEM / vregs)
# ----------------------------------------------------------------------------
def _msa_fused_kernel(x_ref, wtab_ref, bias_ref, mask_ref, fc1c_ref, fc1b_ref,
                      fc2w_ref, fc2b_ref, out_ref, *, scale, width, H, W,
                      hidden):
    # x_ref:    [1, C, H*W]             VMEM (C = scale*width)
    # wtab_ref: [width, scale*width*9]  VMEM, BN-folded weights as columns,
    #                                   col = (s*width + ci)*9 + ky*3 + kx
    # bias_ref: [scale, width, 1]       VMEM, folded BN bias columns
    # mask_ref: [3, H*W]                VMEM, column masks for dx = -1, 0, +1
    # fc1c_ref: [hidden, width, H*W]    VMEM, pooled+fc1 folded coefficients
    # fc1b_ref: [hidden]                SMEM
    # fc2w_ref: [width, hidden]         VMEM
    # fc2b_ref: [width, 1]              VMEM
    # out_ref:  [1, C, H*W]             VMEM
    f32 = jnp.float32
    HW = H * W

    # dx boundary masks, loaded once; dy boundaries are handled by the
    # zero-extended row below.
    m_left = mask_ref[0:1, :]     # valid lanes when reading col - 1
    m_right = mask_ref[2:3, :]    # valid lanes when reading col + 1
    zpad = jnp.zeros((1, W + 1), f32)

    group_feats = []
    attn_exp = []
    carry = None
    for s in range(scale):
        xg = x_ref[0, s * width:(s + 1) * width, :].astype(f32)   # (width, HW)
        if carry is not None:
            xg = xg + carry                      # serial Res2Net carry sp+spx

        # ---- 3x3 conv + folded BN for this group --------------------------
        partial = []                             # one accumulator per ci (ILP)
        for ci in range(width):
            row = xg[ci:ci + 1, :]                                 # (1, HW)
            # Zero-extended row: slicing at offset (W+1)+d gives row[p + d]
            # with zeros outside the image (implicit conv padding).
            rowp = jnp.concatenate([zpad, row, zpad], axis=1)      # (1, HW+2W+2)
            acc = None
            for dy in (-1, 0, 1):
                for dx in (-1, 0, 1):
                    d = dy * W + dx
                    if d == 0:
                        sh = row
                    else:
                        start = (W + 1) + d
                        sh = rowp[:, start:start + HW]             # (1, HW)
                    if dx == -1:
                        sh = sh * m_left
                    elif dx == 1:
                        sh = sh * m_right
                    t = (dy + 1) * 3 + (dx + 1)
                    k = (s * width + ci) * 9 + t
                    wcol = wtab_ref[:, k:k + 1]                    # (width, 1)
                    term = wcol * sh                               # (width, HW)
                    acc = term if acc is None else acc + term
            partial.append(acc)
        feat = partial[0]
        for ci in range(1, width):
            feat = feat + partial[ci]
        feat = feat + bias_ref[s]                                  # (width, HW)
        group_feats.append(feat)
        carry = feat

        # ---- SPR attention logits for this group --------------------------
        # avg_pool(1)/avg_pool(2)/fc1 folded into coefficient maps:
        #   z_h = sum_{c,p} feat[c,p] * fc1c[h,c,p] == fc1(cat(pool1, pool2))_h
        logits = fc2b_ref[...]                                     # (width, 1)
        for h in range(hidden):
            zl = jnp.sum(feat * fc1c_ref[h], axis=1, keepdims=True)   # (width,1)
            z = jnp.sum(zl, axis=0, keepdims=True)                    # (1, 1)
            y1 = jnp.maximum(z + fc1b_ref[h], 0.0)                    # ReLU
            logits = logits + fc2w_ref[:, h:h + 1] * y1               # (width,1)
        sig = 1.0 / (1.0 + jnp.exp(-logits))                          # sigmoid
        attn_exp.append(jnp.exp(sig))

    # ---- softmax over the scale dim + channel-wise scaling + store --------
    denom = attn_exp[0]
    for s in range(1, scale):
        denom = denom + attn_exp[s]
    for s in range(scale):
        attn = attn_exp[s] / denom                                 # (width, 1)
        scaled = group_feats[s] * attn                             # (width, HW)
        out_ref[0, s * width:(s + 1) * width, :] = scaled.astype(out_ref.dtype)


# ----------------------------------------------------------------------------
# Wrapper: parameter folding + pallas_call
# ----------------------------------------------------------------------------
@functools.partial(jax.jit, static_argnames=("scale",))
def msa_forward(x, conv_w, bn_scale, bn_bias, fc1_w, fc1_b, fc2_w, fc2_b, *,
                scale):
    """x: [B, C, H, W] f32; conv_w: [scale, width, width, 3, 3];
    bn_scale/bn_bias: [scale, width] (eval-mode BN folded);
    fc1_w: [hidden, 5*width]; fc1_b: [hidden]; fc2_w: [width, hidden];
    fc2_b: [width]."""
    B, C, H, W = x.shape
    width = C // scale
    HW = H * W
    hidden = fc1_w.shape[0]

    # Fold the BN per-channel scale into the conv weights (conv is linear and
    # bias-free), then lay the weights out as (width_out, (s, ci, tap)) columns.
    w_f = conv_w.astype(jnp.float32) * bn_scale[:, :, None, None, None]
    w_tab = jnp.transpose(w_f, (1, 0, 2, 3, 4)).reshape(width, scale * width * 9)
    bias_col = bn_bias.reshape(scale, width, 1).astype(jnp.float32)

    # Column-validity masks for the +-1 horizontal taps (static constants).
    col = np.arange(HW) % W
    masks = np.stack([col >= 1, np.ones(HW, dtype=bool), col <= W - 2], axis=0)
    masks = jnp.asarray(masks.astype(np.float32))                  # (3, HW)

    # Fold AdaptiveAvgPool2d(1), AdaptiveAvgPool2d(2) and the fc1 1x1 conv into
    # one per-pixel coefficient map per hidden unit.
    H2, W2 = H // 2, W // 2
    qi = np.arange(H)[:, None] // H2
    qj = np.arange(W)[None, :] // W2
    qidx = (qi * 2 + qj).reshape(-1)                               # (HW,)
    w_p1 = fc1_w[:, :width]                                        # (hidden, width)
    w_p2 = fc1_w[:, width:].reshape(hidden, width, 4)              # torch (c,i,j)
    fc1_coef = (w_p1[:, :, None] / float(HW)
                + w_p2[:, :, qidx] / float(H2 * W2)).astype(jnp.float32)

    x_flat = x.reshape(B, C, HW)

    kern = functools.partial(_msa_fused_kernel, scale=scale, width=width,
                             H=H, W=W, hidden=hidden)
    out = pl.pallas_call(
        kern,
        out_shape=jax.ShapeDtypeStruct((B, C, HW), x.dtype),
        grid_spec=pltpu.PrefetchScalarGridSpec(
            num_scalar_prefetch=0,
            grid=(B,),
            in_specs=[
                pl.BlockSpec((1, C, HW), lambda b: (b, 0, 0)),               # x
                pl.BlockSpec((width, scale * width * 9), lambda b: (0, 0)),  # conv cols
                pl.BlockSpec((scale, width, 1), lambda b: (0, 0, 0)),        # bn bias
                pl.BlockSpec((3, HW), lambda b: (0, 0)),                     # dx masks
                pl.BlockSpec((hidden, width, HW), lambda b: (0, 0, 0)),      # fc1 coef
                pl.BlockSpec(memory_space=pltpu.MemorySpace.SMEM),           # fc1 bias
                pl.BlockSpec((width, hidden), lambda b: (0, 0)),             # fc2 w
                pl.BlockSpec((width, 1), lambda b: (0, 0)),                  # fc2 b
            ],
            out_specs=pl.BlockSpec((1, C, HW), lambda b: (b, 0, 0)),
        ),
        compiler_params=pltpu.CompilerParams(
            dimension_semantics=("parallel",)),
    )(x_flat, w_tab, bias_col, masks, fc1_coef, fc1_b.astype(jnp.float32),
      fc2_w.astype(jnp.float32), fc2_b.reshape(width, 1).astype(jnp.float32))
    return out.reshape(B, C, H, W)


# ----------------------------------------------------------------------------
# Pure-JAX reference (independent path) for a correctness check
# ----------------------------------------------------------------------------
def _spr_softmax_attention(feats, fc1_w, fc1_b, fc2_w, fc2_b, scale, width):
    B, C, H, W = feats.shape
    hi = jax.lax.Precision.HIGHEST
    f = feats.reshape(B, scale, width, H, W)
    p1 = jnp.mean(f, axis=(3, 4))                                      # [B, S, width]
    p2 = jnp.mean(f.reshape(B, scale, width, 2, H // 2, 2, W // 2), axis=(4, 6))
    p2 = p2.reshape(B, scale, 4 * width)
    pooled = jnp.concatenate([p1, p2], axis=-1)                        # [B, S, 5*width]
    y1 = jnp.einsum("bsk,ok->bso", pooled, fc1_w, precision=hi) + fc1_b
    y1 = jnp.maximum(y1, 0.0)
    y2 = jnp.einsum("bso,co->bsc", y1, fc2_w, precision=hi) + fc2_b
    attn = jax.nn.sigmoid(y2)
    attn = jax.nn.softmax(attn, axis=1)                                # over scale
    return attn.reshape(B, scale * width)


def _msa_reference(x, conv_w, bn_scale, bn_bias, fc1_w, fc1_b, fc2_w, fc2_b, scale):
    B, C, H, W = x.shape
    width = C // scale
    outs = []
    sp = None
    for s in range(scale):
        xs = x[:, s * width:(s + 1) * width]
        sp = xs if s == 0 else sp + xs
        sp = jax.lax.conv_general_dilated(
            sp, conv_w[s], window_strides=(1, 1), padding=((1, 1), (1, 1)),
            dimension_numbers=("NCHW", "OIHW", "NCHW"),
            precision=jax.lax.Precision.HIGHEST)
        sp = sp * bn_scale[s][None, :, None, None] + bn_bias[s][None, :, None, None]
        outs.append(sp)
    feats = jnp.concatenate(outs, axis=1)
    attn = _spr_softmax_attention(feats, fc1_w, fc1_b, fc2_w, fc2_b, scale, width)
    f = feats.reshape(B, scale, width, H, W)
    a = attn.reshape(B, scale, width)[:, :, :, None, None]
    return (f * a).reshape(B, C, H, W)


if __name__ == "__main__":
    # MSAModule(inplanes=16, scale=4, stride=1): width = 4, SPR reduction = 4.
    B, inplanes, H, W = 2, 16, 16, 16
    scale = 4
    width = inplanes // scale
    reduction = 4
    hidden = width // reduction
    eps = 1e-5

    key = jax.random.PRNGKey(0)
    ks = jax.random.split(key, 10)

    x = jax.random.normal(ks[0], (B, inplanes, H, W), dtype=jnp.float32)

    # Per-group conv3x3 (bias=False), OIHW: [scale, width, width, 3, 3]
    conv_w = 0.1 * jax.random.normal(ks[1], (scale, width, width, 3, 3), jnp.float32)

    # Per-group BatchNorm2d(width), inference mode -> folded scale/bias
    gamma = 1.0 + 0.1 * jax.random.normal(ks[2], (scale, width), jnp.float32)
    beta = 0.1 * jax.random.normal(ks[3], (scale, width), jnp.float32)
    running_mean = 0.1 * jax.random.normal(ks[4], (scale, width), jnp.float32)
    running_var = 1.0 + 0.1 * jnp.abs(jax.random.normal(ks[5], (scale, width), jnp.float32))
    bn_scale = gamma / jnp.sqrt(running_var + eps)
    bn_bias = beta - running_mean * bn_scale

    # SPRModule(width): fc1 Conv2d(5*width -> width//reduction, 1, bias=True),
    #                   fc2 Conv2d(width//reduction -> width, 1, bias=True)
    fc1_w = 0.1 * jax.random.normal(ks[6], (hidden, 5 * width), jnp.float32)
    fc1_b = 0.1 * jax.random.normal(ks[7], (hidden,), jnp.float32)
    fc2_w = 0.1 * jax.random.normal(ks[8], (width, hidden), jnp.float32)
    fc2_b = 0.1 * jax.random.normal(ks[9], (width,), jnp.float32)

    out = msa_forward(x, conv_w, bn_scale, bn_bias, fc1_w, fc1_b, fc2_w, fc2_b,
                      scale=scale)
    out = jax.block_until_ready(out)

    assert out.shape == (B, inplanes, H, W), out.shape
    assert out.dtype == jnp.float32
    assert bool(jnp.all(jnp.isfinite(out)))

    ref = _msa_reference(x, conv_w, bn_scale, bn_bias, fc1_w, fc1_b, fc2_w, fc2_b,
                         scale)
    max_err = float(jnp.max(jnp.abs(out - ref)))
    assert max_err < 2e-4, max_err

    print("KERNEL_OK")
</pallas_src>

<mosaic_0001>
module attributes {stable_mosaic.version = 11 : i64} {
  func.func @_msa_fused_kernel(%arg0: i32, %arg1: memref<1x16x256xf32, #tpu.memory_space<vmem>>, %arg2: memref<4x144xf32, #tpu.memory_space<vmem>>, %arg3: memref<4x4x1xf32, #tpu.memory_space<vmem>>, %arg4: memref<3x256xf32, #tpu.memory_space<vmem>>, %arg5: memref<1x4x256xf32, #tpu.memory_space<vmem>>, %arg6: memref<1xf32, #tpu.memory_space<smem>>, %arg7: memref<4x1xf32, #tpu.memory_space<vmem>>, %arg8: memref<4x1xf32, #tpu.memory_space<vmem>>, %arg9: memref<1x16x256xf32, #tpu.memory_space<vmem>>) attributes {dimension_semantics = [#tpu.dimension_semantics<parallel>], iteration_bounds = array<i64: 2>, scalar_prefetch = 0 : i64, scratch_operands = 0 : i64, tpu.core_type = #tpu.core_type<tc>, window_params = [{transform_indices = @transform_0, window_bounds = array<i64: 1, 16, 256>}, {pipeline_mode = #tpu.pipeline_mode<synchronous>, transform_indices = @transform_1, window_bounds = array<i64: 4, 144>}, {pipeline_mode = #tpu.pipeline_mode<synchronous>, transform_indices = @transform_2, window_bounds = array<i64: 4, 4, 1>}, {pipeline_mode = #tpu.pipeline_mode<synchronous>, transform_indices = @transform_3, window_bounds = array<i64: 3, 256>}, {pipeline_mode = #tpu.pipeline_mode<synchronous>, transform_indices = @transform_4, window_bounds = array<i64: 1, 4, 256>}, {transform_indices = @transform_5, window_bounds = array<i64: 1>}, {pipeline_mode = #tpu.pipeline_mode<synchronous>, transform_indices = @transform_6, window_bounds = array<i64: 4, 1>}, {pipeline_mode = #tpu.pipeline_mode<synchronous>, transform_indices = @transform_7, window_bounds = array<i64: 4, 1>}, {transform_indices = @transform_8, window_bounds = array<i64: 1, 16, 256>}]} {
    %c0 = arith.constant 0 : index
    %c0_0 = arith.constant 0 : index
    %0 = vector.load %arg4[%c0, %c0_0] : memref<3x256xf32, #tpu.memory_space<vmem>>, vector<1x256xf32>
    %c2 = arith.constant 2 : index
    %c0_1 = arith.constant 0 : index
    %1 = vector.load %arg4[%c2, %c0_1] : memref<3x256xf32, #tpu.memory_space<vmem>>, vector<1x256xf32>
    %cst = arith.constant 0.000000e+00 : f32
    %2 = vector.broadcast %cst : f32 to vector<1x17xf32>
    %c0_2 = arith.constant 0 : index
    %c0_3 = arith.constant 0 : index
    %c0_4 = arith.constant 0 : index
    %3 = vector.load %arg1[%c0_2, %c0_3, %c0_4] : memref<1x16x256xf32, #tpu.memory_space<vmem>>, vector<1x4x256xf32>
    %4 = vector.shape_cast %3 : vector<1x4x256xf32> to vector<4x256xf32>
    %5 = vector.extract_strided_slice %4 {offsets = [0, 0], sizes = [1, 256], strides = [1, 1]} : vector<4x256xf32> to vector<1x256xf32>
    %6 = tpu.concatenate %2, %5, %2 in 1 : vector<1x17xf32>, vector<1x256xf32>, vector<1x17xf32> -> vector<1x290xf32>
    %7 = vector.extract_strided_slice %6 {offsets = [0, 0], sizes = [1, 256], strides = [1, 1]} : vector<1x290xf32> to vector<1x256xf32>
    %8 = arith.mulf %7, %0 : vector<1x256xf32>
    %c0_5 = arith.constant 0 : index
    %c0_6 = arith.constant 0 : index
    %9 = vector.load %arg2[%c0_5, %c0_6] : memref<4x144xf32, #tpu.memory_space<vmem>>, vector<4x1xf32>
    %10 = vector.broadcast %9 : vector<4x1xf32> to vector<4x256xf32>
    %11 = vector.broadcast %8 : vector<1x256xf32> to vector<4x256xf32>
    %12 = arith.mulf %10, %11 : vector<4x256xf32>
    %13 = vector.extract_strided_slice %6 {offsets = [0, 1], sizes = [1, 256], strides = [1, 1]} : vector<1x290xf32> to vector<1x256xf32>
    %c0_7 = arith.constant 0 : index
    %c1 = arith.constant 1 : index
    %14 = vector.load %arg2[%c0_7, %c1] : memref<4x144xf32, #tpu.memory_space<vmem>>, vector<4x1xf32>
    %15 = vector.broadcast %14 : vector<4x1xf32> to vector<4x256xf32>
    %16 = vector.broadcast %13 : vector<1x256xf32> to vector<4x256xf32>
    %17 = arith.mulf %15, %16 : vector<4x256xf32>
    %18 = arith.addf %12, %17 : vector<4x256xf32>
    %19 = vector.extract_strided_slice %6 {offsets = [0, 2], sizes = [1, 256], strides = [1, 1]} : vector<1x290xf32> to vector<1x256xf32>
    %20 = arith.mulf %19, %1 : vector<1x256xf32>
    %c0_8 = arith.constant 0 : index
    %c2_9 = arith.constant 2 : index
    %21 = vector.load %arg2[%c0_8, %c2_9] : memref<4x144xf32, #tpu.memory_space<vmem>>, vector<4x1xf32>
    %22 = vector.broadcast %21 : vector<4x1xf32> to vector<4x256xf32>
    %23 = vector.broadcast %20 : vector<1x256xf32> to vector<4x256xf32>
    %24 = arith.mulf %22, %23 : vector<4x256xf32>
    %25 = arith.addf %18, %24 : vector<4x256xf32>
    %26 = vector.extract_strided_slice %6 {offsets = [0, 16], sizes = [1, 256], strides = [1, 1]} : vector<1x290xf32> to vector<1x256xf32>
    %27 = arith.mulf %26, %0 : vector<1x256xf32>
    %c0_10 = arith.constant 0 : index
    %c3 = arith.constant 3 : index
    %28 = vector.load %arg2[%c0_10, %c3] : memref<4x144xf32, #tpu.memory_space<vmem>>, vector<4x1xf32>
    %29 = vector.broadcast %28 : vector<4x1xf32> to vector<4x256xf32>
    %30 = vector.broadcast %27 : vector<1x256xf32> to vector<4x256xf32>
    %31 = arith.mulf %29, %30 : vector<4x256xf32>
    %32 = arith.addf %25, %31 : vector<4x256xf32>
    %c0_11 = arith.constant 0 : index
    %c4 = arith.constant 4 : index
    %33 = vector.load %arg2[%c0_11, %c4] : memref<4x144xf32, #tpu.memory_space<vmem>>, vector<4x1xf32>
    %34 = vector.broadcast %33 : vector<4x1xf32> to vector<4x256xf32>
    %35 = vector.broadcast %5 : vector<1x256xf32> to vector<4x256xf32>
    %36 = arith.mulf %34, %35 : vector<4x256xf32>
    %37 = arith.addf %32, %36 : vector<4x256xf32>
    %38 = vector.extract_strided_slice %6 {offsets = [0, 18], sizes = [1, 256], strides = [1, 1]} : vector<1x290xf32> to vector<1x256xf32>
    %39 = arith.mulf %38, %1 : vector<1x256xf32>
    %c0_12 = arith.constant 0 : index
    %c5 = arith.constant 5 : index
    %40 = vector.load %arg2[%c0_12, %c5] : memref<4x144xf32, #tpu.memory_space<vmem>>, vector<4x1xf32>
    %41 = vector.broadcast %40 : vector<4x1xf32> to vector<4x256xf32>
    %42 = vector.broadcast %39 : vector<1x256xf32> to vector<4x256xf32>
    %43 = arith.mulf %41, %42 : vector<4x256xf32>
    %44 = arith.addf %37, %43 : vector<4x256xf32>
    %45 = vector.extract_strided_slice %6 {offsets = [0, 32], sizes = [1, 256], strides = [1, 1]} : vector<1x290xf32> to vector<1x256xf32>
    %46 = arith.mulf %45, %0 : vector<1x256xf32>
    %c0_13 = arith.constant 0 : index
    %c6 = arith.constant 6 : index
    %47 = vector.load %arg2[%c0_13, %c6] : memref<4x144xf32, #tpu.memory_space<vmem>>, vector<4x1xf32>
    %48 = vector.broadcast %47 : vector<4x1xf32> to vector<4x256xf32>
    %49 = vector.broadcast %46 : vector<1x256xf32> to vector<4x256xf32>
    %50 = arith.mulf %48, %49 : vector<4x256xf32>
    %51 = arith.addf %44, %50 : vector<4x256xf32>
    %52 = vector.extract_strided_slice %6 {offsets = [0, 33], sizes = [1, 256], strides = [1, 1]} : vector<1x290xf32> to vector<1x256xf32>
    %c0_14 = arith.constant 0 : index
    %c7 = arith.constant 7 : index
    %53 = vector.load %arg2[%c0_14, %c7] : memref<4x144xf32, #tpu.memory_space<vmem>>, vector<4x1xf32>
    %54 = vector.broadcast %53 : vector<4x1xf32> to vector<4x256xf32>
    %55 = vector.broadcast %52 : vector<1x256xf32> to vector<4x256xf32>
    %56 = arith.mulf %54, %55 : vector<4x256xf32>
    %57 = arith.addf %51, %56 : vector<4x256xf32>
    %58 = vector.extract_strided_slice %6 {offsets = [0, 34], sizes = [1, 256], strides = [1, 1]} : vector<1x290xf32> to vector<1x256xf32>
    %59 = arith.mulf %58, %1 : vector<1x256xf32>
    %c0_15 = arith.constant 0 : index
    %c8 = arith.constant 8 : index
    %60 = vector.load %arg2[%c0_15, %c8] : memref<4x144xf32, #tpu.memory_space<vmem>>, vector<4x1xf32>
    %61 = vector.broadcast %60 : vector<4x1xf32> to vector<4x256xf32>
    %62 = vector.broadcast %59 : vector<1x256xf32> to vector<4x256xf32>
    %63 = arith.mulf %61, %62 : vector<4x256xf32>
    %64 = arith.addf %57, %63 : vector<4x256xf32>
    %65 = vector.extract_strided_slice %4 {offsets = [1, 0], sizes = [1, 256], strides = [1, 1]} : vector<4x256xf32> to vector<1x256xf32>
    %66 = tpu.concatenate %2, %65, %2 in 1 : vector<1x17xf32>, vector<1x256xf32>, vector<1x17xf32> -> vector<1x290xf32>
    %67 = vector.extract_strided_slice %66 {offsets = [0, 0], sizes = [1, 256], strides = [1, 1]} : vector<1x290xf32> to vector<1x256xf32>
    %68 = arith.mulf %67, %0 : vector<1x256xf32>
    %c0_16 = arith.constant 0 : index
    %c9 = arith.constant 9 : index
    %69 = vector.load %arg2[%c0_16, %c9] : memref<4x144xf32, #tpu.memory_space<vmem>>, vector<4x1xf32>
    %70 = vector.broadcast %69 : vector<4x1xf32> to vector<4x256xf32>
    %71 = vector.broadcast %68 : vector<1x256xf32> to vector<4x256xf32>
    %72 = arith.mulf %70, %71 : vector<4x256xf32>
    %73 = vector.extract_strided_slice %66 {offsets = [0, 1], sizes = [1, 256], strides = [1, 1]} : vector<1x290xf32> to vector<1x256xf32>
    %c0_17 = arith.constant 0 : index
    %c10 = arith.constant 10 : index
    %74 = vector.load %arg2[%c0_17, %c10] : memref<4x144xf32, #tpu.memory_space<vmem>>, vector<4x1xf32>
    %75 = vector.broadcast %74 : vector<4x1xf32> to vector<4x256xf32>
    %76 = vector.broadcast %73 : vector<1x256xf32> to vector<4x256xf32>
    %77 = arith.mulf %75, %76 : vector<4x256xf32>
    %78 = arith.addf %72, %77 : vector<4x256xf32>
    %79 = vector.extract_strided_slice %66 {offsets = [0, 2], sizes = [1, 256], strides = [1, 1]} : vector<1x290xf32> to vector<1x256xf32>
    %80 = arith.mulf %79, %1 : vector<1x256xf32>
    %c0_18 = arith.constant 0 : index
    %c11 = arith.constant 11 : index
    %81 = vector.load %arg2[%c0_18, %c11] : memref<4x144xf32, #tpu.memory_space<vmem>>, vector<4x1xf32>
    %82 = vector.broadcast %81 : vector<4x1xf32> to vector<4x256xf32>
    %83 = vector.broadcast %80 : vector<1x256xf32> to vector<4x256xf32>
    %84 = arith.mulf %82, %83 : vector<4x256xf32>
    %85 = arith.addf %78, %84 : vector<4x256xf32>
    %86 = vector.extract_strided_slice %66 {offsets = [0, 16], sizes = [1, 256], strides = [1, 1]} : vector<1x290xf32> to vector<1x256xf32>
    %87 = arith.mulf %86, %0 : vector<1x256xf32>
    %c0_19 = arith.constant 0 : index
    %c12 = arith.constant 12 : index
    %88 = vector.load %arg2[%c0_19, %c12] : memref<4x144xf32, #tpu.memory_space<vmem>>, vector<4x1xf32>
    %89 = vector.broadcast %88 : vector<4x1xf32> to vector<4x256xf32>
    %90 = vector.broadcast %87 : vector<1x256xf32> to vector<4x256xf32>
    %91 = arith.mulf %89, %90 : vector<4x256xf32>
    %92 = arith.addf %85, %91 : vector<4x256xf32>
    %c0_20 = arith.constant 0 : index
    %c13 = arith.constant 13 : index
    %93 = vector.load %arg2[%c0_20, %c13] : memref<4x144xf32, #tpu.memory_space<vmem>>, vector<4x1xf32>
    %94 = vector.broadcast %93 : vector<4x1xf32> to vector<4x256xf32>
    %95 = vector.broadcast %65 : vector<1x256xf32> to vector<4x256xf32>
    %96 = arith.mulf %94, %95 : vector<4x256xf32>
    %97 = arith.addf %92, %96 : vector<4x256xf32>
    %98 = vector.extract_strided_slice %66 {offsets = [0, 18], sizes = [1, 256], strides = [1, 1]} : vector<1x290xf32> to vector<1x256xf32>
    %99 = arith.mulf %98, %1 : vector<1x256xf32>
    %c0_21 = arith.constant 0 : index
    %c14 = arith.constant 14 : index
    %100 = vector.load %arg2[%c0_21, %c14] : memref<4x144xf32, #tpu.memory_space<vmem>>, vector<4x1xf32>
    %101 = vector.broadcast %100 : vector<4x1xf32> to vector<4x256xf32>
    %102 = vector.broadcast %99 : vector<1x256xf32> to vector<4x256xf32>
    %103 = arith.mulf %101, %102 : vector<4x256xf32>
    %104 = arith.addf %97, %103 : vector<4x256xf32>
    %105 = vector.extract_strided_slice %66 {offsets = [0, 32], sizes = [1, 256], strides = [1, 1]} : vector<1x290xf32> to vector<1x256xf32>
    %106 = arith.mulf %105, %0 : vector<1x256xf32>
    %c0_22 = arith.constant 0 : index
    %c15 = arith.constant 15 : index
    %107 = vector.load %arg2[%c0_22, %c15] : memref<4x144xf32, #tpu.memory_space<vmem>>, vector<4x1xf32>
    %108 = vector.broadcast %107 : vector<4x1xf32> to vector<4x256xf32>
    %109 = vector.broadcast %106 : vector<1x256xf32> to vector<4x256xf32>
    %110 = arith.mulf %108, %109 : vector<4x256xf32>
    %111 = arith.addf %104, %110 : vector<4x256xf32>
    %112 = vector.extract_strided_slice %66 {offsets = [0, 33], sizes = [1, 256], strides = [1, 1]} : vector<1x290xf32> to vector<1x256xf32>
    %c0_23 = arith.constant 0 : index
    %c16 = arith.constant 16 : index
    %113 = vector.load %arg2[%c0_23, %c16] : memref<4x144xf32, #tpu.memory_space<vmem>>, vector<4x1xf32>
    %114 = vector.broadcast %113 : vector<4x1xf32> to vector<4x256xf32>
    %115 = vector.broadcast %112 : vector<1x256xf32> to vector<4x256xf32>
    %116 = arith.mulf %114, %115 : vector<4x256xf32>
    %117 = arith.addf %111, %116 : vector<4x256xf32>
    %118 = vector.extract_strided_slice %66 {offsets = [0, 34], sizes = [1, 256], strides = [1, 1]} : vector<1x290xf32> to vector<1x256xf32>
    %119 = arith.mulf %118, %1 : vector<1x256xf32>
    %c0_24 = arith.constant 0 : index
    %c17 = arith.constant 17 : index
    %120 = vector.load %arg2[%c0_24, %c17] : memref<4x144xf32, #tpu.memory_space<vmem>>, vector<4x1xf32>
    %121 = vector.broadcast %120 : vector<4x1xf32> to vector<4x256xf32>
    %122 = vector.broadcast %119 : vector<1x256xf32> to vector<4x256xf32>
    %123 = arith.mulf %121, %122 : vector<4x256xf32>
    %124 = arith.addf %117, %123 : vector<4x256xf32>
    %125 = vector.extract_strided_slice %4 {offsets = [2, 0], sizes = [1, 256], strides = [1, 1]} : vector<4x256xf32> to vector<1x256xf32>
    %126 = tpu.concatenate %2, %125, %2 in 1 : vector<1x17xf32>, vector<1x256xf32>, vector<1x17xf32> -> vector<1x290xf32>
    %127 = vector.extract_strided_slice %126 {offsets = [0, 0], sizes = [1, 256], strides = [1, 1]} : vector<1x290xf32> to vector<1x256xf32>
    %128 = arith.mulf %127, %0 : vector<1x256xf32>
    %c0_25 = arith.constant 0 : index
    %c18 = arith.constant 18 : index
    %129 = vector.load %arg2[%c0_25, %c18] : memref<4x144xf32, #tpu.memory_space<vmem>>, vector<4x1xf32>
    %130 = vector.broadcast %129 : vector<4x1xf32> to vector<4x256xf32>
    %131 = vector.broadcast %128 : vector<1x256xf32> to vector<4x256xf32>
    %132 = arith.mulf %130, %131 : vector<4x256xf32>
    %133 = vector.extract_strided_slice %126 {offsets = [0, 1], sizes = [1, 256], strides = [1, 1]} : vector<1x290xf32> to vector<1x256xf32>
    %c0_26 = arith.constant 0 : index
    %c19 = arith.constant 19 : index
    %134 = vector.load %arg2[%c0_26, %c19] : memref<4x144xf32, #tpu.memory_space<vmem>>, vector<4x1xf32>
    %135 = vector.broadcast %134 : vector<4x1xf32> to vector<4x256xf32>
    %136 = vector.broadcast %133 : vector<1x256xf32> to vector<4x256xf32>
    %137 = arith.mulf %135, %136 : vector<4x256xf32>
    %138 = arith.addf %132, %137 : vector<4x256xf32>
    %139 = vector.extract_strided_slice %126 {offsets = [0, 2], sizes = [1, 256], strides = [1, 1]} : vector<1x290xf32> to vector<1x256xf32>
    %140 = arith.mulf %139, %1 : vector<1x256xf32>
    %c0_27 = arith.constant 0 : index
    %c20 = arith.constant 20 : index
    %141 = vector.load %arg2[%c0_27, %c20] : memref<4x144xf32, #tpu.memory_space<vmem>>, vector<4x1xf32>
    %142 = vector.broadcast %141 : vector<4x1xf32> to vector<4x256xf32>
    %143 = vector.broadcast %140 : vector<1x256xf32> to vector<4x256xf32>
    %144 = arith.mulf %142, %143 : vector<4x256xf32>
    %145 = arith.addf %138, %144 : vector<4x256xf32>
    %146 = vector.extract_strided_slice %126 {offsets = [0, 16], sizes = [1, 256], strides = [1, 1]} : vector<1x290xf32> to vector<1x256xf32>
    %147 = arith.mulf %146, %0 : vector<1x256xf32>
    %c0_28 = arith.constant 0 : index
    %c21 = arith.constant 21 : index
    %148 = vector.load %arg2[%c0_28, %c21] : memref<4x144xf32, #tpu.memory_space<vmem>>, vector<4x1xf32>
    %149 = vector.broadcast %148 : vector<4x1xf32> to vector<4x256xf32>
    %150 = vector.broadcast %147 : vector<1x256xf32> to vector<4x256xf32>
    %151 = arith.mulf %149, %150 : vector<4x256xf32>
    %152 = arith.addf %145, %151 : vector<4x256xf32>
    %c0_29 = arith.constant 0 : index
    %c22 = arith.constant 22 : index
    %153 = vector.load %arg2[%c0_29, %c22] : memref<4x144xf32, #tpu.memory_space<vmem>>, vector<4x1xf32>
    %154 = vector.broadcast %153 : vector<4x1xf32> to vector<4x256xf32>
    %155 = vector.broadcast %125 : vector<1x256xf32> to vector<4x256xf32>
    %156 = arith.mulf %154, %155 : vector<4x256xf32>
    %157 = arith.addf %152, %156 : vector<4x256xf32>
    %158 = vector.extract_strided_slice %126 {offsets = [0, 18], sizes = [1, 256], strides = [1, 1]} : vector<1x290xf32> to vector<1x256xf32>
    %159 = arith.mulf %158, %1 : vector<1x256xf32>
    %c0_30 = arith.constant 0 : index
    %c23 = arith.constant 23 : index
    %160 = vector.load %arg2[%c0_30, %c23] : memref<4x144xf32, #tpu.memory_space<vmem>>, vector<4x1xf32>
    %161 = vector.broadcast %160 : vector<4x1xf32> to vector<4x256xf32>
    %162 = vector.broadcast %159 : vector<1x256xf32> to vector<4x256xf32>
    %163 = arith.mulf %161, %162 : vector<4x256xf32>
    %164 = arith.addf %157, %163 : vector<4x256xf32>
    %165 = vector.extract_strided_slice %126 {offsets = [0, 32], sizes = [1, 256], strides = [1, 1]} : vector<1x290xf32> to vector<1x256xf32>
    %166 = arith.mulf %165, %0 : vector<1x256xf32>
    %c0_31 = arith.constant 0 : index
    %c24 = arith.constant 24 : index
    %167 = vector.load %arg2[%c0_31, %c24] : memref<4x144xf32, #tpu.memory_space<vmem>>, vector<4x1xf32>
    %168 = vector.broadcast %167 : vector<4x1xf32> to vector<4x256xf32>
    %169 = vector.broadcast %166 : vector<1x256xf32> to vector<4x256xf32>
    %170 = arith.mulf %168, %169 : vector<4x256xf32>
    %171 = arith.addf %164, %170 : vector<4x256xf32>
    %172 = vector.extract_strided_slice %126 {offsets = [0, 33], sizes = [1, 256], strides = [1, 1]} : vector<1x290xf32> to vector<1x256xf32>
    %c0_32 = arith.constant 0 : index
    %c25 = arith.constant 25 : index
    %173 = vector.load %arg2[%c0_32, %c25] : memref<4x144xf32, #tpu.memory_space<vmem>>, vector<4x1xf32>
    %174 = vector.broadcast %173 : vector<4x1xf32> to vector<4x256xf32>
    %175 = vector.broadcast %172 : vector<1x256xf32> to vector<4x256xf32>
    %176 = arith.mulf %174, %175 : vector<4x256xf32>
    %177 = arith.addf %171, %176 : vector<4x256xf32>
    %178 = vector.extract_strided_slice %126 {offsets = [0, 34], sizes = [1, 256], strides = [1, 1]} : vector<1x290xf32> to vector<1x256xf32>
    %179 = arith.mulf %178, %1 : vector<1x256xf32>
    %c0_33 = arith.constant 0 : index
    %c26 = arith.constant 26 : index
    %180 = vector.load %arg2[%c0_33, %c26] : memref<4x144xf32, #tpu.memory_space<vmem>>, vector<4x1xf32>
    %181 = vector.broadcast %180 : vector<4x1xf32> to vector<4x256xf32>
    %182 = vector.broadcast %179 : vector<1x256xf32> to vector<4x256xf32>
    %183 = arith.mulf %181, %182 : vector<4x256xf32>
    %184 = arith.addf %177, %183 : vector<4x256xf32>
    %185 = vector.extract_strided_slice %4 {offsets = [3, 0], sizes = [1, 256], strides = [1, 1]} : vector<4x256xf32> to vector<1x256xf32>
    %186 = tpu.concatenate %2, %185, %2 in 1 : vector<1x17xf32>, vector<1x256xf32>, vector<1x17xf32> -> vector<1x290xf32>
    %187 = vector.extract_strided_slice %186 {offsets = [0, 0], sizes = [1, 256], strides = [1, 1]} : vector<1x290xf32> to vector<1x256xf32>
    %188 = arith.mulf %187, %0 : vector<1x256xf32>
    %c0_34 = arith.constant 0 : index
    %c27 = arith.constant 27 : index
    %189 = vector.load %arg2[%c0_34, %c27] : memref<4x144xf32, #tpu.memory_space<vmem>>, vector<4x1xf32>
    %190 = vector.broadcast %189 : vector<4x1xf32> to vector<4x256xf32>
    %191 = vector.broadcast %188 : vector<1x256xf32> to vector<4x256xf32>
    %192 = arith.mulf %190, %191 : vector<4x256xf32>
    %193 = vector.extract_strided_slice %186 {offsets = [0, 1], sizes = [1, 256], strides = [1, 1]} : vector<1x290xf32> to vector<1x256xf32>
    %c0_35 = arith.constant 0 : index
    %c28 = arith.constant 28 : index
    %194 = vector.load %arg2[%c0_35, %c28] : memref<4x144xf32, #tpu.memory_space<vmem>>, vector<4x1xf32>
    %195 = vector.broadcast %194 : vector<4x1xf32> to vector<4x256xf32>
    %196 = vector.broadcast %193 : vector<1x256xf32> to vector<4x256xf32>
    %197 = arith.mulf %195, %196 : vector<4x256xf32>
    %198 = arith.addf %192, %197 : vector<4x256xf32>
    %199 = vector.extract_strided_slice %186 {offsets = [0, 2], sizes = [1, 256], strides = [1, 1]} : vector<1x290xf32> to vector<1x256xf32>
    %200 = arith.mulf %199, %1 : vector<1x256xf32>
    %c0_36 = arith.constant 0 : index
    %c29 = arith.constant 29 : index
    %201 = vector.load %arg2[%c0_36, %c29] : memref<4x144xf32, #tpu.memory_space<vmem>>, vector<4x1xf32>
    %202 = vector.broadcast %201 : vector<4x1xf32> to vector<4x256xf32>
    %203 = vector.broadcast %200 : vector<1x256xf32> to vector<4x256xf32>
    %204 = arith.mulf %202, %203 : vector<4x256xf32>
    %205 = arith.addf %198, %204 : vector<4x256xf32>
    %206 = vector.extract_strided_slice %186 {offsets = [0, 16], sizes = [1, 256], strides = [1, 1]} : vector<1x290xf32> to vector<1x256xf32>
    %207 = arith.mulf %206, %0 : vector<1x256xf32>
    %c0_37 = arith.constant 0 : index
    %c30 = arith.constant 30 : index
    %208 = vector.load %arg2[%c0_37, %c30] : memref<4x144xf32, #tpu.memory_space<vmem>>, vector<4x1xf32>
    %209 = vector.broadcast %208 : vector<4x1xf32> to vector<4x256xf32>
    %210 = vector.broadcast %207 : vector<1x256xf32> to vector<4x256xf32>
    %211 = arith.mulf %209, %210 : vector<4x256xf32>
    %212 = arith.addf %205, %211 : vector<4x256xf32>
    %c0_38 = arith.constant 0 : index
    %c31 = arith.constant 31 : index
    %213 = vector.load %arg2[%c0_38, %c31] : memref<4x144xf32, #tpu.memory_space<vmem>>, vector<4x1xf32>
    %214 = vector.broadcast %213 : vector<4x1xf32> to vector<4x256xf32>
    %215 = vector.broadcast %185 : vector<1x256xf32> to vector<4x256xf32>
    %216 = arith.mulf %214, %215 : vector<4x256xf32>
    %217 = arith.addf %212, %216 : vector<4x256xf32>
    %218 = vector.extract_strided_slice %186 {offsets = [0, 18], sizes = [1, 256], strides = [1, 1]} : vector<1x290xf32> to vector<1x256xf32>
    %219 = arith.mulf %218, %1 : vector<1x256xf32>
    %c0_39 = arith.constant 0 : index
    %c32 = arith.constant 32 : index
    %220 = vector.load %arg2[%c0_39, %c32] : memref<4x144xf32, #tpu.memory_space<vmem>>, vector<4x1xf32>
    %221 = vector.broadcast %220 : vector<4x1xf32> to vector<4x256xf32>
    %222 = vector.broadcast %219 : vector<1x256xf32> to vector<4x256xf32>
    %223 = arith.mulf %221, %222 : vector<4x256xf32>
    %224 = arith.addf %217, %223 : vector<4x256xf32>
    %225 = vector.extract_strided_slice %186 {offsets = [0, 32], sizes = [1, 256], strides = [1, 1]} : vector<1x290xf32> to vector<1x256xf32>
    %226 = arith.mulf %225, %0 : vector<1x256xf32>
    %c0_40 = arith.constant 0 : index
    %c33 = arith.constant 33 : index
    %227 = vector.load %arg2[%c0_40, %c33] : memref<4x144xf32, #tpu.memory_space<vmem>>, vector<4x1xf32>
    %228 = vector.broadcast %227 : vector<4x1xf32> to vector<4x256xf32>
    %229 = vector.broadcast %226 : vector<1x256xf32> to vector<4x256xf32>
    %230 = arith.mulf %228, %229 : vector<4x256xf32>
    %231 = arith.addf %224, %230 : vector<4x256xf32>
    %232 = vector.extract_strided_slice %186 {offsets = [0, 33], sizes = [1, 256], strides = [1, 1]} : vector<1x290xf32> to vector<1x256xf32>
    %c0_41 = arith.constant 0 : index
    %c34 = arith.constant 34 : index
    %233 = vector.load %arg2[%c0_41, %c34] : memref<4x144xf32, #tpu.memory_space<vmem>>, vector<4x1xf32>
    %234 = vector.broadcast %233 : vector<4x1xf32> to vector<4x256xf32>
    %235 = vector.broadcast %232 : vector<1x256xf32> to vector<4x256xf32>
    %236 = arith.mulf %234, %235 : vector<4x256xf32>
    %237 = arith.addf %231, %236 : vector<4x256xf32>
    %238 = vector.extract_strided_slice %186 {offsets = [0, 34], sizes = [1, 256], strides = [1, 1]} : vector<1x290xf32> to vector<1x256xf32>
    %239 = arith.mulf %238, %1 : vector<1x256xf32>
    %c0_42 = arith.constant 0 : index
    %c35 = arith.constant 35 : index
    %240 = vector.load %arg2[%c0_42, %c35] : memref<4x144xf32, #tpu.memory_space<vmem>>, vector<4x1xf32>
    %241 = vector.broadcast %240 : vector<4x1xf32> to vector<4x256xf32>
    %242 = vector.broadcast %239 : vector<1x256xf32> to vector<4x256xf32>
    %243 = arith.mulf %241, %242 : vector<4x256xf32>
    %244 = arith.addf %237, %243 : vector<4x256xf32>
    %245 = arith.addf %64, %124 : vector<4x256xf32>
    %246 = arith.addf %245, %184 : vector<4x256xf32>
    %247 = arith.addf %246, %244 : vector<4x256xf32>
    %c0_43 = arith.constant 0 : index
    %c0_44 = arith.constant 0 : index
    %c0_45 = arith.constant 0 : index
    %248 = vector.load %arg3[%c0_43, %c0_44, %c0_45] : memref<4x4x1xf32, #tpu.memory_space<vmem>>, vector<1x4x1xf32>
    %249 = vector.shape_cast %248 : vector<1x4x1xf32> to vector<4x1xf32>
    %250 = vector.broadcast %249 : vector<4x1xf32> to vector<4x256xf32>
    %251 = arith.addf %247, %250 : vector<4x256xf32>
    %c0_46 = arith.constant 0 : index
    %c0_47 = arith.constant 0 : index
    %252 = vector.load %arg8[%c0_46, %c0_47] : memref<4x1xf32, #tpu.memory_space<vmem>>, vector<4x1xf32>
    %c0_48 = arith.constant 0 : index
    %c0_49 = arith.constant 0 : index
    %c0_50 = arith.constant 0 : index
    %253 = vector.load %arg5[%c0_48, %c0_49, %c0_50] : memref<1x4x256xf32, #tpu.memory_space<vmem>>, vector<1x4x256xf32>
    %254 = vector.shape_cast %253 : vector<1x4x256xf32> to vector<4x256xf32>
    %255 = arith.mulf %251, %254 : vector<4x256xf32>
    %cst_51 = arith.constant dense<0.000000e+00> : vector<4xf32>
    %256 = vector.multi_reduction <add>, %255, %cst_51 [1] : vector<4x256xf32> to vector<4xf32>
    %257 = vector.shape_cast %256 : vector<4xf32> to vector<4x1xf32>
    %cst_52 = arith.constant dense<0.000000e+00> : vector<1xf32>
    %258 = vector.multi_reduction <add>, %257, %cst_52 [0] : vector<4x1xf32> to vector<1xf32>
    %259 = vector.shape_cast %258 : vector<1xf32> to vector<1x1xf32>
    %c0_53 = arith.constant 0 : index
    %260 = memref.load %arg6[%c0_53] : memref<1xf32, #tpu.memory_space<smem>>
    %261 = vector.broadcast %260 : f32 to vector<1x1xf32>
    %262 = arith.addf %259, %261 : vector<1x1xf32>
    %cst_54 = arith.constant 0.000000e+00 : f32
    %263 = vector.broadcast %cst_54 : f32 to vector<1x1xf32>
    %264 = arith.maximumf %262, %263 : vector<1x1xf32>
    %c0_55 = arith.constant 0 : index
    %c0_56 = arith.constant 0 : index
    %265 = vector.load %arg7[%c0_55, %c0_56] : memref<4x1xf32, #tpu.memory_space<vmem>>, vector<4x1xf32>
    %266 = vector.broadcast %264 : vector<1x1xf32> to vector<4x1xf32>
    %267 = arith.mulf %265, %266 : vector<4x1xf32>
    %268 = arith.addf %252, %267 : vector<4x1xf32>
    %cst_57 = arith.constant 0.000000e+00 : f32
    %269 = vector.broadcast %cst_57 : f32 to vector<4x1xf32>
    %270 = arith.subf %269, %268 : vector<4x1xf32>
    %271 = math.exp %270 : vector<4x1xf32>
    %cst_58 = arith.constant 1.000000e+00 : f32
    %272 = vector.broadcast %cst_58 : f32 to vector<4x1xf32>
    %273 = arith.addf %272, %271 : vector<4x1xf32>
    %cst_59 = arith.constant 1.000000e+00 : f32
    %274 = vector.broadcast %cst_59 : f32 to vector<4x1xf32>
    %275 = arith.divf %274, %273 : vector<4x1xf32>
    %276 = math.exp %275 : vector<4x1xf32>
    %c0_60 = arith.constant 0 : index
    %c4_61 = arith.constant 4 : index
    %c0_62 = arith.constant 0 : index
    %277 = vector.load %arg1[%c0_60, %c4_61, %c0_62] : memref<1x16x256xf32, #tpu.memory_space<vmem>>, vector<1x4x256xf32>
    %278 = vector.shape_cast %277 : vector<1x4x256xf32> to vector<4x256xf32>
    %279 = arith.addf %278, %251 : vector<4x256xf32>
    %280 = vector.extract_strided_slice %279 {offsets = [0, 0], sizes = [1, 256], strides = [1, 1]} : vector<4x256xf32> to vector<1x256xf32>
    %281 = tpu.concatenate %2, %280, %2 in 1 : vector<1x17xf32>, vector<1x256xf32>, vector<1x17xf32> -> vector<1x290xf32>
    %282 = vector.extract_strided_slice %281 {offsets = [0, 0], sizes = [1, 256], strides = [1, 1]} : vector<1x290xf32> to vector<1x256xf32>
    %283 = arith.mulf %282, %0 : vector<1x256xf32>
    %c0_63 = arith.constant 0 : index
    %c36 = arith.constant 36 : index
    %284 = vector.load %arg2[%c0_63, %c36] : memref<4x144xf32, #tpu.memory_space<vmem>>, vector<4x1xf32>
    %285 = vector.broadcast %284 : vector<4x1xf32> to vector<4x256xf32>
    %286 = vector.broadcast %283 : vector<1x256xf32> to vector<4x256xf32>
    %287 = arith.mulf %285, %286 : vector<4x256xf32>
    %288 = vector.extract_strided_slice %281 {offsets = [0, 1], sizes = [1, 256], strides = [1, 1]} : vector<1x290xf32> to vector<1x256xf32>
    %c0_64 = arith.constant 0 : index
    %c37 = arith.constant 37 : index
    %289 = vector.load %arg2[%c0_64, %c37] : memref<4x144xf32, #tpu.memory_space<vmem>>, vector<4x1xf32>
    %290 = vector.broadcast %289 : vector<4x1xf32> to vector<4x256xf32>
    %291 = vector.broadcast %288 : vector<1x256xf32> to vector<4x256xf32>
    %292 = arith.mulf %290, %291 : vector<4x256xf32>
    %293 = arith.addf %287, %292 : vector<4x256xf32>
    %294 = vector.extract_strided_slice %281 {offsets = [0, 2], sizes = [1, 256], strides = [1, 1]} : vector<1x290xf32> to vector<1x256xf32>
    %295 = arith.mulf %294, %1 : vector<1x256xf32>
    %c0_65 = arith.constant 0 : index
    %c38 = arith.constant 38 : index
    %296 = vector.load %arg2[%c0_65, %c38] : memref<4x144xf32, #tpu.memory_space<vmem>>, vector<4x1xf32>
    %297 = vector.broadcast %296 : vector<4x1xf32> to vector<4x256xf32>
    %298 = vector.broadcast %295 : vector<1x256xf32> to vector<4x256xf32>
    %299 = arith.mulf %297, %298 : vector<4x256xf32>
    %300 = arith.addf %293, %299 : vector<4x256xf32>
    %301 = vector.extract_strided_slice %281 {offsets = [0, 16], sizes = [1, 256], strides = [1, 1]} : vector<1x290xf32> to vector<1x256xf32>
    %302 = arith.mulf %301, %0 : vector<1x256xf32>
    %c0_66 = arith.constant 0 : index
    %c39 = arith.constant 39 : index
    %303 = vector.load %arg2[%c0_66, %c39] : memref<4x144xf32, #tpu.memory_space<vmem>>, vector<4x1xf32>
    %304 = vector.broadcast %303 : vector<4x1xf32> to vector<4x256xf32>
    %305 = vector.broadcast %302 : vector<1x256xf32> to vector<4x256xf32>
    %306 = arith.mulf %304, %305 : vector<4x256xf32>
    %307 = arith.addf %300, %306 : vector<4x256xf32>
    %c0_67 = arith.constant 0 : index
    %c40 = arith.constant 40 : index
    %308 = vector.load %arg2[%c0_67, %c40] : memref<4x144xf32, #tpu.memory_space<vmem>>, vector<4x1xf32>
    %309 = vector.broadcast %308 : vector<4x1xf32> to vector<4x256xf32>
    %310 = vector.broadcast %280 : vector<1x256xf32> to vector<4x256xf32>
    %311 = arith.mulf %309, %310 : vector<4x256xf32>
    %312 = arith.addf %307, %311 : vector<4x256xf32>
    %313 = vector.extract_strided_slice %281 {offsets = [0, 18], sizes = [1, 256], strides = [1, 1]} : vector<1x290xf32> to vector<1x256xf32>
    %314 = arith.mulf %313, %1 : vector<1x256xf32>
    %c0_68 = arith.constant 0 : index
    %c41 = arith.constant 41 : index
    %315 = vector.load %arg2[%c0_68, %c41] : memref<4x144xf32, #tpu.memory_space<vmem>>, vector<4x1xf32>
    %316 = vector.broadcast %315 : vector<4x1xf32> to vector<4x256xf32>
    %317 = vector.broadcast %314 : vector<1x256xf32> to vector<4x256xf32>
    %318 = arith.mulf %316, %317 : vector<4x256xf32>
    %319 = arith.addf %312, %318 : vector<4x256xf32>
    %320 = vector.extract_strided_slice %281 {offsets = [0, 32], sizes = [1, 256], strides = [1, 1]} : vector<1x290xf32> to vector<1x256xf32>
    %321 = arith.mulf %320, %0 : vector<1x256xf32>
    %c0_69 = arith.constant 0 : index
    %c42 = arith.constant 42 : index
    %322 = vector.load %arg2[%c0_69, %c42] : memref<4x144xf32, #tpu.memory_space<vmem>>, vector<4x1xf32>
    %323 = vector.broadcast %322 : vector<4x1xf32> to vector<4x256xf32>
    %324 = vector.broadcast %321 : vector<1x256xf32> to vector<4x256xf32>
    %325 = arith.mulf %323, %324 : vector<4x256xf32>
    %326 = arith.addf %319, %325 : vector<4x256xf32>
    %327 = vector.extract_strided_slice %281 {offsets = [0, 33], sizes = [1, 256], strides = [1, 1]} : vector<1x290xf32> to vector<1x256xf32>
    %c0_70 = arith.constant 0 : index
    %c43 = arith.constant 43 : index
    %328 = vector.load %arg2[%c0_70, %c43] : memref<4x144xf32, #tpu.memory_space<vmem>>, vector<4x1xf32>
    %329 = vector.broadcast %328 : vector<4x1xf32> to vector<4x256xf32>
    %330 = vector.broadcast %327 : vector<1x256xf32> to vector<4x256xf32>
    %331 = arith.mulf %329, %330 : vector<4x256xf32>
    %332 = arith.addf %326, %331 : vector<4x256xf32>
    %333 = vector.extract_strided_slice %281 {offsets = [0, 34], sizes = [1, 256], strides = [1, 1]} : vector<1x290xf32> to vector<1x256xf32>
    %334 = arith.mulf %333, %1 : vector<1x256xf32>
    %c0_71 = arith.constant 0 : index
    %c44 = arith.constant 44 : index
    %335 = vector.load %arg2[%c0_71, %c44] : memref<4x144xf32, #tpu.memory_space<vmem>>, vector<4x1xf32>
    %336 = vector.broadcast %335 : vector<4x1xf32> to vector<4x256xf32>
    %337 = vector.broadcast %334 : vector<1x256xf32> to vector<4x256xf32>
    %338 = arith.mulf %336, %337 : vector<4x256xf32>
    %339 = arith.addf %332, %338 : vector<4x256xf32>
    %340 = vector.extract_strided_slice %279 {offsets = [1, 0], sizes = [1, 256], strides = [1, 1]} : vector<4x256xf32> to vector<1x256xf32>
    %341 = tpu.concatenate %2, %340, %2 in 1 : vector<1x17xf32>, vector<1x256xf32>, vector<1x17xf32> -> vector<1x290xf32>
    %342 = vector.extract_strided_slice %341 {offsets = [0, 0], sizes = [1, 256], strides = [1, 1]} : vector<1x290xf32> to vector<1x256xf32>
    %343 = arith.mulf %342, %0 : vector<1x256xf32>
    %c0_72 = arith.constant 0 : index
    %c45 = arith.constant 45 : index
    %344 = vector.load %arg2[%c0_72, %c45] : memref<4x144xf32, #tpu.memory_space<vmem>>, vector<4x1xf32>
    %345 = vector.broadcast %344 : vector<4x1xf32> to vector<4x256xf32>
    %346 = vector.broadcast %343 : vector<1x256xf32> to vector<4x256xf32>
    %347 = arith.mulf %345, %346 : vector<4x256xf32>
    %348 = vector.extract_strided_slice %341 {offsets = [0, 1], sizes = [1, 256], strides = [1, 1]} : vector<1x290xf32> to vector<1x256xf32>
    %c0_73 = arith.constant 0 : index
    %c46 = arith.constant 46 : index
    %349 = vector.load %arg2[%c0_73, %c46] : memref<4x144xf32, #tpu.memory_space<vmem>>, vector<4x1xf32>
    %350 = vector.broadcast %349 : vector<4x1xf32> to vector<4x256xf32>
    %351 = vector.broadcast %348 : vector<1x256xf32> to vector<4x256xf32>
    %352 = arith.mulf %350, %351 : vector<4x256xf32>
    %353 = arith.addf %347, %352 : vector<4x256xf32>
    %354 = vector.extract_strided_slice %341 {offsets = [0, 2], sizes = [1, 256], strides = [1, 1]} : vector<1x290xf32> to vector<1x256xf32>
    %355 = arith.mulf %354, %1 : vector<1x256xf32>
    %c0_74 = arith.constant 0 : index
    %c47 = arith.constant 47 : index
    %356 = vector.load %arg2[%c0_74, %c47] : memref<4x144xf32, #tpu.memory_space<vmem>>, vector<4x1xf32>
    %357 = vector.broadcast %356 : vector<4x1xf32> to vector<4x256xf32>
    %358 = vector.broadcast %355 : vector<1x256xf32> to vector<4x256xf32>
    %359 = arith.mulf %357, %358 : vector<4x256xf32>
    %360 = arith.addf %353, %359 : vector<4x256xf32>
    %361 = vector.extract_strided_slice %341 {offsets = [0, 16], sizes = [1, 256], strides = [1, 1]} : vector<1x290xf32> to vector<1x256xf32>
    %362 = arith.mulf %361, %0 : vector<1x256xf32>
    %c0_75 = arith.constant 0 : index
    %c48 = arith.constant 48 : index
    %363 = vector.load %arg2[%c0_75, %c48] : memref<4x144xf32, #tpu.memory_space<vmem>>, vector<4x1xf32>
    %364 = vector.broadcast %363 : vector<4x1xf32> to vector<4x256xf32>
    %365 = vector.broadcast %362 : vector<1x256xf32> to vector<4x256xf32>
    %366 = arith.mulf %364, %365 : vector<4x256xf32>
    %367 = arith.addf %360, %366 : vector<4x256xf32>
    %c0_76 = arith.constant 0 : index
    %c49 = arith.constant 49 : index
    %368 = vector.load %arg2[%c0_76, %c49] : memref<4x144xf32, #tpu.memory_space<vmem>>, vector<4x1xf32>
    %369 = vector.broadcast %368 : vector<4x1xf32> to vector<4x256xf32>
    %370 = vector.broadcast %340 : vector<1x256xf32> to vector<4x256xf32>
    %371 = arith.mulf %369, %370 : vector<4x256xf32>
    %372 = arith.addf %367, %371 : vector<4x256xf32>
    %373 = vector.extract_strided_slice %341 {offsets = [0, 18], sizes = [1, 256], strides = [1, 1]} : vector<1x290xf32> to vector<1x256xf32>
    %374 = arith.mulf %373, %1 : vector<1x256xf32>
    %c0_77 = arith.constant 0 : index
    %c50 = arith.constant 50 : index
    %375 = vector.load %arg2[%c0_77, %c50] : memref<4x144xf32, #tpu.memory_space<vmem>>, vector<4x1xf32>
    %376 = vector.broadcast %375 : vector<4x1xf32> to vector<4x256xf32>
    %377 = vector.broadcast %374 : vector<1x256xf32> to vector<4x256xf32>
    %378 = arith.mulf %376, %377 : vector<4x256xf32>
    %379 = arith.addf %372, %378 : vector<4x256xf32>
    %380 = vector.extract_strided_slice %341 {offsets = [0, 32], sizes = [1, 256], strides = [1, 1]} : vector<1x290xf32> to vector<1x256xf32>
    %381 = arith.mulf %380, %0 : vector<1x256xf32>
    %c0_78 = arith.constant 0 : index
    %c51 = arith.constant 51 : index
    %382 = vector.load %arg2[%c0_78, %c51] : memref<4x144xf32, #tpu.memory_space<vmem>>, vector<4x1xf32>
    %383 = vector.broadcast %382 : vector<4x1xf32> to vector<4x256xf32>
    %384 = vector.broadcast %381 : vector<1x256xf32> to vector<4x256xf32>
    %385 = arith.mulf %383, %384 : vector<4x256xf32>
    %386 = arith.addf %379, %385 : vector<4x256xf32>
    %387 = vector.extract_strided_slice %341 {offsets = [0, 33], sizes = [1, 256], strides = [1, 1]} : vector<1x290xf32> to vector<1x256xf32>
    %c0_79 = arith.constant 0 : index
    %c52 = arith.constant 52 : index
    %388 = vector.load %arg2[%c0_79, %c52] : memref<4x144xf32, #tpu.memory_space<vmem>>, vector<4x1xf32>
    %389 = vector.broadcast %388 : vector<4x1xf32> to vector<4x256xf32>
    %390 = vector.broadcast %387 : vector<1x256xf32> to vector<4x256xf32>
    %391 = arith.mulf %389, %390 : vector<4x256xf32>
    %392 = arith.addf %386, %391 : vector<4x256xf32>
    %393 = vector.extract_strided_slice %341 {offsets = [0, 34], sizes = [1, 256], strides = [1, 1]} : vector<1x290xf32> to vector<1x256xf32>
    %394 = arith.mulf %393, %1 : vector<1x256xf32>
    %c0_80 = arith.constant 0 : index
    %c53 = arith.constant 53 : index
    %395 = vector.load %arg2[%c0_80, %c53] : memref<4x144xf32, #tpu.memory_space<vmem>>, vector<4x1xf32>
    %396 = vector.broadcast %395 : vector<4x1xf32> to vector<4x256xf32>
    %397 = vector.broadcast %394 : vector<1x256xf32> to vector<4x256xf32>
    %398 = arith.mulf %396, %397 : vector<4x256xf32>
    %399 = arith.addf %392, %398 : vector<4x256xf32>
    %400 = vector.extract_strided_slice %279 {offsets = [2, 0], sizes = [1, 256], strides = [1, 1]} : vector<4x256xf32> to vector<1x256xf32>
    %401 = tpu.concatenate %2, %400, %2 in 1 : vector<1x17xf32>, vector<1x256xf32>, vector<1x17xf32> -> vector<1x290xf32>
    %402 = vector.extract_strided_slice %401 {offsets = [0, 0], sizes = [1, 256], strides = [1, 1]} : vector<1x290xf32> to vector<1x256xf32>
    %403 = arith.mulf %402, %0 : vector<1x256xf32>
    %c0_81 = arith.constant 0 : index
    %c54 = arith.constant 54 : index
    %404 = vector.load %arg2[%c0_81, %c54] : memref<4x144xf32, #tpu.memory_space<vmem>>, vector<4x1xf32>
    %405 = vector.broadcast %404 : vector<4x1xf32> to vector<4x256xf32>
    %406 = vector.broadcast %403 : vector<1x256xf32> to vector<4x256xf32>
    %407 = arith.mulf %405, %406 : vector<4x256xf32>
    %408 = vector.extract_strided_slice %401 {offsets = [0, 1], sizes = [1, 256], strides = [1, 1]} : vector<1x290xf32> to vector<1x256xf32>
    %c0_82 = arith.constant 0 : index
    %c55 = arith.constant 55 : index
    %409 = vector.load %arg2[%c0_82, %c55] : memref<4x144xf32, #tpu.memory_space<vmem>>, vector<4x1xf32>
    %410 = vector.broadcast %409 : vector<4x1xf32> to vector<4x256xf32>
    %411 = vector.broadcast %408 : vector<1x256xf32> to vector<4x256xf32>
    %412 = arith.mulf %410, %411 : vector<4x256xf32>
    %413 = arith.addf %407, %412 : vector<4x256xf32>
    %414 = vector.extract_strided_slice %401 {offsets = [0, 2], sizes = [1, 256], strides = [1, 1]} : vector<1x290xf32> to vector<1x256xf32>
    %415 = arith.mulf %414, %1 : vector<1x256xf32>
    %c0_83 = arith.constant 0 : index
    %c56 = arith.constant 56 : index
    %416 = vector.load %arg2[%c0_83, %c56] : memref<4x144xf32, #tpu.memory_space<vmem>>, vector<4x1xf32>
    %417 = vector.broadcast %416 : vector<4x1xf32> to vector<4x256xf32>
    %418 = vector.broadcast %415 : vector<1x256xf32> to vector<4x256xf32>
    %419 = arith.mulf %417, %418 : vector<4x256xf32>
    %420 = arith.addf %413, %419 : vector<4x256xf32>
    %421 = vector.extract_strided_slice %401 {offsets = [0, 16], sizes = [1, 256], strides = [1, 1]} : vector<1x290xf32> to vector<1x256xf32>
    %422 = arith.mulf %421, %0 : vector<1x256xf32>
    %c0_84 = arith.constant 0 : index
    %c57 = arith.constant 57 : index
    %423 = vector.load %arg2[%c0_84, %c57] : memref<4x144xf32, #tpu.memory_space<vmem>>, vector<4x1xf32>
    %424 = vector.broadcast %423 : vector<4x1xf32> to vector<4x256xf32>
    %425 = vector.broadcast %422 : vector<1x256xf32> to vector<4x256xf32>
    %426 = arith.mulf %424, %425 : vector<4x256xf32>
    %427 = arith.addf %420, %426 : vector<4x256xf32>
    %c0_85 = arith.constant 0 : index
    %c58 = arith.constant 58 : index
    %428 = vector.load %arg2[%c0_85, %c58] : memref<4x144xf32, #tpu.memory_space<vmem>>, vector<4x1xf32>
    %429 = vector.broadcast %428 : vector<4x1xf32> to vector<4x256xf32>
    %430 = vector.broadcast %400 : vector<1x256xf32> to vector<4x256xf32>
    %431 = arith.mulf %429, %430 : vector<4x256xf32>
    %432 = arith.addf %427, %431 : vector<4x256xf32>
    %433 = vector.extract_strided_slice %401 {offsets = [0, 18], sizes = [1, 256], strides = [1, 1]} : vector<1x290xf32> to vector<1x256xf32>
    %434 = arith.mulf %433, %1 : vector<1x256xf32>
    %c0_86 = arith.constant 0 : index
    %c59 = arith.constant 59 : index
    %435 = vector.load %arg2[%c0_86, %c59] : memref<4x144xf32, #tpu.memory_space<vmem>>, vector<4x1xf32>
    %436 = vector.broadcast %435 : vector<4x1xf32> to vector<4x256xf32>
    %437 = vector.broadcast %434 : vector<1x256xf32> to vector<4x256xf32>
    %438 = arith.mulf %436, %437 : vector<4x256xf32>
    %439 = arith.addf %432, %438 : vector<4x256xf32>
    %440 = vector.extract_strided_slice %401 {offsets = [0, 32], sizes = [1, 256], strides = [1, 1]} : vector<1x290xf32> to vector<1x256xf32>
    %441 = arith.mulf %440, %0 : vector<1x256xf32>
    %c0_87 = arith.constant 0 : index
    %c60 = arith.constant 60 : index
    %442 = vector.load %arg2[%c0_87, %c60] : memref<4x144xf32, #tpu.memory_space<vmem>>, vector<4x1xf32>
    %443 = vector.broadcast %442 : vector<4x1xf32> to vector<4x256xf32>
    %444 = vector.broadcast %441 : vector<1x256xf32> to vector<4x256xf32>
    %445 = arith.mulf %443, %444 : vector<4x256xf32>
    %446 = arith.addf %439, %445 : vector<4x256xf32>
    %447 = vector.extract_strided_slice %401 {offsets = [0, 33], sizes = [1, 256], strides = [1, 1]} : vector<1x290xf32> to vector<1x256xf32>
    %c0_88 = arith.constant 0 : index
    %c61 = arith.constant 61 : index
    %448 = vector.load %arg2[%c0_88, %c61] : memref<4x144xf32, #tpu.memory_space<vmem>>, vector<4x1xf32>
    %449 = vector.broadcast %448 : vector<4x1xf32> to vector<4x256xf32>
    %450 = vector.broadcast %447 : vector<1x256xf32> to vector<4x256xf32>
    %451 = arith.mulf %449, %450 : vector<4x256xf32>
    %452 = arith.addf %446, %451 : vector<4x256xf32>
    %453 = vector.extract_strided_slice %401 {offsets = [0, 34], sizes = [1, 256], strides = [1, 1]} : vector<1x290xf32> to vector<1x256xf32>
    %454 = arith.mulf %453, %1 : vector<1x256xf32>
    %c0_89 = arith.constant 0 : index
    %c62 = arith.constant 62 : index
    %455 = vector.load %arg2[%c0_89, %c62] : memref<4x144xf32, #tpu.memory_space<vmem>>, vector<4x1xf32>
    %456 = vector.broadcast %455 : vector<4x1xf32> to vector<4x256xf32>
    %457 = vector.broadcast %454 : vector<1x256xf32> to vector<4x256xf32>
    %458 = arith.mulf %456, %457 : vector<4x256xf32>
    %459 = arith.addf %452, %458 : vector<4x256xf32>
    %460 = vector.extract_strided_slice %279 {offsets = [3, 0], sizes = [1, 256], strides = [1, 1]} : vector<4x256xf32> to vector<1x256xf32>
    %461 = tpu.concatenate %2, %460, %2 in 1 : vector<1x17xf32>, vector<1x256xf32>, vector<1x17xf32> -> vector<1x290xf32>
    %462 = vector.extract_strided_slice %461 {offsets = [0, 0], sizes = [1, 256], strides = [1, 1]} : vector<1x290xf32> to vector<1x256xf32>
    %463 = arith.mulf %462, %0 : vector<1x256xf32>
    %c0_90 = arith.constant 0 : index
    %c63 = arith.constant 63 : index
    %464 = vector.load %arg2[%c0_90, %c63] : memref<4x144xf32, #tpu.memory_space<vmem>>, vector<4x1xf32>
    %465 = vector.broadcast %464 : vector<4x1xf32> to vector<4x256xf32>
    %466 = vector.broadcast %463 : vector<1x256xf32> to vector<4x256xf32>
    %467 = arith.mulf %465, %466 : vector<4x256xf32>
    %468 = vector.extract_strided_slice %461 {offsets = [0, 1], sizes = [1, 256], strides = [1, 1]} : vector<1x290xf32> to vector<1x256xf32>
    %c0_91 = arith.constant 0 : index
    %c64 = arith.constant 64 : index
    %469 = vector.load %arg2[%c0_91, %c64] : memref<4x144xf32, #tpu.memory_space<vmem>>, vector<4x1xf32>
    %470 = vector.broadcast %469 : vector<4x1xf32> to vector<4x256xf32>
    %471 = vector.broadcast %468 : vector<1x256xf32> to vector<4x256xf32>
    %472 = arith.mulf %470, %471 : vector<4x256xf32>
    %473 = arith.addf %467, %472 : vector<4x256xf32>
    %474 = vector.extract_strided_slice %461 {offsets = [0, 2], sizes = [1, 256], strides = [1, 1]} : vector<1x290xf32> to vector<1x256xf32>
    %475 = arith.mulf %474, %1 : vector<1x256xf32>
    %c0_92 = arith.constant 0 : index
    %c65 = arith.constant 65 : index
    %476 = vector.load %arg2[%c0_92, %c65] : memref<4x144xf32, #tpu.memory_space<vmem>>, vector<4x1xf32>
    %477 = vector.broadcast %476 : vector<4x1xf32> to vector<4x256xf32>
    %478 = vector.broadcast %475 : vector<1x256xf32> to vector<4x256xf32>
    %479 = arith.mulf %477, %478 : vector<4x256xf32>
    %480 = arith.addf %473, %479 : vector<4x256xf32>
    %481 = vector.extract_strided_slice %461 {offsets = [0, 16], sizes = [1, 256], strides = [1, 1]} : vector<1x290xf32> to vector<1x256xf32>
    %482 = arith.mulf %481, %0 : vector<1x256xf32>
    %c0_93 = arith.constant 0 : index
    %c66 = arith.constant 66 : index
    %483 = vector.load %arg2[%c0_93, %c66] : memref<4x144xf32, #tpu.memory_space<vmem>>, vector<4x1xf32>
    %484 = vector.broadcast %483 : vector<4x1xf32> to vector<4x256xf32>
    %485 = vector.broadcast %482 : vector<1x256xf32> to vector<4x256xf32>
    %486 = arith.mulf %484, %485 : vector<4x256xf32>
    %487 = arith.addf %480, %486 : vector<4x256xf32>
    %c0_94 = arith.constant 0 : index
    %c67 = arith.constant 67 : index
    %488 = vector.load %arg2[%c0_94, %c67] : memref<4x144xf32, #tpu.memory_space<vmem>>, vector<4x1xf32>
    %489 = vector.broadcast %488 : vector<4x1xf32> to vector<4x256xf32>
    %490 = vector.broadcast %460 : vector<1x256xf32> to vector<4x256xf32>
    %491 = arith.mulf %489, %490 : vector<4x256xf32>
    %492 = arith.addf %487, %491 : vector<4x256xf32>
    %493 = vector.extract_strided_slice %461 {offsets = [0, 18], sizes = [1, 256], strides = [1, 1]} : vector<1x290xf32> to vector<1x256xf32>
    %494 = arith.mulf %493, %1 : vector<1x256xf32>
    %c0_95 = arith.constant 0 : index
    %c68 = arith.constant 68 : index
    %495 = vector.load %arg2[%c0_95, %c68] : memref<4x144xf32, #tpu.memory_space<vmem>>, vector<4x1xf32>
    %496 = vector.broadcast %495 : vector<4x1xf32> to vector<4x256xf32>
    %497 = vector.broadcast %494 : vector<1x256xf32> to vector<4x256xf32>
    %498 = arith.mulf %496, %497 : vector<4x256xf32>
    %499 = arith.addf %492, %498 : vector<4x256xf32>
    %500 = vector.extract_strided_slice %461 {offsets = [0, 32], sizes = [1, 256], strides = [1, 1]} : vector<1x290xf32> to vector<1x256xf32>
    %501 = arith.mulf %500, %0 : vector<1x256xf32>
    %c0_96 = arith.constant 0 : index
    %c69 = arith.constant 69 : index
    %502 = vector.load %arg2[%c0_96, %c69] : memref<4x144xf32, #tpu.memory_space<vmem>>, vector<4x1xf32>
    %503 = vector.broadcast %502 : vector<4x1xf32> to vector<4x256xf32>
    %504 = vector.broadcast %501 : vector<1x256xf32> to vector<4x256xf32>
    %505 = arith.mulf %503, %504 : vector<4x256xf32>
    %506 = arith.addf %499, %505 : vector<4x256xf32>
    %507 = vector.extract_strided_slice %461 {offsets = [0, 33], sizes = [1, 256], strides = [1, 1]} : vector<1x290xf32> to vector<1x256xf32>
    %c0_97 = arith.constant 0 : index
    %c70 = arith.constant 70 : index
    %508 = vector.load %arg2[%c0_97, %c70] : memref<4x144xf32, #tpu.memory_space<vmem>>, vector<4x1xf32>
    %509 = vector.broadcast %508 : vector<4x1xf32> to vector<4x256xf32>
    %510 = vector.broadcast %507 : vector<1x256xf32> to vector<4x256xf32>
    %511 = arith.mulf %509, %510 : vector<4x256xf32>
    %512 = arith.addf %506, %511 : vector<4x256xf32>
    %513 = vector.extract_strided_slice %461 {offsets = [0, 34], sizes = [1, 256], strides = [1, 1]} : vector<1x290xf32> to vector<1x256xf32>
    %514 = arith.mulf %513, %1 : vector<1x256xf32>
    %c0_98 = arith.constant 0 : index
    %c71 = arith.constant 71 : index
    %515 = vector.load %arg2[%c0_98, %c71] : memref<4x144xf32, #tpu.memory_space<vmem>>, vector<4x1xf32>
    %516 = vector.broadcast %515 : vector<4x1xf32> to vector<4x256xf32>
    %517 = vector.broadcast %514 : vector<1x256xf32> to vector<4x256xf32>
    %518 = arith.mulf %516, %517 : vector<4x256xf32>
    %519 = arith.addf %512, %518 : vector<4x256xf32>
    %520 = arith.addf %339, %399 : vector<4x256xf32>
    %521 = arith.addf %520, %459 : vector<4x256xf32>
    %522 = arith.addf %521, %519 : vector<4x256xf32>
    %c1_99 = arith.constant 1 : index
    %c0_100 = arith.constant 0 : index
    %c0_101 = arith.constant 0 : index
    %523 = vector.load %arg3[%c1_99, %c0_100, %c0_101] : memref<4x4x1xf32, #tpu.memory_space<vmem>>, vector<1x4x1xf32>
    %524 = vector.shape_cast %523 : vector<1x4x1xf32> to vector<4x1xf32>
    %525 = vector.broadcast %524 : vector<4x1xf32> to vector<4x256xf32>
    %526 = arith.addf %522, %525 : vector<4x256xf32>
    %c0_102 = arith.constant 0 : index
    %c0_103 = arith.constant 0 : index
    %527 = vector.load %arg8[%c0_102, %c0_103] : memref<4x1xf32, #tpu.memory_space<vmem>>, vector<4x1xf32>
    %c0_104 = arith.constant 0 : index
    %c0_105 = arith.constant 0 : index
    %c0_106 = arith.constant 0 : index
    %528 = vector.load %arg5[%c0_104, %c0_105, %c0_106] : memref<1x4x256xf32, #tpu.memory_space<vmem>>, vector<1x4x256xf32>
    %529 = vector.shape_cast %528 : vector<1x4x256xf32> to vector<4x256xf32>
    %530 = arith.mulf %526, %529 : vector<4x256xf32>
    %cst_107 = arith.constant dense<0.000000e+00> : vector<4xf32>
    %531 = vector.multi_reduction <add>, %530, %cst_107 [1] : vector<4x256xf32> to vector<4xf32>
    %532 = vector.shape_cast %531 : vector<4xf32> to vector<4x1xf32>
    %cst_108 = arith.constant dense<0.000000e+00> : vector<1xf32>
    %533 = vector.multi_reduction <add>, %532, %cst_108 [0] : vector<4x1xf32> to vector<1xf32>
    %534 = vector.shape_cast %533 : vector<1xf32> to vector<1x1xf32>
    %c0_109 = arith.constant 0 : index
    %535 = memref.load %arg6[%c0_109] : memref<1xf32, #tpu.memory_space<smem>>
    %536 = vector.broadcast %535 : f32 to vector<1x1xf32>
    %537 = arith.addf %534, %536 : vector<1x1xf32>
    %cst_110 = arith.constant 0.000000e+00 : f32
    %538 = vector.broadcast %cst_110 : f32 to vector<1x1xf32>
    %539 = arith.maximumf %537, %538 : vector<1x1xf32>
    %c0_111 = arith.constant 0 : index
    %c0_112 = arith.constant 0 : index
    %540 = vector.load %arg7[%c0_111, %c0_112] : memref<4x1xf32, #tpu.memory_space<vmem>>, vector<4x1xf32>
    %541 = vector.broadcast %539 : vector<1x1xf32> to vector<4x1xf32>
    %542 = arith.mulf %540, %541 : vector<4x1xf32>
    %543 = arith.addf %527, %542 : vector<4x1xf32>
    %cst_113 = arith.constant 0.000000e+00 : f32
    %544 = vector.broadcast %cst_113 : f32 to vector<4x1xf32>
    %545 = arith.subf %544, %543 : vector<4x1xf32>
    %546 = math.exp %545 : vector<4x1xf32>
    %cst_114 = arith.constant 1.000000e+00 : f32
    %547 = vector.broadcast %cst_114 : f32 to vector<4x1xf32>
    %548 = arith.addf %547, %546 : vector<4x1xf32>
    %cst_115 = arith.constant 1.000000e+00 : f32
    %549 = vector.broadcast %cst_115 : f32 to vector<4x1xf32>
    %550 = arith.divf %549, %548 : vector<4x1xf32>
    %551 = math.exp %550 : vector<4x1xf32>
    %c0_116 = arith.constant 0 : index
    %c8_117 = arith.constant 8 : index
    %c0_118 = arith.constant 0 : index
    %552 = vector.load %arg1[%c0_116, %c8_117, %c0_118] : memref<1x16x256xf32, #tpu.memory_space<vmem>>, vector<1x4x256xf32>
    %553 = vector.shape_cast %552 : vector<1x4x256xf32> to vector<4x256xf32>
    %554 = arith.addf %553, %526 : vector<4x256xf32>
    %555 = vector.extract_strided_slice %554 {offsets = [0, 0], sizes = [1, 256], strides = [1, 1]} : vector<4x256xf32> to vector<1x256xf32>
    %556 = tpu.concatenate %2, %555, %2 in 1 : vector<1x17xf32>, vector<1x256xf32>, vector<1x17xf32> -> vector<1x290xf32>
    %557 = vector.extract_strided_slice %556 {offsets = [0, 0], sizes = [1, 256], strides = [1, 1]} : vector<1x290xf32> to vector<1x256xf32>
    %558 = arith.mulf %557, %0 : vector<1x256xf32>
    %c0_119 = arith.constant 0 : index
    %c72 = arith.constant 72 : index
    %559 = vector.load %arg2[%c0_119, %c72] : memref<4x144xf32, #tpu.memory_space<vmem>>, vector<4x1xf32>
    %560 = vector.broadcast %559 : vector<4x1xf32> to vector<4x256xf32>
    %561 = vector.broadcast %558 : vector<1x256xf32> to vector<4x256xf32>
    %562 = arith.mulf %560, %561 : vector<4x256xf32>
    %563 = vector.extract_strided_slice %556 {offsets = [0, 1], sizes = [1, 256], strides = [1, 1]} : vector<1x290xf32> to vector<1x256xf32>
    %c0_120 = arith.constant 0 : index
    %c73 = arith.constant 73 : index
    %564 = vector.load %arg2[%c0_120, %c73] : memref<4x144xf32, #tpu.memory_space<vmem>>, vector<4x1xf32>
    %565 = vector.broadcast %564 : vector<4x1xf32> to vector<4x256xf32>
    %566 = vector.broadcast %563 : vector<1x256xf32> to vector<4x256xf32>
    %567 = arith.mulf %565, %566 : vector<4x256xf32>
    %568 = arith.addf %562, %567 : vector<4x256xf32>
    %569 = vector.extract_strided_slice %556 {offsets = [0, 2], sizes = [1, 256], strides = [1, 1]} : vector<1x290xf32> to vector<1x256xf32>
    %570 = arith.mulf %569, %1 : vector<1x256xf32>
    %c0_121 = arith.constant 0 : index
    %c74 = arith.constant 74 : index
    %571 = vector.load %arg2[%c0_121, %c74] : memref<4x144xf32, #tpu.memory_space<vmem>>, vector<4x1xf32>
    %572 = vector.broadcast %571 : vector<4x1xf32> to vector<4x256xf32>
    %573 = vector.broadcast %570 : vector<1x256xf32> to vector<4x256xf32>
    %574 = arith.mulf %572, %573 : vector<4x256xf32>
    %575 = arith.addf %568, %574 : vector<4x256xf32>
    %576 = vector.extract_strided_slice %556 {offsets = [0, 16], sizes = [1, 256], strides = [1, 1]} : vector<1x290xf32> to vector<1x256xf32>
    %577 = arith.mulf %576, %0 : vector<1x256xf32>
    %c0_122 = arith.constant 0 : index
    %c75 = arith.constant 75 : index
    %578 = vector.load %arg2[%c0_122, %c75] : memref<4x144xf32, #tpu.memory_space<vmem>>, vector<4x1xf32>
    %579 = vector.broadcast %578 : vector<4x1xf32> to vector<4x256xf32>
    %580 = vector.broadcast %577 : vector<1x256xf32> to vector<4x256xf32>
    %581 = arith.mulf %579, %580 : vector<4x256xf32>
    %582 = arith.addf %575, %581 : vector<4x256xf32>
    %c0_123 = arith.constant 0 : index
    %c76 = arith.constant 76 : index
    %583 = vector.load %arg2[%c0_123, %c76] : memref<4x144xf32, #tpu.memory_space<vmem>>, vector<4x1xf32>
    %584 = vector.broadcast %583 : vector<4x1xf32> to vector<4x256xf32>
    %585 = vector.broadcast %555 : vector<1x256xf32> to vector<4x256xf32>
    %586 = arith.mulf %584, %585 : vector<4x256xf32>
    %587 = arith.addf %582, %586 : vector<4x256xf32>
    %588 = vector.extract_strided_slice %556 {offsets = [0, 18], sizes = [1, 256], strides = [1, 1]} : vector<1x290xf32> to vector<1x256xf32>
    %589 = arith.mulf %588, %1 : vector<1x256xf32>
    %c0_124 = arith.constant 0 : index
    %c77 = arith.constant 77 : index
    %590 = vector.load %arg2[%c0_124, %c77] : memref<4x144xf32, #tpu.memory_space<vmem>>, vector<4x1xf32>
    %591 = vector.broadcast %590 : vector<4x1xf32> to vector<4x256xf32>
    %592 = vector.broadcast %589 : vector<1x256xf32> to vector<4x256xf32>
    %593 = arith.mulf %591, %592 : vector<4x256xf32>
    %594 = arith.addf %587, %593 : vector<4x256xf32>
    %595 = vector.extract_strided_slice %556 {offsets = [0, 32], sizes = [1, 256], strides = [1, 1]} : vector<1x290xf32> to vector<1x256xf32>
    %596 = arith.mulf %595, %0 : vector<1x256xf32>
    %c0_125 = arith.constant 0 : index
    %c78 = arith.constant 78 : index
    %597 = vector.load %arg2[%c0_125, %c78] : memref<4x144xf32, #tpu.memory_space<vmem>>, vector<4x1xf32>
    %598 = vector.broadcast %597 : vector<4x1xf32> to vector<4x256xf32>
    %599 = vector.broadcast %596 : vector<1x256xf32> to vector<4x256xf32>
    %600 = arith.mulf %598, %599 : vector<4x256xf32>
    %601 = arith.addf %594, %600 : vector<4x256xf32>
    %602 = vector.extract_strided_slice %556 {offsets = [0, 33], sizes = [1, 256], strides = [1, 1]} : vector<1x290xf32> to vector<1x256xf32>
    %c0_126 = arith.constant 0 : index
    %c79 = arith.constant 79 : index
    %603 = vector.load %arg2[%c0_126, %c79] : memref<4x144xf32, #tpu.memory_space<vmem>>, vector<4x1xf32>
    %604 = vector.broadcast %603 : vector<4x1xf32> to vector<4x256xf32>
    %605 = vector.broadcast %602 : vector<1x256xf32> to vector<4x256xf32>
    %606 = arith.mulf %604, %605 : vector<4x256xf32>
    %607 = arith.addf %601, %606 : vector<4x256xf32>
    %608 = vector.extract_strided_slice %556 {offsets = [0, 34], sizes = [1, 256], strides = [1, 1]} : vector<1x290xf32> to vector<1x256xf32>
    %609 = arith.mulf %608, %1 : vector<1x256xf32>
    %c0_127 = arith.constant 0 : index
    %c80 = arith.constant 80 : index
    %610 = vector.load %arg2[%c0_127, %c80] : memref<4x144xf32, #tpu.memory_space<vmem>>, vector<4x1xf32>
    %611 = vector.broadcast %610 : vector<4x1xf32> to vector<4x256xf32>
    %612 = vector.broadcast %609 : vector<1x256xf32> to vector<4x256xf32>
    %613 = arith.mulf %611, %612 : vector<4x256xf32>
    %614 = arith.addf %607, %613 : vector<4x256xf32>
    %615 = vector.extract_strided_slice %554 {offsets = [1, 0], sizes = [1, 256], strides = [1, 1]} : vector<4x256xf32> to vector<1x256xf32>
    %616 = tpu.concatenate %2, %615, %2 in 1 : vector<1x17xf32>, vector<1x256xf32>, vector<1x17xf32> -> vector<1x290xf32>
    %617 = vector.extract_strided_slice %616 {offsets = [0, 0], sizes = [1, 256], strides = [1, 1]} : vector<1x290xf32> to vector<1x256xf32>
    %618 = arith.mulf %617, %0 : vector<1x256xf32>
    %c0_128 = arith.constant 0 : index
    %c81 = arith.constant 81 : index
    %619 = vector.load %arg2[%c0_128, %c81] : memref<4x144xf32, #tpu.memory_space<vmem>>, vector<4x1xf32>
    %620 = vector.broadcast %619 : vector<4x1xf32> to vector<4x256xf32>
    %621 = vector.broadcast %618 : vector<1x256xf32> to vector<4x256xf32>
    %622 = arith.mulf %620, %621 : vector<4x256xf32>
    %623 = vector.extract_strided_slice %616 {offsets = [0, 1], sizes = [1, 256], strides = [1, 1]} : vector<1x290xf32> to vector<1x256xf32>
    %c0_129 = arith.constant 0 : index
    %c82 = arith.constant 82 : index
    %624 = vector.load %arg2[%c0_129, %c82] : memref<4x144xf32, #tpu.memory_space<vmem>>, vector<4x1xf32>
    %625 = vector.broadcast %624 : vector<4x1xf32> to vector<4x256xf32>
    %626 = vector.broadcast %623 : vector<1x256xf32> to vector<4x256xf32>
    %627 = arith.mulf %625, %626 : vector<4x256xf32>
    %628 = arith.addf %622, %627 : vector<4x256xf32>
    %629 = vector.extract_strided_slice %616 {offsets = [0, 2], sizes = [1, 256], strides = [1, 1]} : vector<1x290xf32> to vector<1x256xf32>
    %630 = arith.mulf %629, %1 : vector<1x256xf32>
    %c0_130 = arith.constant 0 : index
    %c83 = arith.constant 83 : index
    %631 = vector.load %arg2[%c0_130, %c83] : memref<4x144xf32, #tpu.memory_space<vmem>>, vector<4x1xf32>
    %632 = vector.broadcast %631 : vector<4x1xf32> to vector<4x256xf32>
    %633 = vector.broadcast %630 : vector<1x256xf32> to vector<4x256xf32>
    %634 = arith.mulf %632, %633 : vector<4x256xf32>
    %635 = arith.addf %628, %634 : vector<4x256xf32>
    %636 = vector.extract_strided_slice %616 {offsets = [0, 16], sizes = [1, 256], strides = [1, 1]} : vector<1x290xf32> to vector<1x256xf32>
    %637 = arith.mulf %636, %0 : vector<1x256xf32>
    %c0_131 = arith.constant 0 : index
    %c84 = arith.constant 84 : index
    %638 = vector.load %arg2[%c0_131, %c84] : memref<4x144xf32, #tpu.memory_space<vmem>>, vector<4x1xf32>
    %639 = vector.broadcast %638 : vector<4x1xf32> to vector<4x256xf32>
    %640 = vector.broadcast %637 : vector<1x256xf32> to vector<4x256xf32>
    %641 = arith.mulf %639, %640 : vector<4x256xf32>
    %642 = arith.addf %635, %641 : vector<4x256xf32>
    %c0_132 = arith.constant 0 : index
    %c85 = arith.constant 85 : index
    %643 = vector.load %arg2[%c0_132, %c85] : memref<4x144xf32, #tpu.memory_space<vmem>>, vector<4x1xf32>
    %644 = vector.broadcast %643 : vector<4x1xf32> to vector<4x256xf32>
    %645 = vector.broadcast %615 : vector<1x256xf32> to vector<4x256xf32>
    %646 = arith.mulf %644, %645 : vector<4x256xf32>
    %647 = arith.addf %642, %646 : vector<4x256xf32>
    %648 = vector.extract_strided_slice %616 {offsets = [0, 18], sizes = [1, 256], strides = [1, 1]} : vector<1x290xf32> to vector<1x256xf32>
    %649 = arith.mulf %648, %1 : vector<1x256xf32>
    %c0_133 = arith.constant 0 : index
    %c86 = arith.constant 86 : index
    %650 = vector.load %arg2[%c0_133, %c86] : memref<4x144xf32, #tpu.memory_space<vmem>>, vector<4x1xf32>
    %651 = vector.broadcast %650 : vector<4x1xf32> to vector<4x256xf32>
    %652 = vector.broadcast %649 : vector<1x256xf32> to vector<4x256xf32>
    %653 = arith.mulf %651, %652 : vector<4x256xf32>
    %654 = arith.addf %647, %653 : vector<4x256xf32>
    %655 = vector.extract_strided_slice %616 {offsets = [0, 32], sizes = [1, 256], strides = [1, 1]} : vector<1x290xf32> to vector<1x256xf32>
    %656 = arith.mulf %655, %0 : vector<1x256xf32>
    %c0_134 = arith.constant 0 : index
    %c87 = arith.constant 87 : index
    %657 = vector.load %arg2[%c0_134, %c87] : memref<4x144xf32, #tpu.memory_space<vmem>>, vector<4x1xf32>
    %658 = vector.broadcast %657 : vector<4x1xf32> to vector<4x256xf32>
    %659 = vector.broadcast %656 : vector<1x256xf32> to vector<4x256xf32>
    %660 = arith.mulf %658, %659 : vector<4x256xf32>
    %661 = arith.addf %654, %660 : vector<4x256xf32>
    %662 = vector.extract_strided_slice %616 {offsets = [0, 33], sizes = [1, 256], strides = [1, 1]} : vector<1x290xf32> to vector<1x256xf32>
    %c0_135 = arith.constant 0 : index
    %c88 = arith.constant 88 : index
    %663 = vector.load %arg2[%c0_135, %c88] : memref<4x144xf32, #tpu.memory_space<vmem>>, vector<4x1xf32>
    %664 = vector.broadcast %663 : vector<4x1xf32> to vector<4x256xf32>
    %665 = vector.broadcast %662 : vector<1x256xf32> to vector<4x256xf32>
    %666 = arith.mulf %664, %665 : vector<4x256xf32>
    %667 = arith.addf %661, %666 : vector<4x256xf32>
    %668 = vector.extract_strided_slice %616 {offsets = [0, 34], sizes = [1, 256], strides = [1, 1]} : vector<1x290xf32> to vector<1x256xf32>
    %669 = arith.mulf %668, %1 : vector<1x256xf32>
    %c0_136 = arith.constant 0 : index
    %c89 = arith.constant 89 : index
    %670 = vector.load %arg2[%c0_136, %c89] : memref<4x144xf32, #tpu.memory_space<vmem>>, vector<4x1xf32>
    %671 = vector.broadcast %670 : vector<4x1xf32> to vector<4x256xf32>
    %672 = vector.broadcast %669 : vector<1x256xf32> to vector<4x256xf32>
    %673 = arith.mulf %671, %672 : vector<4x256xf32>
    %674 = arith.addf %667, %673 : vector<4x256xf32>
    %675 = vector.extract_strided_slice %554 {offsets = [2, 0], sizes = [1, 256], strides = [1, 1]} : vector<4x256xf32> to vector<1x256xf32>
    %676 = tpu.concatenate %2, %675, %2 in 1 : vector<1x17xf32>, vector<1x256xf32>, vector<1x17xf32> -> vector<1x290xf32>
    %677 = vector.extract_strided_slice %676 {offsets = [0, 0], sizes = [1, 256], strides = [1, 1]} : vector<1x290xf32> to vector<1x256xf32>
    %678 = arith.mulf %677, %0 : vector<1x256xf32>
    %c0_137 = arith.constant 0 : index
    %c90 = arith.constant 90 : index
    %679 = vector.load %arg2[%c0_137, %c90] : memref<4x144xf32, #tpu.memory_space<vmem>>, vector<4x1xf32>
    %680 = vector.broadcast %679 : vector<4x1xf32> to vector<4x256xf32>
    %681 = vector.broadcast %678 : vector<1x256xf32> to vector<4x256xf32>
    %682 = arith.mulf %680, %681 : vector<4x256xf32>
    %683 = vector.extract_strided_slice %676 {offsets = [0, 1], sizes = [1, 256], strides = [1, 1]} : vector<1x290xf32> to vector<1x256xf32>
    %c0_138 = arith.constant 0 : index
    %c91 = arith.constant 91 : index
    %684 = vector.load %arg2[%c0_138, %c91] : memref<4x144xf32, #tpu.memory_space<vmem>>, vector<4x1xf32>
    %685 = vector.broadcast %684 : vector<4x1xf32> to vector<4x256xf32>
    %686 = vector.broadcast %683 : vector<1x256xf32> to vector<4x256xf32>
    %687 = arith.mulf %685, %686 : vector<4x256xf32>
    %688 = arith.addf %682, %687 : vector<4x256xf32>
    %689 = vector.extract_strided_slice %676 {offsets = [0, 2], sizes = [1, 256], strides = [1, 1]} : vector<1x290xf32> to vector<1x256xf32>
    %690 = arith.mulf %689, %1 : vector<1x256xf32>
    %c0_139 = arith.constant 0 : index
    %c92 = arith.constant 92 : index
    %691 = vector.load %arg2[%c0_139, %c92] : memref<4x144xf32, #tpu.memory_space<vmem>>, vector<4x1xf32>
    %692 = vector.broadcast %691 : vector<4x1xf32> to vector<4x256xf32>
    %693 = vector.broadcast %690 : vector<1x256xf32> to vector<4x256xf32>
    %694 = arith.mulf %692, %693 : vector<4x256xf32>
    %695 = arith.addf %688, %694 : vector<4x256xf32>
    %696 = vector.extract_strided_slice %676 {offsets = [0, 16], sizes = [1, 256], strides = [1, 1]} : vector<1x290xf32> to vector<1x256xf32>
    %697 = arith.mulf %696, %0 : vector<1x256xf32>
    %c0_140 = arith.constant 0 : index
    %c93 = arith.constant 93 : index
    %698 = vector.load %arg2[%c0_140, %c93] : memref<4x144xf32, #tpu.memory_space<vmem>>, vector<4x1xf32>
    %699 = vector.broadcast %698 : vector<4x1xf32> to vector<4x256xf32>
    %700 = vector.broadcast %697 : vector<1x256xf32> to vector<4x256xf32>
    %701 = arith.mulf %699, %700 : vector<4x256xf32>
    %702 = arith.addf %695, %701 : vector<4x256xf32>
    %c0_141 = arith.constant 0 : index
    %c94 = arith.constant 94 : index
    %703 = vector.load %arg2[%c0_141, %c94] : memref<4x144xf32, #tpu.memory_space<vmem>>, vector<4x1xf32>
    %704 = vector.broadcast %703 : vector<4x1xf32> to vector<4x256xf32>
    %705 = vector.broadcast %675 : vector<1x256xf32> to vector<4x256xf32>
    %706 = arith.mulf %704, %705 : vector<4x256xf32>
    %707 = arith.addf %702, %706 : vector<4x256xf32>
    %708 = vector.extract_strided_slice %676 {offsets = [0, 18], sizes = [1, 256], strides = [1, 1]} : vector<1x290xf32> to vector<1x256xf32>
    %709 = arith.mulf %708, %1 : vector<1x256xf32>
    %c0_142 = arith.constant 0 : index
    %c95 = arith.constant 95 : index
    %710 = vector.load %arg2[%c0_142, %c95] : memref<4x144xf32, #tpu.memory_space<vmem>>, vector<4x1xf32>
    %711 = vector.broadcast %710 : vector<4x1xf32> to vector<4x256xf32>
    %712 = vector.broadcast %709 : vector<1x256xf32> to vector<4x256xf32>
    %713 = arith.mulf %711, %712 : vector<4x256xf32>
    %714 = arith.addf %707, %713 : vector<4x256xf32>
    %715 = vector.extract_strided_slice %676 {offsets = [0, 32], sizes = [1, 256], strides = [1, 1]} : vector<1x290xf32> to vector<1x256xf32>
    %716 = arith.mulf %715, %0 : vector<1x256xf32>
    %c0_143 = arith.constant 0 : index
    %c96 = arith.constant 96 : index
    %717 = vector.load %arg2[%c0_143, %c96] : memref<4x144xf32, #tpu.memory_space<vmem>>, vector<4x1xf32>
    %718 = vector.broadcast %717 : vector<4x1xf32> to vector<4x256xf32>
    %719 = vector.broadcast %716 : vector<1x256xf32> to vector<4x256xf32>
    %720 = arith.mulf %718, %719 : vector<4x256xf32>
    %721 = arith.addf %714, %720 : vector<4x256xf32>
    %722 = vector.extract_strided_slice %676 {offsets = [0, 33], sizes = [1, 256], strides = [1, 1]} : vector<1x290xf32> to vector<1x256xf32>
    %c0_144 = arith.constant 0 : index
    %c97 = arith.constant 97 : index
    %723 = vector.load %arg2[%c0_144, %c97] : memref<4x144xf32, #tpu.memory_space<vmem>>, vector<4x1xf32>
    %724 = vector.broadcast %723 : vector<4x1xf32> to vector<4x256xf32>
    %725 = vector.broadcast %722 : vector<1x256xf32> to vector<4x256xf32>
    %726 = arith.mulf %724, %725 : vector<4x256xf32>
    %727 = arith.addf %721, %726 : vector<4x256xf32>
    %728 = vector.extract_strided_slice %676 {offsets = [0, 34], sizes = [1, 256], strides = [1, 1]} : vector<1x290xf32> to vector<1x256xf32>
    %729 = arith.mulf %728, %1 : vector<1x256xf32>
    %c0_145 = arith.constant 0 : index
    %c98 = arith.constant 98 : index
    %730 = vector.load %arg2[%c0_145, %c98] : memref<4x144xf32, #tpu.memory_space<vmem>>, vector<4x1xf32>
    %731 = vector.broadcast %730 : vector<4x1xf32> to vector<4x256xf32>
    %732 = vector.broadcast %729 : vector<1x256xf32> to vector<4x256xf32>
    %733 = arith.mulf %731, %732 : vector<4x256xf32>
    %734 = arith.addf %727, %733 : vector<4x256xf32>
    %735 = vector.extract_strided_slice %554 {offsets = [3, 0], sizes = [1, 256], strides = [1, 1]} : vector<4x256xf32> to vector<1x256xf32>
    %736 = tpu.concatenate %2, %735, %2 in 1 : vector<1x17xf32>, vector<1x256xf32>, vector<1x17xf32> -> vector<1x290xf32>
    %737 = vector.extract_strided_slice %736 {offsets = [0, 0], sizes = [1, 256], strides = [1, 1]} : vector<1x290xf32> to vector<1x256xf32>
    %738 = arith.mulf %737, %0 : vector<1x256xf32>
    %c0_146 = arith.constant 0 : index
    %c99 = arith.constant 99 : index
    %739 = vector.load %arg2[%c0_146, %c99] : memref<4x144xf32, #tpu.memory_space<vmem>>, vector<4x1xf32>
    %740 = vector.broadcast %739 : vector<4x1xf32> to vector<4x256xf32>
    %741 = vector.broadcast %738 : vector<1x256xf32> to vector<4x256xf32>
    %742 = arith.mulf %740, %741 : vector<4x256xf32>
    %743 = vector.extract_strided_slice %736 {offsets = [0, 1], sizes = [1, 256], strides = [1, 1]} : vector<1x290xf32> to vector<1x256xf32>
    %c0_147 = arith.constant 0 : index
    %c100 = arith.constant 100 : index
    %744 = vector.load %arg2[%c0_147, %c100] : memref<4x144xf32, #tpu.memory_space<vmem>>, vector<4x1xf32>
    %745 = vector.broadcast %744 : vector<4x1xf32> to vector<4x256xf32>
    %746 = vector.broadcast %743 : vector<1x256xf32> to vector<4x256xf32>
    %747 = arith.mulf %745, %746 : vector<4x256xf32>
    %748 = arith.addf %742, %747 : vector<4x256xf32>
    %749 = vector.extract_strided_slice %736 {offsets = [0, 2], sizes = [1, 256], strides = [1, 1]} : vector<1x290xf32> to vector<1x256xf32>
    %750 = arith.mulf %749, %1 : vector<1x256xf32>
    %c0_148 = arith.constant 0 : index
    %c101 = arith.constant 101 : index
    %751 = vector.load %arg2[%c0_148, %c101] : memref<4x144xf32, #tpu.memory_space<vmem>>, vector<4x1xf32>
    %752 = vector.broadcast %751 : vector<4x1xf32> to vector<4x256xf32>
    %753 = vector.broadcast %750 : vector<1x256xf32> to vector<4x256xf32>
    %754 = arith.mulf %752, %753 : vector<4x256xf32>
    %755 = arith.addf %748, %754 : vector<4x256xf32>
    %756 = vector.extract_strided_slice %736 {offsets = [0, 16], sizes = [1, 256], strides = [1, 1]} : vector<1x290xf32> to vector<1x256xf32>
    %757 = arith.mulf %756, %0 : vector<1x256xf32>
    %c0_149 = arith.constant 0 : index
    %c102 = arith.constant 102 : index
    %758 = vector.load %arg2[%c0_149, %c102] : memref<4x144xf32, #tpu.memory_space<vmem>>, vector<4x1xf32>
    %759 = vector.broadcast %758 : vector<4x1xf32> to vector<4x256xf32>
    %760 = vector.broadcast %757 : vector<1x256xf32> to vector<4x256xf32>
    %761 = arith.mulf %759, %760 : vector<4x256xf32>
    %762 = arith.addf %755, %761 : vector<4x256xf32>
    %c0_150 = arith.constant 0 : index
    %c103 = arith.constant 103 : index
    %763 = vector.load %arg2[%c0_150, %c103] : memref<4x144xf32, #tpu.memory_space<vmem>>, vector<4x1xf32>
    %764 = vector.broadcast %763 : vector<4x1xf32> to vector<4x256xf32>
    %765 = vector.broadcast %735 : vector<1x256xf32> to vector<4x256xf32>
    %766 = arith.mulf %764, %765 : vector<4x256xf32>
    %767 = arith.addf %762, %766 : vector<4x256xf32>
    %768 = vector.extract_strided_slice %736 {offsets = [0, 18], sizes = [1, 256], strides = [1, 1]} : vector<1x290xf32> to vector<1x256xf32>
    %769 = arith.mulf %768, %1 : vector<1x256xf32>
    %c0_151 = arith.constant 0 : index
    %c104 = arith.constant 104 : index
    %770 = vector.load %arg2[%c0_151, %c104] : memref<4x144xf32, #tpu.memory_space<vmem>>, vector<4x1xf32>
    %771 = vector.broadcast %770 : vector<4x1xf32> to vector<4x256xf32>
    %772 = vector.broadcast %769 : vector<1x256xf32> to vector<4x256xf32>
    %773 = arith.mulf %771, %772 : vector<4x256xf32>
    %774 = arith.addf %767, %773 : vector<4x256xf32>
    %775 = vector.extract_strided_slice %736 {offsets = [0, 32], sizes = [1, 256], strides = [1, 1]} : vector<1x290xf32> to vector<1x256xf32>
    %776 = arith.mulf %775, %0 : vector<1x256xf32>
    %c0_152 = arith.constant 0 : index
    %c105 = arith.constant 105 : index
    %777 = vector.load %arg2[%c0_152, %c105] : memref<4x144xf32, #tpu.memory_space<vmem>>, vector<4x1xf32>
    %778 = vector.broadcast %777 : vector<4x1xf32> to vector<4x256xf32>
    %779 = vector.broadcast %776 : vector<1x256xf32> to vector<4x256xf32>
    %780 = arith.mulf %778, %779 : vector<4x256xf32>
    %781 = arith.addf %774, %780 : vector<4x256xf32>
    %782 = vector.extract_strided_slice %736 {offsets = [0, 33], sizes = [1, 256], strides = [1, 1]} : vector<1x290xf32> to vector<1x256xf32>
    %c0_153 = arith.constant 0 : index
    %c106 = arith.constant 106 : index
    %783 = vector.load %arg2[%c0_153, %c106] : memref<4x144xf32, #tpu.memory_space<vmem>>, vector<4x1xf32>
    %784 = vector.broadcast %783 : vector<4x1xf32> to vector<4x256xf32>
    %785 = vector.broadcast %782 : vector<1x256xf32> to vector<4x256xf32>
    %786 = arith.mulf %784, %785 : vector<4x256xf32>
    %787 = arith.addf %781, %786 : vector<4x256xf32>
    %788 = vector.extract_strided_slice %736 {offsets = [0, 34], sizes = [1, 256], strides = [1, 1]} : vector<1x290xf32> to vector<1x256xf32>
    %789 = arith.mulf %788, %1 : vector<1x256xf32>
    %c0_154 = arith.constant 0 : index
    %c107 = arith.constant 107 : index
    %790 = vector.load %arg2[%c0_154, %c107] : memref<4x144xf32, #tpu.memory_space<vmem>>, vector<4x1xf32>
    %791 = vector.broadcast %790 : vector<4x1xf32> to vector<4x256xf32>
    %792 = vector.broadcast %789 : vector<1x256xf32> to vector<4x256xf32>
    %793 = arith.mulf %791, %792 : vector<4x256xf32>
    %794 = arith.addf %787, %793 : vector<4x256xf32>
    %795 = arith.addf %614, %674 : vector<4x256xf32>
    %796 = arith.addf %795, %734 : vector<4x256xf32>
    %797 = arith.addf %796, %794 : vector<4x256xf32>
    %c2_155 = arith.constant 2 : index
    %c0_156 = arith.constant 0 : index
    %c0_157 = arith.constant 0 : index
    %798 = vector.load %arg3[%c2_155, %c0_156, %c0_157] : memref<4x4x1xf32, #tpu.memory_space<vmem>>, vector<1x4x1xf32>
    %799 = vector.shape_cast %798 : vector<1x4x1xf32> to vector<4x1xf32>
    %800 = vector.broadcast %799 : vector<4x1xf32> to vector<4x256xf32>
    %801 = arith.addf %797, %800 : vector<4x256xf32>
    %c0_158 = arith.constant 0 : index
    %c0_159 = arith.constant 0 : index
    %802 = vector.load %arg8[%c0_158, %c0_159] : memref<4x1xf32, #tpu.memory_space<vmem>>, vector<4x1xf32>
    %c0_160 = arith.constant 0 : index
    %c0_161 = arith.constant 0 : index
    %c0_162 = arith.constant 0 : index
    %803 = vector.load %arg5[%c0_160, %c0_161, %c0_162] : memref<1x4x256xf32, #tpu.memory_space<vmem>>, vector<1x4x256xf32>
    %804 = vector.shape_cast %803 : vector<1x4x256xf32> to vector<4x256xf32>
    %805 = arith.mulf %801, %804 : vector<4x256xf32>
    %cst_163 = arith.constant dense<0.000000e+00> : vector<4xf32>
    %806 = vector.multi_reduction <add>, %805, %cst_163 [1] : vector<4x256xf32> to vector<4xf32>
    %807 = vector.shape_cast %806 : vector<4xf32> to vector<4x1xf32>
    %cst_164 = arith.constant dense<0.000000e+00> : vector<1xf32>
    %808 = vector.multi_reduction <add>, %807, %cst_164 [0] : vector<4x1xf32> to vector<1xf32>
    %809 = vector.shape_cast %808 : vector<1xf32> to vector<1x1xf32>
    %c0_165 = arith.constant 0 : index
    %810 = memref.load %arg6[%c0_165] : memref<1xf32, #tpu.memory_space<smem>>
    %811 = vector.broadcast %810 : f32 to vector<1x1xf32>
    %812 = arith.addf %809, %811 : vector<1x1xf32>
    %cst_166 = arith.constant 0.000000e+00 : f32
    %813 = vector.broadcast %cst_166 : f32 to vector<1x1xf32>
    %814 = arith.maximumf %812, %813 : vector<1x1xf32>
    %c0_167 = arith.constant 0 : index
    %c0_168 = arith.constant 0 : index
    %815 = vector.load %arg7[%c0_167, %c0_168] : memref<4x1xf32, #tpu.memory_space<vmem>>, vector<4x1xf32>
    %816 = vector.broadcast %814 : vector<1x1xf32> to vector<4x1xf32>
    %817 = arith.mulf %815, %816 : vector<4x1xf32>
    %818 = arith.addf %802, %817 : vector<4x1xf32>
    %cst_169 = arith.constant 0.000000e+00 : f32
    %819 = vector.broadcast %cst_169 : f32 to vector<4x1xf32>
    %820 = arith.subf %819, %818 : vector<4x1xf32>
    %821 = math.exp %820 : vector<4x1xf32>
    %cst_170 = arith.constant 1.000000e+00 : f32
    %822 = vector.broadcast %cst_170 : f32 to vector<4x1xf32>
    %823 = arith.addf %822, %821 : vector<4x1xf32>
    %cst_171 = arith.constant 1.000000e+00 : f32
    %824 = vector.broadcast %cst_171 : f32 to vector<4x1xf32>
    %825 = arith.divf %824, %823 : vector<4x1xf32>
    %826 = math.exp %825 : vector<4x1xf32>
    %c0_172 = arith.constant 0 : index
    %c12_173 = arith.constant 12 : index
    %c0_174 = arith.constant 0 : index
    %827 = vector.load %arg1[%c0_172, %c12_173, %c0_174] : memref<1x16x256xf32, #tpu.memory_space<vmem>>, vector<1x4x256xf32>
    %828 = vector.shape_cast %827 : vector<1x4x256xf32> to vector<4x256xf32>
    %829 = arith.addf %828, %801 : vector<4x256xf32>
    %830 = vector.extract_strided_slice %829 {offsets = [0, 0], sizes = [1, 256], strides = [1, 1]} : vector<4x256xf32> to vector<1x256xf32>
    %831 = tpu.concatenate %2, %830, %2 in 1 : vector<1x17xf32>, vector<1x256xf32>, vector<1x17xf32> -> vector<1x290xf32>
    %832 = vector.extract_strided_slice %831 {offsets = [0, 0], sizes = [1, 256], strides = [1, 1]} : vector<1x290xf32> to vector<1x256xf32>
    %833 = arith.mulf %832, %0 : vector<1x256xf32>
    %c0_175 = arith.constant 0 : index
    %c108 = arith.constant 108 : index
    %834 = vector.load %arg2[%c0_175, %c108] : memref<4x144xf32, #tpu.memory_space<vmem>>, vector<4x1xf32>
    %835 = vector.broadcast %834 : vector<4x1xf32> to vector<4x256xf32>
    %836 = vector.broadcast %833 : vector<1x256xf32> to vector<4x256xf32>
    %837 = arith.mulf %835, %836 : vector<4x256xf32>
    %838 = vector.extract_strided_slice %831 {offsets = [0, 1], sizes = [1, 256], strides = [1, 1]} : vector<1x290xf32> to vector<1x256xf32>
    %c0_176 = arith.constant 0 : index
    %c109 = arith.constant 109 : index
    %839 = vector.load %arg2[%c0_176, %c109] : memref<4x144xf32, #tpu.memory_space<vmem>>, vector<4x1xf32>
    %840 = vector.broadcast %839 : vector<4x1xf32> to vector<4x256xf32>
    %841 = vector.broadcast %838 : vector<1x256xf32> to vector<4x256xf32>
    %842 = arith.mulf %840, %841 : vector<4x256xf32>
    %843 = arith.addf %837, %842 : vector<4x256xf32>
    %844 = vector.extract_strided_slice %831 {offsets = [0, 2], sizes = [1, 256], strides = [1, 1]} : vector<1x290xf32> to vector<1x256xf32>
    %845 = arith.mulf %844, %1 : vector<1x256xf32>
    %c0_177 = arith.constant 0 : index
    %c110 = arith.constant 110 : index
    %846 = vector.load %arg2[%c0_177, %c110] : memref<4x144xf32, #tpu.memory_space<vmem>>, vector<4x1xf32>
    %847 = vector.broadcast %846 : vector<4x1xf32> to vector<4x256xf32>
    %848 = vector.broadcast %845 : vector<1x256xf32> to vector<4x256xf32>
    %849 = arith.mulf %847, %848 : vector<4x256xf32>
    %850 = arith.addf %843, %849 : vector<4x256xf32>
    %851 = vector.extract_strided_slice %831 {offsets = [0, 16], sizes = [1, 256], strides = [1, 1]} : vector<1x290xf32> to vector<1x256xf32>
    %852 = arith.mulf %851, %0 : vector<1x256xf32>
    %c0_178 = arith.constant 0 : index
    %c111 = arith.constant 111 : index
    %853 = vector.load %arg2[%c0_178, %c111] : memref<4x144xf32, #tpu.memory_space<vmem>>, vector<4x1xf32>
    %854 = vector.broadcast %853 : vector<4x1xf32> to vector<4x256xf32>
    %855 = vector.broadcast %852 : vector<1x256xf32> to vector<4x256xf32>
    %856 = arith.mulf %854, %855 : vector<4x256xf32>
    %857 = arith.addf %850, %856 : vector<4x256xf32>
    %c0_179 = arith.constant 0 : index
    %c112 = arith.constant 112 : index
    %858 = vector.load %arg2[%c0_179, %c112] : memref<4x144xf32, #tpu.memory_space<vmem>>, vector<4x1xf32>
    %859 = vector.broadcast %858 : vector<4x1xf32> to vector<4x256xf32>
    %860 = vector.broadcast %830 : vector<1x256xf32> to vector<4x256xf32>
    %861 = arith.mulf %859, %860 : vector<4x256xf32>
    %862 = arith.addf %857, %861 : vector<4x256xf32>
    %863 = vector.extract_strided_slice %831 {offsets = [0, 18], sizes = [1, 256], strides = [1, 1]} : vector<1x290xf32> to vector<1x256xf32>
    %864 = arith.mulf %863, %1 : vector<1x256xf32>
    %c0_180 = arith.constant 0 : index
    %c113 = arith.constant 113 : index
    %865 = vector.load %arg2[%c0_180, %c113] : memref<4x144xf32, #tpu.memory_space<vmem>>, vector<4x1xf32>
    %866 = vector.broadcast %865 : vector<4x1xf32> to vector<4x256xf32>
    %867 = vector.broadcast %864 : vector<1x256xf32> to vector<4x256xf32>
    %868 = arith.mulf %866, %867 : vector<4x256xf32>
    %869 = arith.addf %862, %868 : vector<4x256xf32>
    %870 = vector.extract_strided_slice %831 {offsets = [0, 32], sizes = [1, 256], strides = [1, 1]} : vector<1x290xf32> to vector<1x256xf32>
    %871 = arith.mulf %870, %0 : vector<1x256xf32>
    %c0_181 = arith.constant 0 : index
    %c114 = arith.constant 114 : index
    %872 = vector.load %arg2[%c0_181, %c114] : memref<4x144xf32, #tpu.memory_space<vmem>>, vector<4x1xf32>
    %873 = vector.broadcast %872 : vector<4x1xf32> to vector<4x256xf32>
    %874 = vector.broadcast %871 : vector<1x256xf32> to vector<4x256xf32>
    %875 = arith.mulf %873, %874 : vector<4x256xf32>
    %876 = arith.addf %869, %875 : vector<4x256xf32>
    %877 = vector.extract_strided_slice %831 {offsets = [0, 33], sizes = [1, 256], strides = [1, 1]} : vector<1x290xf32> to vector<1x256xf32>
    %c0_182 = arith.constant 0 : index
    %c115 = arith.constant 115 : index
    %878 = vector.load %arg2[%c0_182, %c115] : memref<4x144xf32, #tpu.memory_space<vmem>>, vector<4x1xf32>
    %879 = vector.broadcast %878 : vector<4x1xf32> to vector<4x256xf32>
    %880 = vector.broadcast %877 : vector<1x256xf32> to vector<4x256xf32>
    %881 = arith.mulf %879, %880 : vector<4x256xf32>
    %882 = arith.addf %876, %881 : vector<4x256xf32>
    %883 = vector.extract_strided_slice %831 {offsets = [0, 34], sizes = [1, 256], strides = [1, 1]} : vector<1x290xf32> to vector<1x256xf32>
    %884 = arith.mulf %883, %1 : vector<1x256xf32>
    %c0_183 = arith.constant 0 : index
    %c116 = arith.constant 116 : index
    %885 = vector.load %arg2[%c0_183, %c116] : memref<4x144xf32, #tpu.memory_space<vmem>>, vector<4x1xf32>
    %886 = vector.broadcast %885 : vector<4x1xf32> to vector<4x256xf32>
    %887 = vector.broadcast %884 : vector<1x256xf32> to vector<4x256xf32>
    %888 = arith.mulf %886, %887 : vector<4x256xf32>
    %889 = arith.addf %882, %888 : vector<4x256xf32>
    %890 = vector.extract_strided_slice %829 {offsets = [1, 0], sizes = [1, 256], strides = [1, 1]} : vector<4x256xf32> to vector<1x256xf32>
    %891 = tpu.concatenate %2, %890, %2 in 1 : vector<1x17xf32>, vector<1x256xf32>, vector<1x17xf32> -> vector<1x290xf32>
    %892 = vector.extract_strided_slice %891 {offsets = [0, 0], sizes = [1, 256], strides = [1, 1]} : vector<1x290xf32> to vector<1x256xf32>
    %893 = arith.mulf %892, %0 : vector<1x256xf32>
    %c0_184 = arith.constant 0 : index
    %c117 = arith.constant 117 : index
    %894 = vector.load %arg2[%c0_184, %c117] : memref<4x144xf32, #tpu.memory_space<vmem>>, vector<4x1xf32>
    %895 = vector.broadcast %894 : vector<4x1xf32> to vector<4x256xf32>
    %896 = vector.broadcast %893 : vector<1x256xf32> to vector<4x256xf32>
    %897 = arith.mulf %895, %896 : vector<4x256xf32>
    %898 = vector.extract_strided_slice %891 {offsets = [0, 1], sizes = [1, 256], strides = [1, 1]} : vector<1x290xf32> to vector<1x256xf32>
    %c0_185 = arith.constant 0 : index
    %c118 = arith.constant 118 : index
    %899 = vector.load %arg2[%c0_185, %c118] : memref<4x144xf32, #tpu.memory_space<vmem>>, vector<4x1xf32>
    %900 = vector.broadcast %899 : vector<4x1xf32> to vector<4x256xf32>
    %901 = vector.broadcast %898 : vector<1x256xf32> to vector<4x256xf32>
    %902 = arith.mulf %900, %901 : vector<4x256xf32>
    %903 = arith.addf %897, %902 : vector<4x256xf32>
    %904 = vector.extract_strided_slice %891 {offsets = [0, 2], sizes = [1, 256], strides = [1, 1]} : vector<1x290xf32> to vector<1x256xf32>
    %905 = arith.mulf %904, %1 : vector<1x256xf32>
    %c0_186 = arith.constant 0 : index
    %c119 = arith.constant 119 : index
    %906 = vector.load %arg2[%c0_186, %c119] : memref<4x144xf32, #tpu.memory_space<vmem>>, vector<4x1xf32>
    %907 = vector.broadcast %906 : vector<4x1xf32> to vector<4x256xf32>
    %908 = vector.broadcast %905 : vector<1x256xf32> to vector<4x256xf32>
    %909 = arith.mulf %907, %908 : vector<4x256xf32>
    %910 = arith.addf %903, %909 : vector<4x256xf32>
    %911 = vector.extract_strided_slice %891 {offsets = [0, 16], sizes = [1, 256], strides = [1, 1]} : vector<1x290xf32> to vector<1x256xf32>
    %912 = arith.mulf %911, %0 : vector<1x256xf32>
    %c0_187 = arith.constant 0 : index
    %c120 = arith.constant 120 : index
    %913 = vector.load %arg2[%c0_187, %c120] : memref<4x144xf32, #tpu.memory_space<vmem>>, vector<4x1xf32>
    %914 = vector.broadcast %913 : vector<4x1xf32> to vector<4x256xf32>
    %915 = vector.broadcast %912 : vector<1x256xf32> to vector<4x256xf32>
    %916 = arith.mulf %914, %915 : vector<4x256xf32>
    %917 = arith.addf %910, %916 : vector<4x256xf32>
    %c0_188 = arith.constant 0 : index
    %c121 = arith.constant 121 : index
    %918 = vector.load %arg2[%c0_188, %c121] : memref<4x144xf32, #tpu.memory_space<vmem>>, vector<4x1xf32>
    %919 = vector.broadcast %918 : vector<4x1xf32> to vector<4x256xf32>
    %920 = vector.broadcast %890 : vector<1x256xf32> to vector<4x256xf32>
    %921 = arith.mulf %919, %920 : vector<4x256xf32>
    %922 = arith.addf %917, %921 : vector<4x256xf32>
    %923 = vector.extract_strided_slice %891 {offsets = [0, 18], sizes = [1, 256], strides = [1, 1]} : vector<1x290xf32> to vector<1x256xf32>
    %924 = arith.mulf %923, %1 : vector<1x256xf32>
    %c0_189 = arith.constant 0 : index
    %c122 = arith.constant 122 : index
    %925 = vector.load %arg2[%c0_189, %c122] : memref<4x144xf32, #tpu.memory_space<vmem>>, vector<4x1xf32>
    %926 = vector.broadcast %925 : vector<4x1xf32> to vector<4x256xf32>
    %927 = vector.broadcast %924 : vector<1x256xf32> to vector<4x256xf32>
    %928 = arith.mulf %926, %927 : vector<4x256xf32>
    %929 = arith.addf %922, %928 : vector<4x256xf32>
    %930 = vector.extract_strided_slice %891 {offsets = [0, 32], sizes = [1, 256], strides = [1, 1]} : vector<1x290xf32> to vector<1x256xf32>
    %931 = arith.mulf %930, %0 : vector<1x256xf32>
    %c0_190 = arith.constant 0 : index
    %c123 = arith.constant 123 : index
    %932 = vector.load %arg2[%c0_190, %c123] : memref<4x144xf32, #tpu.memory_space<vmem>>, vector<4x1xf32>
    %933 = vector.broadcast %932 : vector<4x1xf32> to vector<4x256xf32>
    %934 = vector.broadcast %931 : vector<1x256xf32> to vector<4x256xf32>
    %935 = arith.mulf %933, %934 : vector<4x256xf32>
    %936 = arith.addf %929, %935 : vector<4x256xf32>
    %937 = vector.extract_strided_slice %891 {offsets = [0, 33], sizes = [1, 256], strides = [1, 1]} : vector<1x290xf32> to vector<1x256xf32>
    %c0_191 = arith.constant 0 : index
    %c124 = arith.constant 124 : index
    %938 = vector.load %arg2[%c0_191, %c124] : memref<4x144xf32, #tpu.memory_space<vmem>>, vector<4x1xf32>
    %939 = vector.broadcast %938 : vector<4x1xf32> to vector<4x256xf32>
    %940 = vector.broadcast %937 : vector<1x256xf32> to vector<4x256xf32>
    %941 = arith.mulf %939, %940 : vector<4x256xf32>
    %942 = arith.addf %936, %941 : vector<4x256xf32>
    %943 = vector.extract_strided_slice %891 {offsets = [0, 34], sizes = [1, 256], strides = [1, 1]} : vector<1x290xf32> to vector<1x256xf32>
    %944 = arith.mulf %943, %1 : vector<1x256xf32>
    %c0_192 = arith.constant 0 : index
    %c125 = arith.constant 125 : index
    %945 = vector.load %arg2[%c0_192, %c125] : memref<4x144xf32, #tpu.memory_space<vmem>>, vector<4x1xf32>
    %946 = vector.broadcast %945 : vector<4x1xf32> to vector<4x256xf32>
    %947 = vector.broadcast %944 : vector<1x256xf32> to vector<4x256xf32>
    %948 = arith.mulf %946, %947 : vector<4x256xf32>
    %949 = arith.addf %942, %948 : vector<4x256xf32>
    %950 = vector.extract_strided_slice %829 {offsets = [2, 0], sizes = [1, 256], strides = [1, 1]} : vector<4x256xf32> to vector<1x256xf32>
    %951 = tpu.concatenate %2, %950, %2 in 1 : vector<1x17xf32>, vector<1x256xf32>, vector<1x17xf32> -> vector<1x290xf32>
    %952 = vector.extract_strided_slice %951 {offsets = [0, 0], sizes = [1, 256], strides = [1, 1]} : vector<1x290xf32> to vector<1x256xf32>
    %953 = arith.mulf %952, %0 : vector<1x256xf32>
    %c0_193 = arith.constant 0 : index
    %c126 = arith.constant 126 : index
    %954 = vector.load %arg2[%c0_193, %c126] : memref<4x144xf32, #tpu.memory_space<vmem>>, vector<4x1xf32>
    %955 = vector.broadcast %954 : vector<4x1xf32> to vector<4x256xf32>
    %956 = vector.broadcast %953 : vector<1x256xf32> to vector<4x256xf32>
    %957 = arith.mulf %955, %956 : vector<4x256xf32>
    %958 = vector.extract_strided_slice %951 {offsets = [0, 1], sizes = [1, 256], strides = [1, 1]} : vector<1x290xf32> to vector<1x256xf32>
    %c0_194 = arith.constant 0 : index
    %c127 = arith.constant 127 : index
    %959 = vector.load %arg2[%c0_194, %c127] : memref<4x144xf32, #tpu.memory_space<vmem>>, vector<4x1xf32>
    %960 = vector.broadcast %959 : vector<4x1xf32> to vector<4x256xf32>
    %961 = vector.broadcast %958 : vector<1x256xf32> to vector<4x256xf32>
    %962 = arith.mulf %960, %961 : vector<4x256xf32>
    %963 = arith.addf %957, %962 : vector<4x256xf32>
    %964 = vector.extract_strided_slice %951 {offsets = [0, 2], sizes = [1, 256], strides = [1, 1]} : vector<1x290xf32> to vector<1x256xf32>
    %965 = arith.mulf %964, %1 : vector<1x256xf32>
    %c0_195 = arith.constant 0 : index
    %c128 = arith.constant 128 : index
    %966 = vector.load %arg2[%c0_195, %c128] : memref<4x144xf32, #tpu.memory_space<vmem>>, vector<4x1xf32>
    %967 = vector.broadcast %966 : vector<4x1xf32> to vector<4x256xf32>
    %968 = vector.broadcast %965 : vector<1x256xf32> to vector<4x256xf32>
    %969 = arith.mulf %967, %968 : vector<4x256xf32>
    %970 = arith.addf %963, %969 : vector<4x256xf32>
    %971 = vector.extract_strided_slice %951 {offsets = [0, 16], sizes = [1, 256], strides = [1, 1]} : vector<1x290xf32> to vector<1x256xf32>
    %972 = arith.mulf %971, %0 : vector<1x256xf32>
    %c0_196 = arith.constant 0 : index
    %c129 = arith.constant 129 : index
    %973 = vector.load %arg2[%c0_196, %c129] : memref<4x144xf32, #tpu.memory_space<vmem>>, vector<4x1xf32>
    %974 = vector.broadcast %973 : vector<4x1xf32> to vector<4x256xf32>
    %975 = vector.broadcast %972 : vector<1x256xf32> to vector<4x256xf32>
    %976 = arith.mulf %974, %975 : vector<4x256xf32>
    %977 = arith.addf %970, %976 : vector<4x256xf32>
    %c0_197 = arith.constant 0 : index
    %c130 = arith.constant 130 : index
    %978 = vector.load %arg2[%c0_197, %c130] : memref<4x144xf32, #tpu.memory_space<vmem>>, vector<4x1xf32>
    %979 = vector.broadcast %978 : vector<4x1xf32> to vector<4x256xf32>
    %980 = vector.broadcast %950 : vector<1x256xf32> to vector<4x256xf32>
    %981 = arith.mulf %979, %980 : vector<4x256xf32>
    %982 = arith.addf %977, %981 : vector<4x256xf32>
    %983 = vector.extract_strided_slice %951 {offsets = [0, 18], sizes = [1, 256], strides = [1, 1]} : vector<1x290xf32> to vector<1x256xf32>
    %984 = arith.mulf %983, %1 : vector<1x256xf32>
    %c0_198 = arith.constant 0 : index
    %c131 = arith.constant 131 : index
    %985 = vector.load %arg2[%c0_198, %c131] : memref<4x144xf32, #tpu.memory_space<vmem>>, vector<4x1xf32>
    %986 = vector.broadcast %985 : vector<4x1xf32> to vector<4x256xf32>
    %987 = vector.broadcast %984 : vector<1x256xf32> to vector<4x256xf32>
    %988 = arith.mulf %986, %987 : vector<4x256xf32>
    %989 = arith.addf %982, %988 : vector<4x256xf32>
    %990 = vector.extract_strided_slice %951 {offsets = [0, 32], sizes = [1, 256], strides = [1, 1]} : vector<1x290xf32> to vector<1x256xf32>
    %991 = arith.mulf %990, %0 : vector<1x256xf32>
    %c0_199 = arith.constant 0 : index
    %c132 = arith.constant 132 : index
    %992 = vector.load %arg2[%c0_199, %c132] : memref<4x144xf32, #tpu.memory_space<vmem>>, vector<4x1xf32>
    %993 = vector.broadcast %992 : vector<4x1xf32> to vector<4x256xf32>
    %994 = vector.broadcast %991 : vector<1x256xf32> to vector<4x256xf32>
    %995 = arith.mulf %993, %994 : vector<4x256xf32>
    %996 = arith.addf %989, %995 : vector<4x256xf32>
    %997 = vector.extract_strided_slice %951 {offsets = [0, 33], sizes = [1, 256], strides = [1, 1]} : vector<1x290xf32> to vector<1x256xf32>
    %c0_200 = arith.constant 0 : index
    %c133 = arith.constant 133 : index
    %998 = vector.load %arg2[%c0_200, %c133] : memref<4x144xf32, #tpu.memory_space<vmem>>, vector<4x1xf32>
    %999 = vector.broadcast %998 : vector<4x1xf32> to vector<4x256xf32>
    %1000 = vector.broadcast %997 : vector<1x256xf32> to vector<4x256xf32>
    %1001 = arith.mulf %999, %1000 : vector<4x256xf32>
    %1002 = arith.addf %996, %1001 : vector<4x256xf32>
    %1003 = vector.extract_strided_slice %951 {offsets = [0, 34], sizes = [1, 256], strides = [1, 1]} : vector<1x290xf32> to vector<1x256xf32>
    %1004 = arith.mulf %1003, %1 : vector<1x256xf32>
    %c0_201 = arith.constant 0 : index
    %c134 = arith.constant 134 : index
    %1005 = vector.load %arg2[%c0_201, %c134] : memref<4x144xf32, #tpu.memory_space<vmem>>, vector<4x1xf32>
    %1006 = vector.broadcast %1005 : vector<4x1xf32> to vector<4x256xf32>
    %1007 = vector.broadcast %1004 : vector<1x256xf32> to vector<4x256xf32>
    %1008 = arith.mulf %1006, %1007 : vector<4x256xf32>
    %1009 = arith.addf %1002, %1008 : vector<4x256xf32>
    %1010 = vector.extract_strided_slice %829 {offsets = [3, 0], sizes = [1, 256], strides = [1, 1]} : vector<4x256xf32> to vector<1x256xf32>
    %1011 = tpu.concatenate %2, %1010, %2 in 1 : vector<1x17xf32>, vector<1x256xf32>, vector<1x17xf32> -> vector<1x290xf32>
    %1012 = vector.extract_strided_slice %1011 {offsets = [0, 0], sizes = [1, 256], strides = [1, 1]} : vector<1x290xf32> to vector<1x256xf32>
    %1013 = arith.mulf %1012, %0 : vector<1x256xf32>
    %c0_202 = arith.constant 0 : index
    %c135 = arith.constant 135 : index
    %1014 = vector.load %arg2[%c0_202, %c135] : memref<4x144xf32, #tpu.memory_space<vmem>>, vector<4x1xf32>
    %1015 = vector.broadcast %1014 : vector<4x1xf32> to vector<4x256xf32>
    %1016 = vector.broadcast %1013 : vector<1x256xf32> to vector<4x256xf32>
    %1017 = arith.mulf %1015, %1016 : vector<4x256xf32>
    %1018 = vector.extract_strided_slice %1011 {offsets = [0, 1], sizes = [1, 256], strides = [1, 1]} : vector<1x290xf32> to vector<1x256xf32>
    %c0_203 = arith.constant 0 : index
    %c136 = arith.constant 136 : index
    %1019 = vector.load %arg2[%c0_203, %c136] : memref<4x144xf32, #tpu.memory_space<vmem>>, vector<4x1xf32>
    %1020 = vector.broadcast %1019 : vector<4x1xf32> to vector<4x256xf32>
    %1021 = vector.broadcast %1018 : vector<1x256xf32> to vector<4x256xf32>
    %1022 = arith.mulf %1020, %1021 : vector<4x256xf32>
    %1023 = arith.addf %1017, %1022 : vector<4x256xf32>
    %1024 = vector.extract_strided_slice %1011 {offsets = [0, 2], sizes = [1, 256], strides = [1, 1]} : vector<1x290xf32> to vector<1x256xf32>
    %1025 = arith.mulf %1024, %1 : vector<1x256xf32>
    %c0_204 = arith.constant 0 : index
    %c137 = arith.constant 137 : index
    %1026 = vector.load %arg2[%c0_204, %c137] : memref<4x144xf32, #tpu.memory_space<vmem>>, vector<4x1xf32>
    %1027 = vector.broadcast %1026 : vector<4x1xf32> to vector<4x256xf32>
    %1028 = vector.broadcast %1025 : vector<1x256xf32> to vector<4x256xf32>
    %1029 = arith.mulf %1027, %1028 : vector<4x256xf32>
    %1030 = arith.addf %1023, %1029 : vector<4x256xf32>
    %1031 = vector.extract_strided_slice %1011 {offsets = [0, 16], sizes = [1, 256], strides = [1, 1]} : vector<1x290xf32> to vector<1x256xf32>
    %1032 = arith.mulf %1031, %0 : vector<1x256xf32>
    %c0_205 = arith.constant 0 : index
    %c138 = arith.constant 138 : index
    %1033 = vector.load %arg2[%c0_205, %c138] : memref<4x144xf32, #tpu.memory_space<vmem>>, vector<4x1xf32>
    %1034 = vector.broadcast %1033 : vector<4x1xf32> to vector<4x256xf32>
    %1035 = vector.broadcast %1032 : vector<1x256xf32> to vector<4x256xf32>
    %1036 = arith.mulf %1034, %1035 : vector<4x256xf32>
    %1037 = arith.addf %1030, %1036 : vector<4x256xf32>
    %c0_206 = arith.constant 0 : index
    %c139 = arith.constant 139 : index
    %1038 = vector.load %arg2[%c0_206, %c139] : memref<4x144xf32, #tpu.memory_space<vmem>>, vector<4x1xf32>
    %1039 = vector.broadcast %1038 : vector<4x1xf32> to vector<4x256xf32>
    %1040 = vector.broadcast %1010 : vector<1x256xf32> to vector<4x256xf32>
    %1041 = arith.mulf %1039, %1040 : vector<4x256xf32>
    %1042 = arith.addf %1037, %1041 : vector<4x256xf32>
    %1043 = vector.extract_strided_slice %1011 {offsets = [0, 18], sizes = [1, 256], strides = [1, 1]} : vector<1x290xf32> to vector<1x256xf32>
    %1044 = arith.mulf %1043, %1 : vector<1x256xf32>
    %c0_207 = arith.constant 0 : index
    %c140 = arith.constant 140 : index
    %1045 = vector.load %arg2[%c0_207, %c140] : memref<4x144xf32, #tpu.memory_space<vmem>>, vector<4x1xf32>
    %1046 = vector.broadcast %1045 : vector<4x1xf32> to vector<4x256xf32>
    %1047 = vector.broadcast %1044 : vector<1x256xf32> to vector<4x256xf32>
    %1048 = arith.mulf %1046, %1047 : vector<4x256xf32>
    %1049 = arith.addf %1042, %1048 : vector<4x256xf32>
    %1050 = vector.extract_strided_slice %1011 {offsets = [0, 32], sizes = [1, 256], strides = [1, 1]} : vector<1x290xf32> to vector<1x256xf32>
    %1051 = arith.mulf %1050, %0 : vector<1x256xf32>
    %c0_208 = arith.constant 0 : index
    %c141 = arith.constant 141 : index
    %1052 = vector.load %arg2[%c0_208, %c141] : memref<4x144xf32, #tpu.memory_space<vmem>>, vector<4x1xf32>
    %1053 = vector.broadcast %1052 : vector<4x1xf32> to vector<4x256xf32>
    %1054 = vector.broadcast %1051 : vector<1x256xf32> to vector<4x256xf32>
    %1055 = arith.mulf %1053, %1054 : vector<4x256xf32>
    %1056 = arith.addf %1049, %1055 : vector<4x256xf32>
    %1057 = vector.extract_strided_slice %1011 {offsets = [0, 33], sizes = [1, 256], strides = [1, 1]} : vector<1x290xf32> to vector<1x256xf32>
    %c0_209 = arith.constant 0 : index
    %c142 = arith.constant 142 : index
    %1058 = vector.load %arg2[%c0_209, %c142] : memref<4x144xf32, #tpu.memory_space<vmem>>, vector<4x1xf32>
    %1059 = vector.broadcast %1058 : vector<4x1xf32> to vector<4x256xf32>
    %1060 = vector.broadcast %1057 : vector<1x256xf32> to vector<4x256xf32>
    %1061 = arith.mulf %1059, %1060 : vector<4x256xf32>
    %1062 = arith.addf %1056, %1061 : vector<4x256xf32>
    %1063 = vector.extract_strided_slice %1011 {offsets = [0, 34], sizes = [1, 256], strides = [1, 1]} : vector<1x290xf32> to vector<1x256xf32>
    %1064 = arith.mulf %1063, %1 : vector<1x256xf32>
    %c0_210 = arith.constant 0 : index
    %c143 = arith.constant 143 : index
    %1065 = vector.load %arg2[%c0_210, %c143] : memref<4x144xf32, #tpu.memory_space<vmem>>, vector<4x1xf32>
    %1066 = vector.broadcast %1065 : vector<4x1xf32> to vector<4x256xf32>
    %1067 = vector.broadcast %1064 : vector<1x256xf32> to vector<4x256xf32>
    %1068 = arith.mulf %1066, %1067 : vector<4x256xf32>
    %1069 = arith.addf %1062, %1068 : vector<4x256xf32>
    %1070 = arith.addf %889, %949 : vector<4x256xf32>
    %1071 = arith.addf %1070, %1009 : vector<4x256xf32>
    %1072 = arith.addf %1071, %1069 : vector<4x256xf32>
    %c3_211 = arith.constant 3 : index
    %c0_212 = arith.constant 0 : index
    %c0_213 = arith.constant 0 : index
    %1073 = vector.load %arg3[%c3_211, %c0_212, %c0_213] : memref<4x4x1xf32, #tpu.memory_space<vmem>>, vector<1x4x1xf32>
    %1074 = vector.shape_cast %1073 : vector<1x4x1xf32> to vector<4x1xf32>
    %1075 = vector.broadcast %1074 : vector<4x1xf32> to vector<4x256xf32>
    %1076 = arith.addf %1072, %1075 : vector<4x256xf32>
    %c0_214 = arith.constant 0 : index
    %c0_215 = arith.constant 0 : index
    %1077 = vector.load %arg8[%c0_214, %c0_215] : memref<4x1xf32, #tpu.memory_space<vmem>>, vector<4x1xf32>
    %c0_216 = arith.constant 0 : index
    %c0_217 = arith.constant 0 : index
    %c0_218 = arith.constant 0 : index
    %1078 = vector.load %arg5[%c0_216, %c0_217, %c0_218] : memref<1x4x256xf32, #tpu.memory_space<vmem>>, vector<1x4x256xf32>
    %1079 = vector.shape_cast %1078 : vector<1x4x256xf32> to vector<4x256xf32>
    %1080 = arith.mulf %1076, %1079 : vector<4x256xf32>
    %cst_219 = arith.constant dense<0.000000e+00> : vector<4xf32>
    %1081 = vector.multi_reduction <add>, %1080, %cst_219 [1] : vector<4x256xf32> to vector<4xf32>
    %1082 = vector.shape_cast %1081 : vector<4xf32> to vector<4x1xf32>
    %cst_220 = arith.constant dense<0.000000e+00> : vector<1xf32>
    %1083 = vector.multi_reduction <add>, %1082, %cst_220 [0] : vector<4x1xf32> to vector<1xf32>
    %1084 = vector.shape_cast %1083 : vector<1xf32> to vector<1x1xf32>
    %c0_221 = arith.constant 0 : index
    %1085 = memref.load %arg6[%c0_221] : memref<1xf32, #tpu.memory_space<smem>>
    %1086 = vector.broadcast %1085 : f32 to vector<1x1xf32>
    %1087 = arith.addf %1084, %1086 : vector<1x1xf32>
    %cst_222 = arith.constant 0.000000e+00 : f32
    %1088 = vector.broadcast %cst_222 : f32 to vector<1x1xf32>
    %1089 = arith.maximumf %1087, %1088 : vector<1x1xf32>
    %c0_223 = arith.constant 0 : index
    %c0_224 = arith.constant 0 : index
    %1090 = vector.load %arg7[%c0_223, %c0_224] : memref<4x1xf32, #tpu.memory_space<vmem>>, vector<4x1xf32>
    %1091 = vector.broadcast %1089 : vector<1x1xf32> to vector<4x1xf32>
    %1092 = arith.mulf %1090, %1091 : vector<4x1xf32>
    %1093 = arith.addf %1077, %1092 : vector<4x1xf32>
    %cst_225 = arith.constant 0.000000e+00 : f32
    %1094 = vector.broadcast %cst_225 : f32 to vector<4x1xf32>
    %1095 = arith.subf %1094, %1093 : vector<4x1xf32>
    %1096 = math.exp %1095 : vector<4x1xf32>
    %cst_226 = arith.constant 1.000000e+00 : f32
    %1097 = vector.broadcast %cst_226 : f32 to vector<4x1xf32>
    %1098 = arith.addf %1097, %1096 : vector<4x1xf32>
    %cst_227 = arith.constant 1.000000e+00 : f32
    %1099 = vector.broadcast %cst_227 : f32 to vector<4x1xf32>
    %1100 = arith.divf %1099, %1098 : vector<4x1xf32>
    %1101 = math.exp %1100 : vector<4x1xf32>
    %1102 = arith.addf %276, %551 : vector<4x1xf32>
    %1103 = arith.addf %1102, %826 : vector<4x1xf32>
    %1104 = arith.addf %1103, %1101 : vector<4x1xf32>
    %1105 = arith.divf %276, %1104 : vector<4x1xf32>
    %1106 = vector.broadcast %1105 : vector<4x1xf32> to vector<4x256xf32>
    %1107 = arith.mulf %251, %1106 : vector<4x256xf32>
    %c0_228 = arith.constant 0 : index
    %c0_229 = arith.constant 0 : index
    %c0_230 = arith.constant 0 : index
    %1108 = vector.load %arg9[%c0_228, %c0_229, %c0_230] : memref<1x16x256xf32, #tpu.memory_space<vmem>>, vector<1x4x256xf32>
    %1109 = vector.shape_cast %1108 : vector<1x4x256xf32> to vector<4x256xf32>
    %1110 = vector.shape_cast %1107 : vector<4x256xf32> to vector<1x4x256xf32>
    tpu.vector_store %arg9[%c0_228, %c0_229, %c0_230], %1110 {strides = array<i32>} : memref<1x16x256xf32, #tpu.memory_space<vmem>>, vector<1x4x256xf32>,
    %1111 = arith.divf %551, %1104 : vector<4x1xf32>
    %1112 = vector.broadcast %1111 : vector<4x1xf32> to vector<4x256xf32>
    %1113 = arith.mulf %526, %1112 : vector<4x256xf32>
    %c0_231 = arith.constant 0 : index
    %c4_232 = arith.constant 4 : index
    %c0_233 = arith.constant 0 : index
    %1114 = vector.load %arg9[%c0_231, %c4_232, %c0_233] : memref<1x16x256xf32, #tpu.memory_space<vmem>>, vector<1x4x256xf32>
    %1115 = vector.shape_cast %1114 : vector<1x4x256xf32> to vector<4x256xf32>
    %1116 = vector.shape_cast %1113 : vector<4x256xf32> to vector<1x4x256xf32>
    tpu.vector_store %arg9[%c0_231, %c4_232, %c0_233], %1116 {strides = array<i32>} : memref<1x16x256xf32, #tpu.memory_space<vmem>>, vector<1x4x256xf32>,
    %1117 = arith.divf %826, %1104 : vector<4x1xf32>
    %1118 = vector.broadcast %1117 : vector<4x1xf32> to vector<4x256xf32>
    %1119 = arith.mulf %801, %1118 : vector<4x256xf32>
    %c0_234 = arith.constant 0 : index
    %c8_235 = arith.constant 8 : index
    %c0_236 = arith.constant 0 : index
    %1120 = vector.load %arg9[%c0_234, %c8_235, %c0_236] : memref<1x16x256xf32, #tpu.memory_space<vmem>>, vector<1x4x256xf32>
    %1121 = vector.shape_cast %1120 : vector<1x4x256xf32> to vector<4x256xf32>
    %1122 = vector.shape_cast %1119 : vector<4x256xf32> to vector<1x4x256xf32>
    tpu.vector_store %arg9[%c0_234, %c8_235, %c0_236], %1122 {strides = array<i32>} : memref<1x16x256xf32, #tpu.memory_space<vmem>>, vector<1x4x256xf32>,
    %1123 = arith.divf %1101, %1104 : vector<4x1xf32>
    %1124 = vector.broadcast %1123 : vector<4x1xf32> to vector<4x256xf32>
    %1125 = arith.mulf %1076, %1124 : vector<4x256xf32>
    %c0_237 = arith.constant 0 : index
    %c12_238 = arith.constant 12 : index
    %c0_239 = arith.constant 0 : index
    %1126 = vector.load %arg9[%c0_237, %c12_238, %c0_239] : memref<1x16x256xf32, #tpu.memory_space<vmem>>, vector<1x4x256xf32>
    %1127 = vector.shape_cast %1126 : vector<1x4x256xf32> to vector<4x256xf32>
    %1128 = vector.shape_cast %1125 : vector<4x256xf32> to vector<1x4x256xf32>
    tpu.vector_store %arg9[%c0_237, %c12_238, %c0_239], %1128 {strides = array<i32>} : memref<1x16x256xf32, #tpu.memory_space<vmem>>, vector<1x4x256xf32>,
    return
  }
  func.func @transform_0(%arg0: i32) -> (i32, i32, i32) {
    %c0_i32 = arith.constant 0 : i32
    %c0_i32_0 = arith.constant 0 : i32
    %c0_i32_1 = arith.constant 0 : i32
    return %arg0, %c0_i32, %c0_i32_0 : i32, i32, i32
  }
  func.func @transform_1(%arg0: i32) -> (i32, i32) {
    %c0_i32 = arith.constant 0 : i32
    %c0_i32_0 = arith.constant 0 : i32
    %c0_i32_1 = arith.constant 0 : i32
    return %c0_i32, %c0_i32_0 : i32, i32
  }
  func.func @transform_2(%arg0: i32) -> (i32, i32, i32) {
    %c0_i32 = arith.constant 0 : i32
    %c0_i32_0 = arith.constant 0 : i32
    %c0_i32_1 = arith.constant 0 : i32
    %c0_i32_2 = arith.constant 0 : i32
    return %c0_i32, %c0_i32_0, %c0_i32_1 : i32, i32, i32
  }
  func.func @transform_3(%arg0: i32) -> (i32, i32) {
    %c0_i32 = arith.constant 0 : i32
    %c0_i32_0 = arith.constant 0 : i32
    %c0_i32_1 = arith.constant 0 : i32
    return %c0_i32, %c0_i32_0 : i32, i32
  }
  func.func @transform_4(%arg0: i32) -> (i32, i32, i32) {
    %c0_i32 = arith.constant 0 : i32
    %c0_i32_0 = arith.constant 0 : i32
    %c0_i32_1 = arith.constant 0 : i32
    %c0_i32_2 = arith.constant 0 : i32
    return %c0_i32, %c0_i32_0, %c0_i32_1 : i32, i32, i32
  }
  func.func @transform_5(%arg0: i32) -> i32 {
    %c0_i32 = arith.constant 0 : i32
    %c0_i32_0 = arith.constant 0 : i32
    return %c0_i32 : i32
  }
  func.func @transform_6(%arg0: i32) -> (i32, i32) {
    %c0_i32 = arith.constant 0 : i32
    %c0_i32_0 = arith.constant 0 : i32
    %c0_i32_1 = arith.constant 0 : i32
    return %c0_i32, %c0_i32_0 : i32, i32
  }
  func.func @transform_7(%arg0: i32) -> (i32, i32) {
    %c0_i32 = arith.constant 0 : i32
    %c0_i32_0 = arith.constant 0 : i32
    %c0_i32_1 = arith.constant 0 : i32
    return %c0_i32, %c0_i32_0 : i32, i32
  }
  func.func @transform_8(%arg0: i32) -> (i32, i32, i32) {
    %c0_i32 = arith.constant 0 : i32
    %c0_i32_0 = arith.constant 0 : i32
    %c0_i32_1 = arith.constant 0 : i32
    return %arg0, %c0_i32, %c0_i32_0 : i32, i32, i32
  }
}

</mosaic_0001>

<bundles_post_ra>
// kernel: msa_forward.1
= control target key start
LH: loop header
LB: loop body
LE: loop exit
PB: predicated region body
PF: predicated region fallthrough
CT: control target
= control target key end

     0   :  { %s5248_s29 = smov 0   ;;  %s7634_s0 = inlined_call_operand.vmem [shape: f32[2,16,256], index: 0, kind: input, shape index: {}]   ;;  %s7635_s1 = inlined_call_operand.vmem [shape: f32[4,144], index: 1, kind: input, shape index: {}]   ;;  %s7636_s2 = inlined_call_operand.vmem [shape: f32[4,4,1], index: 2, kind: input, shape index: {}]   ;;  %s7637_s3 = inlined_call_operand.vmem [shape: f32[3,256], index: 3, kind: input, shape index: {}]   ;;  %s7638_s4 = inlined_call_operand.vmem [shape: f32[1,4,256], index: 4, kind: input, shape index: {}]   ;;  %s7639_s5 = inlined_call_operand.<no memory space> [shape: f32[1], index: 5, kind: input, shape index: {}]   ;;  %s7640_s6 = inlined_call_operand.vmem [shape: f32[4,1], index: 6, kind: input, shape index: {}]   ;;  %s7641_s7 = inlined_call_operand.vmem [shape: f32[4,1], index: 7, kind: input, shape index: {}]   ;;  %s7642_s8 = inlined_call_operand.vmem [shape: f32[2,16,256], index: 8, kind: output, shape index: {}]  }
   0x1   :  { %13 = sst [smem:[#allocation2]] %s7639_s5 }
   0x2 LB: > { %s4698_s30 = sadd.s32 4294967295, %s5056_s29   ;;  %p4702_p0 = scmp.ge.s32.totalorder %s5056_s29, 1  ;;  %s5056_s29 = sphi %s5248_s29, %s19_s29  }
   0x3   : > { %p263_p1 = scmp.lt.s32.totalorder %s5056_s29, 3 }
   0x5   : > { %p264_p2 = pnand %p4702_p0, %p263_p1 }
   0x7   : > { %267 = sbr.rel (%p264_p2) target bundleno = 3342 (0xd0e), region = 52 }
   0xc   : > { %v5259_v0 = vld [vmem:[%s7635_s1] sm:$0xf]  ;;  %p297_p3 = scmp.lt.s32.totalorder %s4698_s30, 1  ;;  %v7651_v1 = vmov 2   ;;  %v7658_v2 = vmov 0   ;;  %s5060_s16 = smov 17  }
   0xd   : > { %7685 = vst [vmem:[#allocation3_spill] sm:$0xff] %v5259_v0  ;;  %4867 = vset.pattern.permute.xlu2 %v7651_v1  ;;  %4865 = vset.pattern.permute.xlu1 %v7658_v2  ;;  %v307_v3 = vld [vmem:[%s7637_s3] ss:$4 sm:$0x3]  ;;  %v7654_v6 = vmov 1   ;;  %s5062_s17 = smov 16  }
   0xe   : > { %395 = vperm.xlu2 %4867, %v5259_v0   ;;  %335 = vperm.xlu1 %4865, %v5259_v0   ;;  %s7740_s30 = smov (!%p297_p3, %s4698_s30), 1  ;;  %v5281_v5 = vperm.slane %v307_v3, 0  ;;  %v4707_v7 = vld [vmem:[%s7637_s3 + $0x2] ss:$4 sm:$0x3]  ;;  %s5063_s20 = smov 18  }
   0xf   : > { %s4713_s12 = sshll.u32 %s7740_s30, 5  ;;  %v380_v9 = vperm.slane %v4707_v7, 0  ;;  %v381_v10 = vperm.slane %v4707_v7, 1  ;;  %s5064_s21 = smov 2   ;;  %v7649_v11 = vmov 3   ;;  %v5297_v12 = vperm.slane %v307_v3, 1 }
  0x10   : > { %s5276_s15 = scalar_lea.vmem %s7634_s0, %s4713_s12  ;;  %s5066_s22 = smov 32   ;;  %v7644_v13 = vmov 6   ;;  %v7647_v14 = vmov 4   ;;  %v7652_v16 = vmov 5   ;;  %v7657_v17 = vmov 7  }
  0x11   : > { %v5279_v4 = vld [vmem:[%s5276_s15] sm:$0xf]  ;;  %v5292_v8 = vld [vmem:[%s5276_s15 + $0x8] sm:$0xf]  ;;  %4871 = vset.pattern.permute.xlu0 %v7644_v13  ;;  %s5068_s23 = smov 34   ;;  %v7656_v18 = vmov 8  }
  0x12   : > { %314 = vrot.lane.b32.xlu0 %v5279_v4, %s5060_s16  ;;  %v620_v15 = vrot.slane %v5292_v8, 1  ;;  %v7655_v19 = vmov 9   ;;  %v7648_v20 = vmov 11   ;;  %v619_v21 = vrot.slane %v5279_v4, 1  ;;  %s5078_s24 = smov 127   ;;  %s5079_s25 = smov 95  }
  0x13   : > { %v7646_v22 = vmov 12   ;;  %v7645_v24 = vmov 13   ;;  %v7653_v25 = vmov 10   ;;  %vm318_vm0 = vcmask 138240   ;;  %s5080_s26 = smov 126   ;;  %s5081_s27 = smov 96  }
  0x14   : > { %vm347_vm1 = vcmask 1043456   ;;  %vm386_vm2 = vcmask 15360   ;;  %s5082_s28 = smov 94   ;;  %s5083_s9 = smov 112   ;;  %vm426_vm3 = vcmask 130048   ;;  %vm483_vm4 = vcmask 146432  }
  0x15   : > { %s5084_s10 = smov 110   ;;  %vm523_vm5 = vcmask 261120   ;;  %vm583_vm6 = vcmask 277504   ;;  %vm374_vm7 = vcmask 1039360   ;;  %vm417_vm8 = vcmask 1031168   ;;  %s1383_s11 = sld [smem:[#allocation2]] }
  0x16   : > { %4866 = vset.pattern.permute.xlu1 %v7654_v6  ;;  %422 = vrot.lane.b32.xlu2 %v5281_v5, %s5062_s17  ;;  %vm457_vm9 = vcmask 916480   ;;  %vm514_vm10 = vcmask 900096   ;;  %vm554_vm11 = vcmask 785408   ;;  %vm574_vm12 = vcmask 777216  }
  0x17   : > { %352 = vperm.xlu1 %4866, %v5259_v0   ;;  %4876 = vset.pattern.permute.xlu2 %v7648_v20  ;;  %vm614_vm13 = vcmask 769024  }
  0x1a   : > { %316 = vrot.lane.b32.xlu0 %v5292_v8, %s5060_s16 }
  0x1e   : > { %479 = vrot.lane.b32.xlu2 %v380_v9, %s5063_s20 }
  0x1f   : > { %384 = vrot.lane.b32.xlu1 %v381_v10, %s5064_s21 }
  0x20   : > { %4868 = vset.pattern.permute.xlu1 %v7649_v11 }
  0x22   : > { %382 = vrot.lane.b32.xlu0 %v380_v9, %s5064_s21  ;;  %s306_s21 = scalar_lea.vmem %s7642_s8, %s4713_s12 }
  0x26   : > { %521 = vrot.lane.b32.xlu2 %v5297_v12, %s5066_s22 }
  0x27   : > { %435 = vperm.xlu1 %4868, %v5259_v0  }
  0x2a   : > { %424 = vrot.lane.b32.xlu0 %v5297_v12, %s5062_s17 }
  0x2e   : > { %581 = vrot.lane.b32.xlu2 %v381_v10, %s5068_s23 }
  0x2f   : > { %4869 = vset.pattern.permute.xlu1 %v7647_v14 }
  0x30   : > { %463 = vperm.xlu1 %4869, %v5259_v0  }
  0x32   : > { %481 = vrot.lane.b32.xlu0 %v381_v10, %s5063_s20 }
  0x36   : > { %623 = vrot.lane.b32.xlu2 %v620_v15, %s5060_s16 }
  0x38   : > { %4870 = vset.pattern.permute.xlu1 %v7652_v16 }
  0x39   : > { %492 = vperm.xlu1 %4870, %v5259_v0  }
  0x3a   : > { %532 = vperm.xlu0 %4871, %v5259_v0  }
  0x3e   : > { %680 = vperm.xlu2 %4876, %v5259_v0  }
  0x41   : > { %519 = vrot.lane.b32.xlu1 %v5281_v5, %s5066_s22 }
  0x42   : > { %4872 = vset.pattern.permute.xlu1 %v7657_v17  ;;  %4873 = vset.pattern.permute.xlu0 %v7656_v18 }
  0x43   : > { %592 = vperm.xlu0 %4873, %v5259_v0  }
  0x46   : > { %4877 = vset.pattern.permute.xlu2 %v7646_v22 }
  0x47   : > { %710 = vperm.xlu2 %4877, %v5259_v0  }
  0x49   : > { %560 = vperm.xlu1 %4872, %v5259_v0  }
  0x4b   : > { %4874 = vset.pattern.permute.xlu0 %v7655_v19  ;;  %v471_v19 = vperm.slane %v5292_v8, 0 }
  0x4c   : > { %634 = vperm.xlu0 %4874, %v5259_v0  }
  0x4f   : > { %4878 = vset.pattern.permute.xlu2 %v7645_v24 }
  0x50   : > { %737 = vperm.xlu2 %4878, %v5259_v0  }
  0x51   : > { %579 = vrot.lane.b32.xlu1 %v380_v9, %s5068_s23 }
  0x52   : > { %4875 = vset.pattern.permute.xlu1 %v7653_v25  ;;  %v5091_v25 = vmov 839922192  }
  0x53   : > { %v339_v6 = vunpack.c.l.s4 %v5091_v25 }
  0x59   : > { %621 = vrot.lane.b32.xlu1 %v619_v21, %s5060_s16 }
  0x61   : > { %650 = vperm.xlu1 %4875, %v5259_v0  }
  0x68   : > { %v5323_v23 = vpop.permute.xlu2 %395 }
  0x70   : > { %v5329_v26 = vpop.permute.xlu2 %422 }
  0x71   : > { %7686 = vst [vmem:[#allocation4_spill] sm:$0xff] %v5329_v26 }
  0x78   : > { %v5331_v27 = vpop.permute.xlu2 %479 }
  0x80   : > { %v5333_v28 = vpop.permute.xlu1 %335  ;;  %v5335_v29 = vpop.permute.xlu2 %521 }
  0x81   : > { %7687 = vst [vmem:[#allocation5_spill] sm:$0xff] %v5335_v29 }
  0x84   : > { %v315_v30 = vpop.permute.xlu0 %314 }
  0x85   : > { %v5342_v34 = vsel %vm318_vm0, 0.0, %v315_v30 }
  0x86   : > { %v330_v38 = vmul.f32 %v5281_v5, %v5342_v34  ;;  %v359_v3 = vperm.slane %v5342_v34, 0 }
  0x88   : > { %v5339_v32 = vpop.permute.xlu2 %581  ;;  %v342_v43 = vperm.slane %v330_v38, 0 }
  0x89   : > { %v5337_v31 = vpop.permute.xlu1 %352  ;;  %7688 = vst [vmem:[#allocation6_spill] sm:$0xff] %v5339_v32 }
  0x8c   : > { %v317_v33 = vpop.permute.xlu0 %316 }
  0x8d   : > { %v5345_v35 = vsel %vm318_vm0, %v315_v30, %v317_v33  ;;  %v324_v36 = vsel %vm318_vm0, %v317_v33, 0.0 }
  0x8e   : > { %v361_v37 = vperm.slane %v324_v36, 0  ;;  %v331_v39 = vmul.f32 %v5297_v12, %v5345_v35  ;;  %v530_v41 = vmul.f32 %v5335_v29, %v324_v36  ;;  %v590_v53 = vmul.f32 %v5339_v32, %v324_v36 }
  0x8f   : > { %v360_v60 = vperm.slane %v5345_v35, 0 }
  0x90   : > { %369 = vrot.lane.b32.xlu2 %v361_v37, %s5078_s24  ;;  %569 = vrot.lane.b32.xlu0 %v361_v37, %s5079_s25  ;;  %v343_v44 = vperm.slane %v331_v39, 0  ;;  %v541_v47 = vperm.slane %v530_v41, 0  ;;  %v5360_v49 = vpop.permute.xlu2 %623  ;;  %v601_v56 = vperm.slane %v590_v53, 0  ;;  %v431_v53 = vmul.f32 %v5329_v26, %v5342_v34 }
  0x91   : > { %v5352_v40 = vpop.permute.xlu1 %384  ;;  %v5368_v51 = vsel %vm318_vm0, %v5360_v49, 0.0  ;;  %v365_v7 = vrot.slane %v360_v60, 4 }
  0x92   : > { %v393_v42 = vmul.f32 %v5352_v40, %v324_v36  ;;  %v346_v48 = vrot.slane %v343_v44, 4  ;;  %v659_v54 = vperm.slane %v5368_v51, 0  ;;  %v678_v59 = vmul.f32 %v5368_v51, %v5352_v40 }
  0x93   : > { %v366_v30 = vsel %vm347_vm1, %v359_v3, %v365_v7  ;;  %v442_v3 = vperm.slane %v431_v53, 0 }
  0x94   : > { %v404_v45 = vperm.slane %v393_v42, 0  ;;  %v5358_v46 = vpop.permute.xlu0 %382  ;;  %v5364_v50 = vsel %vm347_vm1, %v342_v43, %v346_v48  ;;  %v689_v63 = vperm.slane %v678_v59, 0 }
  0x95   : > { %v5390_v62 = vsel %vm386_vm2, %v5358_v46, %v5352_v40  ;;  %v391_v37 = vmul.f32 %v5358_v46, %v5342_v34 }
  0x96   : > { %412 = vrot.lane.b32.xlu1 %v404_v45, %s5080_s26  ;;  %v392_v10 = vmul.f32 %v5390_v62, %v5345_v35 }
  0x97   : > { %v402_v43 = vperm.slane %v391_v37, 0 }
  0x98   : > { %549 = vrot.lane.b32.xlu2 %v541_v47, %s5081_s27  ;;  %v403_v38 = vperm.slane %v392_v10, 0 }
  0x99   : > { %v5370_v52 = vpop.permute.xlu1 %435 }
  0x9a   : > { %v408_v44 = vrot.slane %v403_v38, 4 }
  0x9c   : > { %v5375_v55 = vpop.permute.xlu0 %424  ;;  %v409_v47 = vsel %vm347_vm1, %v402_v43, %v408_v44 }
  0x9d   : > { %v433_v57 = vmul.f32 %v5375_v55, %v324_v36  ;;  %v708_v21 = vmul.f32 %v5368_v51, %v5375_v55  ;;  %v5407_v39 = vsel %vm426_vm3, %v5329_v26, %v5375_v55 }
  0x9e   : > { %667 = vrot.lane.b32.xlu1 %v659_v54, %s5078_s24  ;;  %7690 = vst [vmem:[#allocation8_spill] sm:$0xff] %v5407_v39  ;;  %v432_v42 = vmul.f32 %v5407_v39, %v5345_v35 }
  0x9f   : > { %v444_v58 = vperm.slane %v433_v57, 0 }
  0xa0   : > { %609 = vrot.lane.b32.xlu2 %v601_v56, %s5082_s28  ;;  %v443_v45 = vperm.slane %v432_v42, 0 }
  0xa1   : > { %452 = vrot.lane.b32.xlu0 %v444_v58, %s5083_s9 }
  0xa2   : > { %v5385_v61 = vpop.permute.xlu1 %463  ;;  %v448_v57 = vrot.slane %v443_v45, 4 }
  0xa4   : > { %v5393_v9 = vpop.permute.xlu0 %481  ;;  %v449_v10 = vsel %vm347_vm1, %v442_v3, %v448_v57 }
  0xa5   : > { %7689 = vst [vmem:[#allocation7_spill] sm:$0xff] %v5393_v9  ;;  %v490_v15 = vmul.f32 %v5393_v9, %v324_v36  ;;  %v719_v36 = vperm.slane %v708_v21, 0  ;;  %v5419_v48 = vsel %vm483_vm4, %v5331_v27, %v5393_v9 }
  0xa6   : > { %697 = vrot.lane.b32.xlu1 %v689_v63, %s5080_s26  ;;  %v489_v59 = vmul.f32 %v5419_v48, %v5345_v35 }
  0xa7   : > { %v501_v33 = vperm.slane %v490_v15, 0 }
  0xa8   : > { %367 = vrot.lane.b32.xlu2 %v366_v30, %s5078_s24  ;;  %v500_v15 = vperm.slane %v489_v59, 0 }
  0xa9   : > { %509 = vrot.lane.b32.xlu0 %v501_v33, %s5084_s10  ;;  %v488_v33 = vmul.f32 %v5331_v27, %v5342_v34 }
  0xaa   : > { %v505_v42 = vrot.slane %v500_v15, 4 }
  0xab   : > { %v5410_v41 = vpop.permute.xlu1 %492  ;;  %v499_v43 = vperm.slane %v488_v33, 0 }
  0xad   : > { %v506_v44 = vsel %vm347_vm1, %v499_v43, %v505_v42 }
  0xae   : > { %727 = vrot.lane.b32.xlu1 %v719_v36, %s5083_s9  ;;  %v7643_v36 = vmov 15  }
  0xaf   : > { %4880 = vset.pattern.permute.xlu1 %v7643_v36 }
  0xb0   : > { %567 = vrot.lane.b32.xlu2 %v366_v30, %s5079_s25 }
  0xb1   : > { %410 = vrot.lane.b32.xlu0 %v409_v47, %s5080_s26  ;;  %v7650_v47 = vmov 14  }
  0xb2   : > { %4879 = vset.pattern.permute.xlu0 %v7650_v47 }
  0xb3   : > { %v5424_v56 = vpop.permute.xlu1 %519 }
  0xb4   : > { %7691 = vst [vmem:[#allocation9_spill] sm:$0xff] %v5424_v56  ;;  %v5428_v58 = vsel %vm523_vm5, %v5424_v56, %v5335_v29  ;;  %v528_v60 = vmul.f32 %v5424_v56, %v5342_v34 }
  0xb5   : > { %7692 = vst [vmem:[#allocation10_spill] sm:$0xff] %v5428_v58  ;;  %v529_v63 = vmul.f32 %v5428_v58, %v5345_v35 }
  0xb6   : > { %v539_v21 = vperm.slane %v528_v60, 0 }
  0xb7   : > { %v540_v7 = vperm.slane %v529_v63, 0 }
  0xb8   : > { %450 = vrot.lane.b32.xlu2 %v449_v10, %s5083_s9 }
  0xb9   : > { %v545_v30 = vrot.slane %v540_v7, 4 }
  0xbb   : > { %v5440_v37 = vpop.permute.xlu1 %560  ;;  %v546_v38 = vsel %vm347_vm1, %v539_v21, %v545_v30 }
  0xbc   : > { %547 = vrot.lane.b32.xlu1 %v546_v38, %s5081_s27  ;;  %v5465_v38 = vpop.permute.xlu2 %680 }
  0xc0   : > { %507 = vrot.lane.b32.xlu2 %v506_v44, %s5084_s10 }
  0xc3   : > { %v5447_v45 = vpop.permute.xlu1 %579 }
  0xc4   : > { %7693 = vst [vmem:[#allocation11_spill] sm:$0xff] %v5447_v45  ;;  %v5452_v53 = vsel %vm583_vm6, %v5447_v45, %v5339_v32  ;;  %v588_v57 = vmul.f32 %v5447_v45, %v5342_v34 }
  0xc5   : > { %7694 = vst [vmem:[#allocation12_spill] sm:$0xff] %v5452_v53  ;;  %v589_v59 = vmul.f32 %v5452_v53, %v5345_v35 }
  0xc6   : > { %v599_v63 = vperm.slane %v588_v57, 0 }
  0xc7   : > { %v600_v60 = vperm.slane %v589_v59, 0 }
  0xc9   : > { %v605_v3 = vrot.slane %v600_v60, 4 }
  0xcb   : > { %v622_v7 = vpop.permute.xlu1 %621  ;;  %v606_v10 = vsel %vm347_vm1, %v599_v63, %v605_v3 }
  0xcc   : > { %v625_v15 = vsel %vm318_vm0, %v622_v7, %v5360_v49  ;;  %v629_v21 = vsel %vm318_vm0, 0.0, %v622_v7  ;;  %607 = vrot.lane.b32.xlu1 %v606_v10, %s5082_s28 }
  0xcd   : > { %v631_v30 = vmul.f32 %v629_v21, %v5281_v5  ;;  %v632_v34 = vmul.f32 %v625_v15, %v5297_v12  ;;  %v658_v33 = vperm.slane %v625_v15, 0  ;;  %v753_v35 = vmul.f32 %v629_v21, %v5331_v27 }
  0xce   : > { %v754_v42 = vmul.f32 %v625_v15, %v5419_v48  ;;  %v676_v43 = vmul.f32 %v629_v21, %v5358_v46  ;;  %v677_v44 = vmul.f32 %v625_v15, %v5390_v62  ;;  %v657_v57 = vperm.slane %v629_v21, 0 }
  0xcf   : > { %v642_v49 = vperm.slane %v632_v34, 0  ;;  %v663_v59 = vrot.slane %v658_v33, 4  ;;  %v641_v3 = vperm.slane %v631_v30, 0  ;;  %v707_v36 = vmul.f32 %v625_v15, %v5407_v39 }
  0xd0   : > { %v765_v60 = vperm.slane %v754_v42, 0  ;;  %v688_v63 = vperm.slane %v677_v44, 0  ;;  %v764_v13 = vperm.slane %v753_v35, 0  ;;  %v687_v22 = vperm.slane %v676_v43, 0  ;;  %v5485_v44 = vpop.permute.xlu2 %710 }
  0xd1   : > { %v645_v7 = vrot.slane %v642_v49, 4  ;;  %v664_v10 = vsel %vm347_vm1, %v657_v57, %v663_v59  ;;  %v755_v30 = vmul.f32 %v5368_v51, %v5393_v9  ;;  %v718_v42 = vperm.slane %v707_v36, 0 }
  0xd2   : > { %665 = vrot.lane.b32.xlu2 %v664_v10, %s5078_s24  ;;  %v770_v24 = vrot.slane %v765_v60, 4  ;;  %v693_v14 = vrot.slane %v688_v63, 4  ;;  %v784_v35 = vmul.f32 %v625_v15, %v5428_v58  ;;  %v706_v43 = vmul.f32 %v629_v21, %v5329_v26 }
  0xd3   : > { %v5475_v20 = vsel %vm347_vm1, %v641_v3, %v645_v7  ;;  %v766_v49 = vperm.slane %v755_v30, 0  ;;  %v723_v57 = vrot.slane %v718_v42, 4  ;;  %v5087_v3 = vmov 16  }
  0xd4   : > { %v771_v34 = vsel %vm347_vm1, %v764_v13, %v770_v24  ;;  %v694_v33 = vsel %vm347_vm1, %v687_v22, %v693_v14  ;;  %v795_v59 = vperm.slane %v784_v35, 0  ;;  %v717_v13 = vperm.slane %v706_v43, 0 }
  0xd5   : > { %772 = vrot.lane.b32.xlu1 %v771_v34, %s5084_s10  ;;  %695 = vrot.lane.b32.xlu0 %v694_v33, %s5080_s26  ;;  %v783_v14 = vmul.f32 %v629_v21, %v5424_v56  ;;  %v833_v7 = vmul.f32 %v625_v15, %v5452_v53  ;;  %v785_v34 = vmul.f32 %v5368_v51, %v5335_v29  ;;  %v470_v53 = vperm.slane %v5279_v4, 0 }
  0xd6   : > { %v724_v22 = vsel %vm347_vm1, %v717_v13, %v723_v57  ;;  %v800_v24 = vrot.slane %v795_v59, 4  ;;  %v832_v35 = vmul.f32 %v629_v21, %v5447_v45  ;;  %v5089_v57 = vmov 18  }
  0xd7   : > { %v794_v36 = vperm.slane %v783_v14, 0  ;;  %v844_v33 = vperm.slane %v833_v7, 0  ;;  %v796_v42 = vperm.slane %v785_v34, 0  ;;  %v862_v13 = vrot.slane %v5279_v4, 2 }
  0xd8   : > { %v5493_v63 = vpop.permute.xlu2 %737  ;;  %v843_v15 = vperm.slane %v832_v35, 0  ;;  %v863_v21 = vrot.slane %v5292_v8, 2  ;;  %v834_v14 = vmul.f32 %v5368_v51, %v5339_v32  ;;  %v5566_v45 = vunpack.c.0.s8 %v339_v6 }
  0xd9   : > { %v801_v60 = vsel %vm347_vm1, %v794_v36, %v800_v24  ;;  %v849_v43 = vrot.slane %v844_v33, 4  ;;  %v5523_v36 = vpop.permute.xlu0 %532  ;;  %v474_v32 = vrot.slane %v471_v19, 4 }
  0xda   : > { %774 = vrot.lane.b32.xlu2 %v766_v49, %s5084_s10  ;;  %v5088_v49 = vmov 17   ;;  %v341_v29 = vperm.slane %v5333_v28, %v5566_v45  ;;  %v358_v28 = vperm.slane %v5337_v31, %v5566_v45 }
  0xdb   : > { %v850_v59 = vsel %vm347_vm1, %v843_v15, %v849_v43  ;;  %v475_v6 = vsel %vm347_vm1, %v470_v53, %v474_v32 }
  0xdc   : > { %v350_v32 = vmul.f32 %v5364_v50, %v341_v29  ;;  %v686_v29 = vperm.slane %v5465_v38, %v5566_v45 }
  0xdd   : > { %787 = vperm.xlu1 %4880, %v5259_v0   ;;  %725 = vrot.lane.b32.xlu0 %v724_v22, %s5083_s9  ;;  %v845_v22 = vperm.slane %v834_v14, 0 }
  0xe2   : > { %802 = vrot.lane.b32.xlu2 %v801_v60, %s5081_s27  ;;  %v5526_v60 = vpop.permute.xlu1 %650 }
  0xe5   : > { %4881 = vset.pattern.permute.xlu1 %v5087_v3  ;;  %757 = vperm.xlu0 %4879, %v5259_v0   ;;  %v5528_v3 = vpop.permute.xlu0 %592 }
  0xe6   : > { %814 = vperm.xlu1 %4881, %v5259_v0  }
  0xea   : > { %821 = vrot.lane.b32.xlu2 %v664_v10, %s5079_s25  ;;  %v5502_v30 = vpop.permute.xlu2 %369 }
  0xed   : > { %804 = vrot.lane.b32.xlu0 %v796_v42, %s5081_s27  ;;  %v5532_v51 = vpop.permute.xlu0 %634 }
  0xee   : > { %4882 = vset.pattern.permute.xlu1 %v5088_v49  ;;  %4883 = vset.pattern.permute.xlu0 %v5089_v57 }
  0xef   : > { %836 = vperm.xlu1 %4882, %v5259_v0  }
  0xf2   : > { %851 = vrot.lane.b32.xlu2 %v850_v59, %s5082_s28  ;;  %v5509_v10 = vpop.permute.xlu2 %549 }
  0xf5   : > { %823 = vrot.lane.b32.xlu0 %v659_v54, %s5079_s25 }
  0xf7   : > { %864 = vrot.lane.b32.xlu1 %v862_v13, %s5060_s16 }
  0xfa   : > { %866 = vrot.lane.b32.xlu2 %v863_v21, %s5060_s16  ;;  %v5520_v24 = vpop.permute.xlu2 %609 }
  0xfd   : > { %853 = vrot.lane.b32.xlu0 %v845_v22, %s5082_s28  ;;  %v5090_v22 = vmov 19  }
  0xfe   : > { %4884 = vset.pattern.permute.xlu1 %v5090_v22  ;;  %v372_v22 = vrot.slane %v5502_v30, 4 }
  0xff   : > { %893 = vperm.xlu1 %4884, %v5259_v0  }
 0x102   : > { %v368_v54 = vpop.permute.xlu2 %367  ;;  %v5538_v35 = vpop.permute.xlu0 %569 }
 0x103   : > { %v371_v2 = vrot.slane %v368_v54, 4 }
 0x105   : > { %877 = vperm.xlu0 %4883, %v5259_v0   ;;  %v373_v58 = vsel %vm347_vm1, %v371_v2, %v372_v22  ;;  %v469_v0 = vperm.slane %v5385_v61, %v5566_v45  ;;  %v401_v2 = vperm.slane %v5323_v23, %v5566_v45  ;;  %v441_v61 = vperm.slane %v5370_v52, %v5566_v45 }
 0x106   : > { %v375_v30 = vsel %vm374_vm7, %v368_v54, %v373_v58  ;;  %v745_v52 = vperm.slane %v5292_v8, 1 }
 0x107   : > { %v5592_v54 = vmul.f32 %v475_v6, %v469_v0  ;;  %v716_v0 = vperm.slane %v5485_v44, %v5566_v45 }
 0x108   : > { %v413_v7 = vpop.permute.xlu1 %412 }
 0x109   : > { %v415_v25 = vrot.slane %v413_v7, 4  ;;  %v377_v7 = vmul.f32 %v375_v30, %v358_v28 }
 0x10a   : > { %v5530_v34 = vpop.permute.xlu2 %567 }
 0x10b   : > { %v378_v8 = vadd.f32 %v377_v7, %v350_v32 }
 0x110   : > { %v5534_v33 = vpop.permute.xlu1 %667 }
 0x112   : > { %v5536_v42 = vpop.permute.xlu2 %450 }
 0x113   : > { %v453_v57 = vpop.permute.xlu0 %452  ;;  %v454_v58 = vrot.slane %v5536_v42, 4 }
 0x114   : > { %v455_v53 = vrot.slane %v453_v57, 4  ;;  %v670_v57 = vrot.slane %v5534_v33, 4 }
 0x118   : > { %v5540_v43 = vpop.permute.xlu1 %697 }
 0x119   : > { %v700_v28 = vrot.slane %v5540_v43, 4  ;;  %v5092_v43 = vmov 20  }
 0x11a   : > { %v5542_v49 = vpop.permute.xlu2 %507  ;;  %4885 = vset.pattern.permute.xlu2 %v5092_v43 }
 0x11b   : > { %v5550_v21 = vpop.permute.xlu0 %509  ;;  %v511_v23 = vrot.slane %v5542_v49, 4 }
 0x120   : > { %v5546_v59 = vpop.permute.xlu1 %727 }
 0x121   : > { %v730_v32 = vrot.slane %v5546_v59, 4 }
 0x123   : > { %v411_v1 = vpop.permute.xlu0 %410 }
 0x124   : > { %v414_v56 = vrot.slane %v411_v1, 4 }
 0x126   : > { %v416_v19 = vsel %vm347_vm1, %v414_v56, %v415_v25  ;;  %v498_v56 = vperm.slane %v5410_v41, %v5566_v45  ;;  %v456_v25 = vsel %vm347_vm1, %v454_v58, %v455_v53  ;;  %v748_v53 = vrot.slane %v745_v52, 4 }
 0x127   : > { %v418_v22 = vsel %vm417_vm8, %v411_v1, %v416_v19  ;;  %v640_v19 = vperm.slane %v5532_v51, %v5566_v45  ;;  %v512_v51 = vrot.slane %v5550_v21, 4 }
 0x128   : > { %v420_v6 = vmul.f32 %v418_v22, %v401_v2  ;;  %v458_v22 = vsel %vm457_vm9, %v5536_v42, %v456_v25  ;;  %v656_v42 = vperm.slane %v5526_v60, %v5566_v45  ;;  %v552_v25 = vrot.slane %v5509_v10, 4 }
 0x12a   : > { %v421_v7 = vadd.f32 %v420_v6, %v378_v8  ;;  %v5093_v6 = vmov 24   ;;  %v571_v8 = vrot.slane %v5530_v34, 4 }
 0x12b   : > { %4889 = vset.pattern.permute.xlu1 %v5093_v6 }
 0x12c   : > { %v5544_v15 = vpop.permute.xlu2 %665 }
 0x12d   : > { %v669_v50 = vrot.slane %v5544_v15, 4 }
 0x12e   : > { %v5552_v14 = vpop.permute.xlu1 %547 }
 0x12f   : > { %v671_v31 = vsel %vm347_vm1, %v669_v50, %v670_v57  ;;  %v551_v50 = vrot.slane %v5552_v14, 4 }
 0x130   : > { %v672_v21 = vsel %vm374_vm7, %v5544_v15, %v671_v31  ;;  %v513_v15 = vsel %vm347_vm1, %v511_v23, %v512_v51 }
 0x131   : > { %v553_v10 = vsel %vm347_vm1, %v551_v50, %v552_v25  ;;  %v515_v51 = vsel %vm514_vm10, %v5542_v49, %v513_v15  ;;  %v7696_v25 = vperm.slane %v5279_v4, 1 }
 0x134   : > { %v5548_v13 = vpop.permute.xlu2 %774 }
 0x13c   : > { %v5555_v11 = vpop.permute.xlu2 %802 }
 0x13d   : > { %v806_v41 = vrot.slane %v5555_v11, 4 }
 0x13e   : > { %v5557_v47 = vpop.permute.xlu1 %607 }
 0x144   : > { %v5559_v16 = vpop.permute.xlu2 %821 }
 0x147   : > { %v5562_v18 = vpop.permute.xlu0 %695  ;;  %v5564_v17 = vpop.permute.xlu1 %772 }
 0x148   : > { %v699_v30 = vrot.slane %v5562_v18, 4 }
 0x14a   : > { %v701_v52 = vsel %vm347_vm1, %v699_v30, %v700_v28  ;;  %v572_v30 = vrot.slane %v5538_v35, 4  ;;  %v674_v28 = vmul.f32 %v672_v21, %v656_v42  ;;  %v648_v35 = vmul.f32 %v5475_v20, %v640_v19 }
 0x14b   : > { %v702_v60 = vsel %vm417_vm8, %v5562_v18, %v701_v52  ;;  %v776_v20 = vrot.slane %v5564_v17, 4 }
 0x14c   : > { %v5571_v9 = vpop.permute.xlu2 %851  ;;  %v704_v18 = vmul.f32 %v702_v60, %v686_v29  ;;  %v5094_v29 = vmov 23  }
 0x14d   : > { %4888 = vset.pattern.permute.xlu0 %v5094_v29 }
 0x14f   : > { %v5580_v26 = vpop.permute.xlu0 %725  ;;  %v5582_v39 = vpop.permute.xlu1 %787 }
 0x150   : > { %v729_v2 = vrot.slane %v5580_v26, 4 }
 0x152   : > { %v731_v59 = vsel %vm347_vm1, %v729_v2, %v730_v32  ;;  %v611_v2 = vrot.slane %v5557_v47, 4  ;;  %v612_v32 = vrot.slane %v5520_v24, 4 }
 0x154   : > { %v5608_v1 = vpop.permute.xlu2 %866  ;;  %v613_v50 = vsel %vm347_vm1, %v611_v2, %v612_v32  ;;  %v825_v2 = vrot.slane %v5559_v16, 4 }
 0x155   : > { %v5614_v38 = vsel %vm318_vm0, %v5608_v1, 0.0 }
 0x156   : > { %v7680_v33 = vperm.slane %v5614_v38, 0  ;;  %v921_v57 = vmul.f32 %v5614_v38, %v5352_v40  ;;  %v951_v49 = vmul.f32 %v5614_v38, %v5375_v55 }
 0x157   : > { %v5623_v58 = vpop.permute.xlu0 %757 }
 0x158   : > { %v5629_v44 = vpop.permute.xlu1 %814  ;;  %910 = vrot.lane.b32.xlu1 %v7680_v33, %s5078_s24  ;;  %v460_v33 = vmul.f32 %v458_v22, %v441_v61  ;;  %v743_v61 = vperm.slane %v5493_v63, %v5566_v45  ;;  %v732_v22 = vsel %vm457_vm9, %v5580_v26, %v731_v59  ;;  %v932_v43 = vperm.slane %v921_v57, 0 }
 0x159   : > { %v555_v63 = vsel %vm554_vm11, %v5552_v14, %v553_v10  ;;  %v734_v19 = vmul.f32 %v732_v22, %v716_v0  ;;  %v517_v14 = vmul.f32 %v515_v51, %v498_v56  ;;  %v777_v0 = vrot.slane %v5548_v13, 4 }
 0x15a   : > { %v461_v31 = vadd.f32 %v460_v33, %v421_v7  ;;  %v573_v33 = vsel %vm347_vm1, %v571_v8, %v572_v30  ;;  %v675_v7 = vadd.f32 %v674_v28, %v648_v35  ;;  %v566_v57 = vperm.slane %v5440_v37, %v5566_v45 }
 0x15b   : > { %v749_v59 = vsel %vm347_vm1, %v7696_v25, %v748_v53  ;;  %v575_v6 = vsel %vm574_vm12, %v5530_v34, %v573_v33  ;;  %v778_v8 = vsel %vm347_vm1, %v776_v20, %v777_v0  ;;  %v763_v30 = vperm.slane %v5623_v58, %v5566_v45 }
 0x15c   : > { %v478_v26 = vadd.f32 %v5592_v54, %v461_v31  ;;  %v7695_v54 = vperm.slane %v5523_v36, %v5566_v45  ;;  %v705_v21 = vadd.f32 %v704_v18, %v675_v7  ;;  %v615_v36 = vsel %vm614_vm13, %v5557_v47, %v613_v50 }
 0x15d   : > { %v962_v60 = vperm.slane %v951_v49, 0  ;;  %v751_v15 = vmul.f32 %v749_v59, %v743_v61  ;;  %v577_v53 = vmul.f32 %v575_v6, %v566_v57  ;;  %v7697_v34 = vperm.slane %v5528_v3, %v5566_v45  ;;  %v7698_v6 = vld [vmem:[#allocation8_spill] sm:$0xff] }
 0x15e   : > { %v557_v42 = vmul.f32 %v555_v63, %v7695_v54  ;;  %v518_v56 = vadd.f32 %v517_v14, %v478_v26  ;;  %v735_v13 = vadd.f32 %v734_v19, %v705_v21  ;;  %v779_v47 = vsel %vm514_vm10, %v5564_v17, %v778_v8 }
 0x15f   : > { %v805_v23 = vpop.permute.xlu0 %804  ;;  %v617_v10 = vmul.f32 %v615_v36, %v7697_v34  ;;  %v855_v58 = vrot.slane %v5571_v9, 4  ;;  %v793_v61 = vperm.slane %v5582_v39, %v5566_v45  ;;  %v781_v3 = vmul.f32 %v779_v47, %v763_v30 }
 0x160   : > { %940 = vrot.lane.b32.xlu1 %v932_v43, %s5080_s26  ;;  %v807_v52 = vrot.slane %v805_v23, 4  ;;  %v558_v31 = vadd.f32 %v557_v42, %v518_v56  ;;  %v752_v43 = vadd.f32 %v751_v15, %v735_v13  ;;  %v820_v33 = vperm.slane %v5629_v44, %v5566_v45 }
 0x161   : > { %v5666_v24 = vpop.permute.xlu1 %836 }
 0x162   : > { %v808_v37 = vsel %vm347_vm1, %v806_v41, %v807_v52  ;;  %v782_v29 = vadd.f32 %v781_v3, %v752_v43  ;;  %v842_v36 = vperm.slane %v5666_v24, %v5566_v45  ;;  %v578_v24 = vadd.f32 %v577_v53, %v558_v31 }
 0x163   : > { %v809_v35 = vsel %vm554_vm11, %v5555_v11, %v808_v37  ;;  %v5095_v53 = vmov 21   ;;  %v5096_v31 = vmov 25  }
 0x164   : > { %v811_v63 = vmul.f32 %v809_v35, %v793_v61  ;;  %v618_v61 = vadd.f32 %v617_v10, %v578_v24  ;;  %v7701_v10 = vld [vmem:[#allocation5_spill] sm:$0xff] }
 0x166   : > { %v812_v56 = vadd.f32 %v811_v63, %v782_v29  ;;  %v7702_v63 = vld [vmem:[#allocation7_spill] sm:$0xff]  ;;  %v7704_v29 = vperm.slane %v5614_v38, 0 }
 0x167   : > { %v824_v28 = vpop.permute.xlu0 %823 }
 0x168   : > { %v826_v22 = vrot.slane %v824_v28, 4  ;;  %970 = vrot.lane.b32.xlu1 %v962_v60, %s5083_s9 }
 0x169   : > { %v865_v32 = vpop.permute.xlu1 %864 }
 0x16a   : > { %v827_v18 = vsel %vm347_vm1, %v825_v2, %v826_v22  ;;  %v5707_v23 = vsel %vm318_vm0, %v865_v32, %v5608_v1  ;;  %v5710_v17 = vsel %vm318_vm0, 0.0, %v865_v32  ;;  %v7699_v22 = vld [vmem:[#allocation4_spill] sm:$0xff]  ;;  %v7700_v32 = vld [vmem:[#allocation3_spill] sm:$0xff] }
 0x16b   : > { %v828_v39 = vsel %vm574_vm12, %v5559_v16, %v827_v18  ;;  %v901_v51 = vperm.slane %v5707_v23, 0  ;;  %v996_v11 = vmul.f32 %v5710_v17, %v5331_v27  ;;  %v997_v7 = vmul.f32 %v5707_v23, %v5419_v48 }
 0x16c   : > { %v919_v1 = vmul.f32 %v5710_v17, %v5358_v46  ;;  %v920_v26 = vmul.f32 %v5707_v23, %v5390_v62  ;;  %v900_v44 = vperm.slane %v5710_v17, 0  ;;  %v874_v16 = vmul.f32 %v5710_v17, %v5281_v5 }
 0x16d   : > { %v906_v20 = vrot.slane %v901_v51, 4  ;;  %v875_v19 = vmul.f32 %v5707_v23, %v5297_v12  ;;  %v830_v50 = vmul.f32 %v828_v39, %v820_v33  ;;  %v1008_v52 = vperm.slane %v997_v7, 0 }
 0x16e   : > { %v931_v49 = vperm.slane %v920_v26, 0  ;;  %v1007_v42 = vperm.slane %v996_v11, 0  ;;  %v930_v0 = vperm.slane %v919_v1, 0  ;;  %v950_v41 = vmul.f32 %v5707_v23, %v7698_v6  ;;  %v7703_v26 = vld [vmem:[#allocation10_spill] sm:$0xff] }
 0x16f   : > { %v854_v14 = vpop.permute.xlu0 %853  ;;  %v5731_v54 = vsel %vm347_vm1, %v900_v44, %v906_v20  ;;  %v885_v21 = vperm.slane %v875_v19, 0  ;;  %v1013_v25 = vrot.slane %v1008_v52, 4  ;;  %v884_v8 = vperm.slane %v874_v16, 0 }
 0x170   : > { %v856_v57 = vrot.slane %v854_v14, 4  ;;  %908 = vrot.lane.b32.xlu2 %v5731_v54, %s5078_s24  ;;  %v936_v59 = vrot.slane %v931_v49, 4  ;;  %v961_v15 = vperm.slane %v950_v41, 0  ;;  %v831_v2 = vadd.f32 %v830_v50, %v812_v56  ;;  %v7705_v50 = vld [vmem:[#allocation9_spill] sm:$0xff]  ;;  %v7706_v49 = vld [vmem:[#allocation6_spill] sm:$0xff]  ;;  %v7708_v41 = vld [vmem:[#allocation11_spill] sm:$0xff] }
 0x171   : > { %v888_v13 = vrot.slane %v885_v21, 4  ;;  %v1014_v37 = vsel %vm347_vm1, %v1007_v42, %v1013_v25  ;;  %v1028_v33 = vmul.f32 %v5614_v38, %v7701_v10  ;;  %v5097_v39 = vmov 22  }
 0x172   : > { %v857_v30 = vsel %vm347_vm1, %v855_v58, %v856_v57  ;;  %v937_v60 = vsel %vm347_vm1, %v930_v0, %v936_v59  ;;  %1015 = vrot.lane.b32.xlu1 %v1014_v37, %s5084_s10  ;;  %v949_v58 = vmul.f32 %v5710_v17, %v7699_v22  ;;  %v966_v35 = vrot.slane %v961_v15, 4  ;;  %v7707_v57 = vld [vmem:[#allocation12_spill] sm:$0xff] }
 0x173   : > { %v858_v28 = vsel %vm614_vm13, %v5571_v9, %v857_v30  ;;  %938 = vrot.lane.b32.xlu0 %v937_v60, %s5080_s26  ;;  %v5747_v34 = vsel %vm347_vm1, %v884_v8, %v888_v13  ;;  %v1039_v51 = vperm.slane %v1028_v33, 0  ;;  %v5098_v11 = vmov 26   ;;  %v894_v30 = vpop.permute.xlu1 %893 }
 0x174   : > { %v860_v47 = vmul.f32 %v858_v28, %v842_v36  ;;  %v960_v3 = vperm.slane %v949_v58, 0  ;;  %v998_v7 = vmul.f32 %v5614_v38, %v7702_v63  ;;  %v5099_v1 = vmov 27  }
 0x175   : > { %v1027_v44 = vmul.f32 %v5707_v23, %v7703_v26  ;;  %v1105_v16 = vrot.slane %v5279_v4, 3  ;;  %v1026_v52 = vmul.f32 %v5710_v17, %v7705_v50  ;;  %v1077_v14 = vmul.f32 %v5614_v38, %v7706_v49  ;;  %v5789_v38 = vld [vmem:[%s7635_s1] sm:$0xf] }
 0x176   : > { %v861_v43 = vadd.f32 %v860_v47, %v831_v2  ;;  %v967_v18 = vsel %vm347_vm1, %v960_v3, %v966_v35  ;;  %v1009_v20 = vperm.slane %v998_v7, 0  ;;  %v1076_v25 = vmul.f32 %v5707_v23, %v7707_v57  ;;  %v5797_v23 = vld [vmem:[%s5276_s15 + $0x8] sm:$0xf] }
 0x177   : > { %v1038_v19 = vperm.slane %v1027_v44, 0  ;;  %v1037_v0 = vperm.slane %v1026_v52, 0  ;;  %v1088_v21 = vperm.slane %v1077_v14, 0  ;;  %v1075_v56 = vmul.f32 %v5710_v17, %v7708_v41  ;;  %v878_v17 = vpop.permute.xlu0 %877 }
 0x178   : > { %923 = vperm.xlu2 %4885, %v7700_v32   ;;  %v5752_v9 = vadd.f32 %v861_v43, %v618_v61  ;;  %v1087_v59 = vperm.slane %v1076_v25, 0  ;;  %v5100_v3 = vmov 28   ;;  %v5101_v44 = vmov 29  }
 0x179   : > { %v1043_v42 = vrot.slane %v1038_v19, 4  ;;  %v1086_v8 = vperm.slane %v1075_v56, 0  ;;  %v883_v52 = vperm.slane %v878_v17, %v5566_v45 }
 0x17a   : > { %1030 = vperm.xlu1 %4889, %v7700_v32   ;;  %v1092_v36 = vrot.slane %v1087_v59, 4 }
 0x17b   : > { %968 = vrot.lane.b32.xlu0 %v967_v18, %s5083_s9  ;;  %v1044_v4 = vsel %vm347_vm1, %v1037_v0, %v1043_v42 }
 0x17c   : > { %v1093_v13 = vsel %vm347_vm1, %v1086_v8, %v1092_v36  ;;  %v891_v8 = vmul.f32 %v5747_v34, %v883_v52 }
 0x180   : > { %4886 = vset.pattern.permute.xlu2 %v5095_v53 }
 0x181   : > { %953 = vperm.xlu2 %4886, %v7700_v32  }
 0x182   : > { %4890 = vset.pattern.permute.xlu1 %v5096_v31 }
 0x183   : > { %1000 = vperm.xlu0 %4888, %v7700_v32   ;;  %1057 = vperm.xlu1 %4890, %v7700_v32  }
 0x189   : > { %4887 = vset.pattern.permute.xlu2 %v5097_v39 }
 0x18a   : > { %980 = vperm.xlu2 %4887, %v7700_v32  }
 0x18b   : > { %1047 = vrot.lane.b32.xlu0 %v1039_v51, %s5081_s27  ;;  %4891 = vset.pattern.permute.xlu1 %v5098_v11 }
 0x18c   : > { %4892 = vset.pattern.permute.xlu0 %v5099_v1  ;;  %1079 = vperm.xlu1 %4891, %v7700_v32  }
 0x192   : > { %1017 = vrot.lane.b32.xlu2 %v1009_v20, %s5084_s10  ;;  %v899_v20 = vperm.slane %v894_v30, %v5566_v45 }
 0x193   : > { %1066 = vrot.lane.b32.xlu0 %v7704_v29, %s5079_s25  ;;  %4894 = vset.pattern.permute.xlu2 %v5101_v44 }
 0x194   : > { %1107 = vrot.lane.b32.xlu1 %v1105_v16, %s5060_s16 }
 0x195   : > { %4893 = vset.pattern.permute.xlu1 %v5100_v3 }
 0x19a   : > { %1045 = vrot.lane.b32.xlu2 %v1044_v4, %s5081_s27 }
 0x19b   : > { %1096 = vrot.lane.b32.xlu0 %v1088_v21, %s5082_s28  ;;  %v988_v21 = vperm.slane %v5797_v23, 2 }
 0x19c   : > { %1136 = vperm.xlu1 %4893, %v5789_v38  }
 0x1a2   : > { %1064 = vrot.lane.b32.xlu2 %v5731_v54, %s5079_s25  ;;  %v1106_v54 = vrot.slane %v5797_v23, 3 }
 0x1a3   : > { %1120 = vperm.xlu0 %4892, %v5789_v38  }
 0x1aa   : > { %1094 = vrot.lane.b32.xlu2 %v1093_v13, %s5082_s28 }
 0x1b2   : > { %1109 = vrot.lane.b32.xlu2 %v1106_v54, %s5060_s16 }
 0x1ca   : > { %v909_v37 = vpop.permute.xlu2 %908  ;;  %v911_v60 = vpop.permute.xlu1 %910 }
 0x1cb   : > { %v912_v18 = vrot.slane %v909_v37, 4  ;;  %v913_v53 = vrot.slane %v911_v60, 4 }
 0x1cd   : > { %v914_v11 = vsel %vm347_vm1, %v912_v18, %v913_v53  ;;  %v5102_v53 = vmov 32  }
 0x1ce   : > { %v915_v29 = vsel %vm374_vm7, %v909_v37, %v914_v11  ;;  %v5821_v37 = vld [vmem:[%s5276_s15] sm:$0xf]  ;;  %4897 = vset.pattern.permute.xlu0 %v5102_v53 }
 0x1cf   : > { %v917_v25 = vmul.f32 %v915_v29, %v899_v20  ;;  %v987_v60 = vperm.slane %v5821_v37, 2 }
 0x1d2   : > { %v924_v15 = vpop.permute.xlu2 %923  ;;  %v941_v28 = vpop.permute.xlu1 %940 }
 0x1d3   : > { %v943_v7 = vrot.slane %v941_v28, 4  ;;  %v929_v59 = vperm.slane %v924_v15, %v5566_v45  ;;  %v991_v28 = vrot.slane %v988_v21, 4 }
 0x1da   : > { %v971_v2 = vpop.permute.xlu1 %970 }
 0x1db   : > { %v954_v24 = vpop.permute.xlu2 %953  ;;  %v973_v16 = vrot.slane %v971_v2, 4  ;;  %v918_v2 = vadd.f32 %v917_v25, %v891_v8 }
 0x1dc   : > { %v959_v13 = vperm.slane %v954_v24, %v5566_v45  ;;  %v992_v24 = vsel %vm347_vm1, %v987_v60, %v991_v28 }
 0x1e4   : > { %v981_v47 = vpop.permute.xlu2 %980  ;;  %v1016_v61 = vpop.permute.xlu1 %1015 }
 0x1e5   : > { %v939_v58 = vpop.permute.xlu0 %938  ;;  %v1019_v17 = vrot.slane %v1016_v61, 4  ;;  %v986_v15 = vperm.slane %v981_v47, %v5566_v45 }
 0x1e6   : > { %v942_v39 = vrot.slane %v939_v58, 4 }
 0x1e7   : > { %v994_v20 = vmul.f32 %v992_v24, %v986_v15 }
 0x1e8   : > { %v944_v19 = vsel %vm347_vm1, %v942_v39, %v943_v7 }
 0x1e9   : > { %v945_v0 = vsel %vm417_vm8, %v939_v58, %v944_v19 }
 0x1ea   : > { %v947_v54 = vmul.f32 %v945_v0, %v929_v59 }
 0x1ec   : > { %v1018_v43 = vpop.permute.xlu2 %1017  ;;  %v5801_v32 = vpop.permute.xlu1 %1030  ;;  %v948_v3 = vadd.f32 %v947_v54, %v918_v2 }
 0x1ed   : > { %v969_v35 = vpop.permute.xlu0 %968  ;;  %v1020_v30 = vrot.slane %v1018_v43, 4 }
 0x1ee   : > { %v972_v1 = vrot.slane %v969_v35, 4 }
 0x1f0   : > { %v974_v14 = vsel %vm347_vm1, %v972_v1, %v973_v16 }
 0x1f1   : > { %v975_v56 = vsel %vm457_vm9, %v969_v35, %v974_v14  ;;  %v1021_v35 = vsel %vm347_vm1, %v1019_v17, %v1020_v30  ;;  %v1036_v14 = vperm.slane %v5801_v32, %v5566_v45 }
 0x1f2   : > { %v977_v58 = vmul.f32 %v975_v56, %v959_v13  ;;  %v1022_v1 = vsel %vm514_vm10, %v1016_v61, %v1021_v35 }
 0x1f4   : > { %v1046_v31 = vpop.permute.xlu2 %1045  ;;  %v978_v11 = vadd.f32 %v977_v58, %v948_v3 }
 0x1f5   : > { %v1001_v33 = vpop.permute.xlu0 %1000  ;;  %v5804_v51 = vpop.permute.xlu1 %1057  ;;  %v1049_v44 = vrot.slane %v1046_v31, 4 }
 0x1f6   : > { %v1006_v18 = vperm.slane %v1001_v33, %v5566_v45  ;;  %v995_v52 = vadd.f32 %v994_v20, %v978_v11  ;;  %v1063_v0 = vperm.slane %v5804_v51, %v5566_v45 }
 0x1f8   : > { %v1024_v16 = vmul.f32 %v1022_v1, %v1006_v18 }
 0x1fa   : > { %v1025_v61 = vadd.f32 %v1024_v16, %v995_v52  ;;  %v5103_v52 = vmov 33  }
 0x1fb   : > { %4898 = vset.pattern.permute.xlu1 %v5103_v52 }
 0x1fc   : > { %v1065_v42 = vpop.permute.xlu2 %1064 }
 0x1fd   : > { %v1048_v4 = vpop.permute.xlu0 %1047  ;;  %v1068_v19 = vrot.slane %v1065_v42, 4 }
 0x1fe   : > { %v5816_v36 = vpop.permute.xlu1 %1079  ;;  %v1050_v43 = vrot.slane %v1048_v4, 4 }
 0x200   : > { %v1051_v29 = vsel %vm347_vm1, %v1049_v44, %v1050_v43 }
 0x201   : > { %v1052_v4 = vsel %vm554_vm11, %v1046_v31, %v1051_v29 }
 0x202   : > { %v1054_v2 = vmul.f32 %v1052_v4, %v1036_v14 }
 0x204   : > { %v1095_v34 = vpop.permute.xlu2 %1094  ;;  %v1055_v1 = vadd.f32 %v1054_v2, %v1025_v61 }
 0x205   : > { %v1067_v39 = vpop.permute.xlu0 %1066  ;;  %v1098_v25 = vrot.slane %v1095_v34, 4 }
 0x206   : > { %v1069_v7 = vrot.slane %v1067_v39, 4  ;;  %v1108_v47 = vpop.permute.xlu1 %1107 }
 0x207   : > { %v5836_v21 = vsel %vm318_vm0, 0.0, %v1108_v47 }
 0x208   : > { %v1070_v33 = vsel %vm347_vm1, %v1068_v19, %v1069_v7  ;;  %v1117_v56 = vmul.f32 %v5836_v21, %v5281_v5  ;;  %v1143_v51 = vperm.slane %v5836_v21, 0  ;;  %v1162_v17 = vmul.f32 %v5836_v21, %v5358_v46 }
 0x209   : > { %v1071_v8 = vsel %vm574_vm12, %v1065_v42, %v1070_v33  ;;  %v1085_v42 = vperm.slane %v5816_v36, %v5566_v45  ;;  %v1192_v14 = vmul.f32 %v5836_v21, %v7699_v22 }
 0x20a   : > { %v1127_v35 = vperm.slane %v1117_v56, 0  ;;  %v1073_v53 = vmul.f32 %v1071_v8, %v1063_v0  ;;  %v1173_v20 = vperm.slane %v1162_v17, 0  ;;  %v5105_v17 = vmov 31  }
 0x20c   : > { %v1110_v59 = vpop.permute.xlu2 %1109  ;;  %v1074_v19 = vadd.f32 %v1073_v53, %v1055_v1  ;;  %v1269_v53 = vmul.f32 %v5836_v21, %v7705_v50 }
 0x20d   : > { %v1097_v13 = vpop.permute.xlu0 %1096  ;;  %v5843_v54 = vsel %vm318_vm0, %v1108_v47, %v1110_v59  ;;  %v5846_v32 = vsel %vm318_vm0, %v1110_v59, 0.0  ;;  %v1203_v59 = vperm.slane %v1192_v14, 0 }
 0x20e   : > { %v1099_v30 = vrot.slane %v1097_v13, 4  ;;  %v1145_v60 = vperm.slane %v5846_v32, 0  ;;  %v1144_v31 = vperm.slane %v5843_v54, 0  ;;  %v1118_v28 = vmul.f32 %v5843_v54, %v5297_v12 }
 0x20f   : > { %v1163_v58 = vmul.f32 %v5843_v54, %v5390_v62  ;;  %v1193_v36 = vmul.f32 %v5843_v54, %v7698_v6  ;;  %v1164_v7 = vmul.f32 %v5846_v32, %v5352_v40  ;;  %v1240_v56 = vmul.f32 %v5843_v54, %v5419_v48 }
 0x210   : > { %v1100_v3 = vsel %vm347_vm1, %v1098_v25, %v1099_v30  ;;  %1153 = vrot.lane.b32.xlu1 %v1145_v60, %s5078_s24  ;;  %v1149_v15 = vrot.slane %v1144_v31, 4  ;;  %v1128_v18 = vperm.slane %v1118_v28, 0  ;;  %v1194_v25 = vmul.f32 %v5846_v32, %v5375_v55 }
 0x211   : > { %v1101_v24 = vsel %vm614_vm13, %v1095_v34, %v1100_v3  ;;  %v1174_v43 = vperm.slane %v1163_v58, 0  ;;  %v1204_v29 = vperm.slane %v1193_v36, 0  ;;  %v1175_v33 = vperm.slane %v1164_v7, 0 }
 0x212   : > { %v5867_v39 = vsel %vm347_vm1, %v1143_v51, %v1149_v15  ;;  %v1131_v11 = vrot.slane %v1128_v18, 4  ;;  %v1103_v44 = vmul.f32 %v1101_v24, %v1085_v42  ;;  %v1205_v13 = vperm.slane %v1194_v25, 0 }
 0x213   : > { %1151 = vrot.lane.b32.xlu2 %v5867_v39, %s5078_s24  ;;  %v1179_v16 = vrot.slane %v1174_v43, 4  ;;  %v1209_v61 = vrot.slane %v1204_v29, 4  ;;  %v1251_v51 = vperm.slane %v1240_v56, 0  ;;  %v5104_v30 = vmov 30  }
 0x214   : > { %v5874_v34 = vsel %vm347_vm1, %v1127_v35, %v1131_v11  ;;  %v1104_v0 = vadd.f32 %v1103_v44, %v1074_v19  ;;  %v1271_v42 = vmul.f32 %v5846_v32, %v7701_v10  ;;  %v1241_v3 = vmul.f32 %v5846_v32, %v7702_v63 }
 0x215   : > { %v1180_v47 = vsel %vm347_vm1, %v1173_v20, %v1179_v16  ;;  %v1210_v8 = vsel %vm347_vm1, %v1203_v59, %v1209_v61  ;;  %v1256_v31 = vrot.slane %v1251_v51, 4  ;;  %v1270_v15 = vmul.f32 %v5843_v54, %v7703_v26  ;;  %v1351_v16 = vld [vmem:[%s7636_s2] sm:$0xf]  ;;  %v1121_v14 = vpop.permute.xlu0 %1120 }
 0x216   : > { %1181 = vrot.lane.b32.xlu0 %v1180_v47, %s5080_s26  ;;  %v5882_v4 = vadd.f32 %v5752_v9, %v1104_v0  ;;  %v1239_v9 = vmul.f32 %v5836_v21, %v5331_v27  ;;  %v1282_v58 = vperm.slane %v1271_v42, 0  ;;  %v1252_v35 = vperm.slane %v1241_v3, 0 }
 0x217   : > { %v1281_v18 = vperm.slane %v1270_v15, 0  ;;  %v5106_v24 = vmov 34   ;;  %v1320_v43 = vmul.f32 %v5846_v32, %v7706_v49  ;;  %v1280_v11 = vperm.slane %v1269_v53, 0 }
 0x218   : > { %1183 = vrot.lane.b32.xlu1 %v1175_v33, %s5080_s26  ;;  %v1250_v28 = vperm.slane %v1239_v9, 0  ;;  %v5107_v44 = vmov 35   ;;  %v1318_v32 = vmul.f32 %v5836_v21, %v7708_v41  ;;  %v7709_v47 = vmov 0   ;;  %v1137_v33 = vpop.permute.xlu1 %1136 }
 0x219   : > { %v1286_v36 = vrot.slane %v1281_v18, 4  ;;  %v1331_v7 = vperm.slane %v1320_v43, 0  ;;  %v1231_v53 = vperm.slane %v5797_v23, 3  ;;  %v1142_v43 = vperm.slane %v1137_v33, %v5566_v45 }
 0x21a   : > { %v1257_v2 = vsel %vm347_vm1, %v1250_v28, %v1256_v31  ;;  %v1329_v29 = vperm.slane %v1318_v32, 0  ;;  %v1230_v32 = vperm.slane %v5821_v37, 3 }
 0x21b   : > { %1166 = vperm.xlu2 %4894, %v5789_v38   ;;  %v1287_v1 = vsel %vm347_vm1, %v1280_v11, %v1286_v36 }
 0x21e   : > { %1211 = vrot.lane.b32.xlu0 %v1210_v8, %s5083_s9 }
 0x220   : > { %1213 = vrot.lane.b32.xlu1 %v1205_v13, %s5083_s9 }
 0x223   : > { %4895 = vset.pattern.permute.xlu2 %v5104_v30 }
 0x224   : > { %1196 = vperm.xlu2 %4895, %v5789_v38  }
 0x226   : > { %1243 = vperm.xlu0 %4897, %v5789_v38  }
 0x228   : > { %1258 = vrot.lane.b32.xlu1 %v1257_v2, %s5084_s10 }
 0x22c   : > { %4896 = vset.pattern.permute.xlu2 %v5105_v17 }
 0x22d   : > { %1223 = vperm.xlu2 %4896, %v5789_v38  }
 0x22e   : > { %1290 = vrot.lane.b32.xlu0 %v1282_v58, %s5081_s27 }
 0x230   : > { %1273 = vperm.xlu1 %4898, %v5789_v38  }
 0x235   : > { %1260 = vrot.lane.b32.xlu2 %v1252_v35, %s5084_s10  ;;  %v1126_v35 = vperm.slane %v1121_v14, %v5566_v45 }
 0x236   : > { %1309 = vrot.lane.b32.xlu0 %v1145_v60, %s5079_s25  ;;  %v1319_v60 = vmul.f32 %v5843_v54, %v7707_v57 }
 0x238   : > { %4899 = vset.pattern.permute.xlu1 %v5106_v24  ;;  %v1330_v20 = vperm.slane %v1319_v60, 0 }
 0x239   : > { %1300 = vperm.xlu1 %4899, %v5789_v38  }
 0x23a   : > { %v1335_v19 = vrot.slane %v1330_v20, 4  ;;  %v1134_v20 = vmul.f32 %v5874_v34, %v1126_v35 }
 0x23c   : > { %v1336_v54 = vsel %vm347_vm1, %v1329_v29, %v1335_v19 }
 0x23d   : > { %1288 = vrot.lane.b32.xlu2 %v1287_v1, %s5081_s27 }
 0x23e   : > { %1339 = vrot.lane.b32.xlu0 %v1331_v7, %s5082_s28 }
 0x241   : > { %4900 = vset.pattern.permute.xlu1 %v5107_v44 }
 0x242   : > { %1322 = vperm.xlu1 %4900, %v5789_v38  }
 0x245   : > { %1307 = vrot.lane.b32.xlu2 %v5867_v39, %s5079_s25 }
 0x24a   : > { %4901 = vset.pattern.permute.xlu1 %v7709_v47 }
 0x24b   : > { %1354 = vperm.xlu1 %4901, %v1351_v16   ;;  %v1234_v16 = vrot.slane %v1231_v53, 4 }
 0x24d   : > { %1337 = vrot.lane.b32.xlu2 %v1336_v54, %s5082_s28  ;;  %v1235_v34 = vsel %vm347_vm1, %v1230_v32, %v1234_v16 }
 0x26d   : > { %v1152_v38 = vpop.permute.xlu2 %1151 }
 0x26e   : > { %v1155_v31 = vrot.slane %v1152_v38, 4 }
 0x275   : > { %v1167_v52 = vpop.permute.xlu2 %1166 }
 0x276   : > { %v1172_v1 = vperm.slane %v1167_v52, %v5566_v45 }
 0x27e   : > { %v1197_v39 = vpop.permute.xlu2 %1196 }
 0x27f   : > { %v1202_v23 = vperm.slane %v1197_v39, %v5566_v45 }
 0x282   : > { %v1154_v0 = vpop.permute.xlu1 %1153 }
 0x283   : > { %v1156_v30 = vrot.slane %v1154_v0, 4 }
 0x285   : > { %v1157_v2 = vsel %vm347_vm1, %v1155_v31, %v1156_v30 }
 0x286   : > { %v1158_v18 = vsel %vm374_vm7, %v1152_v38, %v1157_v2 }
 0x287   : > { %v1224_v21 = vpop.permute.xlu2 %1223  ;;  %v1160_v60 = vmul.f32 %v1158_v18, %v1142_v43 }
 0x288   : > { %v1182_v61 = vpop.permute.xlu0 %1181  ;;  %v1229_v33 = vperm.slane %v1224_v21, %v5566_v45 }
 0x289   : > { %v1185_v42 = vrot.slane %v1182_v61, 4  ;;  %v1161_v0 = vadd.f32 %v1160_v60, %v1134_v20 }
 0x28a   : > { %v1184_v25 = vpop.permute.xlu1 %1183  ;;  %v1237_v31 = vmul.f32 %v1235_v34, %v1229_v33 }
 0x28b   : > { %v1186_v28 = vrot.slane %v1184_v25, 4 }
 0x28d   : > { %v1187_v3 = vsel %vm347_vm1, %v1185_v42, %v1186_v28 }
 0x28e   : > { %v1188_v11 = vsel %vm417_vm8, %v1182_v61, %v1187_v3 }
 0x28f   : > { %v1261_v56 = vpop.permute.xlu2 %1260  ;;  %v1190_v29 = vmul.f32 %v1188_v11, %v1172_v1 }
 0x290   : > { %v1212_v59 = vpop.permute.xlu0 %1211  ;;  %v1263_v54 = vrot.slane %v1261_v56, 4 }
 0x291   : > { %v1215_v15 = vrot.slane %v1212_v59, 4 }
 0x292   : > { %v1214_v8 = vpop.permute.xlu1 %1213 }
 0x293   : > { %v1216_v17 = vrot.slane %v1214_v8, 4  ;;  %v1191_v8 = vadd.f32 %v1190_v29, %v1161_v0 }
 0x295   : > { %v1217_v36 = vsel %vm347_vm1, %v1215_v15, %v1216_v17 }
 0x296   : > { %v1218_v19 = vsel %vm457_vm9, %v1212_v59, %v1217_v36 }
 0x297   : > { %v1289_v51 = vpop.permute.xlu2 %1288  ;;  %v1220_v61 = vmul.f32 %v1218_v19, %v1202_v23  ;;  %v5108_v19 = vmov 37   ;;  %v5109_v23 = vmov 36  }
 0x298   : > { %v1244_v13 = vpop.permute.xlu0 %1243  ;;  %v1292_v52 = vrot.slane %v1289_v51, 4  ;;  %4903 = vset.pattern.permute.xlu1 %v5108_v19  ;;  %4902 = vset.pattern.permute.xlu0 %v5109_v23  ;;  %v5116_v23 = vmov 42  }
 0x299   : > { %v1249_v37 = vperm.slane %v1244_v13, %v5566_v45  ;;  %v1221_v28 = vadd.f32 %v1220_v61, %v1191_v8  ;;  %v1412_v8 = vld [vmem:[%s5276_s15 + $0x8] sm:$0xf0] }
 0x29a   : > { %v1259_v9 = vpop.permute.xlu1 %1258 }
 0x29b   : > { %v1262_v44 = vrot.slane %v1259_v9, 4  ;;  %v1238_v35 = vadd.f32 %v1237_v31, %v1221_v28 }
 0x29d   : > { %v1264_v25 = vsel %vm347_vm1, %v1262_v44, %v1263_v54 }
 0x29e   : > { %v1265_v56 = vsel %vm514_vm10, %v1259_v9, %v1264_v25 }
 0x29f   : > { %v1308_v7 = vpop.permute.xlu2 %1307 }
 0x2a0   : > { %v1291_v58 = vpop.permute.xlu0 %1290  ;;  %v1311_v21 = vrot.slane %v1308_v7, 4 }
 0x2a1   : > { %v1293_v38 = vrot.slane %v1291_v58, 4  ;;  %v1267_v58 = vmul.f32 %v1265_v56, %v1249_v37  ;;  %v1411_v37 = vld [vmem:[%s5276_s15] sm:$0xf0] }
 0x2a2   : > { %v1274_v24 = vpop.permute.xlu1 %1273 }
 0x2a3   : > { %v1294_v59 = vsel %vm347_vm1, %v1292_v52, %v1293_v38  ;;  %v1279_v2 = vperm.slane %v1274_v24, %v5566_v45  ;;  %v1268_v36 = vadd.f32 %v1267_v58, %v1238_v35  ;;  %v1363_v38 = vld [vmem:[%s7638_s4] sm:$0xff] }
 0x2a4   : > { %v1295_v42 = vsel %vm554_vm11, %v1289_v51, %v1294_v59 }
 0x2a5   : > { %v1297_v18 = vmul.f32 %v1295_v42, %v1279_v2 }
 0x2a7   : > { %v1338_v17 = vpop.permute.xlu2 %1337  ;;  %v1298_v60 = vadd.f32 %v1297_v18, %v1268_v36 }
 0x2a8   : > { %v1310_v14 = vpop.permute.xlu0 %1309  ;;  %v1341_v53 = vrot.slane %v1338_v17, 4 }
 0x2a9   : > { %v1312_v30 = vrot.slane %v1310_v14, 4  ;;  %v5110_v14 = vmov 39  }
 0x2aa   : > { %4905 = vset.pattern.permute.xlu2 %v5110_v14 }
 0x2ab   : > { %v1301_v39 = vpop.permute.xlu1 %1300  ;;  %v1313_v3 = vsel %vm347_vm1, %v1311_v21, %v1312_v30 }
 0x2ac   : > { %v1306_v15 = vperm.slane %v1301_v39, %v5566_v45  ;;  %v1314_v9 = vsel %vm574_vm12, %v1308_v7, %v1313_v3 }
 0x2ae   : > { %v1316_v11 = vmul.f32 %v1314_v9, %v1306_v15 }
 0x2b0   : > { %v1340_v13 = vpop.permute.xlu0 %1339  ;;  %v1317_v20 = vadd.f32 %v1316_v11, %v1298_v60  ;;  %v5997_v11 = vld [vmem:[%s7635_s1] sm:$0xf]  ;;  %v5111_v60 = vmov 38  }
 0x2b1   : > { %v1342_v43 = vrot.slane %v1340_v13, 4 }
 0x2b3   : > { %v1343_v1 = vsel %vm347_vm1, %v1341_v53, %v1342_v43 }
 0x2b4   : > { %v1323_v24 = vpop.permute.xlu1 %1322  ;;  %v1344_v44 = vsel %vm614_vm13, %v1338_v17, %v1343_v1 }
 0x2b5   : > { %v1328_v51 = vperm.slane %v1323_v24, %v5566_v45 }
 0x2b7   : > { %v1346_v32 = vmul.f32 %v1344_v44, %v1328_v51  ;;  %v5112_v51 = vmov 40  }
 0x2b9   : > { %v1347_v16 = vadd.f32 %v1346_v32, %v1317_v20  ;;  %v5113_v20 = vmov 41   ;;  %v5114_v32 = vmov 43  }
 0x2bb   : > { %v1350_v29 = vadd.f32 %v5882_v4, %v1347_v16  ;;  %v5115_v16 = vmov 44  }
 0x2bd   : > { %v1355_v7 = vpop.permute.xlu1 %1354 }
 0x2be   : > { %v1359_v54 = vperm.slane %v1355_v7, %v5566_v45 }
 0x2c0   : > { %v5964_v33 = vadd.f32 %v1359_v54, %v1350_v29 }
 0x2c2   : > { %7710 = vst [vmem:[#allocation8_spill] sm:$0xff] %v5964_v33  ;;  %v1364_v0 = vmul.f32 %v1363_v38, %v5964_v33 }
 0x2c4   : > { %1366 = vst [vmem:[#allocation1] ss:$2 sm:$0xff] %v1364_v0 }
 0x2cb   : > { %v1367_v61 = vld.sshfl [vmem:[#allocation1] sm:$0xff pattern:$0x75316420]  ;;  %v1368_v52 = vld.sshfl [vmem:[#allocation1 + $0x8] sm:$0xff pattern:$0x75316420] }
 0x2cc   : > { %1415 = vst [vmem:[#allocation1 + $0x1] ss:$2 sm:$0xff] %v5964_v33  ;;  %v1371_v4 = vsel %vm347_vm1, %v1367_v61, 0.0  ;;  %v1372_v25 = vsel %vm347_vm1, %v1368_v52, 0.0 }
 0x2cd   : > { %v1373_v34 = vadd.f32 %v1372_v25, %v1371_v4 }
 0x2cf   : > { %1374 = vadd.xlane.f32.xlu2 %v1373_v34 }
 0x2d3   : > { %v1416_v59 = vld.sshfl [vmem:[#allocation1] sm:$0xff pattern:$0x75316420]  ;;  %v1417_v30 = vld.sshfl [vmem:[#allocation1 + $0x8] sm:$0xff pattern:$0x75316420] }
 0x2d4   : > { %v5972_v39 = vadd.f32 %v1417_v30, %v1412_v8  ;;  %v5974_v56 = vadd.f32 %v1416_v59, %v1411_v37 }
 0x2d6   : > { %v1425_v31 = vrot.slane %v5972_v39, 4  ;;  %v1424_v28 = vrot.slane %v5974_v56, 4  ;;  %v1552_v21 = vperm.slane %v5972_v39, 4  ;;  %v1795_v2 = vperm.slane %v5972_v39, 5 }
 0x2d7   : > { %v1551_v42 = vperm.slane %v5974_v56, 4  ;;  %v2038_v58 = vperm.slane %v5972_v39, 6  ;;  %v1794_v3 = vperm.slane %v5974_v56, 5  ;;  %v2281_v13 = vperm.slane %v5972_v39, 7 }
 0x2d8   : > { %1428 = vrot.lane.b32.xlu1 %v1425_v31, %s5060_s16  ;;  %1426 = vrot.lane.b32.xlu0 %v1424_v28, %s5060_s16  ;;  %v1555_v17 = vrot.slane %v1552_v21, 4  ;;  %v1798_v15 = vrot.slane %v1795_v2, 4  ;;  %v2037_v18 = vperm.slane %v5974_v56, 6  ;;  %v2280_v9 = vperm.slane %v5974_v56, 7 }
 0x2d9   : > { %v2041_v53 = vrot.slane %v2038_v58, 4  ;;  %v2284_v36 = vrot.slane %v2281_v13, 4  ;;  %v1670_v44 = vrot.slane %v5972_v39, 5  ;;  %v1669_v19 = vrot.slane %v5974_v56, 5 }
 0x2da   : > { %v5987_v35 = vsel %vm347_vm1, %v1551_v42, %v1555_v17  ;;  %v5991_v43 = vsel %vm347_vm1, %v1794_v3, %v1798_v15  ;;  %v5117_v2 = vmov 46   ;;  %v5118_v15 = vmov 45  }
 0x2db   : > { %v6000_v1 = vsel %vm347_vm1, %v2037_v18, %v2041_v53  ;;  %v6003_v24 = vsel %vm347_vm1, %v2280_v9, %v2284_v36 }
 0x2e0   : > { %1457 = vperm.xlu1 %4903, %v5997_v11   ;;  %1441 = vperm.xlu0 %4902, %v5997_v11  }
 0x2e7   : > { %1517 = vperm.xlu2 %4905, %v5997_v11  }
 0x2e8   : > { %4904 = vset.pattern.permute.xlu1 %v5111_v60  ;;  %4906 = vset.pattern.permute.xlu0 %v5112_v51 }
 0x2e9   : > { %1487 = vperm.xlu1 %4904, %v5997_v11   ;;  %1544 = vperm.xlu0 %4906, %v5997_v11  }
 0x2ef   : > { %1673 = vrot.lane.b32.xlu2 %v1670_v44, %s5060_s16 }
 0x2f1   : > { %4907 = vset.pattern.permute.xlu1 %v5113_v20  ;;  %4908 = vset.pattern.permute.xlu0 %v5116_v23 }
 0x2f2   : > { %1564 = vperm.xlu1 %4907, %v5997_v11   ;;  %1594 = vperm.xlu0 %4908, %v5997_v11  }
 0x2fa   : > { %4909 = vset.pattern.permute.xlu1 %v5114_v32  ;;  %4911 = vset.pattern.permute.xlu0 %v5118_v15 }
 0x2fb   : > { %1621 = vperm.xlu1 %4909, %v5997_v11  }
 0x303   : > { %4910 = vset.pattern.permute.xlu1 %v5115_v16 }
 0x304   : > { %1643 = vperm.xlu1 %4910, %v5997_v11  }
 0x30c   : > { %1671 = vrot.lane.b32.xlu1 %v1669_v19, %s5060_s16 }
 0x30d   : > { %4912 = vset.pattern.permute.xlu1 %v5117_v2 }
 0x34a   : > { %v1429_v29 = vpop.permute.xlu1 %1428  ;;  %v1427_v7 = vpop.permute.xlu0 %1426 }
 0x34b   : > { %v1435_v54 = vsel %vm318_vm0, %v1429_v29, 0.0  ;;  %v6020_v38 = vsel %vm318_vm0, %v1427_v7, %v1429_v29  ;;  %v6023_v14 = vsel %vm318_vm0, 0.0, %v1427_v7  ;;  %v6061_v29 = vpop.xlane.xlu2 %1374 }
 0x34c   : > { %v1466_v0 = vperm.slane %v1435_v54, 0  ;;  %v1485_v61 = vmul.f32 %v1435_v54, %v5352_v40  ;;  %v1562_v52 = vmul.f32 %v1435_v54, %v7702_v63  ;;  %v1436_v4 = vmul.f32 %v6023_v14, %v5281_v5  ;;  %7711 = vst [vmem:[#allocation4_spill] sm:$0xff] %v6061_v29 }
 0x34d   : > { %v1437_v25 = vmul.f32 %v6020_v38, %v5297_v12  ;;  %v1515_v28 = vmul.f32 %v1435_v54, %v5375_v55  ;;  %v1592_v21 = vmul.f32 %v1435_v54, %v7701_v10  ;;  %v1465_v3 = vperm.slane %v6020_v38, 0 }
 0x34e   : > { %1474 = vrot.lane.b32.xlu0 %v1466_v0, %s5078_s24  ;;  %v1496_v34 = vperm.slane %v1485_v61, 0  ;;  %v1573_v8 = vperm.slane %v1562_v52, 0  ;;  %v1448_v59 = vperm.slane %v1436_v4, 0  ;;  %v1641_v13 = vmul.f32 %v1435_v54, %v7706_v49 }
 0x34f   : > { %v1449_v37 = vperm.slane %v1437_v25, 0  ;;  %v1526_v17 = vperm.slane %v1515_v28, 0  ;;  %v1603_v58 = vperm.slane %v1592_v21, 0  ;;  %v1484_v18 = vmul.f32 %v6020_v38, %v5390_v62 }
 0x350   : > { %1504 = vrot.lane.b32.xlu1 %v1496_v34, %s5080_s26  ;;  %1581 = vrot.lane.b32.xlu2 %v1573_v8, %s5084_s10  ;;  %v1470_v9 = vrot.slane %v1465_v3, 4  ;;  %v1652_v36 = vperm.slane %v1641_v13, 0  ;;  %v1464_v60 = vperm.slane %v6023_v14, 0  ;;  %v1483_v20 = vmul.f32 %v6023_v14, %v5358_v46 }
 0x351   : > { %v1452_v30 = vrot.slane %v1449_v37, 4  ;;  %v1495_v51 = vperm.slane %v1484_v18, 0  ;;  %v1514_v16 = vmul.f32 %v6020_v38, %v7698_v6  ;;  %v1561_v23 = vmul.f32 %v6020_v38, %v5419_v48 }
 0x352   : > { %v6034_v31 = vpop.permute.xlu1 %1457  ;;  %v1471_v44 = vsel %vm347_vm1, %v1464_v60, %v1470_v9  ;;  %v1494_v19 = vperm.slane %v1483_v20, 0  ;;  %v1513_v61 = vmul.f32 %v6023_v14, %v7699_v22  ;;  %v1560_v25 = vmul.f32 %v6023_v14, %v5331_v27 }
 0x353   : > { %v6039_v42 = vsel %vm347_vm1, %v1448_v59, %v1452_v30  ;;  %v1500_v32 = vrot.slane %v1495_v51, 4  ;;  %v1572_v52 = vperm.slane %v1561_v23, 0  ;;  %v1591_v37 = vmul.f32 %v6020_v38, %v7703_v26  ;;  %v6077_v21 = vpop.permute.xlu2 %1517 }
 0x354   : > { %v1524_v34 = vperm.slane %v1513_v61, 0  ;;  %v1571_v28 = vperm.slane %v1560_v25, 0  ;;  %v5119_v3 = vmov 47   ;;  %v5120_v20 = vmov 50  }
 0x355   : > { %v1501_v54 = vsel %vm347_vm1, %v1494_v19, %v1500_v32  ;;  %v1577_v8 = vrot.slane %v1572_v52, 4  ;;  %4913 = vset.pattern.permute.xlu2 %v5119_v3  ;;  %v1640_v19 = vmul.f32 %v6020_v38, %v7707_v57  ;;  %v5121_v23 = vmov 51  }
 0x356   : > { %1630 = vrot.lane.b32.xlu0 %v1466_v0, %s5079_s25  ;;  %v1525_v0 = vperm.slane %v1514_v16, 0 }
 0x357   : > { %v1578_v2 = vsel %vm347_vm1, %v1571_v28, %v1577_v8  ;;  %v1651_v8 = vperm.slane %v1640_v19, 0 }
 0x358   : > { %1534 = vrot.lane.b32.xlu1 %v1526_v17, %s5083_s9  ;;  %1611 = vrot.lane.b32.xlu2 %v1603_v58, %s5081_s27  ;;  %v1530_v4 = vrot.slane %v1525_v0, 4  ;;  %v1602_v17 = vperm.slane %v1591_v37, 0  ;;  %v1590_v58 = vmul.f32 %v6023_v14, %v7705_v50 }
 0x35a   : > { %v1531_v30 = vsel %vm347_vm1, %v1524_v34, %v1530_v4  ;;  %v1607_v15 = vrot.slane %v1602_v17, 4  ;;  %v1601_v13 = vperm.slane %v1590_v58, 0 }
 0x35b   : > { %v6048_v53 = vpop.permute.xlu1 %1487 }
 0x35c   : > { %v1608_v9 = vsel %vm347_vm1, %v1601_v13, %v1607_v15 }
 0x35e   : > { %1660 = vrot.lane.b32.xlu0 %v1652_v36, %s5082_s28  ;;  %v1674_v36 = vpop.permute.xlu2 %1673 }
 0x35f   : > { %v6090_v60 = vsel %vm318_vm0, %v1674_v36, 0.0 }
 0x360   : > { %1472 = vrot.lane.b32.xlu1 %v1471_v44, %s5078_s24  ;;  %1628 = vrot.lane.b32.xlu2 %v1471_v44, %s5079_s25  ;;  %v1709_v44 = vperm.slane %v6090_v60, 0  ;;  %v1728_v52 = vmul.f32 %v6090_v60, %v5352_v40 }
 0x362   : > { %v1739_v3 = vperm.slane %v1728_v52, 0 }
 0x364   : > { %v6063_v7 = vpop.permute.xlu1 %1564 }
 0x366   : > { %1502 = vrot.lane.b32.xlu0 %v1501_v54, %s5080_s26 }
 0x368   : > { %1700 = vperm.xlu1 %4912, %v5997_v11  }
 0x36d   : > { %v6074_v59 = vpop.permute.xlu1 %1621 }
 0x36e   : > { %1532 = vrot.lane.b32.xlu0 %v1531_v30, %s5083_s9 }
 0x370   : > { %1579 = vrot.lane.b32.xlu1 %v1578_v2, %s5084_s10  ;;  %v1639_v2 = vmul.f32 %v6023_v14, %v7708_v41 }
 0x371   : > { %4917 = vset.pattern.permute.xlu1 %v5121_v23  ;;  %v1758_v23 = vmul.f32 %v6090_v60, %v5375_v55 }
 0x372   : > { %v1650_v19 = vperm.slane %v1639_v2, 0 }
 0x373   : > { %v1769_v2 = vperm.slane %v1758_v23, 0  ;;  %v5124_v23 = vmov 49  }
 0x376   : > { %v6084_v18 = vpop.permute.xlu1 %1643  ;;  %1684 = vperm.xlu0 %4911, %v5997_v11  }
 0x378   : > { %1609 = vrot.lane.b32.xlu1 %v1608_v9, %s5081_s27  ;;  %v1656_v9 = vrot.slane %v1651_v8, 4 }
 0x37e   : > { %v1672_v51 = vpop.permute.xlu1 %1671  ;;  %4916 = vset.pattern.permute.xlu0 %v5120_v20 }
 0x37f   : > { %v6094_v32 = vsel %vm318_vm0, %v1672_v51, %v1674_v36  ;;  %v6097_v16 = vsel %vm318_vm0, 0.0, %v1672_v51 }
 0x380   : > { %1717 = vrot.lane.b32.xlu1 %v1709_v44, %s5078_s24  ;;  %v1708_v54 = vperm.slane %v6094_v32, 0  ;;  %v1726_v0 = vmul.f32 %v6097_v16, %v5358_v46  ;;  %v1727_v61 = vmul.f32 %v6094_v32, %v5390_v62  ;;  %v1707_v4 = vperm.slane %v6097_v16, 0 }
 0x381   : > { %v1757_v34 = vmul.f32 %v6094_v32, %v7698_v6  ;;  %v1883_v17 = vmul.f32 %v6094_v32, %v7707_v57  ;;  %v1882_v13 = vmul.f32 %v6097_v16, %v7708_v41  ;;  %v1756_v36 = vmul.f32 %v6097_v16, %v7699_v22 }
 0x382   : > { %v1713_v38 = vrot.slane %v1708_v54, 4  ;;  %v1738_v25 = vperm.slane %v1727_v61, 0  ;;  %v1737_v30 = vperm.slane %v1726_v0, 0  ;;  %v1681_v14 = vmul.f32 %v6097_v16, %v5281_v5 }
 0x383   : > { %v1768_v15 = vperm.slane %v1757_v34, 0  ;;  %v1894_v51 = vperm.slane %v1883_v17, 0  ;;  %v1682_v20 = vmul.f32 %v6094_v32, %v5297_v12  ;;  %v1893_v0 = vperm.slane %v1882_v13, 0 }
 0x384   : > { %v6115_v37 = vsel %vm347_vm1, %v1707_v4, %v1713_v38  ;;  %v1743_v28 = vrot.slane %v1738_v25, 4  ;;  %v1657_v4 = vsel %vm347_vm1, %v1650_v19, %v1656_v9  ;;  %v1804_v38 = vmul.f32 %v6094_v32, %v5419_v48  ;;  %v1442_v19 = vpop.permute.xlu0 %1441 }
 0x385   : > { %1715 = vrot.lane.b32.xlu2 %v6115_v37, %s5078_s24  ;;  %v1773_v54 = vrot.slane %v1768_v15, 4  ;;  %v1899_v61 = vrot.slane %v1894_v51, 4  ;;  %v1692_v52 = vperm.slane %v1682_v20, 0  ;;  %v1767_v25 = vperm.slane %v1756_v36, 0 }
 0x386   : > { %v1744_v58 = vsel %vm347_vm1, %v1737_v30, %v1743_v28  ;;  %v1691_v8 = vperm.slane %v1681_v14, 0  ;;  %v1835_v36 = vmul.f32 %v6090_v60, %v7701_v10  ;;  %v5122_v51 = vmov 48  }
 0x387   : > { %1745 = vrot.lane.b32.xlu0 %v1744_v58, %s5080_s26  ;;  %v1900_v34 = vsel %vm347_vm1, %v1893_v0, %v1899_v61  ;;  %v1695_v30 = vrot.slane %v1692_v52, 4  ;;  %v1774_v28 = vsel %vm347_vm1, %v1767_v25, %v1773_v54  ;;  %v1815_v58 = vperm.slane %v1804_v38, 0 }
 0x388   : > { %1747 = vrot.lane.b32.xlu1 %v1739_v3, %s5080_s26  ;;  %v1803_v3 = vmul.f32 %v6097_v16, %v5331_v27  ;;  %v1846_v14 = vperm.slane %v1835_v36, 0  ;;  %v5123_v20 = vmov 54   ;;  %v5125_v54 = vmov 52  }
 0x389   : > { %v6143_v17 = vsel %vm347_vm1, %v1691_v8, %v1695_v30  ;;  %v1820_v15 = vrot.slane %v1815_v58, 4  ;;  %v1884_v0 = vmul.f32 %v6090_v60, %v7706_v49  ;;  %v1805_v61 = vmul.f32 %v6090_v60, %v7702_v63 }
 0x38a   : > { %v1814_v13 = vperm.slane %v1803_v3, 0  ;;  %v1834_v52 = vmul.f32 %v6094_v32, %v7703_v26  ;;  %v5126_v30 = vmov 53   ;;  %v1912_v58 = vrot.slane %v5974_v56, 6 }
 0x38b   : > { %v1816_v38 = vperm.slane %v1805_v61, 0 }
 0x38c   : > { %v1821_v9 = vsel %vm347_vm1, %v1814_v13, %v1820_v15  ;;  %v1545_v25 = vpop.permute.xlu0 %1544  ;;  %v1845_v8 = vperm.slane %v1834_v52, 0 }
 0x38d   : > { %1658 = vrot.lane.b32.xlu2 %v1657_v4, %s5082_s28  ;;  %v1895_v4 = vperm.slane %v1884_v0, 0 }
 0x38f   : > { %1775 = vrot.lane.b32.xlu0 %v1774_v28, %s5083_s9  ;;  %v1850_v28 = vrot.slane %v1845_v8, 4 }
 0x390   : > { %1777 = vrot.lane.b32.xlu1 %v1769_v2, %s5083_s9 }
 0x394   : > { %v6175_v32 = vpop.permute.xlu0 %1594 }
 0x395   : > { %1730 = vperm.xlu2 %4913, %v5997_v11  }
 0x397   : > { %1807 = vperm.xlu0 %4916, %v5997_v11  }
 0x398   : > { %1822 = vrot.lane.b32.xlu1 %v1821_v9, %s5084_s10 }
 0x39d   : > { %4914 = vset.pattern.permute.xlu2 %v5122_v51  ;;  %v1913_v51 = vrot.slane %v5972_v39, 6 }
 0x39e   : > { %1760 = vperm.xlu2 %4914, %v5997_v11  }
 0x39f   : > { %1854 = vrot.lane.b32.xlu0 %v1846_v14, %s5081_s27 }
 0x3a0   : > { %1837 = vperm.xlu1 %4917, %v5997_v11   ;;  %4920 = vset.pattern.permute.xlu0 %v5123_v20 }
 0x3a6   : > { %4915 = vset.pattern.permute.xlu2 %v5124_v23 }
 0x3a7   : > { %1873 = vrot.lane.b32.xlu0 %v1709_v44, %s5079_s25  ;;  %1787 = vperm.xlu2 %4915, %v5997_v11   ;;  %v1833_v44 = vmul.f32 %v6097_v16, %v7705_v50 }
 0x3a8   : > { %4918 = vset.pattern.permute.xlu1 %v5125_v54 }
 0x3a9   : > { %1864 = vperm.xlu1 %4918, %v5997_v11   ;;  %v1844_v60 = vperm.slane %v1833_v44, 0  ;;  %v1463_v44 = vperm.slane %v6034_v31, %v5566_v45  ;;  %v1523_v31 = vperm.slane %v6077_v21, %v5566_v45 }
 0x3aa   : > { %v6183_v15 = vpop.permute.xlu2 %1581 }
 0x3ab   : > { %v1851_v2 = vsel %vm347_vm1, %v1844_v60, %v1850_v28  ;;  %v1493_v60 = vperm.slane %v6048_v53, %v5566_v45 }
 0x3af   : > { %1903 = vrot.lane.b32.xlu0 %v1895_v4, %s5082_s28  ;;  %1824 = vrot.lane.b32.xlu2 %v1816_v38, %s5084_s10 }
 0x3b1   : > { %4919 = vset.pattern.permute.xlu1 %v5126_v30  ;;  %v1447_v30 = vperm.slane %v1442_v19, %v5566_v45  ;;  %v1550_v19 = vperm.slane %v1545_v25, %v5566_v45 }
 0x3b2   : > { %1886 = vperm.xlu1 %4919, %v5997_v11   ;;  %v6188_v36 = vpop.permute.xlu2 %1611 }
 0x3b7   : > { %1852 = vrot.lane.b32.xlu2 %v1851_v2, %s5081_s27  ;;  %1927 = vperm.xlu0 %4920, %v5997_v11  }
 0x3ba   : > { %1914 = vrot.lane.b32.xlu1 %v1912_v58, %s5060_s16 }
 0x3bf   : > { %1871 = vrot.lane.b32.xlu2 %v6115_v37, %s5079_s25  ;;  %v6194_v37 = vpop.permute.xlu2 %1628 }
 0x3c0   : > { %v1475_v16 = vpop.permute.xlu0 %1474 }
 0x3c1   : > { %v1477_v54 = vrot.slane %v1475_v16, 4 }
 0x3c2   : > { %v1505_v3 = vpop.permute.xlu1 %1504 }
 0x3c3   : > { %v1507_v61 = vrot.slane %v1505_v3, 4  ;;  %v1455_v3 = vmul.f32 %v6039_v42, %v1447_v30 }
 0x3c7   : > { %1901 = vrot.lane.b32.xlu2 %v1900_v34, %s5082_s28 }
 0x3c8   : > { %v6186_v13 = vpop.permute.xlu0 %1630 }
 0x3ca   : > { %v1535_v9 = vpop.permute.xlu1 %1534 }
 0x3cf   : > { %1916 = vrot.lane.b32.xlu2 %v1913_v51, %s5060_s16  ;;  %v1537_v51 = vrot.slane %v1535_v9, 4 }
 0x3d0   : > { %v6192_v14 = vpop.permute.xlu0 %1660 }
 0x3d2   : > { %v1473_v20 = vpop.permute.xlu1 %1472 }
 0x3d3   : > { %v1476_v23 = vrot.slane %v1473_v20, 4 }
 0x3d5   : > { %v1478_v34 = vsel %vm347_vm1, %v1476_v23, %v1477_v54 }
 0x3d6   : > { %v1479_v8 = vsel %vm374_vm7, %v1473_v20, %v1478_v34 }
 0x3d7   : > { %v1481_v2 = vmul.f32 %v1479_v8, %v1463_v44 }
 0x3d8   : > { %v1503_v0 = vpop.permute.xlu0 %1502 }
 0x3d9   : > { %v1506_v52 = vrot.slane %v1503_v0, 4  ;;  %v1482_v20 = vadd.f32 %v1481_v2, %v1455_v3 }
 0x3da   : > { %v1701_v4 = vpop.permute.xlu1 %1700 }
 0x3db   : > { %v1508_v38 = vsel %vm347_vm1, %v1506_v52, %v1507_v61 }
 0x3dc   : > { %v1509_v28 = vsel %vm417_vm8, %v1503_v0, %v1508_v38  ;;  %v1558_v38 = vmul.f32 %v5987_v35, %v1550_v19  ;;  %v1706_v19 = vperm.slane %v1701_v4, %v5566_v45 }
 0x3dd   : > { %v1511_v23 = vmul.f32 %v1509_v28, %v1493_v60 }
 0x3df   : > { %v1716_v58 = vpop.permute.xlu2 %1715  ;;  %v1512_v34 = vadd.f32 %v1511_v23, %v1482_v20 }
 0x3e0   : > { %v1533_v16 = vpop.permute.xlu0 %1532  ;;  %v1719_v60 = vrot.slane %v1716_v58, 4 }
 0x3e1   : > { %v1536_v54 = vrot.slane %v1533_v16, 4 }
 0x3e2   : > { %v6206_v61 = vpop.permute.xlu1 %1579 }
 0x3e3   : > { %v1538_v0 = vsel %vm347_vm1, %v1536_v54, %v1537_v51 }
 0x3e4   : > { %v1539_v53 = vsel %vm457_vm9, %v1533_v16, %v1538_v0 }
 0x3e5   : > { %v1541_v52 = vmul.f32 %v1539_v53, %v1523_v31 }
 0x3e7   : > { %v1542_v42 = vadd.f32 %v1541_v52, %v1512_v34  ;;  %v6214_v9 = vpop.permute.xlu2 %1658 }
 0x3e8   : > { %v1685_v21 = vpop.permute.xlu0 %1684 }
 0x3e9   : > { %v6216_v8 = vadd.f32 %v1558_v38, %v1542_v42  ;;  %v1690_v20 = vperm.slane %v1685_v21, %v5566_v45 }
 0x3ea   : > { %v6218_v44 = vpop.permute.xlu1 %1609 }
 0x3eb   : > { %v1698_v42 = vmul.f32 %v6143_v17, %v1690_v20 }
 0x3ef   : > { %v1731_v30 = vpop.permute.xlu2 %1730 }
 0x3f0   : > { %v1736_v34 = vperm.slane %v1731_v30, %v5566_v45 }
 0x3f2   : > { %v1718_v28 = vpop.permute.xlu1 %1717 }
 0x3f3   : > { %v1720_v25 = vrot.slane %v1718_v28, 4 }
 0x3f5   : > { %v1721_v16 = vsel %vm347_vm1, %v1719_v60, %v1720_v25 }
 0x3f6   : > { %v1722_v35 = vsel %vm374_vm7, %v1716_v58, %v1721_v16 }
 0x3f7   : > { %v1724_v0 = vmul.f32 %v1722_v35, %v1706_v19 }
 0x3f8   : > { %v1761_v2 = vpop.permute.xlu2 %1760 }
 0x3f9   : > { %v1746_v3 = vpop.permute.xlu0 %1745  ;;  %v1725_v58 = vadd.f32 %v1724_v0, %v1698_v42  ;;  %v1766_v16 = vperm.slane %v1761_v2, %v5566_v45  ;;  %v1584_v42 = vrot.slane %v6183_v15, 4  ;;  %v1600_v15 = vperm.slane %v6175_v32, %v5566_v45 }
 0x3fa   : > { %v1749_v51 = vrot.slane %v1746_v3, 4  ;;  %v1748_v23 = vpop.permute.xlu1 %1747 }
 0x3fb   : > { %v1750_v54 = vrot.slane %v1748_v23, 4 }
 0x3fd   : > { %v1751_v31 = vsel %vm347_vm1, %v1749_v51, %v1750_v54 }
 0x3fe   : > { %v1752_v53 = vsel %vm417_vm8, %v1746_v3, %v1751_v31  ;;  %v5127_v3 = vmov 55  }
 0x3ff   : > { %v1754_v60 = vmul.f32 %v1752_v53, %v1736_v34  ;;  %4921 = vset.pattern.permute.xlu1 %v5127_v3  ;;  %v1583_v34 = vrot.slane %v6206_v61, 4 }
 0x400   : > { %1943 = vperm.xlu1 %4921, %v5997_v11  }
 0x401   : > { %v1776_v52 = vpop.permute.xlu0 %1775  ;;  %v1788_v38 = vpop.permute.xlu2 %1787  ;;  %v1755_v30 = vadd.f32 %v1754_v60, %v1725_v58 }
 0x402   : > { %v1779_v28 = vrot.slane %v1776_v52, 4  ;;  %v1778_v25 = vpop.permute.xlu1 %1777  ;;  %v1793_v4 = vperm.slane %v1788_v38, %v5566_v45 }
 0x403   : > { %v1780_v23 = vrot.slane %v1778_v25, 4 }
 0x404   : > { %v1801_v17 = vmul.f32 %v5991_v43, %v1793_v4  ;;  %v1585_v43 = vsel %vm347_vm1, %v1583_v34, %v1584_v42  ;;  %v5128_v4 = vmov 56   ;;  %v1662_v42 = vrot.slane %v6214_v9, 4 }
 0x405   : > { %v1781_v21 = vsel %vm347_vm1, %v1779_v28, %v1780_v23  ;;  %v1614_v28 = vrot.slane %v6188_v36, 4  ;;  %4922 = vset.pattern.permute.xlu2 %v5128_v4  ;;  %v1586_v36 = vsel %vm514_vm10, %v6206_v61, %v1585_v43  ;;  %v1663_v43 = vrot.slane %v6192_v14, 4 }
 0x406   : > { %v1782_v51 = vsel %vm457_vm9, %v1776_v52, %v1781_v21  ;;  %v1613_v52 = vrot.slane %v6218_v44, 4  ;;  %v1633_v21 = vrot.slane %v6186_v13, 4  ;;  %v1627_v4 = vperm.slane %v6074_v59, %v5566_v45 }
 0x407   : > { %v1784_v54 = vmul.f32 %v1782_v51, %v1766_v16  ;;  %v1570_v51 = vperm.slane %v6063_v7, %v5566_v45 }
 0x408   : > { %v1615_v23 = vsel %vm347_vm1, %v1613_v52, %v1614_v28 }
 0x409   : > { %v1808_v35 = vpop.permute.xlu0 %1807  ;;  %v1825_v31 = vpop.permute.xlu2 %1824  ;;  %v1785_v19 = vadd.f32 %v1784_v54, %v1755_v30  ;;  %v1588_v52 = vmul.f32 %v1586_v36, %v1570_v51 }
 0x40a   : > { %v1823_v20 = vpop.permute.xlu1 %1822  ;;  %v1827_v25 = vrot.slane %v1825_v31, 4  ;;  %v1616_v31 = vsel %vm554_vm11, %v6218_v44, %v1615_v23 }
 0x40b   : > { %v1802_v0 = vadd.f32 %v1801_v17, %v1785_v19  ;;  %v1826_v60 = vrot.slane %v1823_v20, 4  ;;  %v1632_v17 = vrot.slane %v6194_v37, 4  ;;  %v1618_v28 = vmul.f32 %v1616_v31, %v1600_v15 }
 0x40c   : > { %v5129_v31 = vmov 59  }
 0x40d   : > { %v1828_v3 = vsel %vm347_vm1, %v1826_v60, %v1827_v25  ;;  %v1634_v32 = vsel %vm347_vm1, %v1632_v17, %v1633_v21  ;;  %v1649_v17 = vperm.slane %v6084_v18, %v5566_v45  ;;  %4925 = vset.pattern.permute.xlu0 %v5129_v31 }
 0x40e   : > { %v1829_v61 = vsel %vm514_vm10, %v1823_v20, %v1828_v3 }
 0x411   : > { %v1855_v2 = vpop.permute.xlu0 %1854  ;;  %v1853_v53 = vpop.permute.xlu2 %1852 }
 0x412   : > { %v1838_v38 = vpop.permute.xlu1 %1837  ;;  %v1857_v58 = vrot.slane %v1855_v2, 4  ;;  %v1856_v16 = vrot.slane %v1853_v53, 4  ;;  %v1813_v2 = vperm.slane %v1808_v35, %v5566_v45  ;;  %v1589_v35 = vadd.f32 %v1588_v52, %v6216_v8 }
 0x413   : > { %v1843_v25 = vperm.slane %v1838_v38, %v5566_v45  ;;  %v1664_v38 = vsel %vm347_vm1, %v1662_v42, %v1663_v43  ;;  %v5130_v52 = vmov 60  }
 0x414   : > { %v1858_v7 = vsel %vm347_vm1, %v1856_v16, %v1857_v58  ;;  %v1831_v23 = vmul.f32 %v1829_v61, %v1813_v2  ;;  %v1635_v16 = vsel %vm574_vm12, %v6194_v37, %v1634_v32  ;;  %v1619_v21 = vadd.f32 %v1618_v28, %v1589_v35  ;;  %4926 = vset.pattern.permute.xlu1 %v5130_v52 }
 0x415   : > { %v1859_v44 = vsel %vm554_vm11, %v1853_v53, %v1858_v7  ;;  %v1637_v8 = vmul.f32 %v1635_v16, %v1627_v4  ;;  %v1665_v37 = vsel %vm614_vm13, %v6214_v9, %v1664_v38 }
 0x416   : > { %v1861_v51 = vmul.f32 %v1859_v44, %v1843_v25  ;;  %v1832_v3 = vadd.f32 %v1831_v23, %v1802_v0 }
 0x419   : > { %v1874_v30 = vpop.permute.xlu0 %1873  ;;  %v1872_v54 = vpop.permute.xlu2 %1871 }
 0x41a   : > { %v1876_v19 = vrot.slane %v1874_v30, 4  ;;  %v1875_v13 = vrot.slane %v1872_v54, 4 }
 0x41b   : > { %v1865_v34 = vpop.permute.xlu1 %1864 }
 0x41c   : > { %v1877_v60 = vsel %vm347_vm1, %v1875_v13, %v1876_v19  ;;  %v1870_v58 = vperm.slane %v1865_v34, %v5566_v45  ;;  %v1638_v19 = vadd.f32 %v1637_v8, %v1619_v21  ;;  %v1862_v13 = vadd.f32 %v1861_v51, %v1832_v3 }
 0x41d   : > { %v1878_v20 = vsel %vm574_vm12, %v1872_v54, %v1877_v60  ;;  %v1667_v34 = vmul.f32 %v1665_v37, %v1649_v17 }
 0x41e   : > { %v1880_v30 = vmul.f32 %v1878_v20, %v1870_v58 }
 0x41f   : > { %v1668_v18 = vadd.f32 %v1667_v34, %v1638_v19 }
 0x420   : > { %v1881_v0 = vadd.f32 %v1880_v30, %v1862_v13 }
 0x421   : > { %v1904_v53 = vpop.permute.xlu0 %1903  ;;  %v1902_v15 = vpop.permute.xlu2 %1901 }
 0x422   : > { %v1906_v14 = vrot.slane %v1904_v53, 4  ;;  %v1905_v36 = vrot.slane %v1902_v15, 4 }
 0x424   : > { %v1907_v54 = vsel %vm347_vm1, %v1905_v36, %v1906_v14  ;;  %v1887_v59 = vpop.permute.xlu1 %1886 }
 0x425   : > { %v1908_v2 = vsel %vm614_vm13, %v1902_v15, %v1907_v54  ;;  %v1892_v7 = vperm.slane %v1887_v59, %v5566_v45 }
 0x427   : > { %v1910_v32 = vmul.f32 %v1908_v2, %v1892_v7 }
 0x429   : > { %v1911_v61 = vadd.f32 %v1910_v32, %v1881_v0  ;;  %v1917_v42 = vpop.permute.xlu2 %1916 }
 0x42a   : > { %v6276_v9 = vsel %vm318_vm0, %v1917_v42, 0.0 }
 0x42b   : > { %v6278_v28 = vadd.f32 %v1911_v61, %v1668_v18  ;;  %v1952_v25 = vperm.slane %v6276_v9, 0  ;;  %v1971_v16 = vmul.f32 %v6276_v9, %v5352_v40  ;;  %v2001_v31 = vmul.f32 %v6276_v9, %v5375_v55 }
 0x42c   : > { %v1915_v60 = vpop.permute.xlu1 %1914 }
 0x42d   : > { %v6282_v44 = vsel %vm318_vm0, %v1915_v60, %v1917_v42  ;;  %v6285_v43 = vsel %vm318_vm0, 0.0, %v1915_v60  ;;  %1960 = vrot.lane.b32.xlu1 %v1952_v25, %s5078_s24  ;;  %v1982_v3 = vperm.slane %v1971_v16, 0  ;;  %v2012_v7 = vperm.slane %v2001_v31, 0 }
 0x42e   : > { %v1924_v35 = vmul.f32 %v6285_v43, %v5281_v5  ;;  %v1925_v23 = vmul.f32 %v6282_v44, %v5297_v12  ;;  %v1951_v58 = vperm.slane %v6282_v44, 0  ;;  %v1969_v20 = vmul.f32 %v6285_v43, %v5358_v46 }
 0x42f   : > { %v1970_v4 = vmul.f32 %v6282_v44, %v5390_v62  ;;  %v1950_v21 = vperm.slane %v6285_v43, 0  ;;  %v2000_v15 = vmul.f32 %v6282_v44, %v7698_v6  ;;  %v1999_v19 = vmul.f32 %v6285_v43, %v7699_v22 }
 0x430   : > { %v1935_v38 = vperm.slane %v1925_v23, 0  ;;  %v1956_v51 = vrot.slane %v1951_v58, 4  ;;  %v1934_v14 = vperm.slane %v1924_v35, 0  ;;  %v1980_v30 = vperm.slane %v1969_v20, 0 }
 0x431   : > { %v1981_v53 = vperm.slane %v1970_v4, 0  ;;  %v2011_v59 = vperm.slane %v2000_v15, 0  ;;  %v2047_v13 = vmul.f32 %v6282_v44, %v5419_v48  ;;  %v2010_v34 = vperm.slane %v1999_v19, 0 }
 0x432   : > { %v1938_v36 = vrot.slane %v1935_v38, 4  ;;  %v1957_v8 = vsel %vm347_vm1, %v1950_v21, %v1956_v51  ;;  %v2046_v52 = vmul.f32 %v6285_v43, %v5331_v27  ;;  %v5131_v42 = vmov 57  }
 0x433   : > { %1958 = vrot.lane.b32.xlu2 %v1957_v8, %s5078_s24  ;;  %v1986_v17 = vrot.slane %v1981_v53, 4  ;;  %v2016_v2 = vrot.slane %v2011_v59, 4  ;;  %v2058_v0 = vperm.slane %v2047_v13, 0  ;;  %v2078_v35 = vmul.f32 %v6276_v9, %v7701_v10 }
 0x434   : > { %v6307_v37 = vsel %vm347_vm1, %v1934_v14, %v1938_v36  ;;  %v2057_v61 = vperm.slane %v2046_v52, 0  ;;  %v5132_v23 = vmov 58   ;;  %v2048_v16 = vmul.f32 %v6276_v9, %v7702_v63 }
 0x435   : > { %1990 = vrot.lane.b32.xlu1 %v1982_v3, %s5080_s26  ;;  %v1987_v54 = vsel %vm347_vm1, %v1980_v30, %v1986_v17  ;;  %v2017_v32 = vsel %vm347_vm1, %v2010_v34, %v2016_v2  ;;  %v2063_v18 = vrot.slane %v2058_v0, 4  ;;  %v2089_v58 = vperm.slane %v2078_v35, 0  ;;  %v1928_v0 = vpop.permute.xlu0 %1927 }
 0x436   : > { %1988 = vrot.lane.b32.xlu0 %v1987_v54, %s5080_s26  ;;  %v5133_v20 = vmov 63   ;;  %v2077_v4 = vmul.f32 %v6282_v44, %v7703_v26  ;;  %v2059_v38 = vperm.slane %v2048_v16, 0  ;;  %v5134_v51 = vmov 61  }
 0x437   : > { %v2064_v60 = vsel %vm347_vm1, %v2057_v61, %v2063_v18  ;;  %v2076_v53 = vmul.f32 %v6285_v43, %v7705_v50  ;;  %v2127_v15 = vmul.f32 %v6276_v9, %v7706_v49  ;;  %v5135_v17 = vmov 62  }
 0x438   : > { %v2088_v21 = vperm.slane %v2077_v4, 0  ;;  %v2155_v9 = vrot.slane %v5974_v56, 7  ;;  %v2125_v59 = vmul.f32 %v6285_v43, %v7708_v41 }
 0x439   : > { %v2087_v36 = vperm.slane %v2076_v53, 0  ;;  %v2138_v3 = vperm.slane %v2127_v15, 0 }
 0x43a   : > { %v2093_v14 = vrot.slane %v2088_v21, 4  ;;  %v2136_v19 = vperm.slane %v2125_v59, 0 }
 0x43b   : > { %1973 = vperm.xlu2 %4922, %v5997_v11  }
 0x43c   : > { %v2094_v30 = vsel %vm347_vm1, %v2087_v36, %v2093_v14  ;;  %v5136_v14 = vmov 64  }
 0x43d   : > { %2020 = vrot.lane.b32.xlu1 %v2012_v7, %s5083_s9 }
 0x43e   : > { %2018 = vrot.lane.b32.xlu0 %v2017_v32, %s5083_s9 }
 0x443   : > { %4923 = vset.pattern.permute.xlu2 %v5131_v42 }
 0x444   : > { %2003 = vperm.xlu2 %4923, %v5997_v11  }
 0x445   : > { %2065 = vrot.lane.b32.xlu1 %v2064_v60, %s5084_s10 }
 0x446   : > { %2050 = vperm.xlu0 %4925, %v5997_v11  }
 0x44c   : > { %4924 = vset.pattern.permute.xlu2 %v5132_v23 }
 0x44d   : > { %2080 = vperm.xlu1 %4926, %v5997_v11   ;;  %2030 = vperm.xlu2 %4924, %v5997_v11  }
 0x44e   : > { %2097 = vrot.lane.b32.xlu0 %v2089_v58, %s5081_s27  ;;  %v1933_v58 = vperm.slane %v1928_v0, %v5566_v45 }
 0x44f   : > { %4929 = vset.pattern.permute.xlu0 %v5133_v20 }
 0x450   : > { %v1941_v36 = vmul.f32 %v6307_v37, %v1933_v58 }
 0x455   : > { %4927 = vset.pattern.permute.xlu1 %v5134_v51  ;;  %2067 = vrot.lane.b32.xlu2 %v2059_v38, %s5084_s10 }
 0x456   : > { %2116 = vrot.lane.b32.xlu0 %v1952_v25, %s5079_s25  ;;  %2107 = vperm.xlu1 %4927, %v5997_v11   ;;  %v2126_v25 = vmul.f32 %v6282_v44, %v7707_v57  ;;  %v2156_v44 = vrot.slane %v5972_v39, 7 }
 0x458   : > { %v2137_v54 = vperm.slane %v2126_v25, 0 }
 0x45a   : > { %v2142_v31 = vrot.slane %v2137_v54, 4 }
 0x45c   : > { %v2143_v13 = vsel %vm347_vm1, %v2136_v19, %v2142_v31 }
 0x45d   : > { %2095 = vrot.lane.b32.xlu2 %v2094_v30, %s5081_s27 }
 0x45e   : > { %2146 = vrot.lane.b32.xlu0 %v2138_v3, %s5082_s28  ;;  %4928 = vset.pattern.permute.xlu1 %v5135_v17 }
 0x45f   : > { %2129 = vperm.xlu1 %4928, %v5997_v11  }
 0x465   : > { %2114 = vrot.lane.b32.xlu2 %v1957_v8, %s5079_s25 }
 0x466   : > { %2170 = vperm.xlu0 %4929, %v5997_v11  }
 0x467   : > { %2157 = vrot.lane.b32.xlu1 %v2155_v9, %s5060_s16 }
 0x468   : > { %4930 = vset.pattern.permute.xlu1 %v5136_v14 }
 0x46d   : > { %2144 = vrot.lane.b32.xlu2 %v2143_v13, %s5082_s28 }
 0x46f   : > { %2186 = vperm.xlu1 %4930, %v5997_v11  }
 0x472   : > { %v1944_v2 = vpop.permute.xlu1 %1943 }
 0x473   : > { %v1949_v16 = vperm.slane %v1944_v2, %v5566_v45 }
 0x475   : > { %2159 = vrot.lane.b32.xlu2 %v2156_v44, %s5060_s16 }
 0x48d   : > { %v1959_v8 = vpop.permute.xlu2 %1958 }
 0x48e   : > { %v1962_v43 = vrot.slane %v1959_v8, 4 }
 0x495   : > { %v1974_v56 = vpop.permute.xlu2 %1973 }
 0x496   : > { %v1979_v4 = vperm.slane %v1974_v56, %v5566_v45 }
 0x49e   : > { %v2004_v7 = vpop.permute.xlu2 %2003 }
 0x49f   : > { %v1961_v34 = vpop.permute.xlu1 %1960  ;;  %v2009_v17 = vperm.slane %v2004_v7, %v5566_v45 }
 0x4a0   : > { %v1963_v32 = vrot.slane %v1961_v34, 4 }
 0x4a2   : > { %v1964_v60 = vsel %vm347_vm1, %v1962_v43, %v1963_v32  ;;  %v5137_v43 = vmov 65  }
 0x4a3   : > { %v1965_v39 = vsel %vm374_vm7, %v1959_v8, %v1964_v60  ;;  %4931 = vset.pattern.permute.xlu2 %v5137_v43 }
 0x4a4   : > { %v1967_v38 = vmul.f32 %v1965_v39, %v1949_v16 }
 0x4a6   : > { %v1968_v25 = vadd.f32 %v1967_v38, %v1941_v36 }
 0x4a7   : > { %v1991_v52 = vpop.permute.xlu1 %1990  ;;  %v2031_v18 = vpop.permute.xlu2 %2030 }
 0x4a8   : > { %v1993_v61 = vrot.slane %v1991_v52, 4  ;;  %v1989_v42 = vpop.permute.xlu0 %1988  ;;  %v2036_v54 = vperm.slane %v2031_v18, %v5566_v45 }
 0x4a9   : > { %v1992_v35 = vrot.slane %v1989_v42, 4 }
 0x4aa   : > { %v2044_v13 = vmul.f32 %v6000_v1, %v2036_v54 }
 0x4ab   : > { %v1994_v23 = vsel %vm347_vm1, %v1992_v35, %v1993_v61 }
 0x4ac   : > { %v1995_v20 = vsel %vm417_vm8, %v1989_v42, %v1994_v23 }
 0x4ad   : > { %v1997_v3 = vmul.f32 %v1995_v20, %v1979_v4 }
 0x4af   : > { %v2021_v21 = vpop.permute.xlu1 %2020  ;;  %v2068_v51 = vpop.permute.xlu2 %2067  ;;  %v1998_v31 = vadd.f32 %v1997_v3, %v1968_v25 }
 0x4b0   : > { %v2023_v53 = vrot.slane %v2021_v21, 4  ;;  %v2019_v15 = vpop.permute.xlu0 %2018  ;;  %v2070_v32 = vrot.slane %v2068_v51, 4 }
 0x4b1   : > { %v2022_v30 = vrot.slane %v2019_v15, 4 }
 0x4b3   : > { %v2024_v9 = vsel %vm347_vm1, %v2022_v30, %v2023_v53 }
 0x4b4   : > { %v2025_v59 = vsel %vm457_vm9, %v2019_v15, %v2024_v9 }
 0x4b5   : > { %v2027_v19 = vmul.f32 %v2025_v59, %v2009_v17 }
 0x4b7   : > { %v2028_v44 = vadd.f32 %v2027_v19, %v1998_v31  ;;  %v2066_v8 = vpop.permute.xlu1 %2065  ;;  %v2096_v37 = vpop.permute.xlu2 %2095  ;;  %v5138_v31 = vmov 68  }
 0x4b8   : > { %v2051_v2 = vpop.permute.xlu0 %2050  ;;  %v2069_v7 = vrot.slane %v2066_v8, 4  ;;  %v2099_v61 = vrot.slane %v2096_v37, 4  ;;  %4934 = vset.pattern.permute.xlu0 %v5138_v31 }
 0x4b9   : > { %v2045_v56 = vadd.f32 %v2044_v13, %v2028_v44  ;;  %v2056_v60 = vperm.slane %v2051_v2, %v5566_v45 }
 0x4ba   : > { %v2071_v18 = vsel %vm347_vm1, %v2069_v7, %v2070_v32 }
 0x4bb   : > { %v2072_v23 = vsel %vm514_vm10, %v2066_v8, %v2071_v18 }
 0x4bc   : > { %v2074_v4 = vmul.f32 %v2072_v23, %v2056_v60 }
 0x4be   : > { %v2075_v36 = vadd.f32 %v2074_v4, %v2045_v56 }
 0x4bf   : > { %v2081_v34 = vpop.permute.xlu1 %2080  ;;  %v2115_v11 = vpop.permute.xlu2 %2114 }
 0x4c0   : > { %v2098_v0 = vpop.permute.xlu0 %2097  ;;  %v2118_v58 = vrot.slane %v2115_v11, 4  ;;  %v2086_v21 = vperm.slane %v2081_v34, %v5566_v45 }
 0x4c1   : > { %v2100_v52 = vrot.slane %v2098_v0, 4 }
 0x4c3   : > { %v2101_v39 = vsel %vm347_vm1, %v2099_v61, %v2100_v52 }
 0x4c4   : > { %v2102_v38 = vsel %vm554_vm11, %v2096_v37, %v2101_v39  ;;  %v5139_v37 = vmov 69  }
 0x4c5   : > { %v2104_v15 = vmul.f32 %v2102_v38, %v2086_v21  ;;  %4935 = vset.pattern.permute.xlu1 %v5139_v37 }
 0x4c7   : > { %v2145_v42 = vpop.permute.xlu2 %2144  ;;  %v2105_v13 = vadd.f32 %v2104_v15, %v2075_v36 }
 0x4c8   : > { %v2117_v1 = vpop.permute.xlu0 %2116  ;;  %v2108_v35 = vpop.permute.xlu1 %2107  ;;  %v2148_v17 = vrot.slane %v2145_v42, 4 }
 0x4c9   : > { %v2119_v16 = vrot.slane %v2117_v1, 4  ;;  %v2113_v51 = vperm.slane %v2108_v35, %v5566_v45 }
 0x4cb   : > { %v2120_v20 = vsel %vm347_vm1, %v2118_v58, %v2119_v16 }
 0x4cc   : > { %v2121_v53 = vsel %vm574_vm12, %v2115_v11, %v2120_v20 }
 0x4cd   : > { %v2123_v25 = vmul.f32 %v2121_v53, %v2113_v51 }
 0x4cf   : > { %v2160_v14 = vpop.permute.xlu2 %2159  ;;  %v2124_v2 = vadd.f32 %v2123_v25, %v2105_v13 }
 0x4d0   : > { %v2147_v3 = vpop.permute.xlu0 %2146  ;;  %v6386_v30 = vsel %vm318_vm0, %v2160_v14, 0.0 }
 0x4d1   : > { %v2149_v54 = vrot.slane %v2147_v3, 4  ;;  %v2130_v9 = vpop.permute.xlu1 %2129  ;;  %v2195_v59 = vperm.slane %v6386_v30, 0  ;;  %v2214_v34 = vmul.f32 %v6386_v30, %v5352_v40  ;;  %v2244_v39 = vmul.f32 %v6386_v30, %v5375_v55 }
 0x4d2   : > { %v2135_v19 = vperm.slane %v2130_v9, %v5566_v45 }
 0x4d3   : > { %v2150_v44 = vsel %vm347_vm1, %v2148_v17, %v2149_v54  ;;  %2203 = vrot.lane.b32.xlu1 %v2195_v59, %s5078_s24  ;;  %v2225_v7 = vperm.slane %v2214_v34, 0  ;;  %v5141_v34 = vmov 67  }
 0x4d4   : > { %v2151_v8 = vsel %vm614_vm13, %v2145_v42, %v2150_v44 }
 0x4d5   : > { %v2153_v56 = vmul.f32 %v2151_v8, %v2135_v19  ;;  %v5044_v19 = vld [vmem:[%s7635_s1] sm:$0xf] }
 0x4d7   : > { %v2154_v11 = vadd.f32 %v2153_v56, %v2124_v2  ;;  %v5140_v2 = vmov 66   ;;  %v2321_v56 = vmul.f32 %v6386_v30, %v7701_v10 }
 0x4d9   : > { %v2158_v0 = vpop.permute.xlu1 %2157  ;;  %v6398_v32 = vadd.f32 %v6278_v28, %v2154_v11  ;;  %v2332_v11 = vperm.slane %v2321_v56, 0 }
 0x4da   : > { %v6401_v43 = vsel %vm318_vm0, %v2158_v0, %v2160_v14  ;;  %v6404_v52 = vsel %vm318_vm0, 0.0, %v2158_v0  ;;  %v2255_v14 = vperm.slane %v2244_v39, 0  ;;  %v5142_v0 = vmov 70  }
 0x4db   : > { %2233 = vrot.lane.b32.xlu1 %v2225_v7, %s5080_s26  ;;  %v2167_v18 = vmul.f32 %v6404_v52, %v5281_v5  ;;  %v2168_v61 = vmul.f32 %v6401_v43, %v5297_v12  ;;  %v2194_v42 = vperm.slane %v6401_v43, 0  ;;  %v2212_v28 = vmul.f32 %v6404_v52, %v5358_v46 }
 0x4dc   : > { %v2213_v60 = vmul.f32 %v6401_v43, %v5390_v62  ;;  %v2193_v35 = vperm.slane %v6404_v52, 0  ;;  %v2243_v16 = vmul.f32 %v6401_v43, %v7698_v6  ;;  %v2290_v21 = vmul.f32 %v6401_v43, %v5419_v48 }
 0x4dd   : > { %v2178_v1 = vperm.slane %v2168_v61, 0  ;;  %v2199_v23 = vrot.slane %v2194_v42, 4  ;;  %v2177_v20 = vperm.slane %v2167_v18, 0  ;;  %v2223_v51 = vperm.slane %v2212_v28, 0 }
 0x4de   : > { %v2224_v58 = vperm.slane %v2213_v60, 0  ;;  %v2254_v3 = vperm.slane %v2243_v16, 0  ;;  %v2301_v17 = vperm.slane %v2290_v21, 0  ;;  %v2242_v25 = vmul.f32 %v6404_v52, %v7699_v22 }
 0x4df   : > { %v2181_v4 = vrot.slane %v2178_v1, 4  ;;  %v2200_v38 = vsel %vm347_vm1, %v2193_v35, %v2199_v23  ;;  %v2289_v54 = vmul.f32 %v6404_v52, %v5331_v27  ;;  %v2291_v7 = vmul.f32 %v6386_v30, %v7702_v63 }
 0x4e0   : > { %2201 = vrot.lane.b32.xlu2 %v2200_v38, %s5078_s24  ;;  %v2229_v53 = vrot.slane %v2224_v58, 4  ;;  %v2259_v9 = vrot.slane %v2254_v3, 4  ;;  %v2306_v31 = vrot.slane %v2301_v17, 4  ;;  %v2253_v13 = vperm.slane %v2242_v25, 0  ;;  %v2171_v25 = vpop.permute.xlu0 %2170 }
 0x4e1   : > { %v6426_v15 = vsel %vm347_vm1, %v2177_v20, %v2181_v4  ;;  %v2300_v44 = vperm.slane %v2289_v54, 0  ;;  %v2320_v18 = vmul.f32 %v6401_v43, %v7703_v26  ;;  %v2302_v61 = vperm.slane %v2291_v7, 0 }
 0x4e2   : > { %v2230_v36 = vsel %vm347_vm1, %v2223_v51, %v2229_v53  ;;  %v2260_v8 = vsel %vm347_vm1, %v2253_v13, %v2259_v9  ;;  %v2319_v28 = vmul.f32 %v6404_v52, %v7705_v50  ;;  %v5143_v60 = vmov 71  }
 0x4e3   : > { %2231 = vrot.lane.b32.xlu0 %v2230_v36, %s5080_s26  ;;  %2263 = vrot.lane.b32.xlu1 %v2255_v14, %s5083_s9  ;;  %v2307_v37 = vsel %vm347_vm1, %v2300_v44, %v2306_v31  ;;  %v2331_v42 = vperm.slane %v2320_v18, 0  ;;  %v2370_v1 = vmul.f32 %v6386_v30, %v7706_v49  ;;  %v2369_v16 = vmul.f32 %v6401_v43, %v7707_v57  ;;  %v2187_v14 = vpop.permute.xlu1 %2186 }
 0x4e4   : > { %v2330_v23 = vperm.slane %v2319_v28, 0  ;;  %v2368_v20 = vmul.f32 %v6404_v52, %v7708_v41  ;;  %v2192_v56 = vperm.slane %v2187_v14, %v5566_v45 }
 0x4e5   : > { %v2336_v35 = vrot.slane %v2331_v42, 4  ;;  %v2381_v39 = vperm.slane %v2370_v1, 0  ;;  %v2380_v30 = vperm.slane %v2369_v16, 0 }
 0x4e6   : > { %v2379_v21 = vperm.slane %v2368_v20, 0 }
 0x4e7   : > { %v2337_v58 = vsel %vm347_vm1, %v2330_v23, %v2336_v35  ;;  %v2385_v4 = vrot.slane %v2380_v30, 4 }
 0x4e8   : > { %2216 = vperm.xlu2 %4931, %v5044_v19  }
 0x4e9   : > { %v2386_v51 = vsel %vm347_vm1, %v2379_v21, %v2385_v4 }
 0x4eb   : > { %2261 = vrot.lane.b32.xlu0 %v2260_v8, %s5083_s9  ;;  %2308 = vrot.lane.b32.xlu1 %v2307_v37, %s5084_s10 }
 0x4f0   : > { %4932 = vset.pattern.permute.xlu2 %v5140_v2  ;;  %v2176_v2 = vperm.slane %v2171_v25, %v5566_v45 }
 0x4f1   : > { %2246 = vperm.xlu2 %4932, %v5044_v19  }
 0x4f2   : > { %v2184_v42 = vmul.f32 %v6426_v15, %v2176_v2 }
 0x4f3   : > { %2293 = vperm.xlu0 %4934, %v5044_v19   ;;  %2323 = vperm.xlu1 %4935, %v5044_v19  }
 0x4f9   : > { %4933 = vset.pattern.permute.xlu2 %v5141_v34 }
 0x4fa   : > { %2273 = vperm.xlu2 %4933, %v5044_v19  }
 0x4fb   : > { %2340 = vrot.lane.b32.xlu0 %v2332_v11, %s5081_s27  ;;  %4936 = vset.pattern.permute.xlu1 %v5142_v0 }
 0x4fc   : > { %2350 = vperm.xlu1 %4936, %v5044_v19  }
 0x502   : > { %2310 = vrot.lane.b32.xlu2 %v2302_v61, %s5084_s10 }
 0x503   : > { %2359 = vrot.lane.b32.xlu0 %v2195_v59, %s5079_s25  ;;  %v4708_v59 = vld [vmem:[%s7636_s2 + $0x4] sm:$0xf] }
 0x504   : > { %4937 = vset.pattern.permute.xlu1 %v5143_v60 }
 0x505   : > { %2372 = vperm.xlu1 %4937, %v5044_v19  }
 0x50a   : > { %2338 = vrot.lane.b32.xlu2 %v2337_v58, %s5081_s27 }
 0x50b   : > { %2389 = vrot.lane.b32.xlu0 %v2381_v39, %s5082_s28 }
 0x50d   : > { %4938 = vset.pattern.permute.xlu1 %v7709_v47 }
 0x50e   : > { %2405 = vperm.xlu1 %4938, %v4708_v59  }
 0x512   : > { %2357 = vrot.lane.b32.xlu2 %v2200_v38, %s5079_s25 }
 0x51a   : > { %2387 = vrot.lane.b32.xlu2 %v2386_v51, %s5082_s28 }
 0x53a   : > { %v2202_v53 = vpop.permute.xlu2 %2201 }
 0x53b   : > { %v2205_v9 = vrot.slane %v2202_v53, 4 }
 0x542   : > { %v2217_v36 = vpop.permute.xlu2 %2216 }
 0x543   : > { %v2222_v11 = vperm.slane %v2217_v36, %v5566_v45 }
 0x545   : > { %v2204_v3 = vpop.permute.xlu1 %2203 }
 0x546   : > { %v2206_v54 = vrot.slane %v2204_v3, 4 }
 0x548   : > { %v2207_v52 = vsel %vm347_vm1, %v2205_v9, %v2206_v54 }
 0x549   : > { %v2208_v37 = vsel %vm374_vm7, %v2202_v53, %v2207_v52 }
 0x54a   : > { %v2210_v0 = vmul.f32 %v2208_v37, %v2192_v56 }
 0x54b   : > { %v2247_v17 = vpop.permute.xlu2 %2246 }
 0x54c   : > { %v2252_v35 = vperm.slane %v2247_v17, %v5566_v45  ;;  %v2211_v23 = vadd.f32 %v2210_v0, %v2184_v42 }
 0x54d   : > { %v2234_v43 = vpop.permute.xlu1 %2233 }
 0x54e   : > { %v2236_v13 = vrot.slane %v2234_v43, 4 }
 0x554   : > { %v2274_v31 = vpop.permute.xlu2 %2273 }
 0x555   : > { %v2232_v38 = vpop.permute.xlu0 %2231  ;;  %v2264_v19 = vpop.permute.xlu1 %2263  ;;  %v2279_v39 = vperm.slane %v2274_v31, %v5566_v45 }
 0x556   : > { %v2235_v44 = vrot.slane %v2232_v38, 4  ;;  %v2266_v60 = vrot.slane %v2264_v19, 4 }
 0x557   : > { %v2287_v20 = vmul.f32 %v6003_v24, %v2279_v39 }
 0x558   : > { %v2237_v8 = vsel %vm347_vm1, %v2235_v44, %v2236_v13 }
 0x559   : > { %v2238_v34 = vsel %vm417_vm8, %v2232_v38, %v2237_v8 }
 0x55a   : > { %v2240_v28 = vmul.f32 %v2238_v34, %v2222_v11 }
 0x55c   : > { %v2311_v7 = vpop.permute.xlu2 %2310  ;;  %v2241_v16 = vadd.f32 %v2240_v28, %v2211_v23 }
 0x55d   : > { %v2262_v18 = vpop.permute.xlu0 %2261  ;;  %v2309_v61 = vpop.permute.xlu1 %2308  ;;  %v2313_v3 = vrot.slane %v2311_v7, 4 }
 0x55e   : > { %v2265_v1 = vrot.slane %v2262_v18, 4  ;;  %v2312_v17 = vrot.slane %v2309_v61, 4 }
 0x560   : > { %v2267_v58 = vsel %vm347_vm1, %v2265_v1, %v2266_v60  ;;  %v2314_v9 = vsel %vm347_vm1, %v2312_v17, %v2313_v3 }
 0x561   : > { %v2268_v59 = vsel %vm457_vm9, %v2262_v18, %v2267_v58  ;;  %v2315_v44 = vsel %vm514_vm10, %v2309_v61, %v2314_v9 }
 0x562   : > { %v2270_v30 = vmul.f32 %v2268_v59, %v2252_v35  ;;  %v5144_v35 = vmov 72  }
 0x563   : > { %4939 = vset.pattern.permute.xlu0 %v5144_v35  ;;  %v5146_v35 = vmov 76  }
 0x564   : > { %v2271_v4 = vadd.f32 %v2270_v30, %v2241_v16  ;;  %v2339_v53 = vpop.permute.xlu2 %2338 }
 0x565   : > { %v2294_v21 = vpop.permute.xlu0 %2293  ;;  %v2324_v51 = vpop.permute.xlu1 %2323  ;;  %v2342_v54 = vrot.slane %v2339_v53, 4 }
 0x566   : > { %v2288_v15 = vadd.f32 %v2287_v20, %v2271_v4  ;;  %v2299_v31 = vperm.slane %v2294_v21, %v5566_v45  ;;  %v2329_v56 = vperm.slane %v2324_v51, %v5566_v45 }
 0x568   : > { %v2317_v37 = vmul.f32 %v2315_v44, %v2299_v31 }
 0x56a   : > { %v2318_v18 = vadd.f32 %v2317_v37, %v2288_v15  ;;  %v5045_v15 = vld [vmem:[%s7638_s4] sm:$0xff] }
 0x56c   : > { %v2358_v25 = vpop.permute.xlu2 %2357 }
 0x56d   : > { %v2341_v14 = vpop.permute.xlu0 %2340  ;;  %v2361_v24 = vrot.slane %v2358_v25, 4 }
 0x56e   : > { %v2351_v36 = vpop.permute.xlu1 %2350  ;;  %v2343_v43 = vrot.slane %v2341_v14, 4  ;;  %v5145_v14 = vmov 73  }
 0x56f   : > { %v2356_v7 = vperm.slane %v2351_v36, %v5566_v45  ;;  %4940 = vset.pattern.permute.xlu1 %v5145_v14 }
 0x570   : > { %v2344_v19 = vsel %vm347_vm1, %v2342_v54, %v2343_v43  ;;  %v2458_v43 = vld [vmem:[%s5276_s15 + $0x18] sm:$0xf]  ;;  %v2457_v54 = vld [vmem:[%s5276_s15 + $0x10] sm:$0xf] }
 0x571   : > { %v2345_v2 = vsel %vm554_vm11, %v2339_v53, %v2344_v19 }
 0x572   : > { %v2347_v0 = vmul.f32 %v2345_v2, %v2329_v56 }
 0x574   : > { %v2388_v11 = vpop.permute.xlu2 %2387  ;;  %v2348_v61 = vadd.f32 %v2347_v0, %v2318_v18  ;;  %v6530_v0 = vld [vmem:[%s7635_s1] sm:$0xf] }
 0x575   : > { %v2360_v38 = vpop.permute.xlu0 %2359  ;;  %v2391_v60 = vrot.slane %v2388_v11, 4 }
 0x576   : > { %v2362_v52 = vrot.slane %v2360_v38, 4 }
 0x577   : > { %v2373_v13 = vpop.permute.xlu1 %2372 }
 0x578   : > { %v2363_v8 = vsel %vm347_vm1, %v2361_v24, %v2362_v52  ;;  %v2378_v23 = vperm.slane %v2373_v13, %v5566_v45 }
 0x579   : > { %v2364_v34 = vsel %vm574_vm12, %v2358_v25, %v2363_v8 }
 0x57a   : > { %v2366_v28 = vmul.f32 %v2364_v34, %v2356_v7 }
 0x57c   : > { %v2367_v30 = vadd.f32 %v2366_v28, %v2348_v61  ;;  %v5147_v61 = vmov 74  }
 0x57d   : > { %v2390_v42 = vpop.permute.xlu0 %2389 }
 0x57e   : > { %v2392_v1 = vrot.slane %v2390_v42, 4 }
 0x580   : > { %v2393_v39 = vsel %vm347_vm1, %v2391_v60, %v2392_v1  ;;  %v2406_v59 = vpop.permute.xlu1 %2405 }
 0x581   : > { %v2394_v58 = vsel %vm614_vm13, %v2388_v11, %v2393_v39  ;;  %v2410_v4 = vperm.slane %v2406_v59, %v5566_v45  ;;  %v5149_v39 = vmov 78   ;;  %v5151_v59 = vmov 79  }
 0x582   : > { %v2396_v16 = vmul.f32 %v2394_v58, %v2378_v23  ;;  %v5148_v23 = vmov 77   ;;  %v5150_v58 = vmov 75  }
 0x583   : > { %4942 = vset.pattern.permute.xlu2 %v5150_v58 }
 0x584   : > { %v2397_v20 = vadd.f32 %v2396_v16, %v2367_v30 }
 0x586   : > { %v2400_v21 = vadd.f32 %v6398_v32, %v2397_v20 }
 0x588   : > { %v6498_v51 = vadd.f32 %v2410_v4, %v2400_v21 }
 0x58a   : > { %7712 = vst [vmem:[#allocation3_spill] sm:$0xff] %v6498_v51  ;;  %v2413_v53 = vmul.f32 %v5045_v15, %v6498_v51 }
 0x58c   : > { %2415 = vst [vmem:[#allocation1] ss:$2 sm:$0xff] %v2413_v53 }
 0x593   : > { %v2416_v36 = vld.sshfl [vmem:[#allocation1] sm:$0xff pattern:$0x75316420]  ;;  %v2417_v3 = vld.sshfl [vmem:[#allocation1 + $0x8] sm:$0xff pattern:$0x75316420] }
 0x594   : > { %v2420_v17 = vsel %vm347_vm1, %v2416_v36, 0.0  ;;  %v2421_v25 = vsel %vm347_vm1, %v2417_v3, 0.0  ;;  %2460 = vst [vmem:[#allocation1] ss:$2 sm:$0xff] %v6498_v51 }
 0x595   : > { %v2422_v32 = vadd.f32 %v2421_v25, %v2420_v17 }
 0x597   : > { %2423 = vadd.xlane.f32.xlu2 %v2422_v32 }
 0x59b   : > { %v2462_v9 = vld.sshfl [vmem:[#allocation1 + $0x8] sm:$0xff pattern:$0x75316420]  ;;  %v2461_v31 = vld.sshfl [vmem:[#allocation1] sm:$0xff pattern:$0x75316420] }
 0x59c   : > { %v6509_v38 = vadd.f32 %v2462_v9, %v2458_v43  ;;  %v6511_v19 = vadd.f32 %v2461_v31, %v2457_v54 }
 0x59e   : > { %2471 = vrot.lane.b32.xlu1 %v6509_v38, %s5060_s16  ;;  %2469 = vrot.lane.b32.xlu0 %v6511_v19, %s5060_s16  ;;  %v2595_v24 = vperm.slane %v6509_v38, 0  ;;  %v2838_v52 = vperm.slane %v6509_v38, 1  ;;  %v2594_v44 = vperm.slane %v6511_v19, 0  ;;  %v2837_v8 = vperm.slane %v6511_v19, 1 }
 0x59f   : > { %v3081_v2 = vperm.slane %v6509_v38, 2  ;;  %v3324_v56 = vperm.slane %v6509_v38, 3  ;;  %v3080_v11 = vperm.slane %v6511_v19, 2  ;;  %v3323_v42 = vperm.slane %v6511_v19, 3 }
 0x5a0   : > { %v2598_v13 = vrot.slane %v2595_v24, 4  ;;  %v2841_v37 = vrot.slane %v2838_v52, 4 }
 0x5a1   : > { %v3084_v18 = vrot.slane %v3081_v2, 4  ;;  %v3327_v28 = vrot.slane %v3324_v56, 4 }
 0x5a2   : > { %v6524_v34 = vsel %vm347_vm1, %v2594_v44, %v2598_v13  ;;  %v6533_v7 = vsel %vm347_vm1, %v2837_v8, %v2841_v37 }
 0x5a3   : > { %v6537_v60 = vsel %vm347_vm1, %v3080_v11, %v3084_v18  ;;  %v6540_v1 = vsel %vm347_vm1, %v3323_v42, %v3327_v28 }
 0x5a4   : > { %7713 = vst [vmem:[#allocation5_spill] sm:$0xff] %v6540_v1 }
 0x5a6   : > { %2484 = vperm.xlu0 %4939, %v6530_v0   ;;  %2500 = vperm.xlu1 %4940, %v6530_v0  }
 0x5ae   : > { %4943 = vset.pattern.permute.xlu0 %v5146_v35  ;;  %4941 = vset.pattern.permute.xlu1 %v5147_v61 }
 0x5af   : > { %2587 = vperm.xlu0 %4943, %v6530_v0   ;;  %2530 = vperm.xlu1 %4941, %v6530_v0  }
 0x5b0   : > { %2560 = vperm.xlu2 %4942, %v6530_v0  }
 0x5b7   : > { %4944 = vset.pattern.permute.xlu1 %v5148_v23  ;;  %4945 = vset.pattern.permute.xlu0 %v5149_v39  ;;  %v5152_v23 = vmov 80  }
 0x5b8   : > { %2607 = vperm.xlu1 %4944, %v6530_v0   ;;  %2637 = vperm.xlu0 %4945, %v6530_v0  }
 0x5c0   : > { %4946 = vset.pattern.permute.xlu1 %v5151_v59 }
 0x5c1   : > { %2664 = vperm.xlu1 %4946, %v6530_v0  }
 0x5c9   : > { %4947 = vset.pattern.permute.xlu1 %v5152_v23  ;;  %v5154_v23 = vmov 82  }
 0x610   : > { %v2472_v16 = vpop.permute.xlu1 %2471  ;;  %v2470_v30 = vpop.permute.xlu0 %2469 }
 0x611   : > { %v6551_v20 = vsel %vm318_vm0, %v2472_v16, 0.0  ;;  %v2473_v4 = vsel %vm318_vm0, %v2470_v30, %v2472_v16  ;;  %v6555_v21 = vsel %vm318_vm0, 0.0, %v2470_v30 }
 0x612   : > { %v2509_v15 = vperm.slane %v6551_v20, 0  ;;  %v2528_v53 = vmul.f32 %v6551_v20, %v5352_v40  ;;  %v2605_v14 = vmul.f32 %v6551_v20, %v7702_v63  ;;  %v2479_v36 = vmul.f32 %v6555_v21, %v5281_v5 }
 0x613   : > { %v2480_v3 = vmul.f32 %v2473_v4, %v5297_v12  ;;  %v2527_v17 = vmul.f32 %v2473_v4, %v5390_v62  ;;  %v2526_v54 = vmul.f32 %v6555_v21, %v5358_v46  ;;  %v2557_v13 = vmul.f32 %v2473_v4, %v7698_v6 }
 0x614   : > { %2517 = vrot.lane.b32.xlu0 %v2509_v15, %s5078_s24  ;;  %v2539_v25 = vperm.slane %v2528_v53, 0  ;;  %v2616_v32 = vperm.slane %v2605_v14, 0  ;;  %v2491_v31 = vperm.slane %v2479_v36, 0  ;;  %v2558_v44 = vmul.f32 %v6551_v20, %v5375_v55 }
 0x615   : > { %v2492_v43 = vperm.slane %v2480_v3, 0  ;;  %v2538_v9 = vperm.slane %v2527_v17, 0  ;;  %v2635_v8 = vmul.f32 %v6551_v20, %v7701_v10  ;;  %v2537_v2 = vperm.slane %v2526_v54, 0 }
 0x616   : > { %2547 = vrot.lane.b32.xlu1 %v2539_v25, %s5080_s26  ;;  %2624 = vrot.lane.b32.xlu2 %v2616_v32, %s5084_s10  ;;  %v2568_v11 = vperm.slane %v2557_v13, 0  ;;  %v2569_v18 = vperm.slane %v2558_v44, 0  ;;  %v2556_v28 = vmul.f32 %v6555_v21, %v7699_v22  ;;  %v2508_v35 = vperm.slane %v2473_v4, 0 }
 0x617   : > { %v2495_v24 = vrot.slane %v2492_v43, 4  ;;  %v2543_v52 = vrot.slane %v2538_v9, 4  ;;  %v2646_v42 = vperm.slane %v2635_v8, 0  ;;  %v2604_v59 = vmul.f32 %v2473_v4, %v5419_v48 }
 0x618   : > { %v2573_v61 = vrot.slane %v2568_v11, 4  ;;  %v2567_v39 = vperm.slane %v2556_v28, 0  ;;  %v2513_v58 = vrot.slane %v2508_v35, 4  ;;  %v2683_v16 = vmul.f32 %v2473_v4, %v7707_v57  ;;  %v2485_v35 = vpop.permute.xlu0 %2484 }
 0x619   : > { %v6577_v37 = vsel %vm347_vm1, %v2491_v31, %v2495_v24  ;;  %v2544_v56 = vsel %vm347_vm1, %v2537_v2, %v2543_v52  ;;  %v2507_v53 = vperm.slane %v6555_v21, 0  ;;  %v2615_v36 = vperm.slane %v2604_v59, 0 }
 0x61a   : > { %v2574_v30 = vsel %vm347_vm1, %v2567_v39, %v2573_v61  ;;  %v2694_v3 = vperm.slane %v2683_v16, 0  ;;  %v2603_v17 = vmul.f32 %v6555_v21, %v5331_v27  ;;  %v2682_v25 = vmul.f32 %v6555_v21, %v7708_v41 }
 0x61b   : > { %v2514_v14 = vsel %vm347_vm1, %v2507_v53, %v2513_v58  ;;  %v5153_v32 = vmov 81   ;;  %v2620_v43 = vrot.slane %v2615_v36, 4  ;;  %v2634_v9 = vmul.f32 %v2473_v4, %v7703_v26 }
 0x61c   : > { %2545 = vrot.lane.b32.xlu0 %v2544_v56, %s5080_s26  ;;  %v2699_v54 = vrot.slane %v2694_v3, 4  ;;  %v2614_v31 = vperm.slane %v2603_v17, 0  ;;  %v2693_v24 = vperm.slane %v2682_v25, 0  ;;  %v2684_v8 = vmul.f32 %v6551_v20, %v7706_v49 }
 0x61d   : > { %4948 = vset.pattern.permute.xlu0 %v5153_v32  ;;  %v2645_v44 = vperm.slane %v2634_v9, 0  ;;  %v2633_v2 = vmul.f32 %v6555_v21, %v7705_v50  ;;  %v2712_v20 = vrot.slane %v6511_v19, 1  ;;  %v6616_v21 = vpop.xlane.xlu2 %2423 }
 0x61e   : > { %2577 = vrot.lane.b32.xlu1 %v2569_v18, %s5083_s9  ;;  %2654 = vrot.lane.b32.xlu2 %v2646_v42, %s5081_s27  ;;  %v2621_v52 = vsel %vm347_vm1, %v2614_v31, %v2620_v43  ;;  %v2700_v13 = vsel %vm347_vm1, %v2693_v24, %v2699_v54  ;;  %v2695_v56 = vperm.slane %v2684_v8, 0  ;;  %7714 = vst [vmem:[#allocation7_spill] sm:$0xff] %v6616_v21  ;;  %v2501_v42 = vpop.permute.xlu1 %2500 }
 0x61f   : > { %v2650_v4 = vrot.slane %v2645_v44, 4  ;;  %v2644_v11 = vperm.slane %v2633_v2, 0  ;;  %v2490_v8 = vperm.slane %v2485_v35, %v5566_v45 }
 0x621   : > { %v2651_v18 = vsel %vm347_vm1, %v2644_v11, %v2650_v4  ;;  %v2588_v58 = vpop.permute.xlu0 %2587  ;;  %v2498_v35 = vmul.f32 %v6577_v37, %v2490_v8  ;;  %v5155_v8 = vmov 83  }
 0x622   : > { %4950 = vset.pattern.permute.xlu2 %v5155_v8 }
 0x624   : > { %2575 = vrot.lane.b32.xlu0 %v2574_v30, %s5083_s9 }
 0x625   : > { %v2561_v28 = vpop.permute.xlu2 %2560 }
 0x626   : > { %2515 = vrot.lane.b32.xlu1 %v2514_v14, %s5078_s24  ;;  %2671 = vrot.lane.b32.xlu2 %v2514_v14, %s5079_s25  ;;  %v2531_v61 = vpop.permute.xlu1 %2530 }
 0x62a   : > { %v6625_v30 = vpop.permute.xlu0 %2637 }
 0x62c   : > { %2673 = vrot.lane.b32.xlu0 %v2509_v15, %s5079_s25  ;;  %v2713_v15 = vrot.slane %v6509_v38, 1 }
 0x62e   : > { %2622 = vrot.lane.b32.xlu1 %v2621_v52, %s5084_s10  ;;  %2701 = vrot.lane.b32.xlu2 %v2700_v13, %s5082_s28  ;;  %v6621_v59 = vpop.permute.xlu1 %2607 }
 0x634   : > { %2703 = vrot.lane.b32.xlu0 %v2695_v56, %s5082_s28 }
 0x636   : > { %2652 = vrot.lane.b32.xlu1 %v2651_v18, %s5081_s27  ;;  %2716 = vrot.lane.b32.xlu2 %v2713_v15, %s5060_s16  ;;  %v6627_v53 = vpop.permute.xlu1 %2664 }
 0x63c   : > { %2727 = vperm.xlu0 %4948, %v6530_v0  }
 0x63e   : > { %2686 = vperm.xlu1 %4947, %v6530_v0  }
 0x646   : > { %2714 = vrot.lane.b32.xlu1 %v2712_v20, %s5060_s16  ;;  %v2506_v20 = vperm.slane %v2501_v42, %v5566_v45 }
 0x647   : > { %4949 = vset.pattern.permute.xlu1 %v5154_v23 }
 0x64e   : > { %2743 = vperm.xlu1 %4949, %v6530_v0  }
 0x670   : > { %v6619_v39 = vpop.permute.xlu2 %2624 }
 0x678   : > { %v6623_v16 = vpop.permute.xlu2 %2654 }
 0x680   : > { %v6629_v14 = vpop.permute.xlu2 %2671 }
 0x686   : > { %v2518_v36 = vpop.permute.xlu0 %2517 }
 0x687   : > { %v2520_v4 = vrot.slane %v2518_v36, 4  ;;  %v2536_v36 = vperm.slane %v2531_v61, %v5566_v45 }
 0x688   : > { %v2548_v3 = vpop.permute.xlu1 %2547  ;;  %v6631_v17 = vpop.permute.xlu2 %2701 }
 0x689   : > { %v2550_v13 = vrot.slane %v2548_v3, 4 }
 0x68e   : > { %v2546_v25 = vpop.permute.xlu0 %2545 }
 0x68f   : > { %v2549_v31 = vrot.slane %v2546_v25, 4 }
 0x690   : > { %v2578_v32 = vpop.permute.xlu1 %2577  ;;  %v2717_v43 = vpop.permute.xlu2 %2716 }
 0x691   : > { %v6634_v54 = vsel %vm318_vm0, %v2717_v43, 0.0  ;;  %v2551_v56 = vsel %vm347_vm1, %v2549_v31, %v2550_v13  ;;  %v2580_v11 = vrot.slane %v2578_v32, 4  ;;  %v2566_v13 = vperm.slane %v2561_v28, %v5566_v45 }
 0x692   : > { %v7681_v9 = vperm.slane %v6634_v54, 0  ;;  %v2771_v52 = vmul.f32 %v6634_v54, %v5352_v40  ;;  %v2552_v51 = vsel %vm417_vm8, %v2546_v25, %v2551_v56  ;;  %v2801_v42 = vmul.f32 %v6634_v54, %v5375_v55 }
 0x693   : > { %v5157_v28 = vmov 86  }
 0x694   : > { %2760 = vrot.lane.b32.xlu1 %v7681_v9, %s5078_s24  ;;  %v2782_v18 = vperm.slane %v2771_v52, 0  ;;  %v2593_v52 = vperm.slane %v2588_v58, %v5566_v45  ;;  %v2812_v56 = vperm.slane %v2801_v42, 0  ;;  %v5156_v58 = vmov 87   ;;  %4953 = vset.pattern.permute.xlu0 %v5157_v28 }
 0x695   : > { %4954 = vset.pattern.permute.xlu1 %v5156_v58 }
 0x696   : > { %v2576_v24 = vpop.permute.xlu0 %2575  ;;  %v2601_v37 = vmul.f32 %v6524_v34, %v2593_v52 }
 0x697   : > { %v2579_v44 = vrot.slane %v2576_v24, 4 }
 0x698   : > { %v2516_v2 = vpop.permute.xlu1 %2515 }
 0x699   : > { %v2519_v15 = vrot.slane %v2516_v2, 4  ;;  %v2581_v23 = vsel %vm347_vm1, %v2579_v44, %v2580_v11  ;;  %v2554_v44 = vmul.f32 %v2552_v51, %v2536_v36 }
 0x69a   : > { %v2582_v32 = vsel %vm457_vm9, %v2576_v24, %v2581_v23 }
 0x69b   : > { %v2521_v9 = vsel %vm347_vm1, %v2519_v15, %v2520_v4 }
 0x69c   : > { %v2522_v3 = vsel %vm374_vm7, %v2516_v2, %v2521_v9  ;;  %2790 = vrot.lane.b32.xlu1 %v2782_v18, %s5080_s26  ;;  %v2584_v9 = vmul.f32 %v2582_v32, %v2566_v13 }
 0x69d   : > { %v2524_v31 = vmul.f32 %v2522_v3, %v2506_v20 }
 0x69f   : > { %v2525_v25 = vadd.f32 %v2524_v31, %v2498_v35 }
 0x6a0   : > { %v6657_v4 = vpop.permute.xlu1 %2622 }
 0x6a1   : > { %v2555_v2 = vadd.f32 %v2554_v44, %v2525_v25 }
 0x6a3   : > { %v2585_v61 = vadd.f32 %v2584_v9, %v2555_v2 }
 0x6a4   : > { %2820 = vrot.lane.b32.xlu1 %v2812_v56, %s5083_s9 }
 0x6a5   : > { %v6661_v24 = vadd.f32 %v2601_v37, %v2585_v61 }
 0x6a8   : > { %v6663_v11 = vpop.permute.xlu1 %2652 }
 0x6b0   : > { %v6665_v51 = vpop.permute.xlu1 %2686 }
 0x6b8   : > { %v2715_v15 = vpop.permute.xlu1 %2714 }
 0x6b9   : > { %v6668_v18 = vsel %vm318_vm0, %v2715_v15, %v2717_v43  ;;  %v6671_v34 = vsel %vm318_vm0, 0.0, %v2715_v15 }
 0x6ba   : > { %v2724_v20 = vmul.f32 %v6671_v34, %v5281_v5  ;;  %v2725_v23 = vmul.f32 %v6668_v18, %v5297_v12  ;;  %v2751_v3 = vperm.slane %v6668_v18, 0  ;;  %v2846_v35 = vmul.f32 %v6671_v34, %v5331_v27 }
 0x6bb   : > { %v2847_v36 = vmul.f32 %v6668_v18, %v5419_v48  ;;  %v2769_v43 = vmul.f32 %v6671_v34, %v5358_v46  ;;  %v2770_v31 = vmul.f32 %v6668_v18, %v5390_v62  ;;  %v2750_v42 = vperm.slane %v6671_v34, 0 }
 0x6bc   : > { %v2735_v32 = vperm.slane %v2725_v23, 0  ;;  %v2756_v52 = vrot.slane %v2751_v3, 4  ;;  %v2734_v25 = vperm.slane %v2724_v20, 0  ;;  %v2800_v56 = vmul.f32 %v6668_v18, %v7698_v6 }
 0x6bd   : > { %v2858_v13 = vperm.slane %v2847_v36, 0  ;;  %v2781_v44 = vperm.slane %v2770_v31, 0  ;;  %v2857_v37 = vperm.slane %v2846_v35, 0  ;;  %v2780_v8 = vperm.slane %v2769_v43, 0 }
 0x6be   : > { %v2738_v9 = vrot.slane %v2735_v32, 4  ;;  %v2757_v2 = vsel %vm347_vm1, %v2750_v42, %v2756_v52  ;;  %v2811_v20 = vperm.slane %v2800_v56, 0  ;;  %v2799_v3 = vmul.f32 %v6671_v34, %v7699_v22 }
 0x6bf   : > { %2758 = vrot.lane.b32.xlu2 %v2757_v2, %s5078_s24  ;;  %v2863_v61 = vrot.slane %v2858_v13, 4  ;;  %v2786_v58 = vrot.slane %v2781_v44, 4  ;;  %v5158_v31 = vmov 84   ;;  %v5159_v32 = vmov 88  }
 0x6c0   : > { %v6692_v28 = vsel %vm347_vm1, %v2734_v25, %v2738_v9  ;;  %v2816_v36 = vrot.slane %v2811_v20, 4  ;;  %v2810_v35 = vperm.slane %v2799_v3, 0  ;;  %v2878_v42 = vmul.f32 %v6634_v54, %v7701_v10 }
 0x6c1   : > { %v2864_v15 = vsel %vm347_vm1, %v2857_v37, %v2863_v61  ;;  %v2787_v23 = vsel %vm347_vm1, %v2780_v8, %v2786_v58  ;;  %v5160_v52 = vmov 85   ;;  %v5161_v44 = vmov 89  }
 0x6c2   : > { %2865 = vrot.lane.b32.xlu1 %v2864_v15, %s5084_s10  ;;  %2788 = vrot.lane.b32.xlu0 %v2787_v23, %s5080_s26  ;;  %v2817_v43 = vsel %vm347_vm1, %v2810_v35, %v2816_v36  ;;  %v2889_v13 = vperm.slane %v2878_v42, 0  ;;  %v2848_v25 = vmul.f32 %v6634_v54, %v7702_v63  ;;  %v5162_v9 = vmov 90  }
 0x6c3   : > { %v2877_v56 = vmul.f32 %v6668_v18, %v7703_v26  ;;  %v7715_v8 = vperm.slane %v6634_v54, 0  ;;  %v2955_v58 = vrot.slane %v6511_v19, 2  ;;  %v2876_v15 = vmul.f32 %v6671_v34, %v7705_v50 }
 0x6c4   : > { %v2859_v37 = vperm.slane %v2848_v25, 0  ;;  %v2927_v23 = vmul.f32 %v6634_v54, %v7706_v49  ;;  %v2925_v54 = vmul.f32 %v6671_v34, %v7708_v41 }
 0x6c5   : > { %v2888_v61 = vperm.slane %v2877_v56, 0  ;;  %v2887_v3 = vperm.slane %v2876_v15, 0 }
 0x6c6   : > { %v2938_v36 = vperm.slane %v2927_v23, 0  ;;  %v2936_v42 = vperm.slane %v2925_v54, 0 }
 0x6c7   : > { %2773 = vperm.xlu2 %4950, %v6530_v0   ;;  %v2893_v20 = vrot.slane %v2888_v61, 4 }
 0x6c9   : > { %v2894_v35 = vsel %vm347_vm1, %v2887_v3, %v2893_v20 }
 0x6ca   : > { %2880 = vperm.xlu1 %4954, %v6530_v0   ;;  %2818 = vrot.lane.b32.xlu0 %v2817_v43, %s5083_s9  ;;  %v2926_v43 = vmul.f32 %v6668_v18, %v7707_v57 }
 0x6cf   : > { %4951 = vset.pattern.permute.xlu2 %v5158_v31  ;;  %v2937_v31 = vperm.slane %v2926_v43, 0 }
 0x6d0   : > { %2803 = vperm.xlu2 %4951, %v6530_v0  }
 0x6d2   : > { %4955 = vset.pattern.permute.xlu1 %v5159_v32  ;;  %2850 = vperm.xlu0 %4953, %v6530_v0   ;;  %v2942_v32 = vrot.slane %v2937_v31, 4 }
 0x6d3   : > { %2907 = vperm.xlu1 %4955, %v6530_v0  }
 0x6d8   : > { %4952 = vset.pattern.permute.xlu2 %v5160_v52  ;;  %v2943_v52 = vsel %vm347_vm1, %v2936_v42, %v2942_v32 }
 0x6d9   : > { %2830 = vperm.xlu2 %4952, %v6530_v0  }
 0x6da   : > { %2897 = vrot.lane.b32.xlu0 %v2889_v13, %s5081_s27  ;;  %v2956_v13 = vrot.slane %v6509_v38, 2 }
 0x6db   : > { %4956 = vset.pattern.permute.xlu1 %v5161_v44  ;;  %4957 = vset.pattern.permute.xlu0 %v5162_v9  ;;  %v2744_v44 = vpop.permute.xlu1 %2743  ;;  %v6739_v9 = vpop.permute.xlu0 %2673 }
 0x6dc   : > { %2929 = vperm.xlu1 %4956, %v6530_v0   ;;  %v2749_v31 = vperm.slane %v2744_v44, %v5566_v45 }
 0x6e1   : > { %2867 = vrot.lane.b32.xlu2 %v2859_v37, %s5084_s10 }
 0x6e2   : > { %2916 = vrot.lane.b32.xlu0 %v7715_v8, %s5079_s25 }
 0x6e3   : > { %v6741_v37 = vpop.permute.xlu0 %2703 }
 0x6e4   : > { %2957 = vrot.lane.b32.xlu1 %v2955_v58, %s5060_s16 }
 0x6e9   : > { %2895 = vrot.lane.b32.xlu2 %v2894_v35, %s5081_s27 }
 0x6ea   : > { %2946 = vrot.lane.b32.xlu0 %v2938_v36, %s5082_s28 }
 0x6eb   : > { %v2728_v61 = vpop.permute.xlu0 %2727 }
 0x6ec   : > { %v2733_v42 = vperm.slane %v2728_v61, %v5566_v45 }
 0x6f1   : > { %2914 = vrot.lane.b32.xlu2 %v2757_v2, %s5079_s25 }
 0x6f2   : > { %2970 = vperm.xlu0 %4957, %v6530_v0  }
 0x6f9   : > { %2944 = vrot.lane.b32.xlu2 %v2943_v52, %s5082_s28 }
 0x701   : > { %2959 = vrot.lane.b32.xlu2 %v2956_v13, %s5060_s16 }
 0x706   : > { %v2761_v18 = vpop.permute.xlu1 %2760 }
 0x707   : > { %v2763_v15 = vrot.slane %v2761_v18, 4 }
 0x70e   : > { %v2791_v56 = vpop.permute.xlu1 %2790 }
 0x70f   : > { %v2793_v35 = vrot.slane %v2791_v56, 4  ;;  %v5163_v56 = vmov 91  }
 0x710   : > { %4958 = vset.pattern.permute.xlu1 %v5163_v56 }
 0x711   : > { %2986 = vperm.xlu1 %4958, %v6530_v0  }
 0x716   : > { %v2821_v8 = vpop.permute.xlu1 %2820 }
 0x717   : > { %v2823_v21 = vrot.slane %v2821_v8, 4 }
 0x719   : > { %v2759_v25 = vpop.permute.xlu2 %2758 }
 0x71a   : > { %v2762_v58 = vrot.slane %v2759_v25, 4 }
 0x71c   : > { %v2764_v20 = vsel %vm347_vm1, %v2762_v58, %v2763_v15  ;;  %v2741_v58 = vmul.f32 %v6692_v28, %v2733_v42 }
 0x71d   : > { %v2765_v54 = vsel %vm374_vm7, %v2759_v25, %v2764_v20 }
 0x71e   : > { %v2767_v52 = vmul.f32 %v2765_v54, %v2749_v31 }
 0x720   : > { %v2768_v25 = vadd.f32 %v2767_v52, %v2741_v58  ;;  %v2626_v58 = vrot.slane %v6657_v4, 4 }
 0x721   : > { %v2774_v2 = vpop.permute.xlu2 %2773 }
 0x722   : > { %v2779_v18 = vperm.slane %v2774_v2, %v5566_v45 }
 0x72a   : > { %v2804_v34 = vpop.permute.xlu2 %2803 }
 0x72b   : > { %v2809_v61 = vperm.slane %v2804_v34, %v5566_v45 }
 0x733   : > { %v2831_v23 = vpop.permute.xlu2 %2830 }
 0x734   : > { %v2866_v3 = vpop.permute.xlu1 %2865  ;;  %v2789_v36 = vpop.permute.xlu0 %2788  ;;  %v2836_v20 = vperm.slane %v2831_v23, %v5566_v45 }
 0x735   : > { %v2792_v43 = vrot.slane %v2789_v36, 4  ;;  %v2869_v28 = vrot.slane %v2866_v3, 4 }
 0x736   : > { %v2844_v54 = vmul.f32 %v6533_v7, %v2836_v20  ;;  %v2627_v7 = vrot.slane %v6619_v39, 4 }
 0x737   : > { %v2794_v32 = vsel %vm347_vm1, %v2792_v43, %v2793_v35 }
 0x738   : > { %v2795_v13 = vsel %vm417_vm8, %v2789_v36, %v2794_v32 }
 0x739   : > { %v2797_v44 = vmul.f32 %v2795_v13, %v2779_v18 }
 0x73b   : > { %v2868_v33 = vpop.permute.xlu2 %2867  ;;  %v2798_v43 = vadd.f32 %v2797_v44, %v2768_v25  ;;  %v2656_v44 = vrot.slane %v6663_v11, 4 }
 0x73c   : > { %v2819_v15 = vpop.permute.xlu0 %2818  ;;  %v2881_v29 = vpop.permute.xlu1 %2880  ;;  %v2870_v2 = vrot.slane %v2868_v33, 4  ;;  %v5164_v33 = vmov 92  }
 0x73d   : > { %v2822_v1 = vrot.slane %v2819_v15, 4  ;;  %4959 = vset.pattern.permute.xlu2 %v5164_v33  ;;  %v2705_v33 = vrot.slane %v6631_v17, 4 }
 0x73e   : > { %v2871_v32 = vsel %vm347_vm1, %v2869_v28, %v2870_v2  ;;  %v2886_v2 = vperm.slane %v2881_v29, %v5566_v45  ;;  %v2675_v29 = vrot.slane %v6629_v14, 4 }
 0x73f   : > { %v2824_v36 = vsel %vm347_vm1, %v2822_v1, %v2823_v21  ;;  %v2872_v23 = vsel %vm514_vm10, %v2866_v3, %v2871_v32  ;;  %v2628_v3 = vsel %vm347_vm1, %v2626_v58, %v2627_v7 }
 0x740   : > { %v2825_v35 = vsel %vm457_vm9, %v2819_v15, %v2824_v36  ;;  %v2657_v36 = vrot.slane %v6623_v16, 4  ;;  %v2643_v16 = vperm.slane %v6625_v30, %v5566_v45 }
 0x741   : > { %v2827_v31 = vmul.f32 %v2825_v35, %v2809_v61 }
 0x742   : > { %v2658_v39 = vsel %vm347_vm1, %v2656_v44, %v2657_v36  ;;  %v2670_v44 = vperm.slane %v6627_v53, %v5566_v45 }
 0x743   : > { %v2828_v8 = vadd.f32 %v2827_v31, %v2798_v43  ;;  %v2896_v42 = vpop.permute.xlu2 %2895  ;;  %v2676_v43 = vrot.slane %v6739_v9, 4  ;;  %v2706_v9 = vrot.slane %v6741_v37, 4 }
 0x744   : > { %v2851_v13 = vpop.permute.xlu0 %2850  ;;  %v2899_v25 = vrot.slane %v2896_v42, 4 }
 0x745   : > { %v2845_v52 = vadd.f32 %v2844_v54, %v2828_v8  ;;  %v2856_v34 = vperm.slane %v2851_v13, %v5566_v45  ;;  %v2908_v18 = vpop.permute.xlu1 %2907  ;;  %v2629_v54 = vsel %vm514_vm10, %v6657_v4, %v2628_v3  ;;  %v2613_v8 = vperm.slane %v6621_v59, %v5566_v45 }
 0x746   : > { %v2677_v4 = vsel %vm347_vm1, %v2675_v29, %v2676_v43  ;;  %v2707_v7 = vsel %vm347_vm1, %v2705_v33, %v2706_v9 }
 0x747   : > { %v2874_v1 = vmul.f32 %v2872_v23, %v2856_v34  ;;  %v2631_v23 = vmul.f32 %v2629_v54, %v2613_v8  ;;  %v2678_v37 = vsel %vm574_vm12, %v6629_v14, %v2677_v4  ;;  %v2708_v14 = vsel %vm614_vm13, %v6631_v17, %v2707_v7 }
 0x748   : > { %v2680_v3 = vmul.f32 %v2678_v37, %v2670_v44 }
 0x749   : > { %v2875_v21 = vadd.f32 %v2874_v1, %v2845_v52  ;;  %v5165_v52 = vmov 95  }
 0x74a   : > { %4962 = vset.pattern.permute.xlu0 %v5165_v52 }
 0x74b   : > { %v2915_v15 = vpop.permute.xlu2 %2914 }
 0x74c   : > { %v2898_v56 = vpop.permute.xlu0 %2897  ;;  %v2918_v1 = vrot.slane %v2915_v15, 4 }
 0x74d   : > { %v2900_v61 = vrot.slane %v2898_v56, 4 }
 0x74e   : > { %v6763_v20 = vpop.permute.xlu1 %2929 }
 0x74f   : > { %v2901_v35 = vsel %vm347_vm1, %v2899_v25, %v2900_v61  ;;  %v2632_v25 = vadd.f32 %v2631_v23, %v6661_v24 }
 0x750   : > { %v2902_v28 = vsel %vm554_vm11, %v2896_v42, %v2901_v35  ;;  %v2659_v42 = vsel %vm554_vm11, %v6663_v11, %v2658_v39 }
 0x751   : > { %v2904_v31 = vmul.f32 %v2902_v28, %v2886_v2  ;;  %v2661_v58 = vmul.f32 %v2659_v42, %v2643_v16  ;;  %v2935_v16 = vperm.slane %v6763_v20, %v5566_v45 }
 0x753   : > { %v2905_v32 = vadd.f32 %v2904_v31, %v2875_v21  ;;  %v2945_v13 = vpop.permute.xlu2 %2944  ;;  %v2913_v21 = vperm.slane %v2908_v18, %v5566_v45  ;;  %v2692_v18 = vperm.slane %v6665_v51, %v5566_v45  ;;  %v2662_v2 = vadd.f32 %v2661_v58, %v2632_v25 }
 0x754   : > { %v2917_v34 = vpop.permute.xlu0 %2916 }
 0x755   : > { %v2919_v59 = vrot.slane %v2917_v34, 4  ;;  %v2710_v8 = vmul.f32 %v2708_v14, %v2692_v18 }
 0x756   : > { %v2958_v30 = vpop.permute.xlu1 %2957 }
 0x757   : > { %v2920_v56 = vsel %vm347_vm1, %v2918_v1, %v2919_v59  ;;  %v6794_v36 = vsel %vm318_vm0, 0.0, %v2958_v30 }
 0x758   : > { %v2921_v11 = vsel %vm574_vm12, %v2915_v15, %v2920_v56  ;;  %v2948_v15 = vrot.slane %v2945_v13, 4  ;;  %v2967_v39 = vmul.f32 %v6794_v36, %v5281_v5  ;;  %v3012_v29 = vmul.f32 %v6794_v36, %v5358_v46 }
 0x759   : > { %v2923_v61 = vmul.f32 %v2921_v11, %v2913_v21  ;;  %v2993_v9 = vperm.slane %v6794_v36, 0  ;;  %v2681_v21 = vadd.f32 %v2680_v3, %v2662_v2  ;;  %v3042_v3 = vmul.f32 %v6794_v36, %v7699_v22 }
 0x75a   : > { %v2977_v23 = vperm.slane %v2967_v39, 0  ;;  %v3023_v56 = vperm.slane %v3012_v29, 0 }
 0x75b   : > { %v2924_v35 = vadd.f32 %v2923_v61, %v2905_v32  ;;  %v2960_v28 = vpop.permute.xlu2 %2959  ;;  %v2711_v11 = vadd.f32 %v2710_v8, %v2681_v21  ;;  %v5166_v61 = vmov 96  }
 0x75c   : > { %v2947_v43 = vpop.permute.xlu0 %2946  ;;  %v6801_v53 = vsel %vm318_vm0, %v2958_v30, %v2960_v28  ;;  %v6804_v24 = vsel %vm318_vm0, %v2960_v28, 0.0  ;;  %4963 = vset.pattern.permute.xlu1 %v5166_v61  ;;  %v3053_v28 = vperm.slane %v3042_v3, 0 }
 0x75d   : > { %v2949_v31 = vrot.slane %v2947_v43, 4  ;;  %v2995_v51 = vperm.slane %v6804_v24, 0  ;;  %v2994_v54 = vperm.slane %v6801_v53, 0  ;;  %v2968_v17 = vmul.f32 %v6801_v53, %v5297_v12 }
 0x75e   : > { %v3013_v32 = vmul.f32 %v6801_v53, %v5390_v62  ;;  %v3043_v1 = vmul.f32 %v6801_v53, %v7698_v6  ;;  %v3014_v58 = vmul.f32 %v6804_v24, %v5352_v40 }
 0x75f   : > { %v2950_v52 = vsel %vm347_vm1, %v2948_v15, %v2949_v31  ;;  %3003 = vrot.lane.b32.xlu1 %v2995_v51, %s5078_s24  ;;  %v2999_v42 = vrot.slane %v2994_v54, 4  ;;  %v2978_v34 = vperm.slane %v2968_v17, 0  ;;  %v3090_v15 = vmul.f32 %v6801_v53, %v5419_v48 }
 0x760   : > { %v2951_v4 = vsel %vm614_vm13, %v2945_v13, %v2950_v52  ;;  %v3024_v20 = vperm.slane %v3013_v32, 0  ;;  %v3054_v25 = vperm.slane %v3043_v1, 0  ;;  %v3025_v18 = vperm.slane %v3014_v58, 0 }
 0x761   : > { %v2953_v59 = vmul.f32 %v2951_v4, %v2935_v16  ;;  %v6827_v33 = vsel %vm347_vm1, %v2993_v9, %v2999_v42  ;;  %v2981_v30 = vrot.slane %v2978_v34, 4  ;;  %v3101_v31 = vperm.slane %v3090_v15, 0 }
 0x762   : > { %3001 = vrot.lane.b32.xlu2 %v6827_v33, %s5078_s24  ;;  %v3029_v37 = vrot.slane %v3024_v20, 4  ;;  %v3059_v14 = vrot.slane %v3054_v25, 4  ;;  %v3089_v54 = vmul.f32 %v6794_v36, %v5331_v27  ;;  %v5167_v17 = vmov 93  }
 0x763   : > { %v2954_v13 = vadd.f32 %v2953_v59, %v2924_v35  ;;  %v6834_v7 = vsel %vm347_vm1, %v2977_v23, %v2981_v30  ;;  %v3044_v35 = vmul.f32 %v6804_v24, %v5375_v55  ;;  %v3106_v8 = vrot.slane %v3101_v31, 4 }
 0x764   : > { %v3030_v44 = vsel %vm347_vm1, %v3023_v56, %v3029_v37  ;;  %v3060_v43 = vsel %vm347_vm1, %v3053_v28, %v3059_v14  ;;  %v3100_v16 = vperm.slane %v3089_v54, 0  ;;  %v3121_v32 = vmul.f32 %v6804_v24, %v7701_v10 }
 0x765   : > { %3031 = vrot.lane.b32.xlu0 %v3030_v44, %s5080_s26  ;;  %v6840_v2 = vadd.f32 %v2954_v13, %v2711_v11  ;;  %v3055_v39 = vperm.slane %v3044_v35, 0  ;;  %v5168_v52 = vmov 94   ;;  %v3091_v42 = vmul.f32 %v6804_v24, %v7702_v63  ;;  %v2971_v35 = vpop.permute.xlu0 %2970 }
 0x766   : > { %v3107_v29 = vsel %vm347_vm1, %v3100_v16, %v3106_v8  ;;  %v3132_v9 = vperm.slane %v3121_v32, 0  ;;  %v5169_v34 = vmov 99   ;;  %v3120_v4 = vmul.f32 %v6801_v53, %v7703_v26 }
 0x767   : > { %3033 = vrot.lane.b32.xlu1 %v3025_v18, %s5080_s26  ;;  %v3102_v23 = vperm.slane %v3091_v42, 0  ;;  %v3119_v1 = vmul.f32 %v6794_v36, %v7705_v50  ;;  %v5170_v59 = vmov 97   ;;  %v3170_v30 = vmul.f32 %v6804_v24, %v7706_v49 }
 0x768   : > { %v3131_v20 = vperm.slane %v3120_v4, 0  ;;  %v5171_v13 = vmov 98   ;;  %v3168_v24 = vmul.f32 %v6794_v36, %v7708_v41  ;;  %v3198_v44 = vrot.slane %v6511_v19, 3 }
 0x769   : > { %v3130_v21 = vperm.slane %v3119_v1, 0  ;;  %v3181_v56 = vperm.slane %v3170_v30, 0  ;;  %v3199_v18 = vrot.slane %v6509_v38, 3 }
 0x76a   : > { %3016 = vperm.xlu2 %4959, %v6530_v0   ;;  %v3136_v58 = vrot.slane %v3131_v20, 4  ;;  %v3179_v61 = vperm.slane %v3168_v24, 0 }
 0x76c   : > { %v3137_v37 = vsel %vm347_vm1, %v3130_v21, %v3136_v58 }
 0x76d   : > { %3061 = vrot.lane.b32.xlu0 %v3060_v43, %s5083_s9 }
 0x76f   : > { %3063 = vrot.lane.b32.xlu1 %v3055_v39, %s5083_s9 }
 0x772   : > { %4960 = vset.pattern.permute.xlu2 %v5167_v17  ;;  %v2976_v17 = vperm.slane %v2971_v35, %v5566_v45 }
 0x773   : > { %3046 = vperm.xlu2 %4960, %v6530_v0  }
 0x775   : > { %3093 = vperm.xlu0 %4962, %v6530_v0  }
 0x777   : > { %3108 = vrot.lane.b32.xlu1 %v3107_v29, %s5084_s10 }
 0x77b   : > { %4961 = vset.pattern.permute.xlu2 %v5168_v52  ;;  %v5172_v52 = vmov 100  }
 0x77c   : > { %3073 = vperm.xlu2 %4961, %v6530_v0  }
 0x77d   : > { %3140 = vrot.lane.b32.xlu0 %v3132_v9, %s5081_s27  ;;  %v2984_v9 = vmul.f32 %v6834_v7, %v2976_v17 }
 0x77e   : > { %4966 = vset.pattern.permute.xlu0 %v5169_v34 }
 0x77f   : > { %3123 = vperm.xlu1 %4963, %v6530_v0  }
 0x783   : > { %v2987_v14 = vpop.permute.xlu1 %2986 }
 0x784   : > { %3110 = vrot.lane.b32.xlu2 %v3102_v23, %s5084_s10  ;;  %v2992_v38 = vperm.slane %v2987_v14, %v5566_v45 }
 0x785   : > { %3159 = vrot.lane.b32.xlu0 %v2995_v51, %s5079_s25  ;;  %v3169_v51 = vmul.f32 %v6801_v53, %v7707_v57 }
 0x787   : > { %4964 = vset.pattern.permute.xlu1 %v5170_v59  ;;  %v3180_v11 = vperm.slane %v3169_v51, 0 }
 0x788   : > { %3150 = vperm.xlu1 %4964, %v6530_v0  }
 0x789   : > { %v3185_v25 = vrot.slane %v3180_v11, 4 }
 0x78b   : > { %v3186_v53 = vsel %vm347_vm1, %v3179_v61, %v3185_v25 }
 0x78c   : > { %3138 = vrot.lane.b32.xlu2 %v3137_v37, %s5081_s27 }
 0x78d   : > { %3189 = vrot.lane.b32.xlu0 %v3181_v56, %s5082_s28 }
 0x790   : > { %4965 = vset.pattern.permute.xlu1 %v5171_v13 }
 0x791   : > { %3172 = vperm.xlu1 %4965, %v6530_v0  }
 0x794   : > { %3157 = vrot.lane.b32.xlu2 %v6827_v33, %s5079_s25 }
 0x795   : > { %3213 = vperm.xlu0 %4966, %v6530_v0  }
 0x799   : > { %3200 = vrot.lane.b32.xlu1 %v3198_v44, %s5060_s16 }
 0x79a   : > { %4967 = vset.pattern.permute.xlu1 %v5172_v52 }
 0x79c   : > { %3187 = vrot.lane.b32.xlu2 %v3186_v53, %s5082_s28 }
 0x7a1   : > { %3229 = vperm.xlu1 %4967, %v6530_v0  }
 0x7a4   : > { %3202 = vrot.lane.b32.xlu2 %v3199_v18, %s5060_s16 }
 0x7bc   : > { %v3002_v33 = vpop.permute.xlu2 %3001 }
 0x7bd   : > { %v3005_v15 = vrot.slane %v3002_v33, 4 }
 0x7c4   : > { %v3017_v3 = vpop.permute.xlu2 %3016 }
 0x7c5   : > { %v3022_v42 = vperm.slane %v3017_v3, %v5566_v45 }
 0x7cd   : > { %v3047_v36 = vpop.permute.xlu2 %3046 }
 0x7ce   : > { %v3052_v37 = vperm.slane %v3047_v36, %v5566_v45 }
 0x7d1   : > { %v3004_v28 = vpop.permute.xlu1 %3003 }
 0x7d2   : > { %v3006_v19 = vrot.slane %v3004_v28, 4 }
 0x7d4   : > { %v3007_v43 = vsel %vm347_vm1, %v3005_v15, %v3006_v19 }
 0x7d5   : > { %v3008_v31 = vsel %vm374_vm7, %v3002_v33, %v3007_v43 }
 0x7d6   : > { %v3074_v39 = vpop.permute.xlu2 %3073  ;;  %v3010_v16 = vmul.f32 %v3008_v31, %v2992_v38 }
 0x7d7   : > { %v3032_v54 = vpop.permute.xlu0 %3031  ;;  %v3079_v7 = vperm.slane %v3074_v39, %v5566_v45 }
 0x7d8   : > { %v3035_v29 = vrot.slane %v3032_v54, 4  ;;  %v3011_v23 = vadd.f32 %v3010_v16, %v2984_v9 }
 0x7d9   : > { %v3034_v8 = vpop.permute.xlu1 %3033  ;;  %v3087_v44 = vmul.f32 %v6537_v60, %v3079_v7 }
 0x7da   : > { %v3036_v32 = vrot.slane %v3034_v8, 4 }
 0x7dc   : > { %v3037_v34 = vsel %vm347_vm1, %v3035_v29, %v3036_v32  ;;  %v5173_v29 = vmov 101  }
 0x7dd   : > { %v3038_v4 = vsel %vm417_vm8, %v3032_v54, %v3037_v34  ;;  %4968 = vset.pattern.permute.xlu2 %v5173_v29 }
 0x7de   : > { %v3040_v20 = vmul.f32 %v3038_v4, %v3022_v42  ;;  %v3111_v1 = vpop.permute.xlu2 %3110 }
 0x7df   : > { %v3062_v59 = vpop.permute.xlu0 %3061  ;;  %v3113_v53 = vrot.slane %v3111_v1, 4 }
 0x7e0   : > { %v3041_v30 = vadd.f32 %v3040_v20, %v3011_v23  ;;  %v3065_v21 = vrot.slane %v3062_v59, 4 }
 0x7e1   : > { %v3064_v58 = vpop.permute.xlu1 %3063 }
 0x7e2   : > { %v3066_v56 = vrot.slane %v3064_v58, 4 }
 0x7e4   : > { %v3067_v51 = vsel %vm347_vm1, %v3065_v21, %v3066_v56 }
 0x7e5   : > { %v3068_v13 = vsel %vm457_vm9, %v3062_v59, %v3067_v51 }
 0x7e6   : > { %v3070_v11 = vmul.f32 %v3068_v13, %v3052_v37  ;;  %v3139_v0 = vpop.permute.xlu2 %3138  ;;  %v5174_v13 = vmov 104  }
 0x7e7   : > { %v3094_v24 = vpop.permute.xlu0 %3093  ;;  %v3142_v19 = vrot.slane %v3139_v0, 4  ;;  %4971 = vset.pattern.permute.xlu0 %v5174_v13  ;;  %v5176_v13 = vmov 102  }
 0x7e8   : > { %v3071_v25 = vadd.f32 %v3070_v11, %v3041_v30  ;;  %v3099_v18 = vperm.slane %v3094_v24, %v5566_v45 }
 0x7e9   : > { %v3109_v61 = vpop.permute.xlu1 %3108 }
 0x7ea   : > { %v3088_v33 = vadd.f32 %v3087_v44, %v3071_v25  ;;  %v3112_v3 = vrot.slane %v3109_v61, 4  ;;  %v5175_v25 = vmov 105  }
 0x7eb   : > { %4972 = vset.pattern.permute.xlu1 %v5175_v25 }
 0x7ec   : > { %v3114_v14 = vsel %vm347_vm1, %v3112_v3, %v3113_v53 }
 0x7ed   : > { %v3115_v36 = vsel %vm514_vm10, %v3109_v61, %v3114_v14 }
 0x7ee   : > { %v3117_v35 = vmul.f32 %v3115_v36, %v3099_v18  ;;  %v3158_v28 = vpop.permute.xlu2 %3157 }
 0x7ef   : > { %v3141_v15 = vpop.permute.xlu0 %3140  ;;  %v3161_v52 = vrot.slane %v3158_v28, 4 }
 0x7f0   : > { %v3118_v43 = vadd.f32 %v3117_v35, %v3088_v33  ;;  %v3143_v39 = vrot.slane %v3141_v15, 4 }
 0x7f1   : > { %v3124_v31 = vpop.permute.xlu1 %3123 }
 0x7f2   : > { %v3144_v60 = vsel %vm347_vm1, %v3142_v19, %v3143_v39  ;;  %v3129_v54 = vperm.slane %v3124_v31, %v5566_v45 }
 0x7f3   : > { %v3145_v17 = vsel %vm554_vm11, %v3139_v0, %v3144_v60 }
 0x7f4   : > { %v3147_v38 = vmul.f32 %v3145_v17, %v3129_v54 }
 0x7f6   : > { %v3148_v8 = vadd.f32 %v3147_v38, %v3118_v43  ;;  %v3188_v16 = vpop.permute.xlu2 %3187 }
 0x7f7   : > { %v3160_v32 = vpop.permute.xlu0 %3159  ;;  %v3191_v21 = vrot.slane %v3188_v16, 4 }
 0x7f8   : > { %v3162_v9 = vrot.slane %v3160_v32, 4 }
 0x7fa   : > { %v3163_v42 = vsel %vm347_vm1, %v3161_v52, %v3162_v9  ;;  %v3151_v34 = vpop.permute.xlu1 %3150 }
 0x7fb   : > { %v3156_v4 = vperm.slane %v3151_v34, %v5566_v45  ;;  %v3164_v23 = vsel %vm574_vm12, %v3158_v28, %v3163_v42 }
 0x7fd   : > { %v3166_v20 = vmul.f32 %v3164_v23, %v3156_v4 }
 0x7fe   : > { %v3203_v1 = vpop.permute.xlu2 %3202 }
 0x7ff   : > { %v3167_v59 = vadd.f32 %v3166_v20, %v3148_v8  ;;  %v3190_v30 = vpop.permute.xlu0 %3189  ;;  %v6916_v58 = vsel %vm318_vm0, %v3203_v1, 0.0 }
 0x800   : > { %v3192_v56 = vrot.slane %v3190_v30, 4  ;;  %v3238_v37 = vperm.slane %v6916_v58, 0  ;;  %v3257_v0 = vmul.f32 %v6916_v58, %v5352_v40  ;;  %v3287_v36 = vmul.f32 %v6916_v58, %v5375_v55 }
 0x801   : > { %v3334_v25 = vmul.f32 %v6916_v58, %v7702_v63 }
 0x802   : > { %v3193_v7 = vsel %vm347_vm1, %v3191_v21, %v3192_v56  ;;  %3246 = vrot.lane.b32.xlu1 %v3238_v37, %s5078_s24  ;;  %v3268_v53 = vperm.slane %v3257_v0, 0  ;;  %v3298_v17 = vperm.slane %v3287_v36, 0  ;;  %v5046_v56 = vld [vmem:[%s7635_s1] sm:$0xf]  ;;  %v5177_v0 = vmov 106  }
 0x803   : > { %v3173_v51 = vpop.permute.xlu1 %3172  ;;  %v3194_v24 = vsel %vm614_vm13, %v3188_v16, %v3193_v7 }
 0x804   : > { %v3178_v11 = vperm.slane %v3173_v51, %v5566_v45 }
 0x806   : > { %v3196_v44 = vmul.f32 %v3194_v24, %v3178_v11  ;;  %v3364_v11 = vmul.f32 %v6916_v58, %v7701_v10  ;;  %v5178_v24 = vmov 103  }
 0x808   : > { %v3197_v61 = vadd.f32 %v3196_v44, %v3167_v59  ;;  %v3375_v44 = vperm.slane %v3364_v11, 0 }
 0x80a   : > { %3276 = vrot.lane.b32.xlu1 %v3268_v53, %s5080_s26  ;;  %v6929_v18 = vadd.f32 %v6840_v2, %v3197_v61  ;;  %v3345_v53 = vperm.slane %v3334_v25, 0 }
 0x80b   : > { %v3201_v33 = vpop.permute.xlu1 %3200 }
 0x80c   : > { %v6932_v3 = vsel %vm318_vm0, %v3201_v33, %v3203_v1  ;;  %v6935_v14 = vsel %vm318_vm0, 0.0, %v3201_v33  ;;  %v5179_v33 = vmov 107  }
 0x80d   : > { %v3210_v35 = vmul.f32 %v6935_v14, %v5281_v5  ;;  %v3211_v28 = vmul.f32 %v6932_v3, %v5297_v12  ;;  %v3237_v15 = vperm.slane %v6932_v3, 0  ;;  %v3255_v2 = vmul.f32 %v6935_v14, %v5358_v46 }
 0x80e   : > { %v3256_v19 = vmul.f32 %v6932_v3, %v5390_v62  ;;  %v3333_v43 = vmul.f32 %v6932_v3, %v5419_v48  ;;  %v3236_v31 = vperm.slane %v6935_v14, 0  ;;  %v3286_v32 = vmul.f32 %v6932_v3, %v7698_v6 }
 0x80f   : > { %v3221_v39 = vperm.slane %v3211_v28, 0  ;;  %v3242_v60 = vrot.slane %v3237_v15, 4  ;;  %v3220_v54 = vperm.slane %v3210_v35, 0  ;;  %v3266_v52 = vperm.slane %v3255_v2, 0 }
 0x810   : > { %v3267_v38 = vperm.slane %v3256_v19, 0  ;;  %v3344_v29 = vperm.slane %v3333_v43, 0  ;;  %v3332_v34 = vmul.f32 %v6935_v14, %v5331_v27  ;;  %v3297_v23 = vperm.slane %v3286_v32, 0  ;;  %v4709_v19 = vld [vmem:[%s7636_s2 + $0x8] sm:$0xf] }
 0x811   : > { %v3224_v8 = vrot.slane %v3221_v39, 4  ;;  %v3243_v16 = vsel %vm347_vm1, %v3236_v31, %v3242_v60  ;;  %v3285_v1 = vmul.f32 %v6935_v14, %v7699_v22  ;;  %v3363_v61 = vmul.f32 %v6932_v3, %v7703_v26 }
 0x812   : > { %3306 = vrot.lane.b32.xlu1 %v3298_v17, %s5083_s9  ;;  %3244 = vrot.lane.b32.xlu2 %v3243_v16, %s5078_s24  ;;  %v3272_v9 = vrot.slane %v3267_v38, 4  ;;  %v3349_v20 = vrot.slane %v3344_v29, 4  ;;  %v3343_v59 = vperm.slane %v3332_v34, 0  ;;  %v3302_v30 = vrot.slane %v3297_v23, 4  ;;  %v3214_v34 = vpop.permute.xlu0 %3213 }
 0x813   : > { %v6957_v42 = vsel %vm347_vm1, %v3220_v54, %v3224_v8  ;;  %v3296_v7 = vperm.slane %v3285_v1, 0  ;;  %v3374_v36 = vperm.slane %v3363_v61, 0  ;;  %v3362_v35 = vmul.f32 %v6935_v14, %v7705_v50  ;;  %v3230_v38 = vpop.permute.xlu1 %3229 }
 0x814   : > { %v3273_v4 = vsel %vm347_vm1, %v3266_v52, %v3272_v9  ;;  %v3350_v21 = vsel %vm347_vm1, %v3343_v59, %v3349_v20  ;;  %v3413_v28 = vmul.f32 %v6916_v58, %v7706_v49  ;;  %v3411_v31 = vmul.f32 %v6935_v14, %v7708_v41 }
 0x815   : > { %3274 = vrot.lane.b32.xlu0 %v3273_v4, %s5080_s26  ;;  %v3303_v51 = vsel %vm347_vm1, %v3296_v7, %v3302_v30  ;;  %v3379_v15 = vrot.slane %v3374_v36, 4  ;;  %v3373_v2 = vperm.slane %v3362_v35, 0  ;;  %v3235_v7 = vperm.slane %v3230_v38, %v5566_v45 }
 0x816   : > { %v3424_v43 = vperm.slane %v3413_v28, 0  ;;  %v3422_v54 = vperm.slane %v3411_v31, 0 }
 0x817   : > { %v3380_v39 = vsel %vm347_vm1, %v3373_v2, %v3379_v15 }
 0x81a   : > { %3351 = vrot.lane.b32.xlu1 %v3350_v21, %s5084_s10  ;;  %3259 = vperm.xlu2 %4968, %v5046_v56  }
 0x81d   : > { %3304 = vrot.lane.b32.xlu0 %v3303_v51, %s5083_s9 }
 0x822   : > { %4969 = vset.pattern.permute.xlu2 %v5176_v13  ;;  %3366 = vperm.xlu1 %4972, %v5046_v56  }
 0x823   : > { %3289 = vperm.xlu2 %4969, %v5046_v56  }
 0x825   : > { %3336 = vperm.xlu0 %4971, %v5046_v56  }
 0x82a   : > { %4973 = vset.pattern.permute.xlu1 %v5177_v0 }
 0x82b   : > { %4970 = vset.pattern.permute.xlu2 %v5178_v24  ;;  %3393 = vperm.xlu1 %4973, %v5046_v56  }
 0x82c   : > { %3316 = vperm.xlu2 %4970, %v5046_v56  }
 0x82d   : > { %3383 = vrot.lane.b32.xlu0 %v3375_v44, %s5081_s27 }
 0x833   : > { %4974 = vset.pattern.permute.xlu1 %v5179_v33 }
 0x834   : > { %3353 = vrot.lane.b32.xlu2 %v3345_v53, %s5084_s10  ;;  %3415 = vperm.xlu1 %4974, %v5046_v56   ;;  %v3219_v56 = vperm.slane %v3214_v34, %v5566_v45 }
 0x835   : > { %3402 = vrot.lane.b32.xlu0 %v3238_v37, %s5079_s25  ;;  %v3412_v37 = vmul.f32 %v6932_v3, %v7707_v57 }
 0x836   : > { %v3227_v25 = vmul.f32 %v6957_v42, %v3219_v56 }
 0x837   : > { %v3423_v58 = vperm.slane %v3412_v37, 0  ;;  %v7716_v37 = vld [vmem:[#allocation5_spill] sm:$0xff] }
 0x839   : > { %v3428_v60 = vrot.slane %v3423_v58, 4 }
 0x83b   : > { %v3429_v17 = vsel %vm347_vm1, %v3422_v54, %v3428_v60 }
 0x83c   : > { %3381 = vrot.lane.b32.xlu2 %v3380_v39, %s5081_s27  ;;  %4975 = vset.pattern.permute.xlu1 %v7709_v47 }
 0x83d   : > { %3432 = vrot.lane.b32.xlu0 %v3424_v43, %s5082_s28  ;;  %3448 = vperm.xlu1 %4975, %v4709_v19  }
 0x844   : > { %3400 = vrot.lane.b32.xlu2 %v3243_v16, %s5079_s25 }
 0x84c   : > { %3430 = vrot.lane.b32.xlu2 %v3429_v17, %s5082_s28 }
 0x86c   : > { %v3245_v8 = vpop.permute.xlu2 %3244 }
 0x86d   : > { %v3248_v23 = vrot.slane %v3245_v8, 4 }
 0x874   : > { %v3247_v29 = vpop.permute.xlu1 %3246  ;;  %v3260_v32 = vpop.permute.xlu2 %3259 }
 0x875   : > { %v3249_v3 = vrot.slane %v3247_v29, 4  ;;  %v3265_v0 = vperm.slane %v3260_v32, %v5566_v45 }
 0x877   : > { %v3250_v14 = vsel %vm347_vm1, %v3248_v23, %v3249_v3 }
 0x878   : > { %v3251_v21 = vsel %vm374_vm7, %v3245_v8, %v3250_v14 }
 0x879   : > { %v3253_v11 = vmul.f32 %v3251_v21, %v3235_v7 }
 0x87b   : > { %v3254_v35 = vadd.f32 %v3253_v11, %v3227_v25 }
 0x87c   : > { %v3277_v52 = vpop.permute.xlu1 %3276 }
 0x87d   : > { %v3290_v9 = vpop.permute.xlu2 %3289  ;;  %v3279_v1 = vrot.slane %v3277_v52, 4 }
 0x87e   : > { %v3295_v36 = vperm.slane %v3290_v9, %v5566_v45 }
 0x884   : > { %v3307_v4 = vpop.permute.xlu1 %3306 }
 0x885   : > { %v3309_v61 = vrot.slane %v3307_v4, 4 }
 0x886   : > { %v3317_v16 = vpop.permute.xlu2 %3316 }
 0x887   : > { %v3275_v20 = vpop.permute.xlu0 %3274  ;;  %v3322_v28 = vperm.slane %v3317_v16, %v5566_v45 }
 0x888   : > { %v3278_v59 = vrot.slane %v3275_v20, 4 }
 0x889   : > { %v3330_v58 = vmul.f32 %v7716_v37, %v3322_v28 }
 0x88a   : > { %v3280_v30 = vsel %vm347_vm1, %v3278_v59, %v3279_v1 }
 0x88b   : > { %v3281_v51 = vsel %vm417_vm8, %v3275_v20, %v3280_v30 }
 0x88c   : > { %v3352_v13 = vpop.permute.xlu1 %3351  ;;  %v3283_v53 = vmul.f32 %v3281_v51, %v3265_v0 }
 0x88d   : > { %v3355_v52 = vrot.slane %v3352_v13, 4 }
 0x88e   : > { %v3354_v44 = vpop.permute.xlu2 %3353  ;;  %v3284_v19 = vadd.f32 %v3283_v53, %v3254_v35 }
 0x88f   : > { %v3305_v24 = vpop.permute.xlu0 %3304  ;;  %v3356_v8 = vrot.slane %v3354_v44, 4 }
 0x890   : > { %v3308_v33 = vrot.slane %v3305_v24, 4 }
 0x891   : > { %v3357_v34 = vsel %vm347_vm1, %v3355_v52, %v3356_v8 }
 0x892   : > { %v3310_v15 = vsel %vm347_vm1, %v3308_v33, %v3309_v61  ;;  %v3358_v59 = vsel %vm514_vm10, %v3352_v13, %v3357_v34 }
 0x893   : > { %v3311_v2 = vsel %vm457_vm9, %v3305_v24, %v3310_v15  ;;  %v5180_v15 = vmov 108  }
 0x894   : > { %v3313_v43 = vmul.f32 %v3311_v2, %v3295_v36  ;;  %v3367_v39 = vpop.permute.xlu1 %3366  ;;  %4976 = vset.pattern.permute.xlu0 %v5180_v15 }
 0x895   : > { %v3372_v56 = vperm.slane %v3367_v39, %v5566_v45 }
 0x896   : > { %v3314_v31 = vadd.f32 %v3313_v43, %v3284_v19  ;;  %v3382_v54 = vpop.permute.xlu2 %3381 }
 0x897   : > { %v3337_v60 = vpop.permute.xlu0 %3336  ;;  %v3385_v9 = vrot.slane %v3382_v54, 4 }
 0x898   : > { %v3331_v42 = vadd.f32 %v3330_v58, %v3314_v31  ;;  %v3342_v4 = vperm.slane %v3337_v60, %v5566_v45  ;;  %v5181_v31 = vmov 109   ;;  %v5047_v60 = vld [vmem:[%s7638_s4] sm:$0xff] }
 0x899   : > { %4977 = vset.pattern.permute.xlu1 %v5181_v31 }
 0x89a   : > { %v3360_v21 = vmul.f32 %v3358_v59, %v3342_v4 }
 0x89c   : > { %v3361_v44 = vadd.f32 %v3360_v21, %v3331_v42 }
 0x89d   : > { %v3394_v38 = vpop.permute.xlu1 %3393 }
 0x89e   : > { %v3401_v29 = vpop.permute.xlu2 %3400  ;;  %v3399_v0 = vperm.slane %v3394_v38, %v5566_v45 }
 0x89f   : > { %v3384_v17 = vpop.permute.xlu0 %3383  ;;  %v3404_v16 = vrot.slane %v3401_v29, 4 }
 0x8a0   : > { %v3386_v32 = vrot.slane %v3384_v17, 4 }
 0x8a2   : > { %v3387_v23 = vsel %vm347_vm1, %v3385_v9, %v3386_v32  ;;  %v3500_v32 = vld [vmem:[%s5276_s15 + $0x10] sm:$0xf0] }
 0x8a3   : > { %v3388_v30 = vsel %vm554_vm11, %v3382_v54, %v3387_v23 }
 0x8a4   : > { %v3390_v11 = vmul.f32 %v3388_v30, %v3372_v56 }
 0x8a6   : > { %v3416_v14 = vpop.permute.xlu1 %3415  ;;  %v3431_v51 = vpop.permute.xlu2 %3430  ;;  %v3391_v33 = vadd.f32 %v3390_v11, %v3361_v44 }
 0x8a7   : > { %v3403_v3 = vpop.permute.xlu0 %3402  ;;  %v3434_v61 = vrot.slane %v3431_v51, 4  ;;  %v3421_v36 = vperm.slane %v3416_v14, %v5566_v45 }
 0x8a8   : > { %v3405_v20 = vrot.slane %v3403_v3, 4 }
 0x8aa   : > { %v3406_v1 = vsel %vm347_vm1, %v3404_v16, %v3405_v20 }
 0x8ab   : > { %v3407_v7 = vsel %vm574_vm12, %v3401_v29, %v3406_v1  ;;  %v3501_v29 = vld [vmem:[%s5276_s15 + $0x18] sm:$0xf0] }
 0x8ac   : > { %v3409_v25 = vmul.f32 %v3407_v7, %v3399_v0 }
 0x8ae   : > { %v3410_v19 = vadd.f32 %v3409_v25, %v3391_v33  ;;  %v7064_v25 = vld [vmem:[%s7635_s1] sm:$0xf]  ;;  %v5182_v33 = vmov 111  }
 0x8af   : > { %v3433_v24 = vpop.permute.xlu0 %3432  ;;  %v3449_v28 = vpop.permute.xlu1 %3448  ;;  %4979 = vset.pattern.permute.xlu2 %v5182_v33 }
 0x8b0   : > { %v3435_v53 = vrot.slane %v3433_v24, 4  ;;  %v3453_v39 = vperm.slane %v3449_v28, %v5566_v45 }
 0x8b2   : > { %v3436_v13 = vsel %vm347_vm1, %v3434_v61, %v3435_v53 }
 0x8b3   : > { %v3437_v35 = vsel %vm614_vm13, %v3431_v51, %v3436_v13 }
 0x8b4   : > { %v3439_v2 = vmul.f32 %v3437_v35, %v3421_v36  ;;  %v5183_v36 = vmov 110  }
 0x8b6   : > { %v3440_v43 = vadd.f32 %v3439_v2, %v3410_v19 }
 0x8b8   : > { %v3443_v37 = vadd.f32 %v6929_v18, %v3440_v43 }
 0x8ba   : > { %v7028_v58 = vadd.f32 %v3453_v39, %v3443_v37 }
 0x8bc   : > { %v3456_v42 = vmul.f32 %v5047_v60, %v7028_v58 }
 0x8be   : > { %3458 = vst [vmem:[#allocation1] ss:$2 sm:$0xff] %v3456_v42 }
 0x8c5   : > { %v3459_v54 = vld.sshfl [vmem:[#allocation1] sm:$0xff pattern:$0x75316420]  ;;  %v3460_v17 = vld.sshfl [vmem:[#allocation1 + $0x8] sm:$0xff pattern:$0x75316420] }
 0x8c6   : > { %v3463_v38 = vsel %vm347_vm1, %v3459_v54, 0.0  ;;  %v3464_v8 = vsel %vm347_vm1, %v3460_v17, 0.0  ;;  %3504 = vst [vmem:[#allocation1 + $0x1] ss:$2 sm:$0xff] %v7028_v58 }
 0x8c7   : > { %v3465_v18 = vadd.f32 %v3464_v8, %v3463_v38 }
 0x8c9   : > { %3466 = vadd.xlane.f32.xlu2 %v3465_v18 }
 0x8cd   : > { %v3506_v52 = vld.sshfl [vmem:[#allocation1 + $0x8] sm:$0xff pattern:$0x75316420]  ;;  %v3505_v9 = vld.sshfl [vmem:[#allocation1] sm:$0xff pattern:$0x75316420] }
 0x8ce   : > { %v7039_v34 = vadd.f32 %v3506_v52, %v3501_v29  ;;  %v7041_v3 = vadd.f32 %v3505_v9, %v3500_v32 }
 0x8d0   : > { %v3514_v4 = vrot.slane %v7039_v34, 4  ;;  %v3513_v23 = vrot.slane %v7041_v3, 4  ;;  %v3641_v16 = vperm.slane %v7039_v34, 4  ;;  %v3884_v20 = vperm.slane %v7039_v34, 5 }
 0x8d1   : > { %v3640_v14 = vperm.slane %v7041_v3, 4  ;;  %v4129_v59 = vperm.slane %v7039_v34, 6  ;;  %v3883_v30 = vperm.slane %v7041_v3, 5  ;;  %v4372_v56 = vperm.slane %v7039_v34, 7 }
 0x8d2   : > { %3517 = vrot.lane.b32.xlu1 %v3514_v4, %s5060_s16  ;;  %3515 = vrot.lane.b32.xlu0 %v3513_v23, %s5060_s16  ;;  %v3644_v1 = vrot.slane %v3641_v16, 4  ;;  %v3887_v21 = vrot.slane %v3884_v20, 4  ;;  %v4128_v51 = vperm.slane %v7041_v3, 6  ;;  %v4371_v24 = vperm.slane %v7041_v3, 7 }
 0x8d3   : > { %v4132_v11 = vrot.slane %v4129_v59, 4  ;;  %v4375_v44 = vrot.slane %v4372_v56, 4  ;;  %v5185_v59 = vmov 113  }
 0x8d4   : > { %v7054_v7 = vsel %vm347_vm1, %v3640_v14, %v3644_v1  ;;  %v7058_v0 = vsel %vm347_vm1, %v3883_v30, %v3887_v21  ;;  %v5184_v1 = vmov 112  }
 0x8d5   : > { %v7067_v61 = vsel %vm347_vm1, %v4128_v51, %v4132_v11  ;;  %v7070_v53 = vsel %vm347_vm1, %v4371_v24, %v4375_v44 }
 0x8da   : > { %3530 = vperm.xlu0 %4976, %v7064_v25   ;;  %3546 = vperm.xlu1 %4977, %v7064_v25  }
 0x8e1   : > { %3606 = vperm.xlu2 %4979, %v7064_v25  }
 0x8e2   : > { %4978 = vset.pattern.permute.xlu1 %v5183_v36  ;;  %4980 = vset.pattern.permute.xlu0 %v5184_v1  ;;  %v5188_v1 = vmov 117  }
 0x8e3   : > { %3576 = vperm.xlu1 %4978, %v7064_v25  }
 0x8eb   : > { %4981 = vset.pattern.permute.xlu1 %v5185_v59 }
 0x944   : > { %v3518_v13 = vpop.permute.xlu1 %3517  ;;  %v3516_v35 = vpop.permute.xlu0 %3515 }
 0x945   : > { %v7077_v28 = vsel %vm318_vm0, %v3518_v13, 0.0  ;;  %v3519_v15 = vsel %vm318_vm0, %v3516_v35, %v3518_v13  ;;  %v7081_v2 = vsel %vm318_vm0, 0.0, %v3516_v35 }
 0x946   : > { %v3555_v19 = vperm.slane %v7077_v28, 0  ;;  %v3574_v43 = vmul.f32 %v7077_v28, %v5352_v40  ;;  %v3651_v39 = vmul.f32 %v7077_v28, %v7702_v63  ;;  %v3525_v37 = vmul.f32 %v7081_v2, %v5281_v5 }
 0x947   : > { %v3526_v31 = vmul.f32 %v3519_v15, %v5297_v12  ;;  %v3573_v60 = vmul.f32 %v3519_v15, %v5390_v62  ;;  %v3572_v38 = vmul.f32 %v7081_v2, %v5358_v46  ;;  %v3603_v52 = vmul.f32 %v3519_v15, %v7698_v6 }
 0x948   : > { %3563 = vrot.lane.b32.xlu0 %v3555_v19, %s5078_s24  ;;  %v3585_v42 = vperm.slane %v3574_v43, 0  ;;  %v3662_v54 = vperm.slane %v3651_v39, 0  ;;  %v3537_v18 = vperm.slane %v3525_v37, 0  ;;  %v3604_v9 = vmul.f32 %v7077_v28, %v5375_v55 }
 0x949   : > { %v3538_v17 = vperm.slane %v3526_v31, 0  ;;  %v3584_v8 = vperm.slane %v3573_v60, 0  ;;  %v3681_v4 = vmul.f32 %v7077_v28, %v7701_v10  ;;  %v3583_v16 = vperm.slane %v3572_v38, 0 }
 0x94a   : > { %3593 = vrot.lane.b32.xlu1 %v3585_v42, %s5080_s26  ;;  %3670 = vrot.lane.b32.xlu2 %v3662_v54, %s5084_s10  ;;  %v3614_v14 = vperm.slane %v3603_v52, 0  ;;  %v3615_v30 = vperm.slane %v3604_v9, 0  ;;  %v3602_v56 = vmul.f32 %v7081_v2, %v7699_v22  ;;  %v3554_v51 = vperm.slane %v3519_v15, 0 }
 0x94b   : > { %v3541_v29 = vrot.slane %v3538_v17, 4  ;;  %v3589_v32 = vrot.slane %v3584_v8, 4  ;;  %v3692_v21 = vperm.slane %v3681_v4, 0  ;;  %v3729_v33 = vmul.f32 %v3519_v15, %v7707_v57 }
 0x94c   : > { %v3619_v11 = vrot.slane %v3614_v14, 4  ;;  %v3613_v24 = vperm.slane %v3602_v56, 0  ;;  %v3559_v44 = vrot.slane %v3554_v51, 4  ;;  %v3553_v13 = vperm.slane %v7081_v2, 0 }
 0x94d   : > { %v7105_v23 = vsel %vm347_vm1, %v3537_v18, %v3541_v29  ;;  %v3590_v20 = vsel %vm347_vm1, %v3583_v16, %v3589_v32  ;;  %v3740_v43 = vperm.slane %v3729_v33, 0  ;;  %v3728_v39 = vmul.f32 %v7081_v2, %v7708_v41 }
 0x94e   : > { %v3620_v36 = vsel %vm347_vm1, %v3613_v24, %v3619_v11  ;;  %v3560_v35 = vsel %vm347_vm1, %v3553_v13, %v3559_v44  ;;  %v3650_v31 = vmul.f32 %v3519_v15, %v5419_v48  ;;  %v3649_v17 = vmul.f32 %v7081_v2, %v5331_v27  ;;  %v3547_v11 = vpop.permute.xlu1 %3546  ;;  %v3531_v44 = vpop.permute.xlu0 %3530 }
 0x94f   : > { %v3745_v37 = vrot.slane %v3740_v43, 4  ;;  %v3739_v60 = vperm.slane %v3728_v39, 0  ;;  %v3680_v8 = vmul.f32 %v3519_v15, %v7703_v26  ;;  %v5186_v29 = vmov 114  }
 0x950   : > { %3591 = vrot.lane.b32.xlu0 %v3590_v20, %s5080_s26  ;;  %v3661_v54 = vperm.slane %v3650_v31, 0  ;;  %v3660_v18 = vperm.slane %v3649_v17, 0  ;;  %v3759_v32 = vrot.slane %v7039_v34, 5  ;;  %v3679_v4 = vmul.f32 %v7081_v2, %v7705_v50 }
 0x951   : > { %v3746_v42 = vsel %vm347_vm1, %v3739_v60, %v3745_v37  ;;  %v3691_v9 = vperm.slane %v3680_v8, 0  ;;  %v5187_v16 = vmov 115   ;;  %v3730_v59 = vmul.f32 %v7077_v28, %v7706_v49 }
 0x952   : > { %3623 = vrot.lane.b32.xlu1 %v3615_v30, %s5083_s9  ;;  %3700 = vrot.lane.b32.xlu2 %v3692_v21, %s5081_s27  ;;  %v3666_v38 = vrot.slane %v3661_v54, 4  ;;  %v3690_v20 = vperm.slane %v3679_v4, 0  ;;  %v5189_v2 = vmov 116   ;;  %v7150_v21 = vpop.xlane.xlu2 %3466  ;;  %v5190_v51 = vmov 118  }
 0x953   : > { %v3696_v15 = vrot.slane %v3691_v9, 4  ;;  %v3741_v30 = vperm.slane %v3730_v59, 0 }
 0x954   : > { %v3667_v52 = vsel %vm347_vm1, %v3660_v18, %v3666_v38 }
 0x955   : > { %v3697_v14 = vsel %vm347_vm1, %v3690_v20, %v3696_v15  ;;  %v3536_v20 = vperm.slane %v3531_v44, %v5566_v45 }
 0x956   : > { %v3577_v33 = vpop.permute.xlu1 %3576 }
 0x957   : > { %v3582_v54 = vperm.slane %v3577_v33, %v5566_v45 }
 0x958   : > { %3621 = vrot.lane.b32.xlu0 %v3620_v36, %s5083_s9 }
 0x95a   : > { %3561 = vrot.lane.b32.xlu1 %v3560_v35, %s5078_s24  ;;  %3717 = vrot.lane.b32.xlu2 %v3560_v35, %s5079_s25  ;;  %v3607_v56 = vpop.permute.xlu2 %3606 }
 0x95b   : > { %v3612_v9 = vperm.slane %v3607_v56, %v5566_v45  ;;  %v3544_v56 = vmul.f32 %v7105_v23, %v3536_v20 }
 0x960   : > { %3633 = vperm.xlu0 %4980, %v7064_v25  }
 0x962   : > { %3653 = vperm.xlu1 %4981, %v7064_v25   ;;  %3747 = vrot.lane.b32.xlu2 %v3746_v42, %s5082_s28 }
 0x968   : > { %4982 = vset.pattern.permute.xlu0 %v5186_v29 }
 0x969   : > { %3683 = vperm.xlu0 %4982, %v7064_v25  }
 0x96a   : > { %3668 = vrot.lane.b32.xlu1 %v3667_v52, %s5084_s10  ;;  %3762 = vrot.lane.b32.xlu2 %v3759_v32, %s5060_s16 }
 0x96b   : > { %4983 = vset.pattern.permute.xlu1 %v5187_v16 }
 0x971   : > { %3719 = vrot.lane.b32.xlu0 %v3555_v19, %s5079_s25  ;;  %v3758_v19 = vrot.slane %v7041_v3, 5 }
 0x972   : > { %3698 = vrot.lane.b32.xlu1 %v3697_v14, %s5081_s27  ;;  %4985 = vset.pattern.permute.xlu0 %v5188_v1 }
 0x979   : > { %3749 = vrot.lane.b32.xlu0 %v3741_v30, %s5082_s28 }
 0x97a   : > { %3710 = vperm.xlu1 %4983, %v7064_v25  }
 0x981   : > { %3773 = vperm.xlu0 %4985, %v7064_v25  }
 0x982   : > { %4984 = vset.pattern.permute.xlu1 %v5189_v2 }
 0x983   : > { %3732 = vperm.xlu1 %4984, %v7064_v25  }
 0x98b   : > { %3760 = vrot.lane.b32.xlu1 %v3758_v19, %s5060_s16  ;;  %v3552_v19 = vperm.slane %v3547_v11, %v5566_v45  ;;  %v4002_v11 = vrot.slane %v7039_v34, 6 }
 0x98c   : > { %4986 = vset.pattern.permute.xlu1 %v5190_v51 }
 0x993   : > { %3789 = vperm.xlu1 %4986, %v7064_v25  }
 0x9a4   : > { %v3671_v28 = vpop.permute.xlu2 %3670 }
 0x9ac   : > { %v7153_v24 = vpop.permute.xlu2 %3700 }
 0x9b4   : > { %v7155_v36 = vpop.permute.xlu2 %3717 }
 0x9ba   : > { %v3564_v13 = vpop.permute.xlu0 %3563 }
 0x9bb   : > { %v3566_v14 = vrot.slane %v3564_v13, 4 }
 0x9bc   : > { %v3594_v35 = vpop.permute.xlu1 %3593  ;;  %v7157_v43 = vpop.permute.xlu2 %3747 }
 0x9bd   : > { %v3596_v37 = vrot.slane %v3594_v35, 4 }
 0x9c2   : > { %v3592_v39 = vpop.permute.xlu0 %3591 }
 0x9c3   : > { %v3595_v31 = vrot.slane %v3592_v39, 4 }
 0x9c4   : > { %v3624_v60 = vpop.permute.xlu1 %3623  ;;  %v7159_v42 = vpop.permute.xlu2 %3762 }
 0x9c5   : > { %v3597_v17 = vsel %vm347_vm1, %v3595_v31, %v3596_v37  ;;  %v7165_v38 = vsel %vm318_vm0, %v7159_v42, 0.0  ;;  %v3626_v4 = vrot.slane %v3624_v60, 4 }
 0x9c6   : > { %v3598_v8 = vsel %vm417_vm8, %v3592_v39, %v3597_v17  ;;  %v3798_v18 = vperm.slane %v7165_v38, 0  ;;  %v3817_v52 = vmul.f32 %v7165_v38, %v5352_v40 }
 0x9c7   : > { %v3600_v29 = vmul.f32 %v3598_v8, %v3582_v54 }
 0x9c8   : > { %3806 = vrot.lane.b32.xlu1 %v3798_v18, %s5078_s24  ;;  %v3828_v2 = vperm.slane %v3817_v52, 0 }
 0x9ca   : > { %v3622_v32 = vpop.permute.xlu0 %3621 }
 0x9cb   : > { %v3625_v16 = vrot.slane %v3622_v32, 4 }
 0x9cc   : > { %v3562_v15 = vpop.permute.xlu1 %3561 }
 0x9cd   : > { %v3627_v1 = vsel %vm347_vm1, %v3625_v16, %v3626_v4  ;;  %v3565_v59 = vrot.slane %v3562_v15, 4 }
 0x9ce   : > { %v3628_v30 = vsel %vm457_vm9, %v3622_v32, %v3627_v1 }
 0x9cf   : > { %v3630_v51 = vmul.f32 %v3628_v30, %v3612_v9  ;;  %v3567_v33 = vsel %vm347_vm1, %v3565_v59, %v3566_v14  ;;  %v3673_v9 = vrot.slane %v3671_v28, 4  ;;  %v3703_v30 = vrot.slane %v7153_v24, 4 }
 0x9d0   : > { %v3568_v35 = vsel %vm374_vm7, %v3562_v15, %v3567_v33  ;;  %3836 = vrot.lane.b32.xlu1 %v3828_v2, %s5080_s26 }
 0x9d1   : > { %v3570_v39 = vmul.f32 %v3568_v35, %v3552_v19 }
 0x9d2   : > { %v3634_v44 = vpop.permute.xlu0 %3633 }
 0x9d3   : > { %v3571_v13 = vadd.f32 %v3570_v39, %v3544_v56  ;;  %v3639_v37 = vperm.slane %v3634_v44, %v5566_v45  ;;  %v5191_v56 = vmov 119  }
 0x9d4   : > { %v3654_v31 = vpop.permute.xlu1 %3653  ;;  %4987 = vset.pattern.permute.xlu2 %v5191_v56 }
 0x9d5   : > { %v3601_v60 = vadd.f32 %v3600_v29, %v3571_v13  ;;  %v3647_v54 = vmul.f32 %v7054_v7, %v3639_v37  ;;  %v3659_v23 = vperm.slane %v3654_v31, %v5566_v45  ;;  %v3721_v7 = vrot.slane %v7155_v36, 4 }
 0x9d6   : > { %v3751_v37 = vrot.slane %v7157_v43, 4 }
 0x9d7   : > { %v3631_v17 = vadd.f32 %v3630_v51, %v3601_v60 }
 0x9d8   : > { %4005 = vrot.lane.b32.xlu1 %v4002_v11, %s5060_s16 }
 0x9d9   : > { %v3648_v8 = vadd.f32 %v3647_v54, %v3631_v17  ;;  %v5192_v54 = vmov 122  }
 0x9da   : > { %4990 = vset.pattern.permute.xlu1 %v5192_v54 }
 0x9db   : > { %v3684_v32 = vpop.permute.xlu0 %3683 }
 0x9dc   : > { %v3669_v52 = vpop.permute.xlu1 %3668  ;;  %v3689_v2 = vperm.slane %v3684_v32, %v5566_v45 }
 0x9dd   : > { %v3672_v4 = vrot.slane %v3669_v52, 4 }
 0x9df   : > { %v3674_v16 = vsel %vm347_vm1, %v3672_v4, %v3673_v9  ;;  %v5193_v4 = vmov 121  }
 0x9e0   : > { %v3675_v15 = vsel %vm514_vm10, %v3669_v52, %v3674_v16  ;;  %4989 = vset.pattern.permute.xlu0 %v5193_v4 }
 0x9e1   : > { %v3677_v20 = vmul.f32 %v3675_v15, %v3659_v23 }
 0x9e3   : > { %v3678_v29 = vadd.f32 %v3677_v20, %v3648_v8  ;;  %v3720_v14 = vpop.permute.xlu0 %3719 }
 0x9e4   : > { %v3722_v1 = vrot.slane %v3720_v14, 4  ;;  %v3699_v59 = vpop.permute.xlu1 %3698 }
 0x9e5   : > { %v3702_v19 = vrot.slane %v3699_v59, 4 }
 0x9e6   : > { %v3723_v28 = vsel %vm347_vm1, %v3721_v7, %v3722_v1 }
 0x9e7   : > { %v3704_v51 = vsel %vm347_vm1, %v3702_v19, %v3703_v30  ;;  %v3724_v33 = vsel %vm574_vm12, %v7155_v36, %v3723_v28 }
 0x9e8   : > { %v3705_v35 = vsel %vm554_vm11, %v3699_v59, %v3704_v51 }
 0x9e9   : > { %v3707_v39 = vmul.f32 %v3705_v35, %v3689_v2 }
 0x9eb   : > { %v3708_v44 = vadd.f32 %v3707_v39, %v3678_v29  ;;  %v3750_v13 = vpop.permute.xlu0 %3749 }
 0x9ec   : > { %v3752_v24 = vrot.slane %v3750_v13, 4  ;;  %v3711_v31 = vpop.permute.xlu1 %3710 }
 0x9ed   : > { %v3716_v60 = vperm.slane %v3711_v31, %v5566_v45 }
 0x9ee   : > { %v3753_v11 = vsel %vm347_vm1, %v3751_v37, %v3752_v24 }
 0x9ef   : > { %v3726_v17 = vmul.f32 %v3724_v33, %v3716_v60  ;;  %v3754_v36 = vsel %vm614_vm13, %v7157_v43, %v3753_v11 }
 0x9f1   : > { %v3727_v8 = vadd.f32 %v3726_v17, %v3708_v44 }
 0x9f5   : > { %v3733_v32 = vpop.permute.xlu1 %3732 }
 0x9f6   : > { %v3738_v52 = vperm.slane %v3733_v32, %v5566_v45 }
 0x9f8   : > { %v3756_v9 = vmul.f32 %v3754_v36, %v3738_v52 }
 0x9fa   : > { %v7204_v23 = vadd.f32 %v3756_v9, %v3727_v8 }
 0x9fd   : > { %v3761_v16 = vpop.permute.xlu1 %3760 }
 0x9fe   : > { %v3764_v15 = vsel %vm318_vm0, %v3761_v16, %v7159_v42  ;;  %v3768_v20 = vsel %vm318_vm0, 0.0, %v3761_v16 }
 0x9ff   : > { %v3770_v29 = vmul.f32 %v3768_v20, %v5281_v5  ;;  %v3771_v14 = vmul.f32 %v3764_v15, %v5297_v12  ;;  %v3797_v43 = vperm.slane %v3764_v15, 0  ;;  %v3845_v7 = vmul.f32 %v3768_v20, %v7699_v22 }
 0xa00   : > { %v3846_v1 = vmul.f32 %v3764_v15, %v7698_v6  ;;  %v3815_v59 = vmul.f32 %v3768_v20, %v5358_v46  ;;  %v3816_v30 = vmul.f32 %v3764_v15, %v5390_v62  ;;  %v3796_v19 = vperm.slane %v3768_v20, 0 }
 0xa01   : > { %v3781_v2 = vperm.slane %v3771_v14, 0  ;;  %v3802_v28 = vrot.slane %v3797_v43, 4  ;;  %v3780_v33 = vperm.slane %v3770_v29, 0  ;;  %v3856_v39 = vperm.slane %v3845_v7, 0 }
 0xa02   : > { %v3857_v51 = vperm.slane %v3846_v1, 0  ;;  %v3827_v42 = vperm.slane %v3816_v30, 0  ;;  %v3826_v13 = vperm.slane %v3815_v59, 0  ;;  %v3923_v24 = vmul.f32 %v3764_v15, %v7703_v26 }
 0xa03   : > { %v3784_v35 = vrot.slane %v3781_v2, 4  ;;  %v7216_v56 = vsel %vm347_vm1, %v3796_v19, %v3802_v28  ;;  %v3922_v60 = vmul.f32 %v3768_v20, %v7705_v50  ;;  %v3971_v54 = vmul.f32 %v3768_v20, %v7708_v41 }
 0xa04   : > { %3804 = vrot.lane.b32.xlu2 %v7216_v56, %s5078_s24  ;;  %v3862_v44 = vrot.slane %v3857_v51, 4  ;;  %v3832_v37 = vrot.slane %v3827_v42, 4  ;;  %v3972_v11 = vmul.f32 %v3764_v15, %v7707_v57  ;;  %v3934_v8 = vperm.slane %v3923_v24, 0 }
 0xa05   : > { %v7222_v31 = vsel %vm347_vm1, %v3780_v33, %v3784_v35  ;;  %v3933_v52 = vperm.slane %v3922_v60, 0  ;;  %v3982_v4 = vperm.slane %v3971_v54, 0  ;;  %v4001_v43 = vrot.slane %v7041_v3, 6 }
 0xa06   : > { %v3863_v17 = vsel %vm347_vm1, %v3856_v39, %v3862_v44  ;;  %v3833_v36 = vsel %vm347_vm1, %v3826_v13, %v3832_v37  ;;  %v3983_v32 = vperm.slane %v3972_v11, 0  ;;  %v3939_v9 = vrot.slane %v3934_v8, 4  ;;  %v3790_v13 = vpop.permute.xlu1 %3789  ;;  %v3774_v8 = vpop.permute.xlu0 %3773 }
 0xa07   : > { %3864 = vrot.lane.b32.xlu1 %v3863_v17, %s5083_s9  ;;  %3834 = vrot.lane.b32.xlu0 %v3833_v36, %s5080_s26  ;;  %v3894_v7 = vmul.f32 %v7165_v38, %v7702_v63  ;;  %v5194_v1 = vmov 120   ;;  %v4247_v30 = vrot.slane %v7039_v34, 7  ;;  %v7717_v2 = vmov 7  }
 0xa08   : > { %v3988_v16 = vrot.slane %v3983_v32, 4  ;;  %v7232_v29 = vsel %vm347_vm1, %v3933_v52, %v3939_v9  ;;  %v4246_v19 = vrot.slane %v7041_v3, 7  ;;  %v5195_v28 = vmov 123  }
 0xa09   : > { %v3905_v59 = vperm.slane %v3894_v7, 0  ;;  %v3847_v51 = vmul.f32 %v7165_v38, %v5375_v55  ;;  %v3893_v42 = vmul.f32 %v3764_v15, %v5419_v48  ;;  %v3892_v35 = vmul.f32 %v3768_v20, %v5331_v27 }
 0xa0a   : > { %v7235_v14 = vsel %vm347_vm1, %v3982_v4, %v3988_v16  ;;  %v5196_v24 = vmov 126   ;;  %v7718_v60 = vmov 8   ;;  %v3779_v52 = vperm.slane %v3774_v8, %v5566_v45 }
 0xa0b   : > { %v3858_v34 = vperm.slane %v3847_v51, 0  ;;  %v3904_v33 = vperm.slane %v3893_v42, 0  ;;  %v3903_v44 = vperm.slane %v3892_v35, 0  ;;  %v3795_v9 = vperm.slane %v3790_v13, %v5566_v45 }
 0xa0c   : > { %3819 = vperm.xlu2 %4987, %v7064_v25  }
 0xa0d   : > { %v3909_v39 = vrot.slane %v3904_v33, 4 }
 0xa0f   : > { %3896 = vperm.xlu1 %4990, %v7064_v25   ;;  %4003 = vrot.lane.b32.xlu0 %v4001_v43, %s5060_s16  ;;  %v3910_v3 = vsel %vm347_vm1, %v3903_v44, %v3909_v39 }
 0xa14   : > { %4988 = vset.pattern.permute.xlu2 %v5194_v1  ;;  %v3787_v1 = vmul.f32 %v7222_v31, %v3779_v52 }
 0xa15   : > { %3849 = vperm.xlu2 %4988, %v7064_v25  }
 0xa17   : > { %3913 = vrot.lane.b32.xlu1 %v3905_v59, %s5084_s10  ;;  %4250 = vrot.lane.b32.xlu0 %v4247_v30, %s5060_s16 }
 0xa18   : > { %4995 = vset.pattern.permute.xlu1 %v7717_v2 }
 0xa1d   : > { %4248 = vrot.lane.b32.xlu2 %v4246_v19, %s5060_s16 }
 0xa1e   : > { %4991 = vset.pattern.permute.xlu2 %v5195_v28  ;;  %v5197_v28 = vmov 127  }
 0xa1f   : > { %3876 = vperm.xlu0 %4989, %v7064_v25  }
 0xa25   : > { %3866 = vrot.lane.b32.xlu2 %v3858_v34, %s5083_s9 }
 0xa27   : > { %4993 = vset.pattern.permute.xlu0 %v5197_v28 }
 0xa2d   : > { %3911 = vrot.lane.b32.xlu2 %v3910_v3, %s5084_s10 }
 0xa35   : > { %3926 = vperm.xlu2 %4991, %v7064_v25  }
 0xa3a   : > { %v3807_v37 = vpop.permute.xlu1 %3806 }
 0xa3b   : > { %v3809_v4 = vrot.slane %v3807_v37, 4 }
 0xa3d   : > { %4992 = vset.pattern.permute.xlu2 %v5196_v24 }
 0xa3e   : > { %4016 = vperm.xlu2 %4992, %v7064_v25  }
 0xa42   : > { %v3837_v15 = vpop.permute.xlu1 %3836 }
 0xa43   : > { %v3839_v33 = vrot.slane %v3837_v15, 4 }
 0xa46   : > { %4996 = vset.pattern.permute.xlu2 %v7718_v60 }
 0xa4a   : > { %v4006_v54 = vpop.permute.xlu1 %4005 }
 0xa4b   : > { %v7262_v20 = vsel %vm318_vm0, %v4006_v54, 0.0 }
 0xa4c   : > { %v4041_v11 = vperm.slane %v7262_v20, 0  ;;  %v4060_v17 = vmul.f32 %v7262_v20, %v5352_v40 }
 0xa4e   : > { %4049 = vrot.lane.b32.xlu1 %v4041_v11, %s5078_s24  ;;  %v4073_v36 = vperm.slane %v4060_v17, 0 }
 0xa50   : > { %4081 = vrot.lane.b32.xlu2 %v4073_v36, %s5080_s26 }
 0xa5e   : > { %v3805_v32 = vpop.permute.xlu2 %3804 }
 0xa5f   : > { %v3808_v16 = vrot.slane %v3805_v32, 4 }
 0xa61   : > { %v3810_v43 = vsel %vm347_vm1, %v3808_v16, %v3809_v4 }
 0xa62   : > { %v3811_v7 = vsel %vm374_vm7, %v3805_v32, %v3810_v43 }
 0xa63   : > { %v3813_v59 = vmul.f32 %v3811_v7, %v3795_v9 }
 0xa65   : > { %v3814_v30 = vadd.f32 %v3813_v59, %v3787_v1 }
 0xa66   : > { %v3820_v2 = vpop.permute.xlu2 %3819 }
 0xa67   : > { %v3825_v35 = vperm.slane %v3820_v2, %v5566_v45 }
 0xa6f   : > { %v3850_v19 = vpop.permute.xlu2 %3849 }
 0xa70   : > { %v3855_v31 = vperm.slane %v3850_v19, %v5566_v45 }
 0xa77   : > { %v4249_v51 = vpop.permute.xlu2 %4248 }
 0xa79   : > { %v3865_v42 = vpop.permute.xlu1 %3864  ;;  %v3835_v34 = vpop.permute.xlu0 %3834 }
 0xa7a   : > { %v3838_v39 = vrot.slane %v3835_v34, 4  ;;  %v3868_v24 = vrot.slane %v3865_v42, 4 }
 0xa7c   : > { %v3840_v44 = vsel %vm347_vm1, %v3838_v39, %v3839_v33 }
 0xa7d   : > { %v3841_v3 = vsel %vm417_vm8, %v3835_v34, %v3840_v44 }
 0xa7e   : > { %v3843_v13 = vmul.f32 %v3841_v3, %v3825_v35  ;;  %v7306_v3 = vsel %vm318_vm0, 0.0, %v4249_v51 }
 0xa7f   : > { %v3867_v37 = vpop.permute.xlu2 %3866 }
 0xa80   : > { %v3844_v60 = vadd.f32 %v3843_v13, %v3814_v30  ;;  %v3869_v17 = vrot.slane %v3867_v37, 4 }
 0xa81   : > { %v3897_v36 = vpop.permute.xlu1 %3896  ;;  %v4004_v8 = vpop.permute.xlu0 %4003 }
 0xa82   : > { %v3870_v32 = vsel %vm347_vm1, %v3868_v24, %v3869_v17  ;;  %v7282_v15 = vsel %vm318_vm0, %v4004_v8, %v4006_v54  ;;  %v7285_v52 = vsel %vm318_vm0, 0.0, %v4004_v8  ;;  %v3902_v13 = vperm.slane %v3897_v36, %v5566_v45 }
 0xa83   : > { %v3871_v9 = vsel %vm457_vm9, %v3865_v42, %v3870_v32  ;;  %v4040_v4 = vperm.slane %v7282_v15, 0  ;;  %v4058_v43 = vmul.f32 %v7285_v52, %v5358_v46  ;;  %v4059_v7 = vmul.f32 %v7282_v15, %v5390_v62 }
 0xa84   : > { %v3873_v16 = vmul.f32 %v3871_v9, %v3855_v31  ;;  %v4014_v1 = vmul.f32 %v7282_v15, %v5297_v12  ;;  %v4039_v54 = vperm.slane %v7285_v52, 0  ;;  %v4013_v30 = vmul.f32 %v7285_v52, %v5281_v5 }
 0xa85   : > { %v4045_v59 = vrot.slane %v4040_v4, 4  ;;  %v4072_v2 = vperm.slane %v4059_v7, 0  ;;  %v4071_v35 = vperm.slane %v4058_v43, 0  ;;  %v4092_v36 = vmul.f32 %v7262_v20, %v5375_v55 }
 0xa86   : > { %v7298_v19 = vadd.f32 %v3873_v16, %v3844_v60  ;;  %v4024_v28 = vperm.slane %v4014_v1, 0  ;;  %v4023_v24 = vperm.slane %v4013_v30, 0  ;;  %v4168_v43 = vmul.f32 %v7282_v15, %v7703_v26 }
 0xa87   : > { %v7301_v42 = vsel %vm347_vm1, %v4039_v54, %v4045_v59  ;;  %v3912_v34 = vpop.permute.xlu2 %3911  ;;  %v4077_v39 = vrot.slane %v4072_v2, 4  ;;  %v4380_v7 = vmul.f32 %v7306_v3, %v5331_v27  ;;  %v4091_v54 = vmul.f32 %v7282_v15, %v7698_v6 }
 0xa88   : > { %4047 = vrot.lane.b32.xlu0 %v7301_v42, %s5078_s24  ;;  %v3915_v33 = vrot.slane %v3912_v34, 4  ;;  %v4027_v44 = vrot.slane %v4024_v28, 4  ;;  %v4167_v2 = vmul.f32 %v7285_v52, %v7705_v50 }
 0xa89   : > { %v3914_v37 = vpop.permute.xlu1 %3913  ;;  %v4251_v31 = vpop.permute.xlu0 %4250  ;;  %v4078_v32 = vsel %vm347_vm1, %v4071_v35, %v4077_v39  ;;  %v4103_v35 = vperm.slane %v4092_v36, 0  ;;  %v4179_v39 = vperm.slane %v4168_v43, 0 }
 0xa8a   : > { %v3916_v60 = vrot.slane %v3914_v37, 4  ;;  %v7310_v17 = vsel %vm318_vm0, %v4249_v51, %v4251_v31  ;;  %v7313_v8 = vsel %vm318_vm0, %v4251_v31, 0.0  ;;  %4079 = vrot.lane.b32.xlu1 %v4078_v32, %s5080_s26  ;;  %v7322_v16 = vsel %vm347_vm1, %v4023_v24, %v4027_v44 }
 0xa8b   : > { %v7684_v9 = vperm.slane %v7313_v8, 0  ;;  %v4285_v4 = vperm.slane %v7310_v17, 0  ;;  %v4391_v44 = vperm.slane %v4380_v7, 0  ;;  %v4410_v37 = vmul.f32 %v7306_v3, %v7705_v50 }
 0xa8c   : > { %v3917_v51 = vsel %vm347_vm1, %v3915_v33, %v3916_v60  ;;  %v4284_v33 = vperm.slane %v7306_v3, 0  ;;  %v4090_v24 = vmul.f32 %v7285_v52, %v7699_v22  ;;  %v4102_v60 = vperm.slane %v4091_v54, 0 }
 0xa8d   : > { %v3918_v1 = vsel %vm514_vm10, %v3912_v34, %v3917_v51  ;;  %4294 = vrot.lane.b32.xlu2 %v7684_v9, %s5078_s24  ;;  %v4290_v30 = vrot.slane %v4285_v4, 4  ;;  %v4303_v34 = vmul.f32 %v7306_v3, %v5358_v46  ;;  %v4381_v32 = vmul.f32 %v7310_v17, %v5419_v48  ;;  %v7376_v9 = vld [vmem:[%s7635_s1 + $0x4] sm:$0xf] }
 0xa8e   : > { %v3920_v59 = vmul.f32 %v3918_v1, %v3902_v13  ;;  %v4258_v13 = vmul.f32 %v7306_v3, %v5281_v5  ;;  %v4459_v46 = vmul.f32 %v7306_v3, %v7708_v41  ;;  %v4178_v50 = vperm.slane %v4167_v2, 0 }
 0xa8f   : > { %v7337_v28 = vpop.permute.xlu2 %3926  ;;  %v7355_v36 = vsel %vm347_vm1, %v4284_v33, %v4290_v30  ;;  %v4184_v51 = vrot.slane %v4179_v39, 4  ;;  %v4304_v5 = vmul.f32 %v7310_v17, %v5390_v62  ;;  %v4392_v43 = vperm.slane %v4381_v32, 0 }
 0xa90   : > { %4032 = vperm.xlu0 %4993, %v7064_v25   ;;  %v4216_v7 = vmul.f32 %v7285_v52, %v7708_v41  ;;  %v4217_v1 = vmul.f32 %v7282_v15, %v7707_v57  ;;  %v4411_v2 = vmul.f32 %v7310_v17, %v7703_v26  ;;  %v4421_v33 = vperm.slane %v4410_v37, 0 }
 0xa91   : > { %v3877_v31 = vpop.permute.xlu0 %3876  ;;  %v7367_v30 = vsel %vm347_vm1, %v4178_v50, %v4184_v51  ;;  %v4101_v39 = vperm.slane %v4090_v24, 0  ;;  %v4107_v62 = vrot.slane %v4102_v60, 4  ;;  %v4460_v26 = vmul.f32 %v7310_v17, %v7707_v57 }
 0xa92   : > { %v3882_v4 = vperm.slane %v3877_v31, %v5566_v45  ;;  %4292 = vrot.lane.b32.xlu1 %v7355_v36, %s5078_s24  ;;  %v4397_v31 = vrot.slane %v4392_v43, 4  ;;  %v4228_v32 = vperm.slane %v4217_v1, 0  ;;  %v4315_v37 = vperm.slane %v4304_v5, 0 }
 0xa93   : > { %v4227_v24 = vperm.slane %v4216_v7, 0  ;;  %v4471_v1 = vperm.slane %v4460_v26, 0  ;;  %v4268_v5 = vperm.slane %v4258_v13, 0  ;;  %v4108_v7 = vsel %vm347_vm1, %v4101_v39, %v4107_v62 }
 0xa94   : > { %v3890_v54 = vmul.f32 %v7058_v0, %v3882_v4  ;;  %v4422_v0 = vperm.slane %v4411_v2, 0  ;;  %v4259_v4 = vmul.f32 %v7310_v17, %v5297_v12  ;;  %v4233_v60 = vrot.slane %v4228_v32, 4 }
 0xa95   : > { %4111 = vrot.lane.b32.xlu2 %v4103_v35, %s5083_s9  ;;  %v7383_v35 = vsel %vm347_vm1, %v4391_v44, %v4397_v31  ;;  %v4470_v44 = vperm.slane %v4459_v46, 0  ;;  %v4476_v2 = vrot.slane %v4471_v1, 4  ;;  %v4320_v32 = vrot.slane %v4315_v37, 4 }
 0xa96   : > { %v3891_v41 = vadd.f32 %v3890_v54, %v7298_v19  ;;  %v4427_v51 = vrot.slane %v4422_v0, 4  ;;  %v4269_v43 = vperm.slane %v4259_v4, 0  ;;  %v7391_v57 = vsel %vm347_vm1, %v4227_v24, %v4233_v60 }
 0xa97   : > { %v7405_v0 = vsel %vm347_vm1, %v4470_v44, %v4476_v2  ;;  %v4314_v13 = vperm.slane %v4303_v34, 0  ;;  %v4305_v39 = vmul.f32 %v7313_v8, %v5352_v40  ;;  %v4334_v62 = vmul.f32 %v7310_v17, %v7698_v6 }
 0xa98   : > { %v7385_v50 = vadd.f32 %v3920_v59, %v3891_v41  ;;  %4994 = vset.pattern.permute.xlu0 %v7709_v47  ;;  %v4017_v19 = vpop.permute.xlu2 %4016  ;;  %v7395_v59 = vsel %vm347_vm1, %v4421_v33, %v4427_v51  ;;  %v4272_v54 = vrot.slane %v4269_v43, 4  ;;  %v7719_v33 = vmov 9  }
 0xa99   : > { %4064 = vperm.xlu0 %4994, %v7376_v9   ;;  %v4022_v12 = vperm.slane %v4017_v19, %v5566_v45  ;;  %v4321_v46 = vsel %vm347_vm1, %v4314_v13, %v4320_v32  ;;  %v4335_v34 = vmul.f32 %v7313_v8, %v5375_v55  ;;  %v4316_v4 = vperm.slane %v4305_v39, 0 }
 0xa9a   : > { %4109 = vrot.lane.b32.xlu1 %v4108_v7, %s5083_s9  ;;  %v7402_v41 = vsel %vm347_vm1, %v4268_v5, %v4272_v54  ;;  %v4345_v26 = vperm.slane %v4334_v62, 0  ;;  %v4333_v24 = vmul.f32 %v7306_v3, %v7699_v22  ;;  %v7721_v60 = vmov 10  }
 0xa9b   : > { %v7398_v31 = vmul.f32 %v7322_v16, %v4022_v12  ;;  %v7720_v16 = vmov 1   ;;  %v4346_v37 = vperm.slane %v4335_v34, 0  ;;  %v7722_v19 = vmov 5  }
 0xa9c   : > { %v4350_v40 = vrot.slane %v4345_v26, 4  ;;  %v4344_v6 = vperm.slane %v4333_v24, 0  ;;  %v3924_v55 = vmul.f32 %v7165_v38, %v7701_v10  ;;  %v7723_v17 = vmov 2   ;;  %v5048_v24 = vld [vmem:[%s7635_s1] sm:$0xf] }
 0xa9d   : > { %4277 = vperm.xlu2 %4996, %v7376_v9   ;;  %v4138_v3 = vmul.f32 %v7282_v15, %v5419_v48  ;;  %v4139_v43 = vmul.f32 %v7262_v20, %v7702_v63  ;;  %v7724_v12 = vmov 14   ;;  %v4169_v44 = vmul.f32 %v7262_v20, %v7701_v10 }
 0xa9e   : > { %v4351_v51 = vsel %vm347_vm1, %v4344_v6, %v4350_v40  ;;  %v3935_v22 = vperm.slane %v3924_v55, 0  ;;  %v4137_v48 = vmul.f32 %v7285_v52, %v5331_v27  ;;  %v3973_v27 = vmul.f32 %v7165_v38, %v7706_v49 }
 0xa9f   : > { %v4149_v1 = vperm.slane %v4138_v3, 0  ;;  %v4150_v5 = vperm.slane %v4139_v43, 0  ;;  %v4180_v7 = vperm.slane %v4169_v44, 0  ;;  %v7725_v32 = vmov 3  }
 0xaa0   : > { %v4148_v54 = vperm.slane %v4137_v48, 0  ;;  %v3984_v52 = vperm.slane %v3973_v27, 0  ;;  %v4412_v38 = vmul.f32 %v7313_v8, %v7701_v10  ;;  %v5198_v13 = vmov 124  }
 0xaa1   : > { %4322 = vrot.lane.b32.xlu0 %v4321_v46, %s5080_s26  ;;  %v4154_v15 = vrot.slane %v4149_v1, 4  ;;  %v7727_v10 = vmov 4   ;;  %v7729_v34 = vmov 13   ;;  %v5199_v26 = vmov 125  }
 0xaa2   : > { %4998 = vset.pattern.permute.xlu0 %v7719_v33  ;;  %4261 = vperm.xlu1 %4995, %v7376_v9   ;;  %v4218_v6 = vmul.f32 %v7262_v20, %v7706_v49  ;;  %v7730_v1 = vmov 6   ;;  %v4461_v20 = vmul.f32 %v7313_v8, %v7706_v49 }
 0xaa5   : > { %4997 = vset.pattern.permute.xlu2 %v7720_v16 }
 0xaa6   : > { %4094 = vperm.xlu2 %4997, %v7376_v9  }
 0xaa9   : > { %4307 = vperm.xlu0 %4998, %v7376_v9  }
 0xaaa   : > { %4324 = vrot.lane.b32.xlu1 %v4316_v4, %s5080_s26 }
 0xaab   : > { %5000 = vset.pattern.permute.xlu1 %v7721_v60 }
 0xaae   : > { %4354 = vrot.lane.b32.xlu2 %v4346_v37, %s5083_s9 }
 0xaaf   : > { %5007 = vset.pattern.permute.xlu2 %v7722_v19 }
 0xab1   : > { %4999 = vset.pattern.permute.xlu0 %v7723_v17 }
 0xab2   : > { %4121 = vperm.xlu0 %4999, %v7376_v9   ;;  %4352 = vrot.lane.b32.xlu1 %v4351_v51, %s5083_s9 }
 0xab6   : > { %3943 = vrot.lane.b32.xlu2 %v3935_v22, %s5081_s27 }
 0xaba   : > { %3962 = vrot.lane.b32.xlu0 %v3798_v18, %s5079_s25  ;;  %3941 = vrot.lane.b32.xlu1 %v7232_v29, %s5081_s27  ;;  %v4155_v18 = vsel %vm347_vm1, %v4148_v54, %v4154_v15  ;;  %v4382_v29 = vmul.f32 %v7313_v8, %v7702_v63  ;;  %v7726_v63 = vmov 11   ;;  %v7731_v15 = vmov 15  }
 0xabb   : > { %5010 = vset.pattern.permute.xlu0 %v7724_v12  ;;  %v4229_v12 = vperm.slane %v4218_v6, 0 }
 0xabc   : > { %v4393_v2 = vperm.slane %v4382_v29, 0  ;;  %v4472_v29 = vperm.slane %v4461_v20, 0 }
 0xabe   : > { %4158 = vrot.lane.b32.xlu2 %v4150_v5, %s5084_s10 }
 0xac2   : > { %4188 = vrot.lane.b32.xlu0 %v4180_v7, %s5081_s27  ;;  %4156 = vrot.lane.b32.xlu1 %v4155_v18, %s5084_s10 }
 0xac6   : > { %3960 = vrot.lane.b32.xlu2 %v7216_v56, %s5079_s25  ;;  %v4082_v56 = vpop.permute.xlu2 %4081 }
 0xac7   : > { %v4084_v39 = vrot.slane %v4082_v56, 4  ;;  %v7732_v56 = vperm.slane %v7313_v8, 0 }
 0xaca   : > { %4401 = vrot.lane.b32.xlu0 %v4393_v2, %s5084_s10  ;;  %4337 = vperm.xlu1 %5000, %v7376_v9  }
 0xace   : > { %4186 = vrot.lane.b32.xlu2 %v7367_v30, %s5081_s27  ;;  %v4423_v30 = vperm.slane %v4412_v38, 0 }
 0xad2   : > { %3992 = vrot.lane.b32.xlu0 %v3984_v52, %s5082_s28  ;;  %5001 = vset.pattern.permute.xlu1 %v7725_v32 }
 0xad3   : > { %4141 = vperm.xlu1 %5001, %v7376_v9  }
 0xad6   : > { %4399 = vrot.lane.b32.xlu2 %v7383_v35, %s5084_s10  ;;  %v4050_v35 = vpop.permute.xlu1 %4049 }
 0xad7   : > { %v4052_v46 = vrot.slane %v4050_v35, 4 }
 0xada   : > { %4207 = vrot.lane.b32.xlu0 %v4041_v11, %s5079_s25 }
 0xadb   : > { %5002 = vset.pattern.permute.xlu1 %v7726_v63 }
 0xadc   : > { %4364 = vperm.xlu1 %5002, %v7376_v9  }
 0xade   : > { %3990 = vrot.lane.b32.xlu2 %v7235_v14, %s5082_s28 }
 0xae2   : > { %4431 = vrot.lane.b32.xlu0 %v4423_v30, %s5081_s27 }
 0xae4   : > { %5003 = vset.pattern.permute.xlu1 %v5198_v13 }
 0xae5   : > { %3953 = vperm.xlu1 %5003, %v7064_v25   ;;  %v7728_v25 = vmov 12  }
 0xae6   : > { %4205 = vrot.lane.b32.xlu2 %v7301_v42, %s5079_s25 }
 0xae7   : > { %v4295_v11 = vpop.permute.xlu2 %4294 }
 0xae8   : > { %v4297_v51 = vrot.slane %v4295_v11, 4 }
 0xaea   : > { %4235 = vrot.lane.b32.xlu0 %v7391_v57, %s5082_s28 }
 0xaed   : > { %5004 = vset.pattern.permute.xlu1 %v7727_v10 }
 0xaee   : > { %4429 = vrot.lane.b32.xlu2 %v7395_v59, %s5081_s27  ;;  %4171 = vperm.xlu1 %5004, %v7376_v9  }
 0xaef   : > { %v4112_v14 = vpop.permute.xlu2 %4111 }
 0xaf0   : > { %v4114_v2 = vrot.slane %v4112_v14, 4 }
 0xaf2   : > { %4448 = vrot.lane.b32.xlu0 %v7355_v36, %s5079_s25 }
 0xaf6   : > { %4198 = vperm.xlu2 %5007, %v7376_v9   ;;  %5005 = vset.pattern.permute.xlu1 %v7728_v25 }
 0xaf7   : > { %4384 = vperm.xlu1 %5005, %v7376_v9   ;;  %v4278_v42 = vpop.permute.xlu2 %4277 }
 0xaf8   : > { %v4283_v22 = vperm.slane %v4278_v42, %v5566_v45 }
 0xafa   : > { %v4048_v57 = vpop.permute.xlu0 %4047  ;;  %4441 = vperm.xlu0 %5010, %v7376_v9  }
 0xafb   : > { %v4051_v33 = vrot.slane %v4048_v57, 4 }
 0xafc   : > { %v4080_v16 = vpop.permute.xlu1 %4079 }
 0xafd   : > { %v4053_v59 = vsel %vm347_vm1, %v4051_v33, %v4052_v46  ;;  %v4083_v36 = vrot.slane %v4080_v16, 4 }
 0xafe   : > { %v4054_v62 = vsel %vm374_vm7, %v4048_v57, %v4053_v59  ;;  %5008 = vset.pattern.permute.xlu2 %v7729_v34 }
 0xaff   : > { %4414 = vperm.xlu2 %5008, %v7376_v9   ;;  %v4085_v4 = vsel %vm347_vm1, %v4083_v36, %v4084_v39  ;;  %5006 = vset.pattern.permute.xlu1 %v5199_v26 }
 0xb00   : > { %v4086_v37 = vsel %vm417_vm8, %v4080_v16, %v4085_v4  ;;  %3975 = vperm.xlu1 %5006, %v5048_v24   ;;  %v4095_v40 = vpop.permute.xlu2 %4094 }
 0xb01   : > { %v4100_v27 = vperm.slane %v4095_v40, %v5566_v45 }
 0xb02   : > { %v4033_v60 = vpop.permute.xlu0 %4032  ;;  %5014 = vset.pattern.permute.xlu0 %v7709_v47 }
 0xb03   : > { %v4038_v19 = vperm.slane %v4033_v60, %v5566_v45 }
 0xb04   : > { %v4293_v17 = vpop.permute.xlu1 %4292 }
 0xb05   : > { %v4056_v55 = vmul.f32 %v4054_v62, %v4038_v19  ;;  %v4296_v3 = vrot.slane %v4293_v17, 4 }
 0xb07   : > { %v4057_v43 = vadd.f32 %v4056_v55, %v7398_v31  ;;  %5009 = vset.pattern.permute.xlu2 %v7730_v1  ;;  %v4298_v5 = vsel %vm347_vm1, %v4296_v3, %v4297_v51 }
 0xb08   : > { %4220 = vperm.xlu2 %5009, %v7376_v9   ;;  %v4299_v44 = vsel %vm374_vm7, %v4293_v17, %v4298_v5  ;;  %4237 = vrot.lane.b32.xlu1 %v4229_v12, %s5082_s28  ;;  %v4355_v54 = vpop.permute.xlu2 %4354 }
 0xb09   : > { %v4301_v48 = vmul.f32 %v4299_v44, %v4283_v22  ;;  %5011 = vset.pattern.permute.xlu1 %v7731_v15  ;;  %v3932_v22 = vperm.slane %v7337_v28, %v5566_v45 }
 0xb0b   : > { %v4065_v7 = vpop.permute.xlu0 %4064 }
 0xb0c   : > { %v4070_v31 = vperm.slane %v4065_v7, %v5566_v45  ;;  %v4110_v18 = vpop.permute.xlu1 %4109 }
 0xb0d   : > { %v4113_v32 = vrot.slane %v4110_v18, 4 }
 0xb0e   : > { %v4088_v52 = vmul.f32 %v4086_v37, %v4070_v31  ;;  %v4357_v37 = vrot.slane %v4355_v54, 4 }
 0xb0f   : > { %v4115_v38 = vsel %vm347_vm1, %v4113_v32, %v4114_v2 }
 0xb10   : > { %v4089_v63 = vadd.f32 %v4088_v52, %v4057_v43  ;;  %4480 = vrot.lane.b32.xlu2 %v4472_v29, %s5082_s28  ;;  %v4116_v49 = vsel %vm457_vm9, %v4110_v18, %v4115_v38  ;;  %4450 = vrot.lane.b32.xlu1 %v7732_v56, %s5079_s25  ;;  %v3944_v35 = vpop.permute.xlu2 %3943 }
 0xb11   : > { %5012 = vset.pattern.permute.xlu2 %v7709_v47  ;;  %v4118_v30 = vmul.f32 %v4116_v49, %v4100_v27  ;;  %v3946_v17 = vrot.slane %v3944_v35, 4 }
 0xb13   : > { %v4323_v13 = vpop.permute.xlu0 %4322  ;;  %v4119_v11 = vadd.f32 %v4118_v30, %v4089_v63 }
 0xb14   : > { %v4262_v10 = vpop.permute.xlu1 %4261  ;;  %v4326_v33 = vrot.slane %v4323_v13, 4 }
 0xb15   : > { %v4267_v14 = vperm.slane %v4262_v10, %v5566_v45 }
 0xb17   : > { %v4275_v25 = vmul.f32 %v7402_v41, %v4267_v14  ;;  %v4710_v41 = vld [vmem:[%s7636_s2 + $0xc] sm:$0xf] }
 0xb18   : > { %4478 = vrot.lane.b32.xlu1 %v7405_v0, %s5082_s28  ;;  %v4159_v39 = vpop.permute.xlu2 %4158  ;;  %4496 = vperm.xlu2 %5012, %v4710_v41  }
 0xb19   : > { %v4302_v42 = vadd.f32 %v4301_v48, %v4275_v25  ;;  %v4161_v44 = vrot.slane %v4159_v39, 4 }
 0xb1b   : > { %v4308_v57 = vpop.permute.xlu0 %4307 }
 0xb1c   : > { %v4325_v46 = vpop.permute.xlu1 %4324  ;;  %v4313_v8 = vperm.slane %v4308_v57, %v5566_v45 }
 0xb1d   : > { %v4327_v59 = vrot.slane %v4325_v46, 4 }
 0xb1f   : > { %v4328_v16 = vsel %vm347_vm1, %v4326_v33, %v4327_v59 }
 0xb20   : > { %v4329_v62 = vsel %vm417_vm8, %v4323_v13, %v4328_v16  ;;  %4463 = vperm.xlu1 %5011, %v7376_v9   ;;  %v3961_v6 = vpop.permute.xlu2 %3960 }
 0xb21   : > { %v4331_v36 = vmul.f32 %v4329_v62, %v4313_v8  ;;  %v3964_v10 = vrot.slane %v3961_v6, 4 }
 0xb23   : > { %v4332_v34 = vadd.f32 %v4331_v36, %v4302_v42 }
 0xb24   : > { %v4122_v0 = vpop.permute.xlu0 %4121  ;;  %v4353_v26 = vpop.permute.xlu1 %4352 }
 0xb25   : > { %v4127_v4 = vperm.slane %v4122_v0, %v5566_v45  ;;  %v4356_v24 = vrot.slane %v4353_v26, 4 }
 0xb27   : > { %v4135_v60 = vmul.f32 %v7067_v61, %v4127_v4  ;;  %v4358_v40 = vsel %vm347_vm1, %v4356_v24, %v4357_v37 }
 0xb28   : > { %v4359_v9 = vsel %vm457_vm9, %v4353_v26, %v4358_v40  ;;  %5013 = vset.pattern.permute.xlu1 %v7709_v47  ;;  %v4187_v12 = vpop.permute.xlu2 %4186 }
 0xb29   : > { %v4136_v19 = vadd.f32 %v4135_v60, %v4119_v11  ;;  %v4190_v4 = vrot.slane %v4187_v12, 4 }
 0xb2c   : > { %v3942_v55 = vpop.permute.xlu1 %3941  ;;  %v3963_v15 = vpop.permute.xlu0 %3962 }
 0xb2d   : > { %v3945_v51 = vrot.slane %v3942_v55, 4  ;;  %v3965_v30 = vrot.slane %v3963_v15, 4 }
 0xb2f   : > { %v3947_v3 = vsel %vm347_vm1, %v3945_v51, %v3946_v17  ;;  %v3966_v14 = vsel %vm347_vm1, %v3964_v10, %v3965_v30 }
 0xb30   : > { %v3948_v43 = vsel %vm554_vm11, %v3942_v55, %v3947_v3  ;;  %v7548_v28 = vpop.permute.xlu2 %4399  ;;  %v3967_v42 = vsel %vm574_vm12, %v3961_v6, %v3966_v14 }
 0xb31   : > { %v3950_v1 = vmul.f32 %v3948_v43, %v3932_v22 }
 0xb33   : > { %v3951_v61 = vadd.f32 %v3950_v1, %v7385_v50 }
 0xb34   : > { %v4157_v5 = vpop.permute.xlu1 %4156  ;;  %v4189_v2 = vpop.permute.xlu0 %4188 }
 0xb35   : > { %v4160_v20 = vrot.slane %v4157_v5, 4  ;;  %v4191_v41 = vrot.slane %v4189_v2, 4 }
 0xb37   : > { %v4162_v47 = vsel %vm347_vm1, %v4160_v20, %v4161_v44  ;;  %v4192_v24 = vsel %vm347_vm1, %v4190_v4, %v4191_v41 }
 0xb38   : > { %v4163_v48 = vsel %vm514_vm10, %v4157_v5, %v4162_v47  ;;  %v3991_v27 = vpop.permute.xlu2 %3990  ;;  %v4193_v55 = vsel %vm554_vm11, %v4187_v12, %v4192_v24 }
 0xb39   : > { %v3994_v0 = vrot.slane %v3991_v27, 4 }
 0xb3c   : > { %v4338_v7 = vpop.permute.xlu1 %4337  ;;  %v4402_v49 = vpop.permute.xlu0 %4401 }
 0xb3d   : > { %v4343_v31 = vperm.slane %v4338_v7, %v5566_v45 }
 0xb3f   : > { %v4361_v54 = vmul.f32 %v4359_v9, %v4343_v31 }
 0xb40   : > { %v4206_v13 = vpop.permute.xlu2 %4205 }
 0xb41   : > { %v4362_v18 = vadd.f32 %v4361_v54, %v4332_v34  ;;  %v4209_v17 = vrot.slane %v4206_v13, 4 }
 0xb44   : > { %v3993_v57 = vpop.permute.xlu0 %3992 }
 0xb45   : > { %v4142_v29 = vpop.permute.xlu1 %4141  ;;  %v3995_v62 = vrot.slane %v3993_v57, 4 }
 0xb46   : > { %v4147_v50 = vperm.slane %v4142_v29, %v5566_v45 }
 0xb47   : > { %v3996_v26 = vsel %vm347_vm1, %v3994_v0, %v3995_v62 }
 0xb48   : > { %v4165_v52 = vmul.f32 %v4163_v48, %v4147_v50  ;;  %v7558_v33 = vpop.permute.xlu2 %4429 }
 0xb4a   : > { %v4166_v32 = vadd.f32 %v4165_v52, %v4136_v19  ;;  %v3997_v19 = vsel %vm614_vm13, %v3991_v27, %v3996_v26 }
 0xb4c   : > { %v4208_v16 = vpop.permute.xlu0 %4207 }
 0xb4d   : > { %v4210_v9 = vrot.slane %v4208_v16, 4 }
 0xb4e   : > { %v4365_v63 = vpop.permute.xlu1 %4364 }
 0xb4f   : > { %v4370_v38 = vperm.slane %v4365_v63, %v5566_v45  ;;  %v4211_v43 = vsel %vm347_vm1, %v4209_v17, %v4210_v9  ;;  %v4403_v63 = vrot.slane %v7548_v28, 4 }
 0xb50   : > { %v4212_v7 = vsel %vm574_vm12, %v4206_v13, %v4211_v43 }
 0xb51   : > { %v4378_v56 = vmul.f32 %v7070_v53, %v4370_v38  ;;  %v4199_v53 = vpop.permute.xlu2 %4198 }
 0xb52   : > { %v4204_v1 = vperm.slane %v4199_v53, %v5566_v45 }
 0xb53   : > { %v7553_v11 = vadd.f32 %v4378_v56, %v4362_v18 }
 0xb54   : > { %v4432_v36 = vpop.permute.xlu0 %4431  ;;  %v4214_v12 = vmul.f32 %v4212_v7, %v4204_v1  ;;  %v7733_v1 = vld [vmem:[#allocation7_spill] sm:$0xff] }
 0xb55   : > { %v4434_v30 = vrot.slane %v4432_v36, 4 }
 0xb57   : > { %v3954_v35 = vpop.permute.xlu1 %3953 }
 0xb58   : > { %v3959_v25 = vperm.slane %v3954_v35, %v5566_v45 }
 0xb59   : > { %v4415_v34 = vpop.permute.xlu2 %4414 }
 0xb5a   : > { %v3969_v46 = vmul.f32 %v3967_v42, %v3959_v25  ;;  %v4433_v25 = vrot.slane %v7558_v33, 4 }
 0xb5c   : > { %v3970_v8 = vadd.f32 %v3969_v46, %v3951_v61  ;;  %v4236_v3 = vpop.permute.xlu0 %4235  ;;  %v4435_v46 = vsel %vm347_vm1, %v4433_v25, %v4434_v30  ;;  %v1387_v25 = vld [vmem:[%s7640_s6] sm:$0xf] }
 0xb5d   : > { %v4239_v20 = vrot.slane %v4236_v3, 4  ;;  %v4436_v62 = vsel %vm554_vm11, %v7558_v33, %v4435_v46  ;;  %v5049_v33 = vld [vmem:[%s7638_s4] sm:$0xff] }
 0xb5e   : > { %v1362_v46 = vld [vmem:[%s7641_s7] sm:$0xf] }
 0xb60   : > { %v4172_v59 = vpop.permute.xlu1 %4171 }
 0xb61   : > { %v4177_v60 = vperm.slane %v4172_v59, %v5566_v45 }
 0xb62   : > { %v4221_v5 = vpop.permute.xlu2 %4220 }
 0xb63   : > { %v4195_v51 = vmul.f32 %v4193_v55, %v4177_v60  ;;  %v4226_v48 = vperm.slane %v4221_v5, %v5566_v45  ;;  %v7734_v5 = vld [vmem:[#allocation4_spill] sm:$0xff] }
 0xb64   : > { %v4449_v50 = vpop.permute.xlu0 %4448 }
 0xb65   : > { %v4196_v47 = vadd.f32 %v4195_v51, %v4166_v32  ;;  %v4452_v13 = vrot.slane %v4449_v50, 4 }
 0xb67   : > { %v4215_v18 = vadd.f32 %v4214_v12, %v4196_v47 }
 0xb69   : > { %v4385_v39 = vpop.permute.xlu1 %4384 }
 0xb6a   : > { %v4390_v38 = vperm.slane %v4385_v39, %v5566_v45  ;;  %v4481_v57 = vpop.permute.xlu2 %4480 }
 0xb6c   : > { %v4442_v14 = vpop.permute.xlu0 %4441 }
 0xb6d   : > { %v4447_v59 = vperm.slane %v4442_v14, %v5566_v45 }
 0xb72   : > { %v3976_v37 = vpop.permute.xlu1 %3975  ;;  %v4497_v24 = vpop.permute.xlu2 %4496 }
 0xb73   : > { %v3981_v40 = vperm.slane %v3976_v37, %v5566_v45 }
 0xb75   : > { %v3999_v6 = vmul.f32 %v3997_v19, %v3981_v40 }
 0xb77   : > { %v4000_v22 = vadd.f32 %v3999_v6, %v3970_v8  ;;  %v4420_v8 = vperm.slane %v4415_v34, %v5566_v45 }
 0xb79   : > { %v4489_v61 = vadd.f32 %v4000_v22, %v7204_v23  ;;  %v4404_v23 = vrot.slane %v4402_v49, 4  ;;  %v4438_v36 = vmul.f32 %v4436_v62, %v4420_v8 }
 0xb7a   : > { %v4238_v44 = vpop.permute.xlu1 %4237 }
 0xb7b   : > { %v4240_v15 = vrot.slane %v4238_v44, 4  ;;  %v4405_v32 = vsel %vm347_vm1, %v4403_v63, %v4404_v23  ;;  %v1376_v44 = vsel %vm347_vm1, %v7734_v5, 0.0 }
 0xb7c   : > { %v4406_v10 = vsel %vm514_vm10, %v7548_v28, %v4405_v32  ;;  %v4483_v28 = vrot.slane %v4481_v57, 4 }
 0xb7d   : > { %v4241_v31 = vsel %vm347_vm1, %v4239_v20, %v4240_v15  ;;  %v4408_v42 = vmul.f32 %v4406_v10, %v4390_v38  ;;  %v3468_v20 = vsel %vm347_vm1, %v7150_v21, 0.0 }
 0xb7e   : > { %v4242_v54 = vsel %vm614_vm13, %v4236_v3, %v4241_v31  ;;  %v3469_v15 = vrot.slane %v3468_v20, 4 }
 0xb7f   : > { %v4244_v29 = vmul.f32 %v4242_v54, %v4226_v48  ;;  %v4409_v39 = vadd.f32 %v4408_v42, %v7553_v11  ;;  %v4501_v11 = vperm.slane %v4497_v24, %v5566_v45  ;;  %v1377_v48 = vrot.slane %v1376_v44, 4 }
 0xb80   : > { %v3470_v31 = vadd.f32 %v3469_v15, %v3468_v20 }
 0xb81   : > { %v4245_v2 = vadd.f32 %v4244_v29, %v4215_v18  ;;  %v4439_v26 = vadd.f32 %v4438_v36, %v4409_v39  ;;  %v1378_v12 = vadd.f32 %v1377_v48, %v1376_v44 }
 0xb82   : > { %v4451_v27 = vpop.permute.xlu1 %4450  ;;  %v3471_v29 = vrot.slane %v3470_v31, 2 }
 0xb83   : > { %v4490_v52 = vadd.f32 %v4489_v61, %v4245_v2  ;;  %v4453_v56 = vrot.slane %v4451_v27, 4  ;;  %v2425_v61 = vsel %vm347_vm1, %v7733_v1, 0.0  ;;  %v1379_v18 = vrot.slane %v1378_v12, 2 }
 0xb84   : > { %v2426_v47 = vrot.slane %v2425_v61, 4  ;;  %v3472_v27 = vadd.f32 %v3471_v29, %v3470_v31 }
 0xb85   : > { %v4454_v49 = vsel %vm347_vm1, %v4452_v13, %v4453_v56  ;;  %v1384_v56 = vstv %s1383_s11 }
 0xb86   : > { %v4455_v53 = vsel %vm574_vm12, %v4449_v50, %v4454_v49  ;;  %v2427_v7 = vadd.f32 %v2426_v47, %v2425_v61  ;;  %v1380_v50 = vadd.f32 %v1379_v18, %v1378_v12  ;;  %v3473_v63 = vrot.slane %v3472_v27, 1 }
 0xb87   : > { %v4457_v41 = vmul.f32 %v4455_v53, %v4447_v59 }
 0xb88   : > { %v2428_v54 = vrot.slane %v2427_v7, 2  ;;  %v3474_v21 = vadd.f32 %v3473_v63, %v3472_v27 }
 0xb89   : > { %v4458_v60 = vadd.f32 %v4457_v41, %v4439_v26 }
 0xb8a   : > { %v4479_v35 = vpop.permute.xlu1 %4478  ;;  %v2429_v2 = vadd.f32 %v2428_v54, %v2427_v7  ;;  %v3475_v10 = vadd.f32 %v3474_v21, %v1384_v56 }
 0xb8b   : > { %v4482_v16 = vrot.slane %v4479_v35, 4 }
 0xb8c   : > { %v2430_v23 = vrot.slane %v2429_v2, 1  ;;  %v3476_v42 = vmax.f32 %v3475_v10, 0.0 }
 0xb8d   : > { %v4484_v0 = vsel %vm347_vm1, %v4482_v16, %v4483_v28 }
 0xb8e   : > { %v4485_v34 = vsel %vm614_vm13, %v4479_v35, %v4484_v0  ;;  %v2431_v32 = vadd.f32 %v2430_v23, %v2429_v2  ;;  %v3477_v8 = vmul.f32 %v3476_v42, %v1387_v25 }
 0xb90   : > { %v2432_v30 = vadd.f32 %v2431_v32, %v1384_v56  ;;  %v3478_v53 = vadd.f32 %v3477_v8, %v1362_v46 }
 0xb92   : > { %v4464_v4 = vpop.permute.xlu1 %4463  ;;  %v2433_v14 = vmax.f32 %v2432_v30, 0.0  ;;  %v3479_v62 = vsub.f32 0.0, %v3478_v53 }
 0xb93   : > { %v4469_v37 = vperm.slane %v4464_v4, %v5566_v45 }
 0xb94   : > { %v2434_v49 = vmul.f32 %v2433_v14, %v1387_v25  ;;  %v3480_v0 = vmul.f32 1.442695, %v3479_v62 }
 0xb95   : > { %v4487_v40 = vmul.f32 %v4485_v34, %v4469_v37 }
 0xb96   : > { %v2435_v59 = vadd.f32 %v2434_v49, %v1362_v46 }
 0xb97   : > { %v4488_v19 = vadd.f32 %v4487_v40, %v4458_v60 }
 0xb98   : > { %v2436_v39 = vsub.f32 0.0, %v2435_v59 }
 0xb99   : > { %v4491_v9 = vadd.f32 %v4490_v52, %v4488_v19  ;;  %v1381_v52 = vrot.slane %v1380_v50, 1 }
 0xb9a   : > { %v2437_v36 = vmul.f32 1.442695, %v2436_v39 }
 0xb9b   : > { %v7591_v6 = vadd.f32 %v4501_v11, %v4491_v9  ;;  %v1382_v38 = vadd.f32 %v1381_v52, %v1380_v50 }
 0xb9c   : > { %5015 = vpow2.f32 %v2437_v36 }
 0xb9d   : > { %v4504_v55 = vmul.f32 %v5049_v33, %v7591_v6  ;;  %v1385_v13 = vadd.f32 %v1384_v56, %v1382_v38 }
 0xb9f   : > { %4506 = vst [vmem:[#allocation1] ss:$2 sm:$0xff] %v4504_v55  ;;  %v1386_v35 = vmax.f32 %v1385_v13, 0.0 }
 0xba1   : > { %v1388_v57 = vmul.f32 %v1387_v25, %v1386_v35 }
 0xba2   : > { %v5016_v24 = vpop.eup %5015 }
 0xba3   : > { %v1389_v16 = vadd.f32 %v1388_v57, %v1362_v46  ;;  %v2439_v9 = vadd.f32 1.0, %v5016_v24 }
 0xba5   : > { %v1390_v28 = vsub.f32 0.0, %v1389_v16  ;;  %v2451_v32 = vand.u32 2147483648, %v2439_v9 }
 0xba6   : > { %v4507_v17 = vld.sshfl [vmem:[#allocation1] sm:$0xff pattern:$0x75316420]  ;;  %v4508_v51 = vld.sshfl [vmem:[#allocation1 + $0x8] sm:$0xff pattern:$0x75316420] }
 0xba7   : > { %v4511_v22 = vsel %vm347_vm1, %v4507_v17, 0.0  ;;  %v4512_v3 = vsel %vm347_vm1, %v4508_v51, 0.0  ;;  %v1391_v41 = vmul.f32 1.442695, %v1390_v28 }
 0xba8   : > { %v4513_v43 = vadd.f32 %v4512_v3, %v4511_v22 }
 0xba9   : > { %5017 = vpow2.f32 %v1391_v41 }
 0xbaa   : > { %4514 = vadd.xlane.f32.xlu0 %v4513_v43  ;;  %5019 = vpow2.f32 %v3480_v0 }
 0xbab   : > { %5021 = vrcp.f32 %v2439_v9 }
 0xbaf   : > { %v5018_v40 = vpop.eup %5017 }
 0xbb0   : > { %v5020_v19 = vpop.eup %5019  ;;  %v1393_v33 = vadd.f32 1.0, %v5018_v40 }
 0xbb1   : > { %v3482_v17 = vadd.f32 1.0, %v5020_v19  ;;  %v5022_v1 = vpop.eup %5021 }
 0xbb2   : > { %5023 = vrcp.f32 %v1393_v33  ;;  %v2441_v47 = vmul.f32 %v5022_v1, %v2439_v9  ;;  %v1405_v23 = vand.u32 2147483648, %v1393_v33  ;;  %vm2446_vm14 = vweird.f32 %v5022_v1 }
 0xbb3   : > { %5025 = vrcp.f32 %v3482_v17  ;;  %vm1399_vm2 = vweird.f32 %v1393_v33  ;;  %v1403_v21 = vand.u32 2147483647, %v1393_v33  ;;  %v3494_v30 = vand.u32 2147483648, %v3482_v17 }
 0xbb4   : > { %v2442_v12 = vsub.f32 1.0, %v2441_v47  ;;  %vm3488_vm5 = vweird.f32 %v3482_v17  ;;  %v3492_v10 = vand.u32 2147483647, %v3482_v17  ;;  %v1406_v42 = vor.u32 1.1754944e-38, %v1405_v23 }
 0xbb5   : > { %vm1404_vm8 = vcmp.eq.f32.partialorder %v1403_v21, 8.507059e+37 }
 0xbb6   : > { %v2443_v18 = vmul.f32 %v5022_v1, %v2442_v12  ;;  %vm3493_vm9 = vcmp.eq.f32.partialorder %v3492_v10, 8.507059e+37 }
 0xbb8   : > { %v5024_v61 = vpop.eup %5023  ;;  %v2444_v52 = vadd.f32 %v5022_v1, %v2443_v18  ;;  %v7737_v18 = vld [vmem:[#allocation8_spill] sm:$0xff] }
 0xbb9   : > { %v5026_v44 = vpop.eup %5025  ;;  %v1395_v48 = vmul.f32 %v5024_v61, %v1393_v33  ;;  %vm1400_vm15 = vweird.f32 %v5024_v61 }
 0xbba   : > { %v3484_v15 = vmul.f32 %v5026_v44, %v3482_v17  ;;  %vm3489_vm0 = vweird.f32 %v5026_v44  ;;  %vm7612_vm4 = vmor %vm1399_vm2, %vm1400_vm15 }
 0xbbb   : > { %v1396_v31 = vsub.f32 1.0, %v1395_v48  ;;  %vm3490_vm6 = vmor %vm3488_vm5, %vm3489_vm0 }
 0xbbc   : > { %v3485_v54 = vsub.f32 1.0, %v3484_v15 }
 0xbbd   : > { %v1397_v29 = vmul.f32 %v5024_v61, %v1396_v31 }
 0xbbe   : > { %v3486_v50 = vmul.f32 %v5026_v44, %v3485_v54 }
 0xbbf   : > { %v1398_v63 = vadd.f32 %v5024_v61, %v1397_v29 }
 0xbc0   : > { %v3487_v38 = vadd.f32 %v5026_v44, %v3486_v50 }
 0xbc1   : > { %v1402_v35 = vsel %vm7612_vm4, %v5024_v61, %v1398_v63 }
 0xbc2   : > { %v3491_v49 = vsel %vm3490_vm6, %v5026_v44, %v3487_v38  ;;  %v1407_v16 = vsel %vm1404_vm8, %v1406_v42, %v1402_v35 }
 0xbc3   : > { %v1409_v36 = vmul.f32 1.442695, %v1407_v16 }
 0xc1d   : > { %v4515_v4 = vpop.xlane.xlu0 %4514 }
 0xc1e   : > { %v4516_v26 = vsel %vm347_vm1, %v4515_v4, 0.0  ;;  %vm2445_vm1 = vweird.f32 %v2439_v9 }
 0xc1f   : > { %v4517_v37 = vrot.slane %v4516_v26, 4  ;;  %vm2447_vm3 = vmor %vm2445_vm1, %vm2446_vm14 }
 0xc20   : > { %v2448_v14 = vsel %vm2447_vm3, %v5022_v1, %v2444_v52  ;;  %v7738_v52 = vld [vmem:[#allocation3_spill] sm:$0xff] }
 0xc21   : > { %v4518_v34 = vadd.f32 %v4517_v37, %v4516_v26 }
 0xc23   : > { %v4519_v60 = vrot.slane %v4518_v34, 2 }
 0xc25   : > { %v4520_v11 = vadd.f32 %v4519_v60, %v4518_v34 }
 0xc27   : > { %v4521_v55 = vrot.slane %v4520_v11, 1 }
 0xc29   : > { %v4522_v51 = vadd.f32 %v4521_v55, %v4520_v11 }
 0xc2b   : > { %v4523_v22 = vadd.f32 %v4522_v51, %v1384_v56  ;;  %v2449_v56 = vand.u32 2147483647, %v2439_v9 }
 0xc2d   : > { %v4524_v3 = vmax.f32 %v4523_v22, 0.0  ;;  %vm2450_vm7 = vcmp.eq.f32.partialorder %v2449_v56, 8.507059e+37 }
 0xc2f   : > { %v4525_v43 = vmul.f32 %v4524_v3, %v1387_v25  ;;  %v2452_v25 = vor.u32 1.1754944e-38, %v2451_v32 }
 0xc31   : > { %v4526_v5 = vadd.f32 %v4525_v43, %v1362_v46  ;;  %v3495_v46 = vor.u32 1.1754944e-38, %v3494_v30  ;;  %v2453_v8 = vsel %vm2450_vm7, %v2452_v25, %v2448_v14 }
 0xc32   : > { %v2455_v28 = vmul.f32 1.442695, %v2453_v8 }
 0xc33   : > { %v4527_v20 = vsub.f32 0.0, %v4526_v5  ;;  %v3496_v53 = vsel %vm3493_vm9, %v3495_v46, %v3491_v49 }
 0xc34   : > { %v3498_v41 = vmul.f32 1.442695, %v3496_v53 }
 0xc35   : > { %v4528_v7 = vmul.f32 1.442695, %v4527_v20 }
 0xc37   : > { %5027 = vpow2.f32 %v4528_v7 }
 0xc3d   : > { %v5028_v2 = vpop.eup %5027 }
 0xc3e   : > { %v4530_v27 = vadd.f32 1.0, %v5028_v2 }
 0xc40   : > { %5029 = vrcp.f32 %v4530_v27  ;;  %v4542_v62 = vand.u32 2147483648, %v4530_v27  ;;  %v4540_v4 = vand.u32 2147483647, %v4530_v27  ;;  %vm4536_vm11 = vweird.f32 %v4530_v27 }
 0xc41   : > { %5031 = vpow2.f32 %v2455_v28 }
 0xc42   : > { %v4543_v37 = vor.u32 1.1754944e-38, %v4542_v62  ;;  %5033 = vpow2.f32 %v1409_v36  ;;  %vm4541_vm13 = vcmp.eq.f32.partialorder %v4540_v4, 8.507059e+37 }
 0xc43   : > { %5035 = vpow2.f32 %v3498_v41 }
 0xc46   : > { %v5030_v57 = vpop.eup %5029 }
 0xc47   : > { %v4532_v59 = vmul.f32 %v5030_v57, %v4530_v27  ;;  %vm4537_vm10 = vweird.f32 %v5030_v57  ;;  %v5032_v40 = vpop.eup %5031 }
 0xc48   : > { %vm4538_vm12 = vmor %vm4536_vm11, %vm4537_vm10  ;;  %v5034_v19 = vpop.eup %5033 }
 0xc49   : > { %v4533_v39 = vsub.f32 1.0, %v4532_v59  ;;  %v5036_v11 = vpop.eup %5035  ;;  %v4548_v9 = vadd.f32 %v5034_v19, %v5032_v40 }
 0xc4b   : > { %v4534_v0 = vmul.f32 %v5030_v57, %v4533_v39  ;;  %v4549_v33 = vadd.f32 %v5036_v11, %v4548_v9 }
 0xc4d   : > { %v4535_v26 = vadd.f32 %v5030_v57, %v4534_v0 }
 0xc4f   : > { %v4539_v34 = vsel %vm4538_vm12, %v5030_v57, %v4535_v26 }
 0xc50   : > { %v4544_v24 = vsel %vm4541_vm13, %v4543_v37, %v4539_v34 }
 0xc51   : > { %v4546_v60 = vmul.f32 1.442695, %v4544_v24 }
 0xc53   : > { %5037 = vpow2.f32 %v4546_v60 }
 0xc59   : > { %v5038_v55 = vpop.eup %5037 }
 0xc5a   : > { %v4550_v17 = vadd.f32 %v5038_v55, %v4549_v33 }
 0xc5c   : > { %5039 = vrcp.f32 %v4550_v17  ;;  %v4562_v43 = vand.u32 2147483648, %v4550_v17  ;;  %v4560_v61 = vand.u32 2147483647, %v4550_v17  ;;  %vm4556_vm15 = vweird.f32 %v4550_v17 }
 0xc5e   : > { %v4563_v44 = vor.u32 1.1754944e-38, %v4562_v43  ;;  %vm4561_vm1 = vcmp.eq.f32.partialorder %v4560_v61, 8.507059e+37 }
 0xc62   : > { %v5040_v51 = vpop.eup %5039 }
 0xc63   : > { %v4552_v22 = vmul.f32 %v5040_v51, %v4550_v17  ;;  %vm4557_vm14 = vweird.f32 %v5040_v51 }
 0xc64   : > { %vm4558_vm0 = vmor %vm4556_vm15, %vm4557_vm14 }
 0xc65   : > { %v4553_v3 = vsub.f32 1.0, %v4552_v22 }
 0xc67   : > { %v4554_v1 = vmul.f32 %v5040_v51, %v4553_v3 }
 0xc69   : > { %v4555_v5 = vadd.f32 %v5040_v51, %v4554_v1 }
 0xc6b   : > { %v4559_v20 = vsel %vm4558_vm0, %v5040_v51, %v4555_v5 }
 0xc6c   : > { %v4564_v47 = vsel %vm4561_vm1, %v4563_v44, %v4559_v20 }
 0xc6d   : > { %v4584_v48 = vmul.f32 %v5032_v40, %v4564_v47  ;;  %v4565_v15 = vmul.f32 %v5034_v19, %v4564_v47  ;;  %v4623_v7 = vmul.f32 %v5038_v55, %v4564_v47  ;;  %v4604_v12 = vmul.f32 %v5036_v11, %v4564_v47 }
 0xc6f   : > { %4587 = vperm.xlu2 %5012, %v4584_v48   ;;  %4568 = vperm.xlu1 %5013, %v4565_v15  }
 0xc77   : > { %4626 = vperm.xlu2 %5012, %v4623_v7   ;;  %4607 = vperm.xlu1 %5013, %v4604_v12  }
 0xcc9   : > { %v4588_v2 = vpop.permute.xlu2 %4587 }
 0xcca   : > { %v4592_v50 = vperm.slane %v4588_v2, %v5566_v45 }
 0xccc   : > { %v4594_v63 = vmul.f32 %v4592_v50, %v7738_v52 }
 0xcd1   : > { %v4627_v13 = vpop.permute.xlu2 %4626 }
 0xcd2   : > { %v4631_v10 = vperm.slane %v4627_v13, %v5566_v45 }
 0xcd4   : > { %v4633_v25 = vmul.f32 %v4631_v10, %v7591_v6 }
 0xce1   : > { %v4569_v31 = vpop.permute.xlu1 %4568 }
 0xce2   : > { %v4573_v54 = vperm.slane %v4569_v31, %v5566_v45 }
 0xce4   : > { %v4575_v29 = vmul.f32 %v4573_v54, %v7737_v18 }
 0xce6   : > { %4577 = vst [vmem:[#allocation1] ss:$2 sm:$0xff] %v4575_v29 }
 0xce9   : > { %v4608_v32 = vpop.permute.xlu1 %4607 }
 0xcea   : > { %v4612_v38 = vperm.slane %v4608_v32, %v5566_v45 }
 0xcec   : > { %v4614_v30 = vmul.f32 %v4612_v38, %v7028_v58 }
 0xced   : > { %v4578_v27 = vld.sshfl [vmem:[#allocation1] sm:$0xff pattern:$0x75316420]  ;;  %v4579_v23 = vld.sshfl [vmem:[#allocation1 + $0x8] sm:$0xff pattern:$0x75316420] }
 0xcee   : > { %4582 = vst [vmem:[%s306_s21] sm:$0xf] %v4578_v27 }
 0xcef   : > { %4583 = vst [vmem:[%s306_s21 + $0x8] sm:$0xf] %v4579_v23 }
 0xcf0   : > { %4597 = vst [vmem:[#allocation1 + $0x1] ss:$2 sm:$0xff] %v4594_v63 }
 0xcf7   : > { %v4598_v56 = vld.sshfl [vmem:[#allocation1] sm:$0xff pattern:$0x75316420]  ;;  %v4599_v21 = vld.sshfl [vmem:[#allocation1 + $0x8] sm:$0xff pattern:$0x75316420] }
 0xcf8   : > { %4602 = vst [vmem:[%s306_s21] sm:$0xf0] %v4598_v56 }
 0xcf9   : > { %4603 = vst [vmem:[%s306_s21 + $0x8] sm:$0xf0] %v4599_v21 }
 0xcfa   : > { %4616 = vst [vmem:[#allocation1] ss:$2 sm:$0xff] %v4614_v30 }
 0xd01   : > { %v4617_v14 = vld.sshfl [vmem:[#allocation1] sm:$0xff pattern:$0x75316420]  ;;  %v4618_v35 = vld.sshfl [vmem:[#allocation1 + $0x8] sm:$0xff pattern:$0x75316420] }
 0xd02   : > { %4621 = vst [vmem:[%s306_s21 + $0x10] sm:$0xf] %v4617_v14 }
 0xd03   : > { %4622 = vst [vmem:[%s306_s21 + $0x18] sm:$0xf] %v4618_v35 }
 0xd04   : > { %4636 = vst [vmem:[#allocation1 + $0x1] ss:$2 sm:$0xff] %v4633_v25 }
 0xd0b   : > { %v4637_v42 = vld.sshfl [vmem:[#allocation1] sm:$0xff pattern:$0x75316420]  ;;  %v4638_v49 = vld.sshfl [vmem:[#allocation1 + $0x8] sm:$0xff pattern:$0x75316420] }
 0xd0c   : > { %4641 = vst [vmem:[%s306_s21 + $0x10] sm:$0xf0] %v4637_v42 }
 0xd0d   : > { %4642 = vst [vmem:[%s306_s21 + $0x18] sm:$0xf0] %v4638_v49 }
 0xd0e PF: > { %s19_s29 = sadd.s32 1, %s5056_s29  }
 0xd0f   : > { %p16_p4 = scmp.ge.s32.totalorder %s19_s29, 4  }
 0xd11   :  { %18 = sbr.rel (!%p16_p4) target bundleno = 2 (0x2), region = 90 }

</bundles_post_ra>
